<compile_context>
chip_gen: v6e
topology: v6e:2x2x1
jax: 0.10.0
libtpu: 0.0.40
codegen_flags: <defaults>
</compile_context>

<pallas_src>
import jax
import jax.numpy as jnp
from jax.experimental import pallas as pl
from jax.experimental.pallas import tpu as pltpu

LRELU_SLOPE = 0.01   # nn.LeakyReLU() default
BN_EPS = 1e-5        # nn.BatchNorm2d default


# ---------------------------------------------------------------------------
# Kernel 1: fused (im2col-matmul conv) + folded BatchNorm affine + LeakyReLU
#           per-group tile, lane-dense output [Cout, E*Ho*Wo] (NCHW flatten order)
# ---------------------------------------------------------------------------
def _conv_bn_lrelu_kernel(p_ref, w_ref, scale_ref, shift_ref, o_ref):
    # w: [Cout, C*K*K] bf16   p: [C*K*K, E*Ho*Wo] bf16  ->  acc: f32 [Cout, E*Ho*Wo]
    acc = jnp.dot(w_ref[...], p_ref[...], preferred_element_type=jnp.float32)
    y = acc * scale_ref[...] + shift_ref[...]             # conv bias + BN folded in
    y = jnp.where(y > 0, y, LRELU_SLOPE * y)               # LeakyReLU (f32)
    o_ref[...] = y.astype(o_ref.dtype)                     # bf16 writeback


def conv_bn_lrelu(x_nchw, w_mat, scale, shift, *, K=3, groups=None):
    """3x3 / stride-1 / valid Conv2d + BatchNorm2d(eval) + LeakyReLU.

    `groups` batch-groups map to grid steps; each step multiplies the weight with
    E = B//groups examples' patches at once (fatter lanes, fewer grid steps)."""
    B, C, H, W = x_nchw.shape
    Cout, CKK = w_mat.shape
    Ho, Wo = H - K + 1, W - K + 1
    S = Ho * Wo
    assert CKK == C * K * K
    groups = B if groups is None else groups
    assert B % groups == 0
    E = B // groups

    # im2col glue (plain JAX, one bf16 materialization):
    # p[g, ci*K*K + kh*K + kw, e*S + i*Wo + j] = x[g*E + e, ci, i+kh, j+kw]
    slabs = [x_nchw[:, :, kh:kh + Ho, kw:kw + Wo]
             for kh in range(K) for kw in range(K)]         # each [B, C, Ho, Wo]
    p = (jnp.stack(slabs, axis=2)                            # [B, C, K*K, Ho, Wo]
           .reshape(groups, E, C, K * K, Ho, Wo)
           .transpose(0, 2, 3, 1, 4, 5)                      # [g, C, KK, E, Ho, Wo]
           .reshape(groups, CKK, E * S)
           .astype(jnp.bfloat16))

    out = pl.pallas_call(
        _conv_bn_lrelu_kernel,
        out_shape=jax.ShapeDtypeStruct((groups, Cout, E * S), jnp.bfloat16),
        grid_spec=pltpu.PrefetchScalarGridSpec(
            num_scalar_prefetch=0,
            grid=(groups,),
            in_specs=[
                pl.BlockSpec((None, CKK, E * S), lambda g: (g, 0, 0)),
                pl.BlockSpec((Cout, CKK), lambda g: (0, 0)),
                pl.BlockSpec((Cout, 1), lambda g: (0, 0)),
                pl.BlockSpec((Cout, 1), lambda g: (0, 0)),
            ],
            out_specs=pl.BlockSpec((None, Cout, E * S), lambda g: (g, 0, 0)),
        ),
        compiler_params=pltpu.CompilerParams(
            dimension_semantics=("parallel",)),               # shard groups on v7x
    )(p, w_mat, scale, shift)

    # Back to NCHW [B, Cout, Ho, Wo]; this transpose fuses into the consumer's next
    # materialization (conv2 im2col / fc feature view) — no standalone HBM pass.
    return (out.reshape(groups, Cout, E, Ho, Wo)
               .transpose(0, 2, 1, 3, 4)
               .reshape(B, Cout, Ho, Wo))


# ---------------------------------------------------------------------------
# Kernel 2: FC head  tanh( (cat(o1,o2) @ W1 + b1) @ W2 + b2 )
#           grid over the two branch halves of W1 (reduction), f32 accumulator,
#           bf16 weight/feature stream, no padding, no concatenate.
# ---------------------------------------------------------------------------
def _fc_kernel(f_ref, w1_ref, b1_ref, w2_ref, b2_ref, o_ref, acc_ref):
    @pl.when(pl.program_id(0) == 0)
    def _():
        acc_ref[...] = jnp.zeros_like(acc_ref)

    # bf16 x bf16 -> f32 on the MXU
    acc_ref[...] += jnp.dot(f_ref[...], w1_ref[...],
                            preferred_element_type=jnp.float32)

    @pl.when(pl.program_id(0) == pl.num_programs(0) - 1)
    def _():
        hidden = acc_ref[...] + b1_ref[...]
        out = jnp.dot(hidden, w2_ref[...],
                      preferred_element_type=jnp.float32) + b2_ref[...]
        o_ref[...] = jnp.tanh(out)


def fc_head(feats, w1_stacked, b1, w2, b2):
    # feats: [2, B, F] bf16 (branch, batch, features); w1_stacked: [2, F, H1] bf16
    n_br, B, F = feats.shape
    H1 = w1_stacked.shape[2]
    N = w2.shape[1]

    return pl.pallas_call(
        _fc_kernel,
        out_shape=jax.ShapeDtypeStruct((B, N), jnp.float32),
        grid_spec=pltpu.PrefetchScalarGridSpec(
            num_scalar_prefetch=0,
            grid=(n_br,),
            in_specs=[
                pl.BlockSpec((None, B, F), lambda r: (r, 0, 0)),
                pl.BlockSpec((None, F, H1), lambda r: (r, 0, 0)),
                pl.BlockSpec((1, H1), lambda r: (0, 0)),
                pl.BlockSpec((H1, N), lambda r: (0, 0)),
                pl.BlockSpec((1, N), lambda r: (0, 0)),
            ],
            out_specs=pl.BlockSpec((B, N), lambda r: (0, 0)),
            scratch_shapes=[pltpu.VMEM((B, H1), jnp.float32)],
        ),
        compiler_params=pltpu.CompilerParams(
            dimension_semantics=("arbitrary",),               # reduction over branches
            vmem_limit_bytes=32 << 20,                        # safe on v5e/v6e/v7x
        ),
    )(feats, w1_stacked, b1, w2, b2)


# ---------------------------------------------------------------------------
# SiameseNetwork forward
# ---------------------------------------------------------------------------
def siamese_forward(pp, x1, x2):
    B = x1.shape[0]
    x = jnp.concatenate([x1, x2], axis=0)                     # [2B, C, H, W] — one CNN pass
    h = conv_bn_lrelu(x, pp["c1_wmat"], pp["c1_scale"], pp["c1_shift"], groups=2)
    h = conv_bn_lrelu(h, pp["c2_wmat"], pp["c2_scale"], pp["c2_shift"], groups=2 * B)
    # conv2 already emits bf16 in NCHW flatten order (matches torch view(B,-1));
    # split back into the 2 siamese branches with a free reshape.
    feats = h.reshape(2, B, -1)                               # [2, B, 27380] bf16
    return fc_head(feats, pp["fc1_w"], pp["fc1_b"], pp["fc2_w"], pp["fc2_b"])


# ---------------------------------------------------------------------------
# Parameters (PyTorch-shaped) + one-time preparation (run OUTSIDE the jitted fwd)
# ---------------------------------------------------------------------------
def init_params(key):
    ks = jax.random.split(key, 16)
    f32 = jnp.float32
    p = {}
    p["conv1_w"] = 0.1 * jax.random.normal(ks[0], (10, 4, 3, 3), f32)
    p["conv1_b"] = 0.1 * jax.random.normal(ks[1], (10,), f32)
    p["bn1_g"] = 1.0 + 0.1 * jax.random.normal(ks[2], (10,), f32)
    p["bn1_b"] = 0.1 * jax.random.normal(ks[3], (10,), f32)
    p["bn1_m"] = 0.1 * jax.random.normal(ks[4], (10,), f32)
    p["bn1_v"] = 1.0 + 0.1 * jnp.abs(jax.random.normal(ks[5], (10,), f32))
    p["conv2_w"] = 0.1 * jax.random.normal(ks[6], (20, 10, 3, 3), f32)
    p["conv2_b"] = 0.1 * jax.random.normal(ks[7], (20,), f32)
    p["bn2_g"] = 1.0 + 0.1 * jax.random.normal(ks[8], (20,), f32)
    p["bn2_b"] = 0.1 * jax.random.normal(ks[9], (20,), f32)
    p["bn2_m"] = 0.1 * jax.random.normal(ks[10], (20,), f32)
    p["bn2_v"] = 1.0 + 0.1 * jnp.abs(jax.random.normal(ks[11], (20,), f32))
    # nn.Linear(54760, 64) / nn.Linear(64, 2); stored transposed ([in, out])
    p["fc1_w_t"] = 0.01 * jax.random.normal(ks[12], (54760, 64), f32)
    p["fc1_b"] = 0.01 * jax.random.normal(ks[13], (64,), f32)
    p["fc2_w_t"] = 0.1 * jax.random.normal(ks[14], (64, 2), f32)
    p["fc2_b"] = 0.1 * jax.random.normal(ks[15], (2,), f32)
    return p


def prepare_params(p):
    """One-time, out-of-forward weight transforms (BN folding, layouts, bf16 cast)."""
    def fold(w, b, g, beta, m, v):
        cout = w.shape[0]
        scale = g / jnp.sqrt(v + BN_EPS)
        shift = (b - m) * scale + beta
        return (w.reshape(cout, -1).astype(jnp.bfloat16),     # bf16 weight stream
                scale.reshape(cout, 1).astype(jnp.float32),   # f32 epilogue
                shift.reshape(cout, 1).astype(jnp.float32))

    pp = {}
    pp["c1_wmat"], pp["c1_scale"], pp["c1_shift"] = fold(
        p["conv1_w"], p["conv1_b"], p["bn1_g"], p["bn1_b"], p["bn1_m"], p["bn1_v"])
    pp["c2_wmat"], pp["c2_scale"], pp["c2_shift"] = fold(
        p["conv2_w"], p["conv2_b"], p["bn2_g"], p["bn2_b"], p["bn2_m"], p["bn2_v"])
    # fc1 rows 0:27380 multiply branch-1 features, rows 27380:54760 multiply branch-2
    # features (torch.cat order) -> stack them on a leading "branch" axis; bf16 stream.
    F = p["fc1_w_t"].shape[0] // 2
    pp["fc1_w"] = p["fc1_w_t"].reshape(2, F, -1).astype(jnp.bfloat16)
    pp["fc1_b"] = p["fc1_b"].reshape(1, -1).astype(jnp.float32)
    pp["fc2_w"] = p["fc2_w_t"].astype(jnp.float32)
    pp["fc2_b"] = p["fc2_b"].reshape(1, -1).astype(jnp.float32)
    return pp


if __name__ == "__main__":
    key = jax.random.PRNGKey(0)
    kp, k1, k2 = jax.random.split(key, 3)
    params = init_params(kp)
    prepped = prepare_params(params)          # one-time; never re-done inside jit

    # Linear(54760, 64) forces spatial 41x41: 2 * 20 * (41-4)^2 = 54760
    B, C, H, W = 2, 4, 41, 41
    x1 = jax.random.normal(k1, (B, C, H, W), jnp.float32)
    x2 = jax.random.normal(k2, (B, C, H, W), jnp.float32)

    fwd = jax.jit(siamese_forward)
    out = fwd(prepped, x1, x2)
    out = jax.block_until_ready(out)

    assert out.shape == (B, 2), out.shape
    assert bool(jnp.all(jnp.isfinite(out)))
    assert bool(jnp.all(jnp.abs(out) <= 1.0))   # tanh range
    print("KERNEL_OK")
</pallas_src>

<mosaic_0001>
module attributes {stable_mosaic.version = 11 : i64} {
  func.func @_conv_bn_lrelu_kernel(%arg0: i32, %arg1: memref<1x36x3042xbf16, #tpu.memory_space<vmem>>, %arg2: memref<10x36xbf16, #tpu.memory_space<vmem>>, %arg3: memref<10x1xf32, #tpu.memory_space<vmem>>, %arg4: memref<10x1xf32, #tpu.memory_space<vmem>>, %arg5: memref<1x10x3042xbf16, #tpu.memory_space<vmem>>) attributes {dimension_semantics = [#tpu.dimension_semantics<parallel>], iteration_bounds = array<i64: 2>, scalar_prefetch = 0 : i64, scratch_operands = 0 : i64, tpu.core_type = #tpu.core_type<tc>, window_params = [{transform_indices = @transform_0, window_bounds = array<i64: 1, 36, 3042>}, {pipeline_mode = #tpu.pipeline_mode<synchronous>, transform_indices = @transform_1, window_bounds = array<i64: 10, 36>}, {pipeline_mode = #tpu.pipeline_mode<synchronous>, transform_indices = @transform_2, window_bounds = array<i64: 10, 1>}, {pipeline_mode = #tpu.pipeline_mode<synchronous>, transform_indices = @transform_3, window_bounds = array<i64: 10, 1>}, {transform_indices = @transform_4, window_bounds = array<i64: 1, 10, 3042>}]} {
    %c0 = arith.constant 0 : index
    %c0_0 = arith.constant 0 : index
    %0 = vector.load %arg2[%c0, %c0_0] : memref<10x36xbf16, #tpu.memory_space<vmem>>, vector<10x36xbf16>
    %c0_1 = arith.constant 0 : index
    %c0_2 = arith.constant 0 : index
    %c0_3 = arith.constant 0 : index
    %1 = vector.load %arg1[%c0_1, %c0_2, %c0_3] : memref<1x36x3042xbf16, #tpu.memory_space<vmem>>, vector<1x36x3042xbf16>
    %2 = vector.shape_cast %1 : vector<1x36x3042xbf16> to vector<36x3042xbf16>
    %cst = arith.constant dense<0.000000e+00> : vector<10x3042xf32>
    %3 = tpu.matmul %0, %2, %cst {dimension_numbers = #tpu.dot_dimension_numbers<[1], [0], [0], [1], [0, 0, 1, 1], [], []>} : vector<10x36xbf16>, vector<36x3042xbf16>, vector<10x3042xf32> -> vector<10x3042xf32>
    %c0_4 = arith.constant 0 : index
    %c0_5 = arith.constant 0 : index
    %4 = vector.load %arg3[%c0_4, %c0_5] : memref<10x1xf32, #tpu.memory_space<vmem>>, vector<10x1xf32>
    %5 = vector.broadcast %4 : vector<10x1xf32> to vector<10x3042xf32>
    %6 = arith.mulf %3, %5 : vector<10x3042xf32>
    %c0_6 = arith.constant 0 : index
    %c0_7 = arith.constant 0 : index
    %7 = vector.load %arg4[%c0_6, %c0_7] : memref<10x1xf32, #tpu.memory_space<vmem>>, vector<10x1xf32>
    %8 = vector.broadcast %7 : vector<10x1xf32> to vector<10x3042xf32>
    %9 = arith.addf %6, %8 : vector<10x3042xf32>
    %cst_8 = arith.constant 0.000000e+00 : f32
    %10 = vector.broadcast %cst_8 : f32 to vector<10x3042xf32>
    %11 = arith.cmpf ogt, %9, %10 : vector<10x3042xf32>
    %cst_9 = arith.constant 0.00999999977 : f32
    %12 = vector.broadcast %cst_9 : f32 to vector<10x3042xf32>
    %13 = arith.mulf %12, %9 : vector<10x3042xf32>
    %14 = arith.select %11, %9, %13 : vector<10x3042xi1>, vector<10x3042xf32>
    %15 = arith.truncf %14 : vector<10x3042xf32> to vector<10x3042xbf16>
    %c0_10 = arith.constant 0 : index
    %c0_11 = arith.constant 0 : index
    %c0_12 = arith.constant 0 : index
    %16 = vector.load %arg5[%c0_10, %c0_11, %c0_12] : memref<1x10x3042xbf16, #tpu.memory_space<vmem>>, vector<1x10x3042xbf16>
    %17 = vector.shape_cast %16 : vector<1x10x3042xbf16> to vector<10x3042xbf16>
    %18 = vector.shape_cast %15 : vector<10x3042xbf16> to vector<1x10x3042xbf16>
    tpu.vector_store %arg5[%c0_10, %c0_11, %c0_12], %18 {strides = array<i32>} : memref<1x10x3042xbf16, #tpu.memory_space<vmem>>, vector<1x10x3042xbf16>,
    return
  }
  func.func @transform_0(%arg0: i32) -> (i32, i32, i32) {
    %c0_i32 = arith.constant 0 : i32
    %c0_i32_0 = arith.constant 0 : i32
    %c0_i32_1 = arith.constant 0 : i32
    return %arg0, %c0_i32, %c0_i32_0 : i32, i32, i32
  }
  func.func @transform_1(%arg0: i32) -> (i32, i32) {
    %c0_i32 = arith.constant 0 : i32
    %c0_i32_0 = arith.constant 0 : i32
    %c0_i32_1 = arith.constant 0 : i32
    return %c0_i32, %c0_i32_0 : i32, i32
  }
  func.func @transform_2(%arg0: i32) -> (i32, i32) {
    %c0_i32 = arith.constant 0 : i32
    %c0_i32_0 = arith.constant 0 : i32
    %c0_i32_1 = arith.constant 0 : i32
    return %c0_i32, %c0_i32_0 : i32, i32
  }
  func.func @transform_3(%arg0: i32) -> (i32, i32) {
    %c0_i32 = arith.constant 0 : i32
    %c0_i32_0 = arith.constant 0 : i32
    %c0_i32_1 = arith.constant 0 : i32
    return %c0_i32, %c0_i32_0 : i32, i32
  }
  func.func @transform_4(%arg0: i32) -> (i32, i32, i32) {
    %c0_i32 = arith.constant 0 : i32
    %c0_i32_0 = arith.constant 0 : i32
    %c0_i32_1 = arith.constant 0 : i32
    return %arg0, %c0_i32, %c0_i32_0 : i32, i32, i32
  }
}

module attributes {stable_mosaic.version = 11 : i64} {
  func.func @_conv_bn_lrelu_kernel(%arg0: i32, %arg1: memref<1x90x1369xbf16, #tpu.memory_space<vmem>>, %arg2: memref<20x90xbf16, #tpu.memory_space<vmem>>, %arg3: memref<20x1xf32, #tpu.memory_space<vmem>>, %arg4: memref<20x1xf32, #tpu.memory_space<vmem>>, %arg5: memref<1x20x1369xbf16, #tpu.memory_space<vmem>>) attributes {dimension_semantics = [#tpu.dimension_semantics<parallel>], iteration_bounds = array<i64: 4>, scalar_prefetch = 0 : i64, scratch_operands = 0 : i64, tpu.core_type = #tpu.core_type<tc>, window_params = [{transform_indices = @transform_0, window_bounds = array<i64: 1, 90, 1369>}, {pipeline_mode = #tpu.pipeline_mode<synchronous>, transform_indices = @transform_1, window_bounds = array<i64: 20, 90>}, {pipeline_mode = #tpu.pipeline_mode<synchronous>, transform_indices = @transform_2, window_bounds = array<i64: 20, 1>}, {pipeline_mode = #tpu.pipeline_mode<synchronous>, transform_indices = @transform_3, window_bounds = array<i64: 20, 1>}, {transform_indices = @transform_4, window_bounds = array<i64: 1, 20, 1369>}]} {
    %c0 = arith.constant 0 : index
    %c0_0 = arith.constant 0 : index
    %0 = vector.load %arg2[%c0, %c0_0] : memref<20x90xbf16, #tpu.memory_space<vmem>>, vector<20x90xbf16>
    %c0_1 = arith.constant 0 : index
    %c0_2 = arith.constant 0 : index
    %c0_3 = arith.constant 0 : index
    %1 = vector.load %arg1[%c0_1, %c0_2, %c0_3] : memref<1x90x1369xbf16, #tpu.memory_space<vmem>>, vector<1x90x1369xbf16>
    %2 = vector.shape_cast %1 : vector<1x90x1369xbf16> to vector<90x1369xbf16>
    %cst = arith.constant dense<0.000000e+00> : vector<20x1369xf32>
    %3 = tpu.matmul %0, %2, %cst {dimension_numbers = #tpu.dot_dimension_numbers<[1], [0], [0], [1], [0, 0, 1, 1], [], []>} : vector<20x90xbf16>, vector<90x1369xbf16>, vector<20x1369xf32> -> vector<20x1369xf32>
    %c0_4 = arith.constant 0 : index
    %c0_5 = arith.constant 0 : index
    %4 = vector.load %arg3[%c0_4, %c0_5] : memref<20x1xf32, #tpu.memory_space<vmem>>, vector<20x1xf32>
    %5 = vector.broadcast %4 : vector<20x1xf32> to vector<20x1369xf32>
    %6 = arith.mulf %3, %5 : vector<20x1369xf32>
    %c0_6 = arith.constant 0 : index
    %c0_7 = arith.constant 0 : index
    %7 = vector.load %arg4[%c0_6, %c0_7] : memref<20x1xf32, #tpu.memory_space<vmem>>, vector<20x1xf32>
    %8 = vector.broadcast %7 : vector<20x1xf32> to vector<20x1369xf32>
    %9 = arith.addf %6, %8 : vector<20x1369xf32>
    %cst_8 = arith.constant 0.000000e+00 : f32
    %10 = vector.broadcast %cst_8 : f32 to vector<20x1369xf32>
    %11 = arith.cmpf ogt, %9, %10 : vector<20x1369xf32>
    %cst_9 = arith.constant 0.00999999977 : f32
    %12 = vector.broadcast %cst_9 : f32 to vector<20x1369xf32>
    %13 = arith.mulf %12, %9 : vector<20x1369xf32>
    %14 = arith.select %11, %9, %13 : vector<20x1369xi1>, vector<20x1369xf32>
    %15 = arith.truncf %14 : vector<20x1369xf32> to vector<20x1369xbf16>
    %c0_10 = arith.constant 0 : index
    %c0_11 = arith.constant 0 : index
    %c0_12 = arith.constant 0 : index
    %16 = vector.load %arg5[%c0_10, %c0_11, %c0_12] : memref<1x20x1369xbf16, #tpu.memory_space<vmem>>, vector<1x20x1369xbf16>
    %17 = vector.shape_cast %16 : vector<1x20x1369xbf16> to vector<20x1369xbf16>
    %18 = vector.shape_cast %15 : vector<20x1369xbf16> to vector<1x20x1369xbf16>
    tpu.vector_store %arg5[%c0_10, %c0_11, %c0_12], %18 {strides = array<i32>} : memref<1x20x1369xbf16, #tpu.memory_space<vmem>>, vector<1x20x1369xbf16>,
    return
  }
  func.func @transform_0(%arg0: i32) -> (i32, i32, i32) {
    %c0_i32 = arith.constant 0 : i32
    %c0_i32_0 = arith.constant 0 : i32
    %c0_i32_1 = arith.constant 0 : i32
    return %arg0, %c0_i32, %c0_i32_0 : i32, i32, i32
  }
  func.func @transform_1(%arg0: i32) -> (i32, i32) {
    %c0_i32 = arith.constant 0 : i32
    %c0_i32_0 = arith.constant 0 : i32
    %c0_i32_1 = arith.constant 0 : i32
    return %c0_i32, %c0_i32_0 : i32, i32
  }
  func.func @transform_2(%arg0: i32) -> (i32, i32) {
    %c0_i32 = arith.constant 0 : i32
    %c0_i32_0 = arith.constant 0 : i32
    %c0_i32_1 = arith.constant 0 : i32
    return %c0_i32, %c0_i32_0 : i32, i32
  }
  func.func @transform_3(%arg0: i32) -> (i32, i32) {
    %c0_i32 = arith.constant 0 : i32
    %c0_i32_0 = arith.constant 0 : i32
    %c0_i32_1 = arith.constant 0 : i32
    return %c0_i32, %c0_i32_0 : i32, i32
  }
  func.func @transform_4(%arg0: i32) -> (i32, i32, i32) {
    %c0_i32 = arith.constant 0 : i32
    %c0_i32_0 = arith.constant 0 : i32
    %c0_i32_1 = arith.constant 0 : i32
    return %arg0, %c0_i32, %c0_i32_0 : i32, i32, i32
  }
}

module attributes {stable_mosaic.version = 11 : i64} {
  func.func @_fc_kernel(%arg0: i32, %arg1: memref<1x2x27380xbf16, #tpu.memory_space<vmem>>, %arg2: memref<1x27380x64xbf16, #tpu.memory_space<vmem>>, %arg3: memref<1x64xf32, #tpu.memory_space<vmem>>, %arg4: memref<64x2xf32, #tpu.memory_space<vmem>>, %arg5: memref<1x2xf32, #tpu.memory_space<vmem>>, %arg6: memref<2x2xf32, #tpu.memory_space<vmem>>, %arg7: memref<2x64xf32, #tpu.memory_space<vmem>>) attributes {dimension_semantics = [#tpu.dimension_semantics<arbitrary>], iteration_bounds = array<i64: 2>, scalar_prefetch = 0 : i64, scratch_operands = 1 : i64, tpu.core_type = #tpu.core_type<tc>, window_params = [{transform_indices = @transform_0, window_bounds = array<i64: 1, 2, 27380>}, {transform_indices = @transform_1, window_bounds = array<i64: 1, 27380, 64>}, {pipeline_mode = #tpu.pipeline_mode<synchronous>, transform_indices = @transform_2, window_bounds = array<i64: 1, 64>}, {pipeline_mode = #tpu.pipeline_mode<synchronous>, transform_indices = @transform_3, window_bounds = array<i64: 64, 2>}, {pipeline_mode = #tpu.pipeline_mode<synchronous>, transform_indices = @transform_4, window_bounds = array<i64: 1, 2>}, {pipeline_mode = #tpu.pipeline_mode<synchronous>, transform_indices = @transform_5, window_bounds = array<i64: 2, 2>}]} {
    %c0_i32 = arith.constant 0 : i32
    %0 = arith.cmpi eq, %arg0, %c0_i32 : i32
    %1 = arith.extui %0 : i1 to i32
    %c0_i32_0 = arith.constant 0 : i32
    %2 = arith.cmpi ne, %1, %c0_i32_0 : i32
    scf.if %2 {
      %cst_11 = arith.constant 0.000000e+00 : f32
      %14 = vector.broadcast %cst_11 : f32 to vector<2x64xf32>
      %c0_12 = arith.constant 0 : index
      %c0_13 = arith.constant 0 : index
      %15 = vector.load %arg7[%c0_12, %c0_13] : memref<2x64xf32, #tpu.memory_space<vmem>>, vector<2x64xf32>
      tpu.vector_store %arg7[%c0_12, %c0_13], %14 {strides = array<i32>} : memref<2x64xf32, #tpu.memory_space<vmem>>, vector<2x64xf32>,
    } else {
    }
    %c0 = arith.constant 0 : index
    %c0_1 = arith.constant 0 : index
    %3 = vector.load %arg7[%c0, %c0_1] : memref<2x64xf32, #tpu.memory_space<vmem>>, vector<2x64xf32>
    %c0_2 = arith.constant 0 : index
    %c0_3 = arith.constant 0 : index
    %c0_4 = arith.constant 0 : index
    %4 = vector.load %arg1[%c0_2, %c0_3, %c0_4] : memref<1x2x27380xbf16, #tpu.memory_space<vmem>>, vector<1x2x27380xbf16>
    %5 = vector.shape_cast %4 : vector<1x2x27380xbf16> to vector<2x27380xbf16>
    %c0_5 = arith.constant 0 : index
    %c0_6 = arith.constant 0 : index
    %c0_7 = arith.constant 0 : index
    %6 = vector.load %arg2[%c0_5, %c0_6, %c0_7] : memref<1x27380x64xbf16, #tpu.memory_space<vmem>>, vector<1x27380x64xbf16>
    %7 = vector.shape_cast %6 : vector<1x27380x64xbf16> to vector<27380x64xbf16>
    %cst = arith.constant dense<0.000000e+00> : vector<2x64xf32>
    %8 = tpu.matmul %5, %7, %cst {dimension_numbers = #tpu.dot_dimension_numbers<[1], [0], [0], [1], [0, 0, 1, 1], [], []>} : vector<2x27380xbf16>, vector<27380x64xbf16>, vector<2x64xf32> -> vector<2x64xf32>
    %9 = arith.addf %3, %8 : vector<2x64xf32>
    %c0_8 = arith.constant 0 : index
    %c0_9 = arith.constant 0 : index
    %10 = vector.load %arg7[%c0_8, %c0_9] : memref<2x64xf32, #tpu.memory_space<vmem>>, vector<2x64xf32>
    tpu.vector_store %arg7[%c0_8, %c0_9], %9 {strides = array<i32>} : memref<2x64xf32, #tpu.memory_space<vmem>>, vector<2x64xf32>,
    %c1_i32 = arith.constant 1 : i32
    %11 = arith.cmpi eq, %arg0, %c1_i32 : i32
    %12 = arith.extui %11 : i1 to i32
    %c0_i32_10 = arith.constant 0 : i32
    %13 = arith.cmpi ne, %12, %c0_i32_10 : i32
    scf.if %13 {
      %c0_11 = arith.constant 0 : index
      %c0_12 = arith.constant 0 : index
      %14 = vector.load %arg7[%c0_11, %c0_12] : memref<2x64xf32, #tpu.memory_space<vmem>>, vector<2x64xf32>
      %c0_13 = arith.constant 0 : index
      %c0_14 = arith.constant 0 : index
      %15 = vector.load %arg3[%c0_13, %c0_14] : memref<1x64xf32, #tpu.memory_space<vmem>>, vector<1x64xf32>
      %16 = vector.broadcast %15 : vector<1x64xf32> to vector<2x64xf32>
      %17 = arith.addf %14, %16 : vector<2x64xf32>
      %c0_15 = arith.constant 0 : index
      %c0_16 = arith.constant 0 : index
      %18 = vector.load %arg4[%c0_15, %c0_16] : memref<64x2xf32, #tpu.memory_space<vmem>>, vector<64x2xf32>
      %cst_17 = arith.constant dense<0.000000e+00> : vector<2x2xf32>
      %19 = tpu.matmul %17, %18, %cst_17 {dimension_numbers = #tpu.dot_dimension_numbers<[1], [0], [0], [1], [0, 0, 1, 1], [], []>} : vector<2x64xf32>, vector<64x2xf32>, vector<2x2xf32> -> vector<2x2xf32>
      %c0_18 = arith.constant 0 : index
      %c0_19 = arith.constant 0 : index
      %20 = vector.load %arg5[%c0_18, %c0_19] : memref<1x2xf32, #tpu.memory_space<vmem>>, vector<1x2xf32>
      %21 = vector.broadcast %20 : vector<1x2xf32> to vector<2x2xf32>
      %22 = arith.addf %19, %21 : vector<2x2xf32>
      %23 = math.tanh %22 : vector<2x2xf32>
      %c0_20 = arith.constant 0 : index
      %c0_21 = arith.constant 0 : index
      %24 = vector.load %arg6[%c0_20, %c0_21] : memref<2x2xf32, #tpu.memory_space<vmem>>, vector<2x2xf32>
      tpu.vector_store %arg6[%c0_20, %c0_21], %23 {strides = array<i32>} : memref<2x2xf32, #tpu.memory_space<vmem>>, vector<2x2xf32>,
    } else {
    }
    return
  }
  func.func @transform_0(%arg0: i32) -> (i32, i32, i32) {
    %c0_i32 = arith.constant 0 : i32
    %c0_i32_0 = arith.constant 0 : i32
    %c0_i32_1 = arith.constant 0 : i32
    return %arg0, %c0_i32, %c0_i32_0 : i32, i32, i32
  }
  func.func @transform_1(%arg0: i32) -> (i32, i32, i32) {
    %c0_i32 = arith.constant 0 : i32
    %c0_i32_0 = arith.constant 0 : i32
    %c0_i32_1 = arith.constant 0 : i32
    return %arg0, %c0_i32, %c0_i32_0 : i32, i32, i32
  }
  func.func @transform_2(%arg0: i32) -> (i32, i32) {
    %c0_i32 = arith.constant 0 : i32
    %c0_i32_0 = arith.constant 0 : i32
    %c0_i32_1 = arith.constant 0 : i32
    return %c0_i32, %c0_i32_0 : i32, i32
  }
  func.func @transform_3(%arg0: i32) -> (i32, i32) {
    %c0_i32 = arith.constant 0 : i32
    %c0_i32_0 = arith.constant 0 : i32
    %c0_i32_1 = arith.constant 0 : i32
    return %c0_i32, %c0_i32_0 : i32, i32
  }
  func.func @transform_4(%arg0: i32) -> (i32, i32) {
    %c0_i32 = arith.constant 0 : i32
    %c0_i32_0 = arith.constant 0 : i32
    %c0_i32_1 = arith.constant 0 : i32
    return %c0_i32, %c0_i32_0 : i32, i32
  }
  func.func @transform_5(%arg0: i32) -> (i32, i32) {
    %c0_i32 = arith.constant 0 : i32
    %c0_i32_0 = arith.constant 0 : i32
    %c0_i32_1 = arith.constant 0 : i32
    return %c0_i32, %c0_i32_0 : i32, i32
  }
}

</mosaic_0001>

<bundles_post_ra>
// kernel: siamese_forward.3
= control target key start
LH: loop header
LB: loop body
LE: loop exit
PB: predicated region body
PF: predicated region fallthrough
CT: control target
= control target key end

     0   :  { %s1878_s15 = smov 0   ;;  %s2172_s0 = inlined_call_operand.vmem [shape: bf16[2,36,3042], index: 0, kind: input, shape index: {}]   ;;  %s2173_s1 = inlined_call_operand.vmem [shape: bf16[10,36], index: 1, kind: input, shape index: {}]   ;;  %s2174_s2 = inlined_call_operand.vmem [shape: f32[10,1], index: 2, kind: input, shape index: {}]   ;;  %s2175_s3 = inlined_call_operand.vmem [shape: f32[10,1], index: 3, kind: input, shape index: {}]   ;;  %s2176_s4 = inlined_call_operand.vmem [shape: bf16[2,10,3042], index: 4, kind: output, shape index: {}]  }
   0x1 LB: > { %s1652_s16 = sadd.s32 4294967295, %s1850_s15   ;;  %p1656_p0 = scmp.ge.s32.totalorder %s1850_s15, 1  ;;  %s1850_s15 = sphi %s1878_s15, %s14_s15  }
   0x2   : > { %p162_p1 = scmp.lt.s32.totalorder %s1850_s15, 3 }
   0x4   : > { %p163_p2 = pnand %p1656_p0, %p162_p1 }
   0x5   : > { %p188_p3 = scmp.lt.s32.totalorder (!%p163_p2), %s1652_s16, 1 }
   0x6   : > { %166 = sbr.rel (%p163_p2) target bundleno = 303 (0x12f), region = 36 }
   0xb   : > { %v1852_v0 = vmov 0   ;;  %v1159_v1 = vld [vmem:[%s2174_s2] sm:$0xff]  ;;  %s2178_s16 = smov (!%p188_p3, %s1652_s16), 1  ;;  %v1160_v3 = vld [vmem:[%s2174_s2 + $0x8] sm:$0x3]  ;;  %vm570_vm0 = vcmask 1041408  }
   0xc   : > { %675 = vmatprep.mubr.bf16.mxu0 %v1852_v0  ;;  %718 = vmatprep.mubr.bf16.mxu1 %v1852_v0  ;;  %v1219_v2 = vld [vmem:[%s2175_s3] sm:$0xff]  ;;  %s1806_s21 = smul.u32 480, %s2178_s16  ;;  %v1220_v4 = vld [vmem:[%s2175_s3 + $0x8] sm:$0x3]  ;;  %vm566_vm1 = vcmask 293888  }
   0xd   : > { %1817 = vset.pattern.permute.xlu0 %v1852_v0  ;;  %1818 = vset.pattern.permute.xlu1 %v1852_v0  ;;  %v1933_v39 = vld [vmem:[%s2173_s1] sm:$0x1f]   ;;  %s1807_s5 = smul.u32 192, %s2178_s16 }
   0xe   : > { %1163 = vperm.xlu0 %1817, %v1159_v1   ;;  %1223 = vperm.xlu1 %1818, %v1219_v2   ;;  %s1908_s28 = scalar_lea.vmem %s2172_s0, %s1806_s21 }
   0xf   : > { %v249_v5 = vld [vmem:[%s1908_s28 + $0x180] sm:$0x33]  ;;  %v250_v6 = vld [vmem:[%s1908_s28 + $0x188] sm:$0x33]  ;;  %v251_v27 = vld [vmem:[%s1908_s28 + $0x190] sm:$0x33]  ;;  %s2057_s8 = scalar_lea.vmem %s2176_s4, %s1807_s5 }
  0x10   : > { %v225_v7 = vld [vmem:[%s1908_s28 + $0xc0] sm:$0xff]  ;;  %v1709_v8 = vcombine.high %v249_v5, %v249_v5  ;;  %v1711_v9 = vcombine.high %v250_v6, %v250_v6  ;;  %v1708_v10 = vcombine.low %v249_v5, %v249_v5  ;;  %v1710_v11 = vcombine.low %v250_v6, %v250_v6  ;;  %v226_v13 = vld [vmem:[%s1908_s28 + $0xc8] sm:$0xff]  ;;  %v252_v28 = vld [vmem:[%s1908_s28 + $0x198] sm:$0x33] }
  0x11   : > { %v237_v12 = vld [vmem:[%s1908_s28 + $0x120] sm:$0xff]  ;;  %v238_v14 = vld [vmem:[%s1908_s28 + $0x128] sm:$0xff]  ;;  %v1713_v31 = vcombine.high %v251_v27, %v251_v27  ;;  %v1715_v32 = vcombine.high %v252_v28, %v252_v28  ;;  %v1712_v33 = vcombine.low %v251_v27, %v251_v27  ;;  %v1714_v34 = vcombine.low %v252_v28, %v252_v28  ;;  %v227_v35 = vld [vmem:[%s1908_s28 + $0xd0] sm:$0xff] }
  0x12   : > { %1168 = vperm.xlu0 %1817, %v1160_v3   ;;  %1228 = vperm.xlu1 %1818, %v1220_v4   ;;  %v1685_v15 = vcombine.high %v225_v7, %v237_v12  ;;  %v1687_v16 = vcombine.high %v226_v13, %v238_v14  ;;  %v201_v17 = vld [vmem:[%s1908_s28] sm:$0xff]  ;;  %v202_v19 = vld [vmem:[%s1908_s28 + $0x8] sm:$0xff]  ;;  %v572_v20 = vsel %vm570_vm0, %v1708_v10, 0  ;;  %v578_v21 = vsel %vm570_vm0, %v1710_v11, 0  ;;  %v239_v36 = vld [vmem:[%s1908_s28 + $0x130] sm:$0xff] }
  0x13   : > { %v213_v18 = vld [vmem:[%s1908_s28 + $0x60] sm:$0xff]  ;;  %1732 = vmatprep.subr.msk.bf16.mxu0 %vm570_vm0, %v1709_v8  ;;  %1734 = vmatprep.subr.msk.bf16.mxu1 %vm570_vm0, %v1711_v9  ;;  %v214_v22 = vld [vmem:[%s1908_s28 + $0x68] sm:$0xff]  ;;  %v1684_v23 = vcombine.low %v225_v7, %v237_v12  ;;  %v1686_v24 = vcombine.low %v226_v13, %v238_v14  ;;  %v228_v37 = vld [vmem:[%s1908_s28 + $0xd8] sm:$0xff]  ;;  %v584_v40 = vsel %vm570_vm0, %v1712_v33, 0  ;;  %v590_v41 = vsel %vm570_vm0, %v1714_v34, 0 }
  0x14   : > { %654 = vmatpush1.bf16.msra.mxu0 %v572_v20  ;;  %697 = vmatpush1.bf16.msra.mxu1 %v578_v21  ;;  %v1661_v25 = vcombine.high %v201_v17, %v213_v18  ;;  %v1663_v26 = vcombine.high %v202_v19, %v214_v22  ;;  %v1660_v29 = vcombine.low %v201_v17, %v213_v18  ;;  %v240_v38 = vld [vmem:[%s1908_s28 + $0x138] sm:$0xff]  ;;  %v203_v44 = vld [vmem:[%s1908_s28 + $0x10] sm:$0xff]  ;;  %v253_v52 = vld [vmem:[%s1908_s28 + $0x1a0] sm:$0x33] }
  0x15   : > { %655 = vmatprep.subr.bf16.mxu0 %v1685_v15  ;;  %698 = vmatprep.subr.bf16.mxu1 %v1687_v16  ;;  %v1662_v30 = vcombine.low %v202_v19, %v214_v22  ;;  %v1689_v42 = vcombine.high %v227_v35, %v239_v36  ;;  %v1691_v43 = vcombine.high %v228_v37, %v240_v38  ;;  %v215_v45 = vld [vmem:[%s1908_s28 + $0x70] sm:$0xff]  ;;  %v204_v46 = vld [vmem:[%s1908_s28 + $0x18] sm:$0xff]  ;;  %v254_v53 = vld [vmem:[%s1908_s28 + $0x1a8] sm:$0x33] }
  0x16   : > { %v216_v47 = vld [vmem:[%s1908_s28 + $0x78] sm:$0xff]  ;;  %v1688_v48 = vcombine.low %v227_v35, %v239_v36  ;;  %v1690_v49 = vcombine.low %v228_v37, %v240_v38  ;;  %v1665_v50 = vcombine.high %v203_v44, %v215_v45  ;;  %v1664_v54 = vcombine.low %v203_v44, %v215_v45  ;;  %v229_v60 = vld [vmem:[%s1908_s28 + $0xe0] sm:$0xff]  ;;  %v230_v62 = vld [vmem:[%s1908_s28 + $0xe8] sm:$0xff] }
  0x17   : > { %v1667_v51 = vcombine.high %v204_v46, %v216_v47  ;;  %v1666_v55 = vcombine.low %v204_v46, %v216_v47  ;;  %v1717_v56 = vcombine.high %v253_v52, %v253_v52  ;;  %v1719_v57 = vcombine.high %v254_v53, %v254_v53  ;;  %v241_v61 = vld [vmem:[%s1908_s28 + $0x140] sm:$0xff]  ;;  %v242_v63 = vld [vmem:[%s1908_s28 + $0x148] sm:$0xff]  ;;  %v255_v13 = vld [vmem:[%s1908_s28 + $0x1b0] sm:$0x33] }
  0x18   : > { %656 = vmatpush1.bf16.msra.mxu0 %v1684_v23  ;;  %699 = vmatpush1.bf16.msra.mxu1 %v1686_v24  ;;  %v1716_v58 = vcombine.low %v253_v52, %v253_v52  ;;  %v1718_v59 = vcombine.low %v254_v53, %v254_v53  ;;  %v1693_v3 = vcombine.high %v229_v60, %v241_v61  ;;  %v205_v5 = vld [vmem:[%s1908_s28 + $0x20] sm:$0xff]  ;;  %v206_v7 = vld [vmem:[%s1908_s28 + $0x28] sm:$0xff]  ;;  %v256_v14 = vld [vmem:[%s1908_s28 + $0x1b8] sm:$0x33] }
  0x19   : > { %657 = vmatprep.subr.bf16.mxu0 %v1661_v25  ;;  %700 = vmatprep.subr.bf16.mxu1 %v1663_v26  ;;  %v1695_v4 = vcombine.high %v230_v62, %v242_v63  ;;  %v217_v6 = vld [vmem:[%s1908_s28 + $0x80] sm:$0xff]  ;;  %v218_v8 = vld [vmem:[%s1908_s28 + $0x88] sm:$0xff]  ;;  %v1692_v9 = vcombine.low %v229_v60, %v241_v61  ;;  %v1694_v10 = vcombine.low %v230_v62, %v242_v63  ;;  %v231_v21 = vld [vmem:[%s1908_s28 + $0xf0] sm:$0xff] }
  0x1a   : > { %v596_v1 = vsel %vm570_vm0, %v1716_v58, 0  ;;  %v602_v2 = vsel %vm570_vm0, %v1718_v59, 0  ;;  %v1669_v11 = vcombine.high %v205_v5, %v217_v6  ;;  %v1671_v12 = vcombine.high %v206_v7, %v218_v8  ;;  %v243_v22 = vld [vmem:[%s1908_s28 + $0x150] sm:$0xff]  ;;  %v232_v23 = vld [vmem:[%s1908_s28 + $0xf8] sm:$0xff]  ;;  %v257_v37 = vld [vmem:[%s1908_s28 + $0x1c0] sm:$0x33] }
  0x1b   : > { %v1668_v15 = vcombine.low %v205_v5, %v217_v6  ;;  %v1670_v16 = vcombine.low %v206_v7, %v218_v8  ;;  %v1721_v17 = vcombine.high %v255_v13, %v255_v13  ;;  %v1723_v18 = vcombine.high %v256_v14, %v256_v14  ;;  %v244_v24 = vld [vmem:[%s1908_s28 + $0x158] sm:$0xff]  ;;  %v258_v38 = vld [vmem:[%s1908_s28 + $0x1c8] sm:$0x33]  ;;  %v233_v46 = vld [vmem:[%s1908_s28 + $0x100] sm:$0xff] }
  0x1c   : > { %658 = vmatpush1.bf16.msra.mxu0 %v1660_v29  ;;  %701 = vmatpush1.bf16.msra.mxu1 %v1662_v30  ;;  %v1720_v19 = vcombine.low %v255_v13, %v255_v13  ;;  %v1722_v20 = vcombine.low %v256_v14, %v256_v14  ;;  %v1697_v27 = vcombine.high %v231_v21, %v243_v22  ;;  %v207_v29 = vld [vmem:[%s1908_s28 + $0x30] sm:$0xff]  ;;  %v245_v47 = vld [vmem:[%s1908_s28 + $0x160] sm:$0xff]  ;;  %v260_v63 = vld [vmem:[%s1908_s28 + $0x1d8] sm:$0x33] }
  0x1d   : > { %1736 = vmatprep.subr.msk.bf16.mxu0 %vm570_vm0, %v1713_v31  ;;  %1738 = vmatprep.subr.msk.bf16.mxu1 %vm570_vm0, %v1715_v32  ;;  %v1699_v28 = vcombine.high %v232_v23, %v244_v24  ;;  %v219_v30 = vld [vmem:[%s1908_s28 + $0x90] sm:$0xff]  ;;  %v208_v31 = vld [vmem:[%s1908_s28 + $0x38] sm:$0xff]  ;;  %v1696_v33 = vcombine.low %v231_v21, %v243_v22  ;;  %v1698_v34 = vcombine.low %v232_v23, %v244_v24 }
  0x1e   : > { %v608_v25 = vsel %vm570_vm0, %v1720_v19, 0  ;;  %v614_v26 = vsel %vm570_vm0, %v1722_v20, 0  ;;  %v220_v32 = vld [vmem:[%s1908_s28 + $0x98] sm:$0xff]  ;;  %v1673_v35 = vcombine.high %v207_v29, %v219_v30  ;;  %v1724_v44 = vcombine.low %v257_v37, %v257_v37  ;;  %v259_v62 = vld [vmem:[%s1908_s28 + $0x1d0] sm:$0x33] }
  0x1f   : > { %1733 = vmatmul.mubr.msk.bf16.vlgmr.msra.gmra.mxu0 %vm566_vm1, %v1933_v39  ;;  %1735 = vmatmul.mubr.msk.bf16.vlgmr.msra.gmra.mxu1 %vm566_vm1, %v1933_v39  ;;  %v1675_v36 = vcombine.high %v208_v31, %v220_v32  ;;  %v1726_v45 = vcombine.low %v258_v38, %v258_v38  ;;  %v1701_v52 = vcombine.high %v233_v46, %v245_v47  ;;  %v235_v7 = vld [vmem:[%s1908_s28 + $0x110] sm:$0xff] }
  0x20   : > { %740 = vmatpush1.bf16.msra.mxu0 %v584_v40  ;;  %783 = vmatpush1.bf16.msra.mxu1 %v590_v41  ;;  %v1672_v40 = vcombine.low %v207_v29, %v219_v30  ;;  %v1674_v41 = vcombine.low %v208_v31, %v220_v32  ;;  %v1700_v58 = vcombine.low %v233_v46, %v245_v47  ;;  %v247_v8 = vld [vmem:[%s1908_s28 + $0x170] sm:$0xff] }
  0x21   : > { %741 = vmatprep.subr.bf16.mxu0 %v1689_v42  ;;  %784 = vmatprep.subr.bf16.mxu1 %v1691_v43  ;;  %v1725_v42 = vcombine.high %v257_v37, %v257_v37  ;;  %v1727_v43 = vcombine.high %v258_v38, %v258_v38  ;;  %v1728_v5 = vcombine.low %v259_v62, %v259_v62 }
  0x22   : > { %761 = vmatprep.mubr.bf16.mxu0 %v1852_v0  ;;  %804 = vmatprep.mubr.bf16.mxu1 %v1852_v0  ;;  %v1730_v6 = vcombine.low %v260_v63, %v260_v63  ;;  %v1705_v13 = vcombine.high %v235_v7, %v247_v8  ;;  %v1704_v19 = vcombine.low %v235_v7, %v247_v8 }
  0x24   : > { %742 = vmatpush1.bf16.msra.mxu0 %v1688_v48  ;;  %785 = vmatpush1.bf16.msra.mxu1 %v1690_v49  ;;  %v234_v48 = vld [vmem:[%s1908_s28 + $0x108] sm:$0xff] }
  0x25   : > { %743 = vmatprep.subr.bf16.mxu0 %v1665_v50  ;;  %786 = vmatprep.subr.bf16.mxu1 %v1667_v51  ;;  %v246_v49 = vld [vmem:[%s1908_s28 + $0x168] sm:$0xff]  ;;  %v620_v50 = vsel %vm570_vm0, %v1724_v44, 0  ;;  %v626_v51 = vsel %vm570_vm0, %v1726_v45, 0 }
  0x26   : > { %v1703_v53 = vcombine.high %v234_v48, %v246_v49  ;;  %v1702_v59 = vcombine.low %v234_v48, %v246_v49 }
  0x28   : > { %744 = vmatpush1.bf16.msra.mxu0 %v1664_v54  ;;  %787 = vmatpush1.bf16.msra.mxu1 %v1666_v55  ;;  %v209_v54 = vld [vmem:[%s1908_s28 + $0x40] sm:$0xff] }
  0x29   : > { %1740 = vmatprep.subr.msk.bf16.mxu0 %vm570_vm0, %v1717_v56  ;;  %1742 = vmatprep.subr.msk.bf16.mxu1 %vm570_vm0, %v1719_v57  ;;  %v221_v55 = vld [vmem:[%s1908_s28 + $0xa0] sm:$0xff]  ;;  %v210_v56 = vld [vmem:[%s1908_s28 + $0x48] sm:$0xff] }
  0x2a   : > { %v222_v57 = vld [vmem:[%s1908_s28 + $0xa8] sm:$0xff]  ;;  %v1677_v60 = vcombine.high %v209_v54, %v221_v55 }
  0x2b   : > { %1737 = vmatmul.mubr.msk.bf16.vlgmr.msra.gmra.mxu0 %vm566_vm1, %v1933_v39  ;;  %1739 = vmatmul.mubr.msk.bf16.vlgmr.msra.gmra.mxu1 %vm566_vm1, %v1933_v39  ;;  %v1679_v61 = vcombine.high %v210_v56, %v222_v57 }
  0x2c   : > { %826 = vmatpush1.bf16.msra.mxu0 %v596_v1  ;;  %869 = vmatpush1.bf16.msra.mxu1 %v602_v2  ;;  %v1676_v1 = vcombine.low %v209_v54, %v221_v55  ;;  %v1678_v2 = vcombine.low %v210_v56, %v222_v57 }
  0x2d   : > { %827 = vmatprep.subr.bf16.mxu0 %v1693_v3  ;;  %870 = vmatprep.subr.bf16.mxu1 %v1695_v4  ;;  %v1729_v3 = vcombine.high %v259_v62, %v259_v62  ;;  %v1731_v4 = vcombine.high %v260_v63, %v260_v63 }
  0x2e   : > { %847 = vmatprep.mubr.bf16.mxu0 %v1852_v0  ;;  %890 = vmatprep.mubr.bf16.mxu1 %v1852_v0 }
  0x30   : > { %828 = vmatpush1.bf16.msra.mxu0 %v1692_v9  ;;  %871 = vmatpush1.bf16.msra.mxu1 %v1694_v10  ;;  %v236_v9 = vld [vmem:[%s1908_s28 + $0x118] sm:$0xff] }
  0x31   : > { %829 = vmatprep.subr.bf16.mxu0 %v1669_v11  ;;  %872 = vmatprep.subr.bf16.mxu1 %v1671_v12  ;;  %v248_v10 = vld [vmem:[%s1908_s28 + $0x178] sm:$0xff]  ;;  %v632_v11 = vsel %vm570_vm0, %v1728_v5, 0  ;;  %v638_v12 = vsel %vm570_vm0, %v1730_v6, 0 }
  0x32   : > { %v1707_v14 = vcombine.high %v236_v9, %v248_v10  ;;  %v1706_v20 = vcombine.low %v236_v9, %v248_v10 }
  0x34   : > { %830 = vmatpush1.bf16.msra.mxu0 %v1668_v15  ;;  %873 = vmatpush1.bf16.msra.mxu1 %v1670_v16  ;;  %v211_v15 = vld [vmem:[%s1908_s28 + $0x50] sm:$0xff] }
  0x35   : > { %1744 = vmatprep.subr.msk.bf16.mxu0 %vm570_vm0, %v1721_v17  ;;  %1746 = vmatprep.subr.msk.bf16.mxu1 %vm570_vm0, %v1723_v18  ;;  %v223_v16 = vld [vmem:[%s1908_s28 + $0xb0] sm:$0xff]  ;;  %v212_v17 = vld [vmem:[%s1908_s28 + $0x58] sm:$0xff] }
  0x36   : > { %v224_v18 = vld [vmem:[%s1908_s28 + $0xb8] sm:$0xff]  ;;  %v1681_v21 = vcombine.high %v211_v15, %v223_v16  ;;  %v1680_v23 = vcombine.low %v211_v15, %v223_v16 }
  0x37   : > { %1741 = vmatmul.mubr.msk.bf16.vlgmr.msra.gmra.mxu0 %vm566_vm1, %v1933_v39  ;;  %1743 = vmatmul.mubr.msk.bf16.vlgmr.msra.gmra.mxu1 %vm566_vm1, %v1933_v39  ;;  %v1683_v22 = vcombine.high %v212_v17, %v224_v18  ;;  %v1682_v24 = vcombine.low %v212_v17, %v224_v18 }
  0x38   : > { %912 = vmatpush1.bf16.msra.mxu0 %v608_v25  ;;  %955 = vmatpush1.bf16.msra.mxu1 %v614_v26 }
  0x39   : > { %913 = vmatprep.subr.bf16.mxu0 %v1697_v27  ;;  %956 = vmatprep.subr.bf16.mxu1 %v1699_v28 }
  0x3a   : > { %933 = vmatprep.mubr.bf16.mxu0 %v1852_v0  ;;  %976 = vmatprep.mubr.bf16.mxu1 %v1852_v0 }
  0x3c   : > { %914 = vmatpush1.bf16.msra.mxu0 %v1696_v33  ;;  %957 = vmatpush1.bf16.msra.mxu1 %v1698_v34 }
  0x3d   : > { %915 = vmatprep.subr.bf16.mxu0 %v1673_v35  ;;  %958 = vmatprep.subr.bf16.mxu1 %v1675_v36 }
  0x40   : > { %916 = vmatpush1.bf16.msra.mxu0 %v1672_v40  ;;  %959 = vmatpush1.bf16.msra.mxu1 %v1674_v41 }
  0x41   : > { %1748 = vmatprep.subr.msk.bf16.mxu0 %vm570_vm0, %v1725_v42  ;;  %1750 = vmatprep.subr.msk.bf16.mxu1 %vm570_vm0, %v1727_v43 }
  0x43   : > { %1745 = vmatmul.mubr.msk.bf16.vlgmr.msra.gmra.mxu0 %vm566_vm1, %v1933_v39  ;;  %1747 = vmatmul.mubr.msk.bf16.vlgmr.msra.gmra.mxu1 %vm566_vm1, %v1933_v39 }
  0x44   : > { %998 = vmatpush1.bf16.msra.mxu0 %v620_v50  ;;  %1041 = vmatpush1.bf16.msra.mxu1 %v626_v51 }
  0x45   : > { %999 = vmatprep.subr.bf16.mxu0 %v1701_v52  ;;  %1042 = vmatprep.subr.bf16.mxu1 %v1703_v53 }
  0x46   : > { %1019 = vmatprep.mubr.bf16.mxu0 %v1852_v0  ;;  %1062 = vmatprep.mubr.bf16.mxu1 %v1852_v0 }
  0x48   : > { %1000 = vmatpush1.bf16.msra.mxu0 %v1700_v58  ;;  %1043 = vmatpush1.bf16.msra.mxu1 %v1702_v59 }
  0x49   : > { %1001 = vmatprep.subr.bf16.mxu0 %v1677_v60  ;;  %1044 = vmatprep.subr.bf16.mxu1 %v1679_v61 }
  0x4c   : > { %1002 = vmatpush1.bf16.msra.mxu0 %v1676_v1  ;;  %1045 = vmatpush1.bf16.msra.mxu1 %v1678_v2 }
  0x4d   : > { %1752 = vmatprep.subr.msk.bf16.mxu0 %vm570_vm0, %v1729_v3  ;;  %1754 = vmatprep.subr.msk.bf16.mxu1 %vm570_vm0, %v1731_v4 }
  0x4f   : > { %1749 = vmatmul.mubr.msk.bf16.vlgmr.msra.gmra.mxu0 %vm566_vm1, %v1933_v39  ;;  %1751 = vmatmul.mubr.msk.bf16.vlgmr.msra.gmra.mxu1 %vm566_vm1, %v1933_v39 }
  0x50   : > { %1084 = vmatpush1.bf16.msra.mxu0 %v632_v11  ;;  %1127 = vmatpush1.bf16.msra.mxu1 %v638_v12 }
  0x51   : > { %1085 = vmatprep.subr.bf16.mxu0 %v1705_v13  ;;  %1128 = vmatprep.subr.bf16.mxu1 %v1707_v14 }
  0x52   : > { %1105 = vmatprep.mubr.bf16.mxu0 %v1852_v0  ;;  %1148 = vmatprep.mubr.bf16.mxu1 %v1852_v0 }
  0x54   : > { %1086 = vmatpush1.bf16.msra.mxu0 %v1704_v19  ;;  %1129 = vmatpush1.bf16.msra.mxu1 %v1706_v20 }
  0x55   : > { %1087 = vmatprep.subr.bf16.mxu0 %v1681_v21  ;;  %1130 = vmatprep.subr.bf16.mxu1 %v1683_v22 }
  0x58   : > { %1088 = vmatpush1.bf16.msra.mxu0 %v1680_v23  ;;  %1131 = vmatpush1.bf16.msra.mxu1 %v1682_v24 }
  0x5b   : > { %1753 = vmatmul.mubr.msk.bf16.vlgmr.msra.gmra.mxu0 %vm566_vm1, %v1933_v39  ;;  %1755 = vmatmul.mubr.msk.bf16.vlgmr.msra.gmra.mxu1 %vm566_vm1, %v1933_v39 }
  0x89   : > { %v2033_v25 = vpop.permute.xlu0 %1163  ;;  %v2035_v26 = vpop.permute.xlu1 %1223 }
  0x8d   : > { %v2043_v35 = vpop.permute.xlu0 %1168  ;;  %v2048_v42 = vpop.permute.xlu1 %1228 }
  0xdf   : > { %v677_v0 = vpop.f32.mrf.mxu0  ;;  %v720_v27 = vpop.f32.mrf.mxu1 }
  0xe0   : > { %v1171_v28 = vmul.f32 %v2033_v25, %v677_v0  ;;  %v1173_v29 = vmul.f32 %v2033_v25, %v720_v27 }
  0xe1   : > { %v679_v30 = vpop.f32.mrf.mxu0  ;;  %v722_v31 = vpop.f32.mrf.mxu1 }
  0xe2   : > { %v1172_v32 = vmul.f32 %v2033_v25, %v679_v30  ;;  %v1231_v33 = vadd.f32 %v2035_v26, %v1171_v28  ;;  %v1174_v34 = vmul.f32 %v2033_v25, %v722_v31  ;;  %v1233_v39 = vadd.f32 %v2035_v26, %v1173_v29 }
  0xe3   : > { %v681_v36 = vpop.f32.mrf.mxu0  ;;  %v724_v37 = vpop.f32.mrf.mxu1 }
  0xe4   : > { %v1232_v38 = vadd.f32 %v2035_v26, %v1172_v32  ;;  %vm1279_vm2 = vcmp.gt.f32.partialorder %v1231_v33, 0.0  ;;  %v1327_v40 = vmul.f32 0.01, %v1231_v33  ;;  %v1234_v41 = vadd.f32 %v2035_v26, %v1174_v34 }
  0xe5   : > { %vm1281_vm3 = vcmp.gt.f32.partialorder %v1233_v39, 0.0  ;;  %v1329_v43 = vmul.f32 0.01, %v1233_v39  ;;  %v1195_v44 = vmul.f32 %v2043_v35, %v681_v36  ;;  %v1197_v45 = vmul.f32 %v2043_v35, %v724_v37  ;;  %v683_v46 = vpop.f32.mrf.mxu0  ;;  %v726_v47 = vpop.f32.mrf.mxu1 }
  0xe6   : > { %vm1280_vm4 = vcmp.gt.f32.partialorder %v1232_v38, 0.0  ;;  %v1328_v48 = vmul.f32 0.01, %v1232_v38  ;;  %vm1282_vm5 = vcmp.gt.f32.partialorder %v1234_v41, 0.0  ;;  %v1375_v49 = vsel %vm1279_vm2, %v1231_v33, %v1327_v40 }
  0xe7   : > { %v1330_v50 = vmul.f32 0.01, %v1234_v41  ;;  %v1196_v51 = vmul.f32 %v2043_v35, %v683_v46  ;;  %v1255_v52 = vadd.f32 %v2048_v42, %v1195_v44  ;;  %v1377_v54 = vsel %vm1281_vm3, %v1233_v39, %v1329_v43 }
  0xe8   : > { %v1376_v53 = vsel %vm1280_vm4, %v1232_v38, %v1328_v48  ;;  %v1198_v55 = vmul.f32 %v2043_v35, %v726_v47  ;;  %v1257_v56 = vadd.f32 %v2048_v42, %v1197_v45 }
  0xe9   : > { %v1782_v57 = vpack.c.bf16 %v1376_v53, %v1375_v49  ;;  %v1378_v58 = vsel %vm1282_vm5, %v1234_v41, %v1330_v50  ;;  %v1256_v59 = vadd.f32 %v2048_v42, %v1196_v51  ;;  %vm1303_vm6 = vcmp.gt.f32.partialorder %v1255_v52, 0.0 }
  0xea   : > { %v1783_v60 = vpack.c.bf16 %v1378_v58, %v1377_v54  ;;  %v1351_v61 = vmul.f32 0.01, %v1255_v52  ;;  %v1258_v62 = vadd.f32 %v2048_v42, %v1198_v55  ;;  %vm1305_vm7 = vcmp.gt.f32.partialorder %v1257_v56, 0.0 }
  0xeb   : > { %1567 = vst [vmem:[%s2057_s8] sm:$0xff] %v1782_v57  ;;  %vm1304_vm8 = vcmp.gt.f32.partialorder %v1256_v59, 0.0  ;;  %v1352_v63 = vmul.f32 0.01, %v1256_v59  ;;  %v1353_v1 = vmul.f32 0.01, %v1257_v56  ;;  %v763_v2 = vpop.f32.mrf.mxu0  ;;  %v806_v3 = vpop.f32.mrf.mxu1 }
  0xec   : > { %1568 = vst [vmem:[%s2057_s8 + $0x8] sm:$0xff] %v1783_v60  ;;  %vm1306_vm9 = vcmp.gt.f32.partialorder %v1258_v62, 0.0  ;;  %v1354_v4 = vmul.f32 0.01, %v1258_v62  ;;  %v1175_v5 = vmul.f32 %v2033_v25, %v763_v2  ;;  %v1399_v6 = vsel %vm1303_vm6, %v1255_v52, %v1351_v61 }
  0xed   : > { %v1400_v7 = vsel %vm1304_vm8, %v1256_v59, %v1352_v63  ;;  %v1401_v8 = vsel %vm1305_vm7, %v1257_v56, %v1353_v1  ;;  %v1177_v9 = vmul.f32 %v2033_v25, %v806_v3  ;;  %v765_v10 = vpop.f32.mrf.mxu0  ;;  %v808_v11 = vpop.f32.mrf.mxu1 }
  0xee   : > { %v1794_v12 = vpack.c.bf16 %v1400_v7, %v1399_v6  ;;  %v1402_v13 = vsel %vm1306_vm9, %v1258_v62, %v1354_v4  ;;  %v1235_v14 = vadd.f32 %v2035_v26, %v1175_v5  ;;  %v1176_v15 = vmul.f32 %v2033_v25, %v765_v10 }
  0xef   : > { %v1795_v16 = vpack.c.bf16 %v1402_v13, %v1401_v8  ;;  %v1237_v17 = vadd.f32 %v2035_v26, %v1177_v9  ;;  %v1178_v18 = vmul.f32 %v2033_v25, %v808_v11  ;;  %v767_v19 = vpop.f32.mrf.mxu0  ;;  %v810_v20 = vpop.f32.mrf.mxu1 }
  0xf0   : > { %1582 = vst [vmem:[%s2057_s8 + $0x60] sm:$0x11] %v1794_v12  ;;  %v1331_v21 = vmul.f32 0.01, %v1235_v14  ;;  %v1236_v22 = vadd.f32 %v2035_v26, %v1176_v15  ;;  %v1199_v23 = vmul.f32 %v2043_v35, %v767_v19  ;;  %vm1283_vm10 = vcmp.gt.f32.partialorder %v1235_v14, 0.0 }
  0xf1   : > { %1583 = vst [vmem:[%s2057_s8 + $0x68] sm:$0x11] %v1795_v16  ;;  %v1333_v24 = vmul.f32 0.01, %v1237_v17  ;;  %v1238_v0 = vadd.f32 %v2035_v26, %v1178_v18  ;;  %v1201_v27 = vmul.f32 %v2043_v35, %v810_v20  ;;  %v769_v28 = vpop.f32.mrf.mxu0  ;;  %vm1285_vm11 = vcmp.gt.f32.partialorder %v1237_v17, 0.0  ;;  %v812_v33 = vpop.f32.mrf.mxu1 }
  0xf2   : > { %vm1284_vm12 = vcmp.gt.f32.partialorder %v1236_v22, 0.0  ;;  %v1332_v29 = vmul.f32 0.01, %v1236_v22  ;;  %v1259_v30 = vadd.f32 %v2048_v42, %v1199_v23  ;;  %v1379_v34 = vsel %vm1283_vm10, %v1235_v14, %v1331_v21 }
  0xf3   : > { %vm1286_vm13 = vcmp.gt.f32.partialorder %v1238_v0, 0.0  ;;  %v1334_v31 = vmul.f32 0.01, %v1238_v0  ;;  %v1261_v32 = vadd.f32 %v2048_v42, %v1201_v27  ;;  %v1200_v36 = vmul.f32 %v2043_v35, %v769_v28 }
  0xf4   : > { %v1380_v39 = vsel %vm1284_vm12, %v1236_v22, %v1332_v29  ;;  %v1381_v37 = vsel %vm1285_vm11, %v1237_v17, %v1333_v24  ;;  %v1355_v41 = vmul.f32 0.01, %v1259_v30  ;;  %vm1307_vm14 = vcmp.gt.f32.partialorder %v1259_v30, 0.0 }
  0xf5   : > { %v1784_v38 = vpack.c.bf16 %v1380_v39, %v1379_v34  ;;  %v1382_v40 = vsel %vm1286_vm13, %v1238_v0, %v1334_v31  ;;  %v1260_v44 = vadd.f32 %v2048_v42, %v1200_v36  ;;  %v1202_v45 = vmul.f32 %v2043_v35, %v812_v33 }
  0xf6   : > { %v1785_v43 = vpack.c.bf16 %v1382_v40, %v1381_v37  ;;  %v1357_v46 = vmul.f32 0.01, %v1261_v32  ;;  %v1403_v52 = vsel %vm1307_vm14, %v1259_v30, %v1355_v41  ;;  %vm1309_vm0 = vcmp.gt.f32.partialorder %v1261_v32, 0.0 }
  0xf7   : > { %1569 = vst [vmem:[%s2057_s8 + $0x10] sm:$0xff] %v1784_v38  ;;  %v849_v47 = vpop.f32.mrf.mxu0  ;;  %v892_v48 = vpop.f32.mrf.mxu1  ;;  %vm1308_vm15 = vcmp.gt.f32.partialorder %v1260_v44, 0.0  ;;  %v1356_v49 = vmul.f32 0.01, %v1260_v44  ;;  %v1262_v50 = vadd.f32 %v2048_v42, %v1202_v45 }
  0xf8   : > { %1570 = vst [vmem:[%s2057_s8 + $0x18] sm:$0xff] %v1785_v43  ;;  %v1179_v51 = vmul.f32 %v2033_v25, %v849_v47  ;;  %v1181_v53 = vmul.f32 %v2033_v25, %v892_v48  ;;  %v1405_v2 = vsel %vm1309_vm0, %v1261_v32, %v1357_v46 }
  0xf9   : > { %v851_v54 = vpop.f32.mrf.mxu0  ;;  %v894_v55 = vpop.f32.mrf.mxu1  ;;  %v1404_v56 = vsel %vm1308_vm15, %v1260_v44, %v1356_v49  ;;  %vm1310_vm1 = vcmp.gt.f32.partialorder %v1262_v50, 0.0  ;;  %v1358_v57 = vmul.f32 0.01, %v1262_v50 }
  0xfa   : > { %v1239_v58 = vadd.f32 %v2035_v26, %v1179_v51  ;;  %v1796_v59 = vpack.c.bf16 %v1404_v56, %v1403_v52  ;;  %v1241_v60 = vadd.f32 %v2035_v26, %v1181_v53  ;;  %v1180_v61 = vmul.f32 %v2033_v25, %v851_v54 }
  0xfb   : > { %v1182_v62 = vmul.f32 %v2033_v25, %v894_v55  ;;  %v853_v63 = vpop.f32.mrf.mxu0  ;;  %v896_v1 = vpop.f32.mrf.mxu1  ;;  %v1406_v3 = vsel %vm1310_vm1, %v1262_v50, %v1358_v57 }
  0xfc   : > { %v1335_v4 = vmul.f32 0.01, %v1239_v58  ;;  %v1203_v5 = vmul.f32 %v2043_v35, %v853_v63  ;;  %1584 = vst [vmem:[%s2057_s8 + $0x70] sm:$0x11] %v1796_v59  ;;  %v1797_v6 = vpack.c.bf16 %v1406_v3, %v1405_v2  ;;  %vm1287_vm2 = vcmp.gt.f32.partialorder %v1239_v58, 0.0 }
  0xfd   : > { %v1240_v7 = vadd.f32 %v2035_v26, %v1180_v61  ;;  %v855_v8 = vpop.f32.mrf.mxu0  ;;  %v1337_v9 = vmul.f32 0.01, %v1241_v60  ;;  %v1242_v10 = vadd.f32 %v2035_v26, %v1182_v62  ;;  %v1205_v12 = vmul.f32 %v2043_v35, %v896_v1  ;;  %v898_v13 = vpop.f32.mrf.mxu1 }
  0xfe   : > { %v1263_v11 = vadd.f32 %v2048_v42, %v1203_v5  ;;  %1585 = vst [vmem:[%s2057_s8 + $0x78] sm:$0x11] %v1797_v6  ;;  %vm1289_vm3 = vcmp.gt.f32.partialorder %v1241_v60, 0.0  ;;  %v1204_v15 = vmul.f32 %v2043_v35, %v855_v8  ;;  %v1383_v16 = vsel %vm1287_vm2, %v1239_v58, %v1335_v4 }
  0xff   : > { %vm1288_vm4 = vcmp.gt.f32.partialorder %v1240_v7, 0.0  ;;  %v1336_v14 = vmul.f32 0.01, %v1240_v7  ;;  %vm1290_vm5 = vcmp.gt.f32.partialorder %v1242_v10, 0.0  ;;  %v1338_v17 = vmul.f32 0.01, %v1242_v10 }
 0x100   : > { %v1359_v18 = vmul.f32 0.01, %v1263_v11  ;;  %v1265_v20 = vadd.f32 %v2048_v42, %v1205_v12  ;;  %v1264_v21 = vadd.f32 %v2048_v42, %v1204_v15  ;;  %v1206_v22 = vmul.f32 %v2043_v35, %v898_v13 }
 0x101   : > { %v1384_v19 = vsel %vm1288_vm4, %v1240_v7, %v1336_v14  ;;  %v1385_v23 = vsel %vm1289_vm3, %v1241_v60, %v1337_v9  ;;  %v1386_v0 = vsel %vm1290_vm5, %v1242_v10, %v1338_v17  ;;  %vm1311_vm6 = vcmp.gt.f32.partialorder %v1263_v11, 0.0 }
 0x102   : > { %v1786_v24 = vpack.c.bf16 %v1384_v19, %v1383_v16  ;;  %v1787_v27 = vpack.c.bf16 %v1386_v0, %v1385_v23  ;;  %v1361_v28 = vmul.f32 0.01, %v1265_v20  ;;  %vm1312_vm7 = vcmp.gt.f32.partialorder %v1264_v21, 0.0 }
 0x103   : > { %v935_v29 = vpop.f32.mrf.mxu0  ;;  %v978_v30 = vpop.f32.mrf.mxu1  ;;  %v1360_v31 = vmul.f32 0.01, %v1264_v21  ;;  %v1266_v32 = vadd.f32 %v2048_v42, %v1206_v22  ;;  %v1407_v39 = vsel %vm1311_vm6, %v1263_v11, %v1359_v18  ;;  %vm1313_vm8 = vcmp.gt.f32.partialorder %v1265_v20, 0.0 }
 0x104   : > { %1571 = vst [vmem:[%s2057_s8 + $0x20] sm:$0xff] %v1786_v24  ;;  %v1183_v33 = vmul.f32 %v2033_v25, %v935_v29  ;;  %v1185_v34 = vmul.f32 %v2033_v25, %v978_v30  ;;  %1572 = vst [vmem:[%s2057_s8 + $0x28] sm:$0xff] %v1787_v27  ;;  %v1409_v49 = vsel %vm1313_vm8, %v1265_v20, %v1361_v28 }
 0x105   : > { %v937_v36 = vpop.f32.mrf.mxu0  ;;  %v980_v37 = vpop.f32.mrf.mxu1  ;;  %v1408_v38 = vsel %vm1312_vm7, %v1264_v21, %v1360_v31  ;;  %vm1314_vm9 = vcmp.gt.f32.partialorder %v1266_v32, 0.0  ;;  %v1362_v40 = vmul.f32 0.01, %v1266_v32 }
 0x106   : > { %v1243_v41 = vadd.f32 %v2035_v26, %v1183_v33  ;;  %v1798_v43 = vpack.c.bf16 %v1408_v38, %v1407_v39  ;;  %v1245_v44 = vadd.f32 %v2035_v26, %v1185_v34  ;;  %v1184_v45 = vmul.f32 %v2033_v25, %v937_v36 }
 0x107   : > { %v1186_v46 = vmul.f32 %v2033_v25, %v980_v37  ;;  %v939_v47 = vpop.f32.mrf.mxu0  ;;  %v982_v48 = vpop.f32.mrf.mxu1  ;;  %v1410_v50 = vsel %vm1314_vm9, %v1266_v32, %v1362_v40  ;;  %vm1578_vm9 = vcmask 1043456  }
 0x108   : > { %v1339_v51 = vmul.f32 0.01, %v1243_v41  ;;  %v1207_v52 = vmul.f32 %v2043_v35, %v939_v47  ;;  %1586 = vst [vmem:[%s2057_s8 + $0x80] sm:$0x11] %v1798_v43  ;;  %v1799_v53 = vpack.c.bf16 %v1410_v50, %v1409_v49  ;;  %vm1291_vm10 = vcmp.gt.f32.partialorder %v1243_v41, 0.0 }
 0x109   : > { %v1244_v54 = vadd.f32 %v2035_v26, %v1184_v45  ;;  %v941_v55 = vpop.f32.mrf.mxu0  ;;  %v1341_v56 = vmul.f32 0.01, %v1245_v44  ;;  %v1246_v57 = vadd.f32 %v2035_v26, %v1186_v46  ;;  %v1209_v59 = vmul.f32 %v2043_v35, %v982_v48  ;;  %v984_v60 = vpop.f32.mrf.mxu1 }
 0x10a   : > { %v1267_v58 = vadd.f32 %v2048_v42, %v1207_v52  ;;  %1587 = vst [vmem:[%s2057_s8 + $0x88] sm:$0x11] %v1799_v53  ;;  %vm1293_vm11 = vcmp.gt.f32.partialorder %v1245_v44, 0.0  ;;  %v1208_v62 = vmul.f32 %v2043_v35, %v941_v55  ;;  %v1387_v63 = vsel %vm1291_vm10, %v1243_v41, %v1339_v51 }
 0x10b   : > { %vm1292_vm12 = vcmp.gt.f32.partialorder %v1244_v54, 0.0  ;;  %v1340_v61 = vmul.f32 0.01, %v1244_v54  ;;  %vm1294_vm13 = vcmp.gt.f32.partialorder %v1246_v57, 0.0  ;;  %v1342_v1 = vmul.f32 0.01, %v1246_v57 }
 0x10c   : > { %v1363_v2 = vmul.f32 0.01, %v1267_v58  ;;  %v1269_v4 = vadd.f32 %v2048_v42, %v1209_v59  ;;  %v1268_v5 = vadd.f32 %v2048_v42, %v1208_v62  ;;  %v1210_v6 = vmul.f32 %v2043_v35, %v984_v60 }
 0x10d   : > { %v1388_v3 = vsel %vm1292_vm12, %v1244_v54, %v1340_v61  ;;  %v1389_v7 = vsel %vm1293_vm11, %v1245_v44, %v1341_v56  ;;  %v1390_v9 = vsel %vm1294_vm13, %v1246_v57, %v1342_v1  ;;  %vm1315_vm14 = vcmp.gt.f32.partialorder %v1267_v58, 0.0 }
 0x10e   : > { %v1788_v8 = vpack.c.bf16 %v1388_v3, %v1387_v63  ;;  %v1789_v10 = vpack.c.bf16 %v1390_v9, %v1389_v7  ;;  %v1365_v11 = vmul.f32 0.01, %v1269_v4  ;;  %vm1316_vm15 = vcmp.gt.f32.partialorder %v1268_v5, 0.0 }
 0x10f   : > { %v1021_v12 = vpop.f32.mrf.mxu0  ;;  %v1064_v13 = vpop.f32.mrf.mxu1  ;;  %v1364_v14 = vmul.f32 0.01, %v1268_v5  ;;  %v1270_v15 = vadd.f32 %v2048_v42, %v1210_v6  ;;  %v1411_v18 = vsel %vm1315_vm14, %v1267_v58, %v1363_v2  ;;  %vm1317_vm0 = vcmp.gt.f32.partialorder %v1269_v4, 0.0 }
 0x110   : > { %1573 = vst [vmem:[%s2057_s8 + $0x30] sm:$0xff] %v1788_v8  ;;  %v1187_v16 = vmul.f32 %v2033_v25, %v1021_v12  ;;  %v1189_v17 = vmul.f32 %v2033_v25, %v1064_v13  ;;  %1574 = vst [vmem:[%s2057_s8 + $0x38] sm:$0xff] %v1789_v10  ;;  %v1413_v31 = vsel %vm1317_vm0, %v1269_v4, %v1365_v11  ;;  %vm1579_vm12 = vcmask 801796  }
 0x111   : > { %v1023_v19 = vpop.f32.mrf.mxu0  ;;  %v1066_v20 = vpop.f32.mrf.mxu1  ;;  %v1412_v21 = vsel %vm1316_vm15, %v1268_v5, %v1364_v14  ;;  %vm1318_vm1 = vcmp.gt.f32.partialorder %v1270_v15, 0.0  ;;  %v1366_v22 = vmul.f32 0.01, %v1270_v15  ;;  %vm1580_vm0 = vmor %vm1579_vm12, %vm1578_vm9 }
 0x112   : > { %v1247_v23 = vadd.f32 %v2035_v26, %v1187_v16  ;;  %v1800_v24 = vpack.c.bf16 %v1412_v21, %v1411_v18  ;;  %v1249_v0 = vadd.f32 %v2035_v26, %v1189_v17  ;;  %v1188_v27 = vmul.f32 %v2033_v25, %v1023_v19 }
 0x113   : > { %v1190_v28 = vmul.f32 %v2033_v25, %v1066_v20  ;;  %v1025_v29 = vpop.f32.mrf.mxu0  ;;  %v1068_v30 = vpop.f32.mrf.mxu1  ;;  %v1414_v32 = vsel %vm1318_vm1, %v1270_v15, %v1366_v22 }
 0x114   : > { %v1343_v33 = vmul.f32 0.01, %v1247_v23  ;;  %v1211_v34 = vmul.f32 %v2043_v35, %v1025_v29  ;;  %1588 = vst [vmem:[%s2057_s8 + $0x90] sm:$0x11] %v1800_v24  ;;  %v1801_v39 = vpack.c.bf16 %v1414_v32, %v1413_v31  ;;  %vm1295_vm2 = vcmp.gt.f32.partialorder %v1247_v23, 0.0 }
 0x115   : > { %v1248_v36 = vadd.f32 %v2035_v26, %v1188_v27  ;;  %v1027_v37 = vpop.f32.mrf.mxu0  ;;  %v1345_v38 = vmul.f32 0.01, %v1249_v0  ;;  %v1250_v40 = vadd.f32 %v2035_v26, %v1190_v28  ;;  %v1213_v43 = vmul.f32 %v2043_v35, %v1068_v30  ;;  %v1070_v44 = vpop.f32.mrf.mxu1 }
 0x116   : > { %v1271_v41 = vadd.f32 %v2048_v42, %v1211_v34  ;;  %1589 = vst [vmem:[%s2057_s8 + $0x98] sm:$0x11] %v1801_v39  ;;  %vm1297_vm3 = vcmp.gt.f32.partialorder %v1249_v0, 0.0  ;;  %v1212_v46 = vmul.f32 %v2043_v35, %v1027_v37  ;;  %v1391_v47 = vsel %vm1295_vm2, %v1247_v23, %v1343_v33 }
 0x117   : > { %vm1296_vm4 = vcmp.gt.f32.partialorder %v1248_v36, 0.0  ;;  %v1344_v45 = vmul.f32 0.01, %v1248_v36  ;;  %vm1298_vm5 = vcmp.gt.f32.partialorder %v1250_v40, 0.0  ;;  %v1346_v48 = vmul.f32 0.01, %v1250_v40 }
 0x118   : > { %v1367_v49 = vmul.f32 0.01, %v1271_v41  ;;  %v1273_v51 = vadd.f32 %v2048_v42, %v1213_v43  ;;  %v1272_v52 = vadd.f32 %v2048_v42, %v1212_v46  ;;  %v1214_v53 = vmul.f32 %v2043_v35, %v1070_v44 }
 0x119   : > { %v1392_v50 = vsel %vm1296_vm4, %v1248_v36, %v1344_v45  ;;  %v1393_v54 = vsel %vm1297_vm3, %v1249_v0, %v1345_v38  ;;  %v1394_v56 = vsel %vm1298_vm5, %v1250_v40, %v1346_v48  ;;  %vm1319_vm6 = vcmp.gt.f32.partialorder %v1271_v41, 0.0 }
 0x11a   : > { %v1790_v55 = vpack.c.bf16 %v1392_v50, %v1391_v47  ;;  %v1791_v57 = vpack.c.bf16 %v1394_v56, %v1393_v54  ;;  %v1369_v58 = vmul.f32 0.01, %v1273_v51  ;;  %vm1320_vm7 = vcmp.gt.f32.partialorder %v1272_v52, 0.0 }
 0x11b   : > { %v1107_v59 = vpop.f32.mrf.mxu0  ;;  %v1150_v60 = vpop.f32.mrf.mxu1  ;;  %v1368_v61 = vmul.f32 0.01, %v1272_v52  ;;  %v1274_v62 = vadd.f32 %v2048_v42, %v1214_v53  ;;  %v1415_v2 = vsel %vm1319_vm6, %v1271_v41, %v1367_v49  ;;  %vm1321_vm8 = vcmp.gt.f32.partialorder %v1273_v51, 0.0 }
 0x11c   : > { %1575 = vst [vmem:[%s2057_s8 + $0x40] sm:$0xff] %v1790_v55  ;;  %v1191_v63 = vmul.f32 %v2033_v25, %v1107_v59  ;;  %v1193_v1 = vmul.f32 %v2033_v25, %v1150_v60  ;;  %1576 = vst [vmem:[%s2057_s8 + $0x48] sm:$0xff] %v1791_v57  ;;  %v1417_v14 = vsel %vm1321_vm8, %v1273_v51, %v1369_v58  ;;  %vm1593_vm4 = vcmask 1040384  }
 0x11d   : > { %v1109_v3 = vpop.f32.mrf.mxu0  ;;  %v1152_v4 = vpop.f32.mrf.mxu1  ;;  %v1416_v5 = vsel %vm1320_vm7, %v1272_v52, %v1368_v61  ;;  %vm1322_vm10 = vcmp.gt.f32.partialorder %v1274_v62, 0.0  ;;  %v1370_v6 = vmul.f32 0.01, %v1274_v62  ;;  %vm1594_vm5 = vcmask 798724  }
 0x11e   : > { %v1251_v7 = vadd.f32 %v2035_v26, %v1191_v63  ;;  %v1802_v8 = vpack.c.bf16 %v1416_v5, %v1415_v2  ;;  %v1253_v9 = vadd.f32 %v2035_v26, %v1193_v1  ;;  %v1192_v10 = vmul.f32 %v2033_v25, %v1109_v3  ;;  %vm1595_vm7 = vmor %vm1594_vm5, %vm1593_vm4 }
 0x11f   : > { %v1194_v11 = vmul.f32 %v2033_v25, %v1152_v4  ;;  %v1111_v12 = vpop.f32.mrf.mxu0  ;;  %v1154_v13 = vpop.f32.mrf.mxu1  ;;  %v1418_v15 = vsel %vm1322_vm10, %v1274_v62, %v1370_v6 }
 0x120   : > { %v1347_v16 = vmul.f32 0.01, %v1251_v7  ;;  %v1215_v17 = vmul.f32 %v2043_v35, %v1111_v12  ;;  %1590 = vst [vmem:[%s2057_s8 + $0xa0] sm:$0x11] %v1802_v8  ;;  %v1803_v18 = vpack.c.bf16 %v1418_v15, %v1417_v14  ;;  %vm1299_vm11 = vcmp.gt.f32.partialorder %v1251_v7, 0.0 }
 0x121   : > { %v1252_v19 = vadd.f32 %v2035_v26, %v1192_v10  ;;  %v1113_v20 = vpop.f32.mrf.mxu0  ;;  %v1349_v21 = vmul.f32 0.01, %v1253_v9  ;;  %v1254_v22 = vadd.f32 %v2035_v26, %v1194_v11  ;;  %v1217_v23 = vmul.f32 %v2043_v35, %v1154_v13  ;;  %v1156_v24 = vpop.f32.mrf.mxu1 }
 0x122   : > { %v1275_v25 = vadd.f32 %v2048_v42, %v1215_v17  ;;  %1591 = vst [vmem:[%s2057_s8 + $0xa8] sm:$0x11] %v1803_v18  ;;  %vm1301_vm13 = vcmp.gt.f32.partialorder %v1253_v9, 0.0  ;;  %v1216_v27 = vmul.f32 %v2043_v35, %v1113_v20  ;;  %v1395_v28 = vsel %vm1299_vm11, %v1251_v7, %v1347_v16 }
 0x123   : > { %vm1300_vm14 = vcmp.gt.f32.partialorder %v1252_v19, 0.0  ;;  %v1348_v0 = vmul.f32 0.01, %v1252_v19  ;;  %vm1302_vm15 = vcmp.gt.f32.partialorder %v1254_v22, 0.0  ;;  %v1350_v29 = vmul.f32 0.01, %v1254_v22 }
 0x124   : > { %v1277_v31 = vadd.f32 %v2048_v42, %v1217_v23  ;;  %v1276_v26 = vadd.f32 %v2048_v42, %v1216_v27  ;;  %v1218_v32 = vmul.f32 %v2043_v35, %v1156_v24  ;;  %v1397_v33 = vsel %vm1301_vm13, %v1253_v9, %v1349_v21 }
 0x125   : > { %v1396_v30 = vsel %vm1300_vm14, %v1252_v19, %v1348_v0  ;;  %v1398_v39 = vsel %vm1302_vm15, %v1254_v22, %v1350_v29  ;;  %v1371_v36 = vmul.f32 0.01, %v1275_v25  ;;  %vm1323_vm1 = vcmp.gt.f32.partialorder %v1275_v25, 0.0 }
 0x126   : > { %v1792_v34 = vpack.c.bf16 %v1396_v30, %v1395_v28  ;;  %v1793_v37 = vpack.c.bf16 %v1398_v39, %v1397_v33  ;;  %vm1324_vm2 = vcmp.gt.f32.partialorder %v1276_v26, 0.0  ;;  %v1373_v38 = vmul.f32 0.01, %v1277_v31 }
 0x127   : > { %v1372_v40 = vmul.f32 0.01, %v1276_v26  ;;  %v1278_v41 = vadd.f32 %v2048_v42, %v1218_v32  ;;  %vm1325_vm3 = vcmp.gt.f32.partialorder %v1277_v31, 0.0  ;;  %v1419_v35 = vsel %vm1323_vm1, %v1275_v25, %v1371_v36 }
 0x128   : > { %1577 = vst [vmem:[%s2057_s8 + $0x50] sm:$0xff] %v1792_v34  ;;  %1581 = vst.msk [vmem:[%s2057_s8 + $0x58] sm:$0xff] %vm1580_vm0, %v1793_v37  ;;  %v1421_v46 = vsel %vm1325_vm3, %v1277_v31, %v1373_v38 }
 0x129   : > { %v1420_v43 = vsel %vm1324_vm2, %v1276_v26, %v1372_v40  ;;  %vm1326_vm6 = vcmp.gt.f32.partialorder %v1278_v41, 0.0  ;;  %v1374_v44 = vmul.f32 0.01, %v1278_v41 }
 0x12a   : > { %v1804_v45 = vpack.c.bf16 %v1420_v43, %v1419_v35 }
 0x12b   : > { %v1422_v47 = vsel %vm1326_vm6, %v1278_v41, %v1374_v44 }
 0x12c   : > { %1592 = vst [vmem:[%s2057_s8 + $0xb0] sm:$0x11] %v1804_v45  ;;  %v1805_v48 = vpack.c.bf16 %v1422_v47, %v1421_v46 }
 0x12e   : > { %1596 = vst.msk [vmem:[%s2057_s8 + $0xb8] sm:$0x11] %vm1595_vm7, %v1805_v48 }
 0x12f PF: > { %s14_s15 = sadd.s32 1, %s1850_s15  }
 0x130   : > { %p11_p4 = scmp.ge.s32.totalorder %s14_s15, 4  }
 0x132   :  { %13 = sbr.rel (!%p11_p4) target bundleno = 1 (0x1), region = 66 }

// kernel: siamese_forward.4
= control target key start
LH: loop header
LB: loop body
LE: loop exit
PB: predicated region body
PF: predicated region fallthrough
CT: control target
= control target key end

     0   :  { %s1640_s15 = smov 0   ;;  %s1907_s0 = inlined_call_operand.vmem [shape: bf16[4,90,1369], index: 0, kind: input, shape index: {}]   ;;  %s1908_s1 = inlined_call_operand.vmem [shape: bf16[20,90], index: 1, kind: input, shape index: {}]   ;;  %s1909_s2 = inlined_call_operand.vmem [shape: f32[20,1], index: 2, kind: input, shape index: {}]   ;;  %s1910_s3 = inlined_call_operand.vmem [shape: f32[20,1], index: 3, kind: input, shape index: {}]   ;;  %s1911_s4 = inlined_call_operand.vmem [shape: bf16[4,20,1369], index: 4, kind: output, shape index: {}]  }
   0x1 LB: > { %s1340_s16 = sadd.s32 4294967295, %s1612_s15   ;;  %p1344_p0 = scmp.ge.s32.totalorder %s1612_s15, 1  ;;  %s1612_s15 = sphi %s1640_s15, %s14_s15  }
   0x2   : > { %p162_p1 = scmp.lt.s32.totalorder %s1612_s15, 5 }
   0x4   : > { %p163_p2 = pnand %p1344_p0, %p162_p1 }
   0x5   : > { %p188_p3 = scmp.lt.s32.totalorder (!%p163_p2), %s1340_s16, 3 }
   0x6   : > { %166 = sbr.rel (%p163_p2) target bundleno = 305 (0x131), region = 36 }
   0xb   : > { %v1614_v0 = vmov 0   ;;  %v951_v1 = vld [vmem:[%s1909_s2] sm:$0xff]  ;;  %s1913_s16 = smov (!%p188_p3, %s1340_s16), 3  ;;  %v953_v2 = vld [vmem:[%s1909_s2 + $0x10] sm:$0xf]  ;;  %v952_v4 = vld [vmem:[%s1909_s2 + $0x8] sm:$0xff] }
   0xc   : > { %680 = vmatprep.mubr.bf16.mxu0 %v1614_v0  ;;  %731 = vmatprep.mubr.bf16.mxu1 %v1614_v0  ;;  %s1495_s21 = smul.u32 528, %s1913_s16  ;;  %v1002_v3 = vld [vmem:[%s1910_s3] sm:$0xff]  ;;  %vm614_vm0 = vcmask 1044480   ;;  %v1003_v5 = vld [vmem:[%s1910_s3 + $0x8] sm:$0xff]  ;;  %v1004_v6 = vld [vmem:[%s1910_s3 + $0x10] sm:$0xf] }
   0xd   : > { %1507 = vset.pattern.permute.xlu1 %v1614_v0  ;;  %1506 = vset.pattern.permute.xlu0 %v1614_v0  ;;  %v1713_v37 = vld [vmem:[%s1908_s1] sm:$0xff]   ;;  %vm607_vm1 = vcmask 736256   ;;  %v1732_v46 = vld [vmem:[%s1908_s1 + $0x8] ss:$0 sps:$4 sm:$0x33]   ;;  %s1496_s11 = smul.u32 132, %s1913_s16 }
   0xe   : > { %966 = vperm.xlu1 %1507, %v953_v2   ;;  %956 = vperm.xlu0 %1506, %v951_v1   ;;  %s1670_s28 = scalar_lea.vmem %s1907_s0, %s1495_s21 }
   0xf   : > { %v1508_v7 = vld [vmem:[%s1670_s28 + $0x1bc] ss:$44 sps:$4 sm:$0x1f]   ;;  %v1510_v8 = vld [vmem:[%s1670_s28 + $0x1c4] ss:$44 sps:$4 sm:$0x1f]   ;;  %s1824_s14 = scalar_lea.vmem %s1911_s4, %s1496_s11 }
  0x10   : > { %1415 = vmatprep.subr.msk.bf16.mxu0 %vm614_vm0, %v1508_v7  ;;  %v1512_v9 = vld [vmem:[%s1670_s28 + $0x1b8] ss:$44 sps:$4 sm:$0x1f]   ;;  %v1513_v10 = vld [vmem:[%s1670_s28 + $0x1c0] ss:$44 sps:$4 sm:$0x1f]   ;;  %1418 = vmatprep.subr.msk.bf16.mxu1 %vm614_vm0, %v1510_v8 }
  0x11   : > { %v1514_v11 = vld [vmem:[%s1670_s28 + $0x164] ss:$44 sps:$4 sm:$0xff]   ;;  %v616_v12 = vsel %vm614_vm0, %v1512_v9, 0  ;;  %v622_v13 = vsel %vm614_vm0, %v1513_v10, 0  ;;  %v1516_v14 = vld [vmem:[%s1670_s28 + $0x16c] ss:$44 sps:$4 sm:$0xff]  }
  0x12   : > { %1007 = vperm.xlu1 %1507, %v1002_v3   ;;  %961 = vperm.xlu0 %1506, %v952_v4   ;;  %v1518_v15 = vld [vmem:[%s1670_s28 + $0x160] ss:$44 sps:$4 sm:$0xff]   ;;  %v1519_v16 = vld [vmem:[%s1670_s28 + $0x168] ss:$44 sps:$4 sm:$0xff]   ;;  %v1525_v20 = vld [vmem:[%s1670_s28 + $0x110] ss:$44 sps:$4 sm:$0xff]  }
  0x13   : > { %653 = vmatpush1.bf16.msra.mxu0 %v616_v12  ;;  %704 = vmatpush1.bf16.msra.mxu1 %v622_v13  ;;  %v1520_v17 = vld [vmem:[%s1670_s28 + $0x10c] ss:$44 sps:$4 sm:$0xff]   ;;  %v1522_v18 = vld [vmem:[%s1670_s28 + $0x114] ss:$44 sps:$4 sm:$0xff]   ;;  %v1528_v22 = vld [vmem:[%s1670_s28 + $0xbc] ss:$44 sps:$4 sm:$0xff]  }
  0x14   : > { %654 = vmatprep.subr.bf16.mxu0 %v1514_v11  ;;  %705 = vmatprep.subr.bf16.mxu1 %v1516_v14  ;;  %v1524_v19 = vld [vmem:[%s1670_s28 + $0x108] ss:$44 sps:$4 sm:$0xff]   ;;  %v1530_v23 = vld [vmem:[%s1670_s28 + $0xb0] ss:$44 sps:$4 sm:$0xff]   ;;  %v1531_v24 = vld [vmem:[%s1670_s28 + $0xb8] ss:$44 sps:$4 sm:$0xff]  }
  0x15   : > { %v1526_v21 = vld [vmem:[%s1670_s28 + $0xb4] ss:$44 sps:$4 sm:$0xff]   ;;  %v1532_v25 = vld [vmem:[%s1670_s28 + $0x5c] ss:$44 sps:$4 sm:$0xff]   ;;  %v1534_v26 = vld [vmem:[%s1670_s28 + $0x64] ss:$44 sps:$4 sm:$0xff]  }
  0x16   : > { %1012 = vperm.xlu0 %1506, %v1003_v5   ;;  %1017 = vperm.xlu1 %1507, %v1004_v6   ;;  %v1536_v27 = vld [vmem:[%s1670_s28 + $0x58] ss:$44 sps:$4 sm:$0xff]   ;;  %v1537_v28 = vld [vmem:[%s1670_s28 + $0x60] ss:$44 sps:$4 sm:$0xff]   ;;  %v1543_v34 = vld [vmem:[%s1670_s28 + $0x8] ss:$44 sps:$4 sm:$0xff]  }
  0x17   : > { %655 = vmatpush1.bf16.msra.mxu0 %v1518_v15  ;;  %706 = vmatpush1.bf16.msra.mxu1 %v1519_v16  ;;  %v1538_v29 = vld [vmem:[%s1670_s28 + $0x4] ss:$44 sps:$4 sm:$0xff]   ;;  %v1540_v30 = vld [vmem:[%s1670_s28 + $0xc] ss:$44 sps:$4 sm:$0xff]   ;;  %v1553_v38 = vld [vmem:[%s1670_s28 + $0x174] ss:$44 sps:$4 sm:$0xff]  }
  0x18   : > { %656 = vmatprep.subr.bf16.mxu0 %v1520_v17  ;;  %707 = vmatprep.subr.bf16.mxu1 %v1522_v18  ;;  %v1542_v31 = vld [vmem:[%s1670_s28] ss:$44 sps:$4 sm:$0xff]   ;;  %v1549_v35 = vld [vmem:[%s1670_s28 + $0x1c8] ss:$44 sps:$4 sm:$0x1f]  }
  0x19   : > { %v1545_v32 = vld [vmem:[%s1670_s28 + $0x1cc] ss:$44 sps:$4 sm:$0x1f]   ;;  %v1547_v33 = vld [vmem:[%s1670_s28 + $0x1d4] ss:$44 sps:$4 sm:$0x1f]  }
  0x1a   : > { %v1550_v36 = vld [vmem:[%s1670_s28 + $0x1d0] ss:$44 sps:$4 sm:$0x1f]   ;;  %v628_v39 = vsel %vm614_vm0, %v1549_v35, 0  ;;  %v1554_v43 = vld [vmem:[%s1670_s28 + $0x178] ss:$44 sps:$4 sm:$0xff]  }
  0x1b   : > { %657 = vmatpush1.bf16.msra.mxu0 %v1524_v19  ;;  %708 = vmatpush1.bf16.msra.mxu1 %v1525_v20  ;;  %v634_v40 = vsel %vm614_vm0, %v1550_v36, 0  ;;  %v1556_v41 = vld [vmem:[%s1670_s28 + $0x17c] ss:$44 sps:$4 sm:$0xff]   ;;  %v1562_v45 = vld [vmem:[%s1670_s28 + $0x124] ss:$44 sps:$4 sm:$0xff]  }
  0x1c   : > { %658 = vmatprep.subr.bf16.mxu0 %v1526_v21  ;;  %709 = vmatprep.subr.bf16.mxu1 %v1528_v22  ;;  %v1551_v42 = vld [vmem:[%s1670_s28 + $0x170] ss:$44 sps:$4 sm:$0xff]   ;;  %v1557_v47 = vld [vmem:[%s1670_s28 + $0x118] ss:$44 sps:$4 sm:$0xff]   ;;  %v1560_v48 = vld [vmem:[%s1670_s28 + $0x120] ss:$44 sps:$4 sm:$0xff]  }
  0x1d   : > { %v1559_v44 = vld [vmem:[%s1670_s28 + $0x11c] ss:$44 sps:$4 sm:$0xff]   ;;  %v1566_v49 = vld [vmem:[%s1670_s28 + $0xc4] ss:$44 sps:$4 sm:$0xff]   ;;  %v1569_v50 = vld [vmem:[%s1670_s28 + $0xcc] ss:$44 sps:$4 sm:$0xff]  }
  0x1e   : > { %v1564_v51 = vld [vmem:[%s1670_s28 + $0xc0] ss:$44 sps:$4 sm:$0xff]   ;;  %v1567_v52 = vld [vmem:[%s1670_s28 + $0xc8] ss:$44 sps:$4 sm:$0xff]   ;;  %v1573_v56 = vld [vmem:[%s1670_s28 + $0x70] ss:$44 sps:$4 sm:$0xff]  }
  0x1f   : > { %659 = vmatpush1.bf16.msra.mxu0 %v1530_v23  ;;  %710 = vmatpush1.bf16.msra.mxu1 %v1531_v24  ;;  %v1572_v53 = vld [vmem:[%s1670_s28 + $0x6c] ss:$44 sps:$4 sm:$0xff]   ;;  %v1575_v54 = vld [vmem:[%s1670_s28 + $0x74] ss:$44 sps:$4 sm:$0xff]   ;;  %v1581_v58 = vld [vmem:[%s1670_s28 + $0x1c] ss:$44 sps:$4 sm:$0xff]  }
  0x20   : > { %660 = vmatprep.subr.bf16.mxu0 %v1532_v25  ;;  %711 = vmatprep.subr.bf16.mxu1 %v1534_v26  ;;  %v1570_v55 = vld [vmem:[%s1670_s28 + $0x68] ss:$44 sps:$4 sm:$0xff]   ;;  %v1576_v59 = vld [vmem:[%s1670_s28 + $0x10] ss:$44 sps:$4 sm:$0xff]   ;;  %v1579_v60 = vld [vmem:[%s1670_s28 + $0x18] ss:$44 sps:$4 sm:$0xff]  }
  0x21   : > { %v1578_v57 = vld [vmem:[%s1670_s28 + $0x14] ss:$44 sps:$4 sm:$0xff]   ;;  %v1582_v61 = vld [vmem:[%s1670_s28 + $0x1dc] ss:$44 sps:$4 sm:$0x1f]  }
  0x22   : > { %v1584_v62 = vld [vmem:[%s1670_s28 + $0x1e0] ss:$44 sps:$4 sm:$0x1f]   ;;  %v1585_v63 = vld [vmem:[%s1670_s28 + $0x1d8] ss:$44 sps:$4 sm:$0x1f]  }
  0x23   : > { %661 = vmatpush1.bf16.msra.mxu0 %v1536_v27  ;;  %712 = vmatpush1.bf16.msra.mxu1 %v1537_v28  ;;  %v640_v1 = vsel %vm614_vm0, %v1585_v63, 0  ;;  %v646_v2 = vsel %vm614_vm0, %v1584_v62, 0  ;;  %v1588_v3 = vld [vmem:[%s1670_s28 + $0x184] ss:$44 sps:$4 sm:$0xff]   ;;  %v1589_v4 = vld [vmem:[%s1670_s28 + $0x188] ss:$44 sps:$4 sm:$0xff]  }
  0x24   : > { %662 = vmatprep.subr.bf16.mxu0 %v1538_v29  ;;  %713 = vmatprep.subr.bf16.mxu1 %v1540_v30  ;;  %v1586_v5 = vld [vmem:[%s1670_s28 + $0x180] ss:$44 sps:$4 sm:$0xff]   ;;  %v1593_v7 = vld [vmem:[%s1670_s28 + $0x130] ss:$44 sps:$4 sm:$0xff]   ;;  %v1590_v8 = vld [vmem:[%s1670_s28 + $0x128] ss:$44 sps:$4 sm:$0xff]  }
  0x25   : > { %v1592_v6 = vld [vmem:[%s1670_s28 + $0x12c] ss:$44 sps:$4 sm:$0xff]   ;;  %v1596_v9 = vld [vmem:[%s1670_s28 + $0xd4] ss:$44 sps:$4 sm:$0xff]   ;;  %v1594_v11 = vld [vmem:[%s1670_s28 + $0xd0] ss:$44 sps:$4 sm:$0xff]  }
  0x26   : > { %v1597_v10 = vld [vmem:[%s1670_s28 + $0xd8] ss:$44 sps:$4 sm:$0xff]   ;;  %v1600_v12 = vld [vmem:[%s1670_s28 + $0x7c] ss:$44 sps:$4 sm:$0xff]   ;;  %v1601_v13 = vld [vmem:[%s1670_s28 + $0x80] ss:$44 sps:$4 sm:$0xff]  }
  0x27   : > { %663 = vmatpush1.bf16.msra.mxu0 %v1542_v31  ;;  %714 = vmatpush1.bf16.msra.mxu1 %v1543_v34  ;;  %v1598_v14 = vld [vmem:[%s1670_s28 + $0x78] ss:$44 sps:$4 sm:$0xff]   ;;  %v1605_v16 = vld [vmem:[%s1670_s28 + $0x28] ss:$44 sps:$4 sm:$0xff]   ;;  %v1602_v17 = vld [vmem:[%s1670_s28 + $0x20] ss:$44 sps:$4 sm:$0xff]  }
  0x28   : > { %1421 = vmatprep.subr.msk.bf16.mxu0 %vm614_vm0, %v1545_v32  ;;  %1424 = vmatprep.subr.msk.bf16.mxu1 %vm614_vm0, %v1547_v33  ;;  %v1604_v15 = vld [vmem:[%s1670_s28 + $0x24] ss:$44 sps:$4 sm:$0xff]  }
  0x2a   : > { %1416 = vmatmul.mubr.msk.bf16.vlgmr.msra.gmra.mxu0 %vm607_vm1, %v1713_v37  ;;  %1419 = vmatmul.mubr.msk.bf16.vlgmr.msra.gmra.mxu1 %vm607_vm1, %v1713_v37 }
  0x2b   : > { %755 = vmatpush1.bf16.msra.mxu0 %v628_v39  ;;  %806 = vmatpush1.bf16.msra.mxu1 %v634_v40 }
  0x2c   : > { %756 = vmatprep.subr.bf16.mxu0 %v1553_v38  ;;  %807 = vmatprep.subr.bf16.mxu1 %v1556_v41 }
  0x2d   : > { %690 = vmatprep.mubr.bf16.mxu0 %v1614_v0  ;;  %741 = vmatprep.mubr.bf16.mxu1 %v1614_v0 }
  0x2f   : > { %757 = vmatpush1.bf16.msra.mxu0 %v1551_v42  ;;  %808 = vmatpush1.bf16.msra.mxu1 %v1554_v43 }
  0x30   : > { %758 = vmatprep.subr.bf16.mxu0 %v1559_v44  ;;  %809 = vmatprep.subr.bf16.mxu1 %v1562_v45 }
  0x32   : > { %1417 = vmatmul.mubr.msk.bf16.gmra.mxu0 %vm607_vm1, %v1732_v46  ;;  %1420 = vmatmul.mubr.msk.bf16.gmra.mxu1 %vm607_vm1, %v1732_v46 }
  0x33   : > { %759 = vmatpush1.bf16.msra.mxu0 %v1557_v47  ;;  %810 = vmatpush1.bf16.msra.mxu1 %v1560_v48 }
  0x34   : > { %760 = vmatprep.subr.bf16.mxu0 %v1566_v49  ;;  %811 = vmatprep.subr.bf16.mxu1 %v1569_v50 }
  0x35   : > { %782 = vmatprep.mubr.bf16.mxu0 %v1614_v0  ;;  %833 = vmatprep.mubr.bf16.mxu1 %v1614_v0 }
  0x37   : > { %761 = vmatpush1.bf16.msra.mxu0 %v1564_v51  ;;  %812 = vmatpush1.bf16.msra.mxu1 %v1567_v52 }
  0x38   : > { %762 = vmatprep.subr.bf16.mxu0 %v1572_v53  ;;  %813 = vmatprep.subr.bf16.mxu1 %v1575_v54 }
  0x3b   : > { %763 = vmatpush1.bf16.msra.mxu0 %v1570_v55  ;;  %814 = vmatpush1.bf16.msra.mxu1 %v1573_v56 }
  0x3c   : > { %764 = vmatprep.subr.bf16.mxu0 %v1578_v57  ;;  %815 = vmatprep.subr.bf16.mxu1 %v1581_v58 }
  0x3f   : > { %765 = vmatpush1.bf16.msra.mxu0 %v1576_v59  ;;  %816 = vmatpush1.bf16.msra.mxu1 %v1579_v60 }
  0x40   : > { %1427 = vmatprep.subr.msk.bf16.mxu0 %vm614_vm0, %v1582_v61  ;;  %1494 = vmatprep.subr.msk.bf16.mxu1 %vm614_vm0, %v1584_v62 }
  0x42   : > { %1422 = vmatmul.mubr.msk.bf16.vlgmr.msra.gmra.mxu0 %vm607_vm1, %v1713_v37  ;;  %1425 = vmatmul.mubr.msk.bf16.vlgmr.msra.gmra.mxu1 %vm607_vm1, %v1713_v37 }
  0x43   : > { %857 = vmatpush1.bf16.msra.mxu0 %v640_v1  ;;  %1479 = vmatpush3.bf16.msra.mxu1 %v646_v2 }
  0x44   : > { %858 = vmatprep.subr.bf16.mxu0 %v1588_v3  ;;  %1480 = vmatprep.subr.bf16.mxu1 %v1589_v4 }
  0x45   : > { %792 = vmatprep.mubr.bf16.mxu0 %v1614_v0  ;;  %843 = vmatprep.mubr.bf16.mxu1 %v1614_v0 }
  0x47   : > { %859 = vmatpush1.bf16.msra.mxu0 %v1586_v5  ;;  %1481 = vmatpush3.bf16.msra.mxu1 %v1589_v4 }
  0x48   : > { %860 = vmatprep.subr.bf16.mxu0 %v1592_v6  ;;  %1482 = vmatprep.subr.bf16.mxu1 %v1593_v7 }
  0x4a   : > { %1423 = vmatmul.mubr.msk.bf16.gmra.mxu0 %vm607_vm1, %v1732_v46  ;;  %1426 = vmatmul.mubr.msk.bf16.gmra.mxu1 %vm607_vm1, %v1732_v46 }
  0x4b   : > { %861 = vmatpush1.bf16.msra.mxu0 %v1590_v8  ;;  %1483 = vmatpush3.bf16.msra.mxu1 %v1593_v7 }
  0x4c   : > { %862 = vmatprep.subr.bf16.mxu0 %v1596_v9  ;;  %1484 = vmatprep.subr.bf16.mxu1 %v1597_v10 }
  0x4d   : > { %884 = vmatprep.mubr.bf16.mxu0 %v1614_v0  ;;  %1490 = vmatprep.mubr.msk.bf16.mxu1 %vm607_vm1, %v1713_v37 }
  0x4f   : > { %863 = vmatpush1.bf16.msra.mxu0 %v1594_v11  ;;  %1485 = vmatpush3.bf16.msra.mxu1 %v1597_v10 }
  0x50   : > { %864 = vmatprep.subr.bf16.mxu0 %v1600_v12  ;;  %1486 = vmatprep.subr.bf16.mxu1 %v1601_v13 }
  0x53   : > { %865 = vmatpush1.bf16.msra.mxu0 %v1598_v14  ;;  %1487 = vmatpush3.bf16.msra.mxu1 %v1601_v13 }
  0x54   : > { %866 = vmatprep.subr.bf16.mxu0 %v1604_v15  ;;  %1488 = vmatprep.subr.bf16.mxu1 %v1605_v16 }
  0x57   : > { %867 = vmatpush1.bf16.msra.mxu0 %v1602_v17  ;;  %1489 = vmatpush3.bf16.msra.mxu1 %v1605_v16 }
  0x5a   : > { %1428 = vmatmul.mubr.msk.bf16.vlgmr.msra.gmra.mxu0 %vm607_vm1, %v1713_v37  ;;  %1491 = vmatmul.mubr.msk.bf16.vlgmr.msra.gmra.mxu1 %vm607_vm1, %v1732_v46 }
  0x5b   : > { %894 = vmatprep.mubr.bf16.mxu0 %v1614_v0 }
  0x62   : > { %1429 = vmatmul.mubr.msk.bf16.gmra.mxu0 %vm607_vm1, %v1732_v46 }
  0x89   : > { %v1798_v18 = vpop.permute.xlu1 %966  ;;  %v1800_v19 = vpop.permute.xlu0 %956 }
  0x8d   : > { %v1802_v20 = vpop.permute.xlu1 %1007  ;;  %v1804_v21 = vpop.permute.xlu0 %961 }
  0x91   : > { %v1815_v36 = vpop.permute.xlu0 %1012  ;;  %v1831_v62 = vpop.permute.xlu1 %1017 }
  0xea   : > { %v682_v22 = vpop.f32.mrf.mxu0  ;;  %v733_v23 = vpop.f32.mrf.mxu1 }
  0xeb   : > { %v969_v24 = vmul.f32 %v1800_v19, %v682_v22  ;;  %v971_v25 = vmul.f32 %v1800_v19, %v733_v23 }
  0xec   : > { %v684_v26 = vpop.f32.mrf.mxu0  ;;  %v735_v0 = vpop.f32.mrf.mxu1 }
  0xed   : > { %v970_v27 = vmul.f32 %v1800_v19, %v684_v26  ;;  %v1020_v28 = vadd.f32 %v1802_v20, %v969_v24  ;;  %v972_v29 = vmul.f32 %v1800_v19, %v735_v0  ;;  %v1022_v30 = vadd.f32 %v1802_v20, %v971_v25 }
  0xee   : > { %v686_v31 = vpop.f32.mrf.mxu0  ;;  %v737_v32 = vpop.f32.mrf.mxu1 }
  0xef   : > { %v1021_v33 = vadd.f32 %v1802_v20, %v970_v27  ;;  %vm1053_vm2 = vcmp.gt.f32.partialorder %v1020_v28, 0.0  ;;  %v1086_v34 = vmul.f32 0.01, %v1020_v28  ;;  %v1023_v35 = vadd.f32 %v1802_v20, %v972_v29 }
  0xf0   : > { %vm1055_vm3 = vcmp.gt.f32.partialorder %v1022_v30, 0.0  ;;  %v1088_v37 = vmul.f32 0.01, %v1022_v30  ;;  %v980_v38 = vmul.f32 %v1804_v21, %v686_v31  ;;  %v982_v39 = vmul.f32 %v1804_v21, %v737_v32  ;;  %v688_v40 = vpop.f32.mrf.mxu0  ;;  %v739_v41 = vpop.f32.mrf.mxu1 }
  0xf1   : > { %vm1054_vm4 = vcmp.gt.f32.partialorder %v1021_v33, 0.0  ;;  %v1087_v42 = vmul.f32 0.01, %v1021_v33  ;;  %v1119_v43 = vsel %vm1053_vm2, %v1020_v28, %v1086_v34  ;;  %vm1056_vm5 = vcmp.gt.f32.partialorder %v1023_v35, 0.0 }
  0xf2   : > { %v1089_v44 = vmul.f32 0.01, %v1023_v35  ;;  %v1121_v45 = vsel %vm1055_vm3, %v1022_v30, %v1088_v37  ;;  %v981_v46 = vmul.f32 %v1804_v21, %v688_v40  ;;  %v1031_v47 = vadd.f32 %v1815_v36, %v980_v38  ;;  %v692_v48 = vpop.f32.mrf.mxu0  ;;  %v743_v49 = vpop.f32.mrf.mxu1 }
  0xf3   : > { %v1120_v50 = vsel %vm1054_vm4, %v1021_v33, %v1087_v42  ;;  %v983_v51 = vmul.f32 %v1804_v21, %v739_v41  ;;  %v1033_v52 = vadd.f32 %v1815_v36, %v982_v39  ;;  %v991_v53 = vmul.f32 %v1798_v18, %v692_v48 }
  0xf4   : > { %v1452_v54 = vpack.c.bf16 %v1120_v50, %v1119_v43  ;;  %v1122_v55 = vsel %vm1056_vm5, %v1023_v35, %v1089_v44  ;;  %v1032_v56 = vadd.f32 %v1815_v36, %v981_v46  ;;  %vm1064_vm6 = vcmp.gt.f32.partialorder %v1031_v47, 0.0  ;;  %v694_v57 = vpop.f32.mrf.mxu0  ;;  %v745_v58 = vpop.f32.mrf.mxu1 }
  0xf5   : > { %v1453_v59 = vpack.c.bf16 %v1122_v55, %v1121_v45  ;;  %v1097_v60 = vmul.f32 0.01, %v1031_v47  ;;  %v1034_v61 = vadd.f32 %v1815_v36, %v983_v51  ;;  %vm1066_vm7 = vcmp.gt.f32.partialorder %v1033_v52, 0.0 }
  0xf6   : > { %1265 = vst [vmem:[%s1824_s14] sm:$0xff] %v1452_v54  ;;  %vm1065_vm8 = vcmp.gt.f32.partialorder %v1032_v56, 0.0  ;;  %v1098_v63 = vmul.f32 0.01, %v1032_v56  ;;  %v1099_v1 = vmul.f32 0.01, %v1033_v52  ;;  %v992_v2 = vmul.f32 %v1798_v18, %v694_v57  ;;  %v696_v3 = vpop.f32.mrf.mxu0  ;;  %v747_v4 = vpop.f32.mrf.mxu1 }
  0xf7   : > { %1266 = vst [vmem:[%s1824_s14 + $0x8] sm:$0xff] %v1453_v59  ;;  %v1130_v5 = vsel %vm1064_vm6, %v1031_v47, %v1097_v60  ;;  %vm1067_vm9 = vcmp.gt.f32.partialorder %v1034_v61, 0.0  ;;  %v1100_v6 = vmul.f32 0.01, %v1034_v61  ;;  %v993_v7 = vmul.f32 %v1798_v18, %v743_v49 }
  0xf8   : > { %v1131_v8 = vsel %vm1065_vm8, %v1032_v56, %v1098_v63  ;;  %v1132_v9 = vsel %vm1066_vm7, %v1033_v52, %v1099_v1  ;;  %v1042_v10 = vadd.f32 %v1831_v62, %v991_v53  ;;  %v1043_v11 = vadd.f32 %v1831_v62, %v992_v2  ;;  %v697_v12 = vpop.f32.mrf.mxu0  ;;  %v748_v13 = vpop.f32.mrf.mxu1 }
  0xf9   : > { %v1458_v14 = vpack.c.bf16 %v1131_v8, %v1130_v5  ;;  %v1133_v15 = vsel %vm1067_vm9, %v1034_v61, %v1100_v6  ;;  %v994_v16 = vmul.f32 %v1798_v18, %v745_v58  ;;  %v1044_v17 = vadd.f32 %v1831_v62, %v993_v7 }
  0xfa   : > { %v1459_v22 = vpack.c.bf16 %v1133_v15, %v1132_v9  ;;  %vm1075_vm10 = vcmp.gt.f32.partialorder %v1042_v10, 0.0  ;;  %vm1076_vm11 = vcmp.gt.f32.partialorder %v1043_v11, 0.0  ;;  %v1108_v23 = vmul.f32 0.01, %v1042_v10 }
  0xfb   : > { %1272 = vst [vmem:[%s1824_s14 + $0x2c] sm:$0xff] %v1458_v14  ;;  %v1109_v24 = vmul.f32 0.01, %v1043_v11  ;;  %v1045_v25 = vadd.f32 %v1831_v62, %v994_v16  ;;  %vm1077_vm12 = vcmp.gt.f32.partialorder %v1044_v17, 0.0  ;;  %v1110_v26 = vmul.f32 0.01, %v1044_v17 }
  0xfc   : > { %1273 = vst [vmem:[%s1824_s14 + $0x34] sm:$0xff] %v1459_v22  ;;  %v1141_v0 = vsel %vm1075_vm10, %v1042_v10, %v1108_v23 }
  0xfd   : > { %v1142_v27 = vsel %vm1076_vm11, %v1043_v11, %v1109_v24  ;;  %vm1078_vm13 = vcmp.gt.f32.partialorder %v1045_v25, 0.0  ;;  %v1111_v28 = vmul.f32 0.01, %v1045_v25  ;;  %v1143_v29 = vsel %vm1077_vm12, %v1044_v17, %v1110_v26 }
  0xfe   : > { %v1464_v30 = vpack.c.bf16 %v1142_v27, %v1141_v0  ;;  %vm1283_vm11 = vcmask 721920  }
  0xff   : > { %v1144_v31 = vsel %vm1078_vm13, %v1045_v25, %v1111_v28 }
 0x100   : > { %1278 = vst [vmem:[%s1824_s14 + $0x58] sm:$0x33] %v1464_v30  ;;  %v1465_v32 = vpack.c.bf16 %v1144_v31, %v1143_v29 }
 0x102   : > { %1279 = vst [vmem:[%s1824_s14 + $0x60] sm:$0x33] %v1465_v32  ;;  %v784_v33 = vpop.f32.mrf.mxu0  ;;  %v835_v34 = vpop.f32.mrf.mxu1 }
 0x103   : > { %v973_v35 = vmul.f32 %v1800_v19, %v784_v33  ;;  %v975_v37 = vmul.f32 %v1800_v19, %v835_v34 }
 0x104   : > { %v786_v38 = vpop.f32.mrf.mxu0  ;;  %v837_v39 = vpop.f32.mrf.mxu1 }
 0x105   : > { %v1024_v40 = vadd.f32 %v1802_v20, %v973_v35  ;;  %v1026_v41 = vadd.f32 %v1802_v20, %v975_v37  ;;  %v974_v42 = vmul.f32 %v1800_v19, %v786_v38  ;;  %v976_v43 = vmul.f32 %v1800_v19, %v837_v39 }
 0x106   : > { %v788_v44 = vpop.f32.mrf.mxu0  ;;  %v839_v45 = vpop.f32.mrf.mxu1 }
 0x107   : > { %vm1057_vm14 = vcmp.gt.f32.partialorder %v1024_v40, 0.0  ;;  %v1090_v46 = vmul.f32 0.01, %v1024_v40  ;;  %vm1059_vm15 = vcmp.gt.f32.partialorder %v1026_v41, 0.0  ;;  %v1092_v47 = vmul.f32 0.01, %v1026_v41 }
 0x108   : > { %v1025_v48 = vadd.f32 %v1802_v20, %v974_v42  ;;  %v1027_v49 = vadd.f32 %v1802_v20, %v976_v43  ;;  %v984_v50 = vmul.f32 %v1804_v21, %v788_v44  ;;  %v986_v51 = vmul.f32 %v1804_v21, %v839_v45  ;;  %v790_v52 = vpop.f32.mrf.mxu0  ;;  %v841_v53 = vpop.f32.mrf.mxu1 }
 0x109   : > { %v1123_v54 = vsel %vm1057_vm14, %v1024_v40, %v1090_v46  ;;  %v1125_v55 = vsel %vm1059_vm15, %v1026_v41, %v1092_v47  ;;  %v985_v56 = vmul.f32 %v1804_v21, %v790_v52  ;;  %v987_v57 = vmul.f32 %v1804_v21, %v841_v53 }
 0x10a   : > { %vm1058_vm0 = vcmp.gt.f32.partialorder %v1025_v48, 0.0  ;;  %v1091_v58 = vmul.f32 0.01, %v1025_v48  ;;  %vm1060_vm1 = vcmp.gt.f32.partialorder %v1027_v49, 0.0  ;;  %v1093_v59 = vmul.f32 0.01, %v1027_v49  ;;  %v794_v60 = vpop.f32.mrf.mxu0  ;;  %v845_v61 = vpop.f32.mrf.mxu1 }
 0x10b   : > { %v1035_v63 = vadd.f32 %v1815_v36, %v984_v50  ;;  %v1037_v1 = vadd.f32 %v1815_v36, %v986_v51  ;;  %v1036_v2 = vadd.f32 %v1815_v36, %v985_v56  ;;  %v1038_v3 = vadd.f32 %v1815_v36, %v987_v57 }
 0x10c   : > { %v1124_v4 = vsel %vm1058_vm0, %v1025_v48, %v1091_v58  ;;  %v1126_v5 = vsel %vm1060_vm1, %v1027_v49, %v1093_v59  ;;  %v995_v6 = vmul.f32 %v1798_v18, %v794_v60  ;;  %v796_v7 = vpop.f32.mrf.mxu0  ;;  %v997_v8 = vmul.f32 %v1798_v18, %v845_v61  ;;  %v847_v9 = vpop.f32.mrf.mxu1 }
 0x10d   : > { %v1454_v10 = vpack.c.bf16 %v1124_v4, %v1123_v54  ;;  %v1455_v11 = vpack.c.bf16 %v1126_v5, %v1125_v55  ;;  %vm1068_vm2 = vcmp.gt.f32.partialorder %v1035_v63, 0.0  ;;  %v1101_v12 = vmul.f32 0.01, %v1035_v63 }
 0x10e   : > { %vm1070_vm3 = vcmp.gt.f32.partialorder %v1037_v1, 0.0  ;;  %v1103_v13 = vmul.f32 0.01, %v1037_v1  ;;  %vm1069_vm4 = vcmp.gt.f32.partialorder %v1036_v2, 0.0  ;;  %v1102_v14 = vmul.f32 0.01, %v1036_v2  ;;  %v798_v15 = vpop.f32.mrf.mxu0  ;;  %v849_v16 = vpop.f32.mrf.mxu1 }
 0x10f   : > { %1267 = vst [vmem:[%s1824_s14 + $0x10] sm:$0xff] %v1454_v10  ;;  %1268 = vst [vmem:[%s1824_s14 + $0x18] sm:$0xff] %v1455_v11  ;;  %v1134_v17 = vsel %vm1068_vm2, %v1035_v63, %v1101_v12  ;;  %vm1071_vm5 = vcmp.gt.f32.partialorder %v1038_v3, 0.0  ;;  %v1104_v22 = vmul.f32 0.01, %v1038_v3  ;;  %v1046_v23 = vadd.f32 %v1831_v62, %v995_v6 }
 0x110   : > { %v1136_v24 = vsel %vm1070_vm3, %v1037_v1, %v1103_v13  ;;  %v1135_v25 = vsel %vm1069_vm4, %v1036_v2, %v1102_v14  ;;  %v996_v26 = vmul.f32 %v1798_v18, %v796_v7  ;;  %v1048_v0 = vadd.f32 %v1831_v62, %v997_v8  ;;  %v799_v27 = vpop.f32.mrf.mxu0  ;;  %v850_v28 = vpop.f32.mrf.mxu1 }
 0x111   : > { %v1460_v29 = vpack.c.bf16 %v1135_v25, %v1134_v17  ;;  %v1137_v30 = vsel %vm1071_vm5, %v1038_v3, %v1104_v22  ;;  %vm1079_vm6 = vcmp.gt.f32.partialorder %v1046_v23, 0.0  ;;  %v1112_v31 = vmul.f32 0.01, %v1046_v23 }
 0x112   : > { %v1461_v32 = vpack.c.bf16 %v1137_v30, %v1136_v24  ;;  %v1047_v33 = vadd.f32 %v1831_v62, %v996_v26  ;;  %v1114_v34 = vmul.f32 0.01, %v1048_v0  ;;  %v998_v35 = vmul.f32 %v1798_v18, %v847_v9 }
 0x113   : > { %1274 = vst [vmem:[%s1824_s14 + $0x3c] sm:$0xff] %v1460_v29  ;;  %v1145_v37 = vsel %vm1079_vm6, %v1046_v23, %v1112_v31  ;;  %vm1081_vm8 = vcmp.gt.f32.partialorder %v1048_v0, 0.0  ;;  %vm1270_vm15 = vcmask 723968  }
 0x114   : > { %1275 = vst [vmem:[%s1824_s14 + $0x44] sm:$0xff] %v1461_v32  ;;  %vm1080_vm7 = vcmp.gt.f32.partialorder %v1047_v33, 0.0  ;;  %v1113_v38 = vmul.f32 0.01, %v1047_v33  ;;  %v1049_v39 = vadd.f32 %v1831_v62, %v998_v35  ;;  %v1147_v42 = vsel %vm1081_vm8, %v1048_v0, %v1114_v34 }
 0x116   : > { %v1146_v40 = vsel %vm1080_vm7, %v1047_v33, %v1113_v38  ;;  %vm1082_vm9 = vcmp.gt.f32.partialorder %v1049_v39, 0.0  ;;  %v1115_v43 = vmul.f32 0.01, %v1049_v39 }
 0x117   : > { %v1466_v41 = vpack.c.bf16 %v1146_v40, %v1145_v37 }
 0x118   : > { %v1148_v44 = vsel %vm1082_vm9, %v1049_v39, %v1115_v43 }
 0x119   : > { %1280 = vst [vmem:[%s1824_s14 + $0x68] sm:$0x33] %v1466_v41  ;;  %v1467_v45 = vpack.c.bf16 %v1148_v44, %v1147_v42 }
 0x11a   : > { %v886_v46 = vpop.f32.mrf.mxu0  ;;  %v1492_v47 = vpop.f32.mrf.mxu1 }
 0x11b   : > { %v977_v48 = vmul.f32 %v1800_v19, %v886_v46  ;;  %v1001_v49 = vmul.f32 %v1492_v47, %v1798_v18  ;;  %1281 = vst [vmem:[%s1824_s14 + $0x70] sm:$0x33] %v1467_v45 }
 0x11c   : > { %v888_v50 = vpop.f32.mrf.mxu0  ;;  %v937_v51 = vpop.f32.mrf.mxu1 }
 0x11d   : > { %v1028_v52 = vadd.f32 %v1802_v20, %v977_v48  ;;  %v1052_v53 = vadd.f32 %v1831_v62, %v1001_v49  ;;  %v978_v54 = vmul.f32 %v1800_v19, %v888_v50  ;;  %v979_v55 = vmul.f32 %v1800_v19, %v937_v51 }
 0x11e   : > { %v890_v56 = vpop.f32.mrf.mxu0  ;;  %v1493_v57 = vpop.f32.mrf.mxu1 }
 0x11f   : > { %vm1085_vm10 = vcmp.gt.f32.partialorder %v1052_v53, 0.0  ;;  %v1118_v58 = vmul.f32 0.01, %v1052_v53  ;;  %v1094_v59 = vmul.f32 0.01, %v1028_v52  ;;  %v1029_v60 = vadd.f32 %v1802_v20, %v978_v54 }
 0x120   : > { %v1030_v61 = vadd.f32 %v1802_v20, %v979_v55  ;;  %v988_v63 = vmul.f32 %v1804_v21, %v890_v56  ;;  %v892_v1 = vpop.f32.mrf.mxu0  ;;  %v940_v2 = vpop.f32.mrf.mxu1  ;;  %vm1061_vm12 = vcmp.gt.f32.partialorder %v1028_v52, 0.0 }
 0x121   : > { %v1151_v3 = vsel %vm1085_vm10, %v1052_v53, %v1118_v58  ;;  %v989_v4 = vmul.f32 %v1804_v21, %v892_v1  ;;  %v990_v19 = vmul.f32 %v1804_v21, %v940_v2  ;;  %vm1062_vm13 = vcmp.gt.f32.partialorder %v1029_v60, 0.0 }
 0x122   : > { %v1469_v5 = vpack.c.bf16 %v1151_v3, %v1151_v3  ;;  %v1095_v6 = vmul.f32 0.01, %v1029_v60  ;;  %vm1063_vm14 = vcmp.gt.f32.partialorder %v1030_v61, 0.0  ;;  %v896_v7 = vpop.f32.mrf.mxu0  ;;  %v1096_v8 = vmul.f32 0.01, %v1030_v61 }
 0x123   : > { %v1039_v9 = vadd.f32 %v1815_v36, %v988_v63  ;;  %v1040_v20 = vadd.f32 %v1815_v36, %v989_v4  ;;  %v1041_v10 = vadd.f32 %v1815_v36, %v990_v19  ;;  %v1127_v11 = vsel %vm1061_vm12, %v1028_v52, %v1094_v59 }
 0x124   : > { %1284 = vst.msk [vmem:[%s1824_s14 + $0x80] sm:$0x3] %vm1283_vm11, %v1469_v5  ;;  %v1128_v12 = vsel %vm1062_vm13, %v1029_v60, %v1095_v6  ;;  %v999_v21 = vmul.f32 %v1798_v18, %v896_v7  ;;  %v898_v13 = vpop.f32.mrf.mxu0  ;;  %v1129_v15 = vsel %vm1063_vm14, %v1030_v61, %v1096_v8 }
 0x125   : > { %v1456_v14 = vpack.c.bf16 %v1128_v12, %v1127_v11  ;;  %vm1072_vm0 = vcmp.gt.f32.partialorder %v1039_v9, 0.0  ;;  %v1105_v16 = vmul.f32 0.01, %v1039_v9  ;;  %v1457_v17 = vpack.c.bf16 %v1129_v15, %v1129_v15 }
 0x126   : > { %vm1073_vm1 = vcmp.gt.f32.partialorder %v1040_v20, 0.0  ;;  %v1106_v22 = vmul.f32 0.01, %v1040_v20  ;;  %vm1074_vm2 = vcmp.gt.f32.partialorder %v1041_v10, 0.0  ;;  %v900_v36 = vpop.f32.mrf.mxu0  ;;  %v1107_v23 = vmul.f32 0.01, %v1041_v10 }
 0x127   : > { %1269 = vst [vmem:[%s1824_s14 + $0x20] sm:$0xff] %v1456_v14  ;;  %v1050_v24 = vadd.f32 %v1831_v62, %v999_v21  ;;  %v1000_v25 = vmul.f32 %v1798_v18, %v898_v13  ;;  %1271 = vst.msk [vmem:[%s1824_s14 + $0x28] sm:$0xf] %vm1270_vm15, %v1457_v17  ;;  %v1138_v26 = vsel %vm1072_vm0, %v1039_v9, %v1105_v16 }
 0x128   : > { %v1139_v0 = vsel %vm1073_vm1, %v1040_v20, %v1106_v22  ;;  %v901_v27 = vpop.f32.mrf.mxu0  ;;  %v1140_v29 = vsel %vm1074_vm2, %v1041_v10, %v1107_v23 }
 0x129   : > { %v1462_v28 = vpack.c.bf16 %v1139_v0, %v1138_v26  ;;  %v1463_v30 = vpack.c.bf16 %v1140_v29, %v1140_v29  ;;  %v1116_v31 = vmul.f32 0.01, %v1050_v24  ;;  %v1051_v32 = vadd.f32 %v1831_v62, %v1000_v25 }
 0x12a   : > { %vm1083_vm3 = vcmp.gt.f32.partialorder %v1050_v24, 0.0 }
 0x12b   : > { %1276 = vst [vmem:[%s1824_s14 + $0x4c] sm:$0xff] %v1462_v28  ;;  %1277 = vst.msk [vmem:[%s1824_s14 + $0x54] sm:$0xf] %vm1270_vm15, %v1463_v30  ;;  %vm1084_vm4 = vcmp.gt.f32.partialorder %v1051_v32, 0.0  ;;  %v1117_v33 = vmul.f32 0.01, %v1051_v32  ;;  %v1149_v34 = vsel %vm1083_vm3, %v1050_v24, %v1116_v31 }
 0x12d   : > { %v1150_v18 = vsel %vm1084_vm4, %v1051_v32, %v1117_v33 }
 0x12e   : > { %v1468_v35 = vpack.c.bf16 %v1150_v18, %v1149_v34 }
 0x130   : > { %1282 = vst [vmem:[%s1824_s14 + $0x78] sm:$0x33] %v1468_v35 }
 0x131 PF: > { %s14_s15 = sadd.s32 1, %s1612_s15  }
 0x132   : > { %p11_p4 = scmp.ge.s32.totalorder %s14_s15, 6  }
 0x134   :  { %13 = sbr.rel (!%p11_p4) target bundleno = 1 (0x1), region = 66 }

// kernel: siamese_forward.5
= control target key start
LH: loop header
LB: loop body
LE: loop exit
PB: predicated region body
PF: predicated region fallthrough
CT: control target
= control target key end

     0   :  { %10 = vsyncpa [#allocation4], 0  ;;  %s25913_s18 = smov 0   ;;  %s28153_s0 = inlined_call_operand.vmem [shape: bf16[2,2,27380], index: 0, kind: input, shape index: {}]   ;;  %s28154_s1 = inlined_call_operand.vmem [shape: bf16[2,27380,64], index: 1, kind: input, shape index: {}]   ;;  %s28155_s2 = inlined_call_operand.vmem [shape: f32[1,64], index: 2, kind: input, shape index: {}]   ;;  %s28156_s3 = inlined_call_operand.vmem [shape: f32[64,2], index: 3, kind: input, shape index: {}]   ;;  %s28157_s4 = inlined_call_operand.vmem [shape: f32[1,2], index: 4, kind: input, shape index: {}]   ;;  %s28158_s5 = inlined_call_operand.hbm [shape: f32[2,2], index: 5, kind: output, shape index: {}]  }
   0x1 LB: > { %s25919_s19 = sadd.s32 4294967295, %s25876_s18   ;;  %p19973_p0 = scmp.ge.s32.totalorder %s25876_s18, 1  ;;  %s25876_s18 = sphi %s25913_s18, %s16_s18  }
   0x2   : > { %p192_p1 = scmp.lt.s32.totalorder %s25876_s18, 3 }
   0x4   : > { %p193_p2 = pnand %p19973_p0, %p192_p1 }
   0x5   : > { %p219_p3 = scmp.lt.s32.totalorder (!%p193_p2), %s25919_s19, 1  ;;  %p19975_p4 = scmp.ne.s32.totalorder (!%p193_p2), %s25919_s19, 0 }
   0x6   : > { %196 = sbr.rel (%p193_p2) target bundleno = 2193 (0x891), region = 40 }
   0xb   : > { %s220_s20 = scalar_select %p219_p3, %s25919_s19, 1 }
   0xc   : > { %232 = sbr.rel (%p19975_p4) target bundleno = 19 (0x13), region = 44 }
   0xd   : > { %s24080_s21 = smul.u32 214, %s220_s20 }
   0xe   : > { %s24081_s22 = smul.u32 13692, %s220_s20 }
   0xf   : > { %s25928_s25 = scalar_lea.vmem %s28153_s0, %s24080_s21 }
  0x10   : > { %s25933_s28 = scalar_lea.vmem %s28154_s1, %s24081_s22 }
  0x11   : > { %vm233_vm0 = vcmask 517120   ;;  %v25878_v0 = vmov 0.0  }
  0x12   : > { %234 = vst.msk [vmem:[#allocation2] sm:$0x3] %vm233_vm0, %v25878_v0 }
  0x13 PF: > { %v24101_v1 = vld [vmem:[%s25933_s28 + $0x78] sm:$0xff]   ;;  %v24105_v5 = vld [vmem:[%s25933_s28 + $0x70] sm:$0xff]   ;;  %v24109_v9 = vld [vmem:[%s25933_s28 + $0x68] sm:$0xff]   ;;  %v3717_v30 = vlaneseq  ;;  %v25879_v36 = vmov 1966171168   ;;  %vm15520_vm1 = vcmask 1041408  }
  0x14   : > { %v24102_v2 = vld [vmem:[%s25933_s28 + $0xf8] sm:$0xff]   ;;  %21697 = vmatprep.subr.bf16.mxu0 %v24101_v1  ;;  %v24106_v6 = vld [vmem:[%s25933_s28 + $0xf0] sm:$0xff]   ;;  %v24110_v10 = vld [vmem:[%s25933_s28 + $0xe8] sm:$0xff]   ;;  %v3715_v37 = vunpack.c.l.s4 %v25879_v36  ;;  %vm15516_vm2 = vcmask 949248   ;;  %vm19805_vm3 = vcmask 517120   ;;  %p21689_p5 = scmp.ne.s32.totalorder %s25919_s19, 1 }
  0x15   : > { %v24103_v3 = vld [vmem:[%s25933_s28 + $0x38] sm:$0xff]   ;;  %21719 = vmatprep.subr.bf16.mxu1 %v24102_v2  ;;  %v24107_v7 = vld [vmem:[%s25933_s28 + $0x30] sm:$0xff]   ;;  %v24111_v11 = vld [vmem:[%s25933_s28 + $0x28] sm:$0xff]   ;;  %v3718_v34 = vshrl.u32 %v3717_v30, 7 }
  0x16   : > { %v24104_v4 = vld [vmem:[%s25933_s28 + $0xb8] sm:$0xff]   ;;  %21698 = vmatpush3.bf16.msra.mxu0 %v24103_v3  ;;  %v24108_v8 = vld [vmem:[%s25933_s28 + $0xb0] sm:$0xff]   ;;  %v24112_v12 = vld [vmem:[%s25933_s28 + $0xa8] sm:$0xff]   ;;  %v3716_v40 = vunpack.c.0.s8 %v3715_v37 }
  0x17   : > { %21720 = vmatpush3.bf16.msra.mxu1 %v24104_v4  ;;  %21699 = vmatprep.subr.bf16.mxu0 %v24105_v5  ;;  %v24113_v13 = vld [vmem:[%s25933_s28 + $0x60] sm:$0xff]   ;;  %v24117_v17 = vld [vmem:[%s25933_s28 + $0x58] sm:$0xff]   ;;  %v24121_v21 = vld [vmem:[%s25933_s28 + $0x50] sm:$0xff]  }
  0x18   : > { %21721 = vmatprep.subr.bf16.mxu1 %v24106_v6  ;;  %v24114_v14 = vld [vmem:[%s25933_s28 + $0xe0] sm:$0xff]   ;;  %v24118_v18 = vld [vmem:[%s25933_s28 + $0xd8] sm:$0xff]   ;;  %v24122_v22 = vld [vmem:[%s25933_s28 + $0xd0] sm:$0xff]   ;;  %v25971_v42 = vsub.s32 %v3716_v40, %v3718_v34 }
  0x19   : > { %v24115_v15 = vld [vmem:[%s25933_s28 + $0x20] sm:$0xff]   ;;  %v24119_v19 = vld [vmem:[%s25933_s28 + $0x18] sm:$0xff]   ;;  %v24123_v23 = vld [vmem:[%s25933_s28 + $0x10] sm:$0xff]  }
  0x1a   : > { %21700 = vmatpush3.bf16.msra.mxu0 %v24107_v7  ;;  %v24116_v16 = vld [vmem:[%s25933_s28 + $0xa0] sm:$0xff]   ;;  %v24120_v20 = vld [vmem:[%s25933_s28 + $0x98] sm:$0xff]   ;;  %v24124_v24 = vld [vmem:[%s25933_s28 + $0x90] sm:$0xff]  }
  0x1b   : > { %21722 = vmatpush3.bf16.msra.mxu1 %v24108_v8  ;;  %21701 = vmatprep.subr.bf16.mxu0 %v24109_v9  ;;  %v24125_v25 = vld [vmem:[%s25933_s28 + $0x48] sm:$0xff]   ;;  %v24129_v29 = vld [vmem:[%s25933_s28 + $0x40] sm:$0xff]   ;;  %v24134_v35 = vld [vmem:[%s25933_s28 + $0x178] sm:$0xff]  }
  0x1c   : > { %21723 = vmatprep.subr.bf16.mxu1 %v24110_v10  ;;  %v24126_v26 = vld [vmem:[%s25933_s28 + $0xc8] sm:$0xff]   ;;  %v24130_v31 = vld [vmem:[%s25933_s28 + $0xc0] sm:$0xff]   ;;  %v24136_v41 = vld [vmem:[%s25933_s28 + $0x1f8] sm:$0xff]  }
  0x1d   : > { %v24127_v27 = vld [vmem:[%s25933_s28 + $0x8] sm:$0xff]   ;;  %v24131_v32 = vld [vmem:[%s25933_s28] sm:$0xff]   ;;  %v24135_v48 = vld [vmem:[%s25933_s28 + $0x138] sm:$0xff]  }
  0x1e   : > { %21702 = vmatpush3.bf16.msra.mxu0 %v24111_v11  ;;  %v24128_v28 = vld [vmem:[%s25933_s28 + $0x88] sm:$0xff]   ;;  %v24132_v33 = vld [vmem:[%s25933_s28 + $0x80] sm:$0xff]   ;;  %v24137_v50 = vld [vmem:[%s25933_s28 + $0x1b8] sm:$0xff]  }
  0x1f   : > { %21724 = vmatpush3.bf16.msra.mxu1 %v24112_v12  ;;  %21703 = vmatprep.subr.bf16.mxu0 %v24113_v13  ;;  %v236_v38 = vld [vmem:[%s25928_s25] sm:$0xff]  ;;  %v24138_v53 = vld [vmem:[%s25933_s28 + $0x170] sm:$0xff]   ;;  %v24142_v59 = vld [vmem:[%s25933_s28 + $0x168] sm:$0xff]  }
  0x20   : > { %21725 = vmatprep.subr.bf16.mxu1 %v24114_v14  ;;  %v3713_v39 = vcombine.high %v236_v38, %v236_v38  ;;  %v3720_v43 = vrot.slane %v236_v38, %v25971_v42  ;;  %v24139_v55 = vld [vmem:[%s25933_s28 + $0x130] sm:$0xff]   ;;  %v24143_v60 = vld [vmem:[%s25933_s28 + $0x128] sm:$0xff]   ;;  %v24146_v63 = vld [vmem:[%s25933_s28 + $0x160] sm:$0xff]  }
  0x21   : > { %v24140_v56 = vld [vmem:[%s25933_s28 + $0x1f0] sm:$0xff]   ;;  %v24144_v61 = vld [vmem:[%s25933_s28 + $0x1e8] sm:$0xff]   ;;  %v24147_v0 = vld [vmem:[%s25933_s28 + $0x120] sm:$0xff]  }
  0x22   : > { %21704 = vmatpush3.bf16.msra.mxu0 %v24115_v15  ;;  %v25975_v44 = vrot.slane %v3713_v39, %v25971_v42  ;;  %v3728_v45 = vcombine.high %v3720_v43, %v3720_v43  ;;  %v3736_v46 = vrot.slane %v3720_v43, %v25971_v42  ;;  %v24141_v58 = vld [vmem:[%s25933_s28 + $0x1b0] sm:$0xff]   ;;  %v24145_v62 = vld [vmem:[%s25933_s28 + $0x1a8] sm:$0xff]   ;;  %v24148_v1 = vld [vmem:[%s25933_s28 + $0x1e0] sm:$0xff]  }
  0x23   : > { %21726 = vmatpush3.bf16.msra.mxu1 %v24116_v16  ;;  %21705 = vmatprep.subr.bf16.mxu0 %v24117_v17  ;;  %v24149_v2 = vld [vmem:[%s25933_s28 + $0x1a0] sm:$0xff]   ;;  %v24150_v3 = vld [vmem:[%s25933_s28 + $0x158] sm:$0xff]   ;;  %v24154_v7 = vld [vmem:[%s25933_s28 + $0x150] sm:$0xff]  }
  0x24   : > { %21727 = vmatprep.subr.bf16.mxu1 %v24118_v18  ;;  %v3729_v47 = vcombine.high %v25975_v44, %v25975_v44  ;;  %v3750_v49 = vrot.slane %v3728_v45, %v25971_v42  ;;  %v3758_v52 = vcombine.high %v3736_v46, %v3736_v46  ;;  %v24151_v4 = vld [vmem:[%s25933_s28 + $0x118] sm:$0xff]   ;;  %v24155_v8 = vld [vmem:[%s25933_s28 + $0x110] sm:$0xff]   ;;  %v24158_v11 = vld [vmem:[%s25933_s28 + $0x148] sm:$0xff]  }
  0x25   : > { %v24152_v5 = vld [vmem:[%s25933_s28 + $0x1d8] sm:$0xff]   ;;  %v24156_v9 = vld [vmem:[%s25933_s28 + $0x1d0] sm:$0xff]   ;;  %v24159_v12 = vld [vmem:[%s25933_s28 + $0x108] sm:$0xff]  }
  0x26   : > { %21706 = vmatpush3.bf16.msra.mxu0 %v24119_v19  ;;  %v3757_v51 = vrot.slane %v3729_v47, %v25971_v42  ;;  %15556 = vmatprep.mubr.bf16.mxu0 %v3750_v49  ;;  %v3760_v54 = vcombine.high %v3750_v49, %v3750_v49  ;;  %v24153_v6 = vld [vmem:[%s25933_s28 + $0x198] sm:$0xff]   ;;  %v24157_v10 = vld [vmem:[%s25933_s28 + $0x190] sm:$0xff]   ;;  %v24160_v13 = vld [vmem:[%s25933_s28 + $0x1c8] sm:$0xff]   ;;  %v3743_v19 = vrot.slane %v25975_v44, %v25971_v42 }
  0x27   : > { %21728 = vmatpush3.bf16.msra.mxu1 %v24120_v20  ;;  %21707 = vmatprep.subr.bf16.mxu0 %v24121_v21  ;;  %v24161_v14 = vld [vmem:[%s25933_s28 + $0x188] sm:$0xff]   ;;  %v24162_v15 = vld [vmem:[%s25933_s28 + $0x140] sm:$0xff]   ;;  %v24166_v20 = vld [vmem:[%s25933_s28 + $0x278] sm:$0xff]  }
  0x28   : > { %21729 = vmatprep.subr.bf16.mxu1 %v24122_v22  ;;  %v3761_v57 = vcombine.high %v3757_v51, %v3757_v51  ;;  %15596 = vmatprep.mubr.bf16.mxu1 %v3760_v54  ;;  %v24163_v16 = vld [vmem:[%s25933_s28 + $0x100] sm:$0xff]   ;;  %v24167_v21 = vld [vmem:[%s25933_s28 + $0x238] sm:$0xff]   ;;  %v24175_v30 = vld [vmem:[%s25933_s28 + $0x228] sm:$0xff]  }
  0x29   : > { %v24164_v17 = vld [vmem:[%s25933_s28 + $0x1c0] sm:$0xff]   ;;  %v24168_v22 = vld [vmem:[%s25933_s28 + $0x2f8] sm:$0xff]   ;;  %v24187_v43 = vld [vmem:[%s25933_s28 + $0x210] sm:$0xff]  }
  0x2a   : > { %21708 = vmatpush3.bf16.msra.mxu0 %v24123_v23  ;;  %v24165_v18 = vld [vmem:[%s25933_s28 + $0x180] sm:$0xff]   ;;  %v24169_v23 = vld [vmem:[%s25933_s28 + $0x2b8] sm:$0xff]   ;;  %v24188_v44 = vld [vmem:[%s25933_s28 + $0x2d0] sm:$0xff]  }
  0x2b   : > { %21730 = vmatpush3.bf16.msra.mxu1 %v24124_v24  ;;  %21709 = vmatprep.subr.bf16.mxu0 %v24125_v25  ;;  %v3759_v24 = vcombine.high %v3743_v19, %v3743_v19  ;;  %v24170_v25 = vld [vmem:[%s25933_s28 + $0x270] sm:$0xff]   ;;  %v24179_v34 = vld [vmem:[%s25933_s28 + $0x220] sm:$0xff]   ;;  %v24182_v37 = vld [vmem:[%s25933_s28 + $0x258] sm:$0xff]  }
  0x2c   : > { %21731 = vmatprep.subr.bf16.mxu1 %v24126_v26  ;;  %v24171_v26 = vld [vmem:[%s25933_s28 + $0x230] sm:$0xff]   ;;  %v24181_v36 = vld [vmem:[%s25933_s28 + $0x2a0] sm:$0xff]   ;;  %v24183_v38 = vld [vmem:[%s25933_s28 + $0x218] sm:$0xff]  }
  0x2d   : > { %v24184_v39 = vld [vmem:[%s25933_s28 + $0x2d8] sm:$0xff]   ;;  %v24189_v45 = vld [vmem:[%s25933_s28 + $0x290] sm:$0xff]   ;;  %v24190_v47 = vld [vmem:[%s25933_s28 + $0x248] sm:$0xff]  }
  0x2e   : > { %21710 = vmatpush3.bf16.msra.mxu0 %v24127_v27  ;;  %v24172_v27 = vld [vmem:[%s25933_s28 + $0x2f0] sm:$0xff]   ;;  %v24185_v40 = vld [vmem:[%s25933_s28 + $0x298] sm:$0xff]   ;;  %v24193_v54 = vld [vmem:[%s25933_s28 + $0x288] sm:$0xff]  }
  0x2f   : > { %21732 = vmatpush3.bf16.msra.mxu1 %v24128_v28  ;;  %21711 = vmatprep.subr.bf16.mxu0 %v24129_v29  ;;  %v24173_v28 = vld [vmem:[%s25933_s28 + $0x2b0] sm:$0xff]   ;;  %v24174_v29 = vld [vmem:[%s25933_s28 + $0x268] sm:$0xff]  }
  0x30   : > { %21733 = vmatprep.subr.bf16.mxu1 %v24130_v31  ;;  %v24176_v31 = vld [vmem:[%s25933_s28 + $0x2e8] sm:$0xff]  }
  0x32   : > { %21712 = vmatpush3.bf16.msra.mxu0 %v24131_v32  ;;  %v24177_v32 = vld [vmem:[%s25933_s28 + $0x2a8] sm:$0xff]  }
  0x33   : > { %21734 = vmatpush3.bf16.msra.mxu1 %v24132_v33  ;;  %21741 = vmatprep.subr.bf16.mxu0 %v24134_v35  ;;  %v24178_v33 = vld [vmem:[%s25933_s28 + $0x260] sm:$0xff]  }
  0x34   : > { %21763 = vmatprep.subr.bf16.mxu1 %v24136_v41  ;;  %v24180_v35 = vld [vmem:[%s25933_s28 + $0x2e0] sm:$0xff]   ;;  %v24186_v41 = vld [vmem:[%s25933_s28 + $0x250] sm:$0xff]  }
  0x35   : > { %15557 = vmatmul.mubr.bf16.vlgmr.msra.gmra.mxu0 %v3736_v46  ;;  %v237_v46 = vld [vmem:[%s25928_s25 + $0x8] sm:$0xff] }
  0x36   : > { %21742 = vmatpush3.bf16.msra.mxu0 %v24135_v48  ;;  %15597 = vmatmul.mubr.bf16.vlgmr.msra.gmra.mxu1 %v3758_v52  ;;  %v3769_v48 = vrot.slane %v237_v46, %v25971_v42  ;;  %v3762_v49 = vcombine.high %v237_v46, %v237_v46  ;;  %v24240_v46 = vld [vmem:[%s25933_s28 + $0x428] sm:$0xff]  }
  0x37   : > { %21743 = vmatprep.subr.bf16.mxu0 %v24138_v53  ;;  %21764 = vmatpush3.bf16.msra.mxu1 %v24137_v50  ;;  %v24191_v50 = vld [vmem:[%s25933_s28 + $0x208] sm:$0xff]  }
  0x38   : > { %15636 = vmatprep.mubr.bf16.mxu0 %v3757_v51  ;;  %21765 = vmatprep.subr.bf16.mxu1 %v24140_v56  ;;  %v24192_v51 = vld [vmem:[%s25933_s28 + $0x2c8] sm:$0xff]   ;;  %v3777_v52 = vcombine.high %v3769_v48, %v3769_v48  ;;  %v26044_v53 = vrot.slane %v3762_v49, %v25971_v42  ;;  %v24243_v49 = vld [vmem:[%s25933_s28 + $0x460] sm:$0xff]  }
  0x39   : > { %15676 = vmatprep.mubr.bf16.mxu1 %v3761_v57  ;;  %v24195_v57 = vld [vmem:[%s25933_s28 + $0x200] sm:$0xff]  }
  0x3a   : > { %21744 = vmatpush3.bf16.msra.mxu0 %v24139_v55  ;;  %v24194_v55 = vld [vmem:[%s25933_s28 + $0x240] sm:$0xff]   ;;  %v3799_v56 = vrot.slane %v3777_v52, %v25971_v42 }
  0x3b   : > { %21745 = vmatprep.subr.bf16.mxu0 %v24142_v59  ;;  %21766 = vmatpush3.bf16.msra.mxu1 %v24141_v58  ;;  %v3778_v58 = vcombine.high %v26044_v53, %v26044_v53  ;;  %v24196_v59 = vld [vmem:[%s25933_s28 + $0x2c0] sm:$0xff]  }
  0x3c   : > { %21767 = vmatprep.subr.bf16.mxu1 %v24144_v61  ;;  %v24197_v61 = vld [vmem:[%s25933_s28 + $0x280] sm:$0xff]  }
  0x3d   : > { %v24246_v52 = vld [vmem:[%s25933_s28 + $0x4a0] sm:$0xff]  }
  0x3e   : > { %21746 = vmatpush3.bf16.msra.mxu0 %v24143_v60  ;;  %v3809_v60 = vcombine.high %v3799_v56, %v3799_v56 }
  0x3f   : > { %21747 = vmatprep.subr.bf16.mxu0 %v24146_v63  ;;  %21768 = vmatpush3.bf16.msra.mxu1 %v24145_v62  ;;  %v3785_v62 = vrot.slane %v3769_v48, %v25971_v42  ;;  %v24198_v63 = vld [vmem:[%s25933_s28 + $0x378] sm:$0xff]   ;;  %v24242_v48 = vld [vmem:[%s25933_s28 + $0x4a8] sm:$0xff]  }
  0x40   : > { %21769 = vmatprep.subr.bf16.mxu1 %v24148_v1  ;;  %v3806_v1 = vrot.slane %v3778_v58, %v25971_v42  ;;  %v24252_v58 = vld [vmem:[%s25933_s28 + $0x410] sm:$0xff]  }
  0x42   : > { %21748 = vmatpush3.bf16.msra.mxu0 %v24147_v0  ;;  %v24199_v0 = vld [vmem:[%s25933_s28 + $0x338] sm:$0xff]  }
  0x43   : > { %21749 = vmatprep.subr.bf16.mxu0 %v24150_v3  ;;  %21770 = vmatpush3.bf16.msra.mxu1 %v24149_v2  ;;  %v24200_v2 = vld [vmem:[%s25933_s28 + $0x3f8] sm:$0xff]  }
  0x44   : > { %21771 = vmatprep.subr.bf16.mxu1 %v24152_v5  ;;  %v24201_v3 = vld [vmem:[%s25933_s28 + $0x3b8] sm:$0xff]   ;;  %v24202_v5 = vld [vmem:[%s25933_s28 + $0x370] sm:$0xff]  }
  0x46   : > { %21750 = vmatpush3.bf16.msra.mxu0 %v24151_v4  ;;  %v3807_v4 = vcombine.high %v3785_v62, %v3785_v62 }
  0x47   : > { %21751 = vmatprep.subr.bf16.mxu0 %v24154_v7  ;;  %21772 = vmatpush3.bf16.msra.mxu1 %v24153_v6  ;;  %v24203_v6 = vld [vmem:[%s25933_s28 + $0x330] sm:$0xff]   ;;  %v3810_v7 = vcombine.high %v3806_v1, %v3806_v1 }
  0x48   : > { %21773 = vmatprep.subr.bf16.mxu1 %v24156_v9  ;;  %v24205_v9 = vld [vmem:[%s25933_s28 + $0x3b0] sm:$0xff]  }
  0x4a   : > { %21752 = vmatpush3.bf16.msra.mxu0 %v24155_v8  ;;  %v24204_v8 = vld [vmem:[%s25933_s28 + $0x3f0] sm:$0xff]  }
  0x4b   : > { %21753 = vmatprep.subr.bf16.mxu0 %v24158_v11  ;;  %21774 = vmatpush3.bf16.msra.mxu1 %v24157_v10  ;;  %v24206_v10 = vld [vmem:[%s25933_s28 + $0x368] sm:$0xff]  }
  0x4c   : > { %21775 = vmatprep.subr.bf16.mxu1 %v24160_v13  ;;  %v24207_v11 = vld [vmem:[%s25933_s28 + $0x328] sm:$0xff]  }
  0x4d   : > { %v24209_v13 = vld [vmem:[%s25933_s28 + $0x3a8] sm:$0xff]  }
  0x4e   : > { %21754 = vmatpush3.bf16.msra.mxu0 %v24159_v12  ;;  %v24208_v12 = vld [vmem:[%s25933_s28 + $0x3e8] sm:$0xff]  }
  0x4f   : > { %21755 = vmatprep.subr.bf16.mxu0 %v24162_v15  ;;  %21776 = vmatpush3.bf16.msra.mxu1 %v24161_v14  ;;  %v24210_v14 = vld [vmem:[%s25933_s28 + $0x360] sm:$0xff]  }
  0x50   : > { %21777 = vmatprep.subr.bf16.mxu1 %v24164_v17  ;;  %v24211_v15 = vld [vmem:[%s25933_s28 + $0x320] sm:$0xff]  }
  0x51   : > { %v24213_v17 = vld [vmem:[%s25933_s28 + $0x3a0] sm:$0xff]  }
  0x52   : > { %21756 = vmatpush3.bf16.msra.mxu0 %v24163_v16  ;;  %v24212_v16 = vld [vmem:[%s25933_s28 + $0x3e0] sm:$0xff]  }
  0x53   : > { %21785 = vmatprep.subr.bf16.mxu0 %v24166_v20  ;;  %21778 = vmatpush3.bf16.msra.mxu1 %v24165_v18  ;;  %v24214_v18 = vld [vmem:[%s25933_s28 + $0x358] sm:$0xff]  }
  0x54   : > { %21807 = vmatprep.subr.bf16.mxu1 %v24168_v22  ;;  %v24216_v20 = vld [vmem:[%s25933_s28 + $0x3d8] sm:$0xff]   ;;  %v24218_v22 = vld [vmem:[%s25933_s28 + $0x350] sm:$0xff]  }
  0x55   : > { %15637 = vmatmul.mubr.bf16.vlgmr.msra.gmra.mxu0 %v3743_v19  ;;  %v24215_v19 = vld [vmem:[%s25933_s28 + $0x318] sm:$0xff]  }
  0x56   : > { %21786 = vmatpush3.bf16.msra.mxu0 %v24167_v21  ;;  %15677 = vmatmul.mubr.bf16.vlgmr.msra.gmra.mxu1 %v3759_v24  ;;  %v24217_v21 = vld [vmem:[%s25933_s28 + $0x398] sm:$0xff]   ;;  %v24220_v24 = vld [vmem:[%s25933_s28 + $0x3d0] sm:$0xff]  }
  0x57   : > { %21787 = vmatprep.subr.bf16.mxu0 %v24170_v25  ;;  %21808 = vmatpush3.bf16.msra.mxu1 %v24169_v23  ;;  %v24219_v23 = vld [vmem:[%s25933_s28 + $0x310] sm:$0xff]  }
  0x58   : > { %21809 = vmatprep.subr.bf16.mxu1 %v24172_v27  ;;  %15716 = vmatprep.mubr.bf16.mxu0 %v3799_v56  ;;  %v24221_v25 = vld [vmem:[%s25933_s28 + $0x390] sm:$0xff]   ;;  %v24223_v27 = vld [vmem:[%s25933_s28 + $0x308] sm:$0xff]   ;;  %v24250_v56 = vld [vmem:[%s25933_s28 + $0x498] sm:$0xff]  }
  0x59   : > { %15756 = vmatprep.mubr.bf16.mxu1 %v3809_v60  ;;  %v24254_v60 = vld [vmem:[%s25933_s28 + $0x490] sm:$0xff]  }
  0x5a   : > { %21788 = vmatpush3.bf16.msra.mxu0 %v24171_v26  ;;  %v24222_v26 = vld [vmem:[%s25933_s28 + $0x348] sm:$0xff]  }
  0x5b   : > { %21789 = vmatprep.subr.bf16.mxu0 %v24174_v29  ;;  %21810 = vmatpush3.bf16.msra.mxu1 %v24173_v28  ;;  %v24224_v28 = vld [vmem:[%s25933_s28 + $0x3c8] sm:$0xff]  }
  0x5c   : > { %21811 = vmatprep.subr.bf16.mxu1 %v24176_v31  ;;  %v24225_v29 = vld [vmem:[%s25933_s28 + $0x388] sm:$0xff]   ;;  %v24227_v31 = vld [vmem:[%s25933_s28 + $0x300] sm:$0xff]  }
  0x5e   : > { %21790 = vmatpush3.bf16.msra.mxu0 %v24175_v30  ;;  %v24226_v30 = vld [vmem:[%s25933_s28 + $0x340] sm:$0xff]  }
  0x5f   : > { %21791 = vmatprep.subr.bf16.mxu0 %v24178_v33  ;;  %21812 = vmatpush3.bf16.msra.mxu1 %v24177_v32  ;;  %v24228_v32 = vld [vmem:[%s25933_s28 + $0x3c0] sm:$0xff]  }
  0x60   : > { %21813 = vmatprep.subr.bf16.mxu1 %v24180_v35  ;;  %v24230_v33 = vld [vmem:[%s25933_s28 + $0x380] sm:$0xff]   ;;  %v24231_v35 = vld [vmem:[%s25933_s28 + $0x478] sm:$0xff]  }
  0x62   : > { %21792 = vmatpush3.bf16.msra.mxu0 %v24179_v34  ;;  %v3792_v34 = vrot.slane %v26044_v53, %v25971_v42  ;;  %v24247_v53 = vld [vmem:[%s25933_s28 + $0x458] sm:$0xff]  }
  0x63   : > { %21793 = vmatprep.subr.bf16.mxu0 %v24182_v37  ;;  %21814 = vmatpush3.bf16.msra.mxu1 %v24181_v36  ;;  %v24232_v36 = vld [vmem:[%s25933_s28 + $0x438] sm:$0xff]  }
  0x64   : > { %21815 = vmatprep.subr.bf16.mxu1 %v24184_v39  ;;  %v24233_v37 = vld [vmem:[%s25933_s28 + $0x4f8] sm:$0xff]   ;;  %v3808_v39 = vcombine.high %v3792_v34, %v3792_v34 }
  0x66   : > { %21794 = vmatpush3.bf16.msra.mxu0 %v24183_v38  ;;  %v24234_v38 = vld [vmem:[%s25933_s28 + $0x4b8] sm:$0xff]  }
  0x67   : > { %21795 = vmatprep.subr.bf16.mxu0 %v24186_v41  ;;  %21816 = vmatpush3.bf16.msra.mxu1 %v24185_v40  ;;  %v24235_v40 = vld [vmem:[%s25933_s28 + $0x470] sm:$0xff]  }
  0x68   : > { %21817 = vmatprep.subr.bf16.mxu1 %v24188_v44  ;;  %v24236_v41 = vld [vmem:[%s25933_s28 + $0x430] sm:$0xff]  }
  0x69   : > { %v24238_v44 = vld [vmem:[%s25933_s28 + $0x4b0] sm:$0xff]  }
  0x6a   : > { %21796 = vmatpush3.bf16.msra.mxu0 %v24187_v43  ;;  %v24237_v43 = vld [vmem:[%s25933_s28 + $0x4f0] sm:$0xff]  }
  0x6b   : > { %21797 = vmatprep.subr.bf16.mxu0 %v24190_v47  ;;  %21818 = vmatpush3.bf16.msra.mxu1 %v24189_v45  ;;  %v24239_v45 = vld [vmem:[%s25933_s28 + $0x468] sm:$0xff]  }
  0x6c   : > { %21819 = vmatprep.subr.bf16.mxu1 %v24192_v51  ;;  %v24241_v47 = vld [vmem:[%s25933_s28 + $0x4e8] sm:$0xff]   ;;  %v24245_v51 = vld [vmem:[%s25933_s28 + $0x4e0] sm:$0xff]  }
  0x6e   : > { %21798 = vmatpush3.bf16.msra.mxu0 %v24191_v50  ;;  %v24244_v50 = vld [vmem:[%s25933_s28 + $0x420] sm:$0xff]  }
  0x6f   : > { %21799 = vmatprep.subr.bf16.mxu0 %v24194_v55  ;;  %21820 = vmatpush3.bf16.msra.mxu1 %v24193_v54  ;;  %v24248_v54 = vld [vmem:[%s25933_s28 + $0x418] sm:$0xff]  }
  0x70   : > { %21821 = vmatprep.subr.bf16.mxu1 %v24196_v59  ;;  %v24249_v55 = vld [vmem:[%s25933_s28 + $0x4d8] sm:$0xff]   ;;  %v24253_v59 = vld [vmem:[%s25933_s28 + $0x4d0] sm:$0xff]  }
  0x72   : > { %21800 = vmatpush3.bf16.msra.mxu0 %v24195_v57  ;;  %v24251_v57 = vld [vmem:[%s25933_s28 + $0x450] sm:$0xff]  }
  0x73   : > { %21829 = vmatprep.subr.bf16.mxu0 %v24198_v63  ;;  %21822 = vmatpush3.bf16.msra.mxu1 %v24197_v61  ;;  %v238_v61 = vld [vmem:[%s25928_s25 + $0x10] sm:$0xff] }
  0x74   : > { %21851 = vmatprep.subr.bf16.mxu1 %v24200_v2  ;;  %v3818_v63 = vrot.slane %v238_v61, %v25971_v42  ;;  %v24257_v2 = vld [vmem:[%s25933_s28 + $0x4c8] sm:$0xff]  }
  0x75   : > { %15717 = vmatmul.mubr.bf16.vlgmr.msra.gmra.mxu0 %v3785_v62  ;;  %v24255_v62 = vld [vmem:[%s25933_s28 + $0x448] sm:$0xff]  }
  0x76   : > { %21830 = vmatpush3.bf16.msra.mxu0 %v24199_v0  ;;  %15796 = vmatprep.mubr.bf16.mxu0 %v3806_v1  ;;  %v3811_v0 = vcombine.high %v238_v61, %v238_v61  ;;  %v24256_v1 = vld [vmem:[%s25933_s28 + $0x408] sm:$0xff]  }
  0x77   : > { %15757 = vmatmul.mubr.bf16.vlgmr.msra.gmra.mxu1 %v3807_v4  ;;  %21831 = vmatprep.subr.bf16.mxu0 %v24202_v5  ;;  %v24258_v5 = vld [vmem:[%s25933_s28 + $0x488] sm:$0xff]  }
  0x78   : > { %21852 = vmatpush3.bf16.msra.mxu1 %v24201_v3  ;;  %15836 = vmatprep.mubr.bf16.mxu1 %v3810_v7  ;;  %v3826_v3 = vcombine.high %v3818_v63, %v3818_v63  ;;  %v26120_v4 = vrot.slane %v3811_v0, %v25971_v42  ;;  %v24305_v61 = vld [vmem:[%s25933_s28 + $0x628] sm:$0xff]   ;;  %v24308_v0 = vld [vmem:[%s25933_s28 + $0x660] sm:$0xff]  }
  0x79   : > { %21853 = vmatprep.subr.bf16.mxu1 %v24204_v8  ;;  %v24260_v8 = vld [vmem:[%s25933_s28 + $0x400] sm:$0xff]  }
  0x7a   : > { %21832 = vmatpush3.bf16.msra.mxu0 %v24203_v6  ;;  %v24259_v6 = vld [vmem:[%s25933_s28 + $0x440] sm:$0xff]   ;;  %v3848_v7 = vrot.slane %v3826_v3, %v25971_v42 }
  0x7b   : > { %21833 = vmatprep.subr.bf16.mxu0 %v24206_v10  ;;  %v24261_v10 = vld [vmem:[%s25933_s28 + $0x4c0] sm:$0xff]  }
  0x7c   : > { %21854 = vmatpush3.bf16.msra.mxu1 %v24205_v9  ;;  %v3827_v9 = vcombine.high %v26120_v4, %v26120_v4  ;;  %v24311_v3 = vld [vmem:[%s25933_s28 + $0x6a0] sm:$0xff]  }
  0x7d   : > { %21855 = vmatprep.subr.bf16.mxu1 %v24208_v12  ;;  %v24262_v12 = vld [vmem:[%s25933_s28 + $0x480] sm:$0xff]  }
  0x7e   : > { %21834 = vmatpush3.bf16.msra.mxu0 %v24207_v11  ;;  %v3858_v11 = vcombine.high %v3848_v7, %v3848_v7 }
  0x7f   : > { %21835 = vmatprep.subr.bf16.mxu0 %v24210_v14  ;;  %v24263_v14 = vld [vmem:[%s25933_s28 + $0x578] sm:$0xff]  }
  0x80   : > { %21856 = vmatpush3.bf16.msra.mxu1 %v24209_v13  ;;  %v3834_v13 = vrot.slane %v3818_v63, %v25971_v42  ;;  %v24307_v63 = vld [vmem:[%s25933_s28 + $0x6a8] sm:$0xff]  }
  0x81   : > { %21857 = vmatprep.subr.bf16.mxu1 %v24212_v16  ;;  %v3855_v16 = vrot.slane %v3827_v9, %v25971_v42  ;;  %v24317_v9 = vld [vmem:[%s25933_s28 + $0x610] sm:$0xff]  }
  0x82   : > { %21836 = vmatpush3.bf16.msra.mxu0 %v24211_v15  ;;  %v24264_v15 = vld [vmem:[%s25933_s28 + $0x538] sm:$0xff]  }
  0x83   : > { %21837 = vmatprep.subr.bf16.mxu0 %v24214_v18  ;;  %v24266_v18 = vld [vmem:[%s25933_s28 + $0x5b8] sm:$0xff]  }
  0x84   : > { %21858 = vmatpush3.bf16.msra.mxu1 %v24213_v17  ;;  %v24265_v17 = vld [vmem:[%s25933_s28 + $0x5f8] sm:$0xff]  }
  0x85   : > { %21859 = vmatprep.subr.bf16.mxu1 %v24216_v20  ;;  %v24267_v20 = vld [vmem:[%s25933_s28 + $0x570] sm:$0xff]  }
  0x86   : > { %21838 = vmatpush3.bf16.msra.mxu0 %v24215_v19  ;;  %v3856_v19 = vcombine.high %v3834_v13, %v3834_v13 }
  0x87   : > { %21839 = vmatprep.subr.bf16.mxu0 %v24218_v22  ;;  %v3859_v22 = vcombine.high %v3855_v16, %v3855_v16 }
  0x88   : > { %21860 = vmatpush3.bf16.msra.mxu1 %v24217_v21  ;;  %v24268_v21 = vld [vmem:[%s25933_s28 + $0x530] sm:$0xff]  }
  0x89   : > { %21861 = vmatprep.subr.bf16.mxu1 %v24220_v24  ;;  %v24270_v24 = vld [vmem:[%s25933_s28 + $0x5b0] sm:$0xff]  }
  0x8a   : > { %21840 = vmatpush3.bf16.msra.mxu0 %v24219_v23  ;;  %v24269_v23 = vld [vmem:[%s25933_s28 + $0x5f0] sm:$0xff]  }
  0x8b   : > { %21841 = vmatprep.subr.bf16.mxu0 %v24222_v26  ;;  %v24272_v26 = vld [vmem:[%s25933_s28 + $0x528] sm:$0xff]  }
  0x8c   : > { %21862 = vmatpush3.bf16.msra.mxu1 %v24221_v25  ;;  %v24271_v25 = vld [vmem:[%s25933_s28 + $0x568] sm:$0xff]  }
  0x8d   : > { %21863 = vmatprep.subr.bf16.mxu1 %v24224_v28  ;;  %v24274_v28 = vld [vmem:[%s25933_s28 + $0x5a8] sm:$0xff]  }
  0x8e   : > { %21842 = vmatpush3.bf16.msra.mxu0 %v24223_v27  ;;  %v24273_v27 = vld [vmem:[%s25933_s28 + $0x5e8] sm:$0xff]  }
  0x8f   : > { %21843 = vmatprep.subr.bf16.mxu0 %v24226_v30  ;;  %v24276_v30 = vld [vmem:[%s25933_s28 + $0x520] sm:$0xff]  }
  0x90   : > { %21864 = vmatpush3.bf16.msra.mxu1 %v24225_v29  ;;  %v24275_v29 = vld [vmem:[%s25933_s28 + $0x560] sm:$0xff]  }
  0x91   : > { %21865 = vmatprep.subr.bf16.mxu1 %v24228_v32  ;;  %v24278_v32 = vld [vmem:[%s25933_s28 + $0x5a0] sm:$0xff]  }
  0x92   : > { %21844 = vmatpush3.bf16.msra.mxu0 %v24227_v31  ;;  %v24277_v31 = vld [vmem:[%s25933_s28 + $0x5e0] sm:$0xff]  }
  0x93   : > { %21873 = vmatprep.subr.bf16.mxu0 %v24231_v35  ;;  %v24281_v35 = vld [vmem:[%s25933_s28 + $0x5d8] sm:$0xff]  }
  0x94   : > { %21866 = vmatpush3.bf16.msra.mxu1 %v24230_v33  ;;  %v24279_v33 = vld [vmem:[%s25933_s28 + $0x558] sm:$0xff]  }
  0x95   : > { %15797 = vmatmul.mubr.bf16.vlgmr.msra.gmra.mxu0 %v3792_v34  ;;  %21895 = vmatprep.subr.bf16.mxu1 %v24233_v37  ;;  %v24280_v34 = vld [vmem:[%s25933_s28 + $0x518] sm:$0xff]   ;;  %v24283_v37 = vld [vmem:[%s25933_s28 + $0x550] sm:$0xff]  }
  0x96   : > { %21874 = vmatpush3.bf16.msra.mxu0 %v24232_v36  ;;  %15876 = vmatprep.mubr.bf16.mxu0 %v3848_v7  ;;  %v24282_v36 = vld [vmem:[%s25933_s28 + $0x598] sm:$0xff]  }
  0x97   : > { %15837 = vmatmul.mubr.bf16.vlgmr.msra.gmra.mxu1 %v3808_v39  ;;  %21875 = vmatprep.subr.bf16.mxu0 %v24235_v40  ;;  %v24285_v39 = vld [vmem:[%s25933_s28 + $0x5d0] sm:$0xff]   ;;  %v24315_v7 = vld [vmem:[%s25933_s28 + $0x698] sm:$0xff]  }
  0x98   : > { %21896 = vmatpush3.bf16.msra.mxu1 %v24234_v38  ;;  %15916 = vmatprep.mubr.bf16.mxu1 %v3858_v11  ;;  %v24284_v38 = vld [vmem:[%s25933_s28 + $0x510] sm:$0xff]  }
  0x99   : > { %21897 = vmatprep.subr.bf16.mxu1 %v24237_v43  ;;  %v24286_v40 = vld [vmem:[%s25933_s28 + $0x590] sm:$0xff]   ;;  %v24288_v43 = vld [vmem:[%s25933_s28 + $0x508] sm:$0xff]  }
  0x9a   : > { %21876 = vmatpush3.bf16.msra.mxu0 %v24236_v41  ;;  %v24287_v41 = vld [vmem:[%s25933_s28 + $0x548] sm:$0xff]   ;;  %v24319_v11 = vld [vmem:[%s25933_s28 + $0x690] sm:$0xff]  }
  0x9b   : > { %21877 = vmatprep.subr.bf16.mxu0 %v24239_v45  ;;  %v24290_v45 = vld [vmem:[%s25933_s28 + $0x588] sm:$0xff]  }
  0x9c   : > { %21898 = vmatpush3.bf16.msra.mxu1 %v24238_v44  ;;  %v24289_v44 = vld [vmem:[%s25933_s28 + $0x5c8] sm:$0xff]  }
  0x9d   : > { %21899 = vmatprep.subr.bf16.mxu1 %v24241_v47  ;;  %v24292_v47 = vld [vmem:[%s25933_s28 + $0x500] sm:$0xff]  }
  0x9e   : > { %21878 = vmatpush3.bf16.msra.mxu0 %v24240_v46  ;;  %v24291_v46 = vld [vmem:[%s25933_s28 + $0x540] sm:$0xff]  }
  0x9f   : > { %21879 = vmatprep.subr.bf16.mxu0 %v24243_v49  ;;  %v24295_v49 = vld [vmem:[%s25933_s28 + $0x580] sm:$0xff]  }
  0xa0   : > { %21900 = vmatpush3.bf16.msra.mxu1 %v24242_v48  ;;  %v24293_v48 = vld [vmem:[%s25933_s28 + $0x5c0] sm:$0xff]  }
  0xa1   : > { %21901 = vmatprep.subr.bf16.mxu1 %v24245_v51  ;;  %v24296_v51 = vld [vmem:[%s25933_s28 + $0x678] sm:$0xff]  }
  0xa2   : > { %21880 = vmatpush3.bf16.msra.mxu0 %v24244_v50  ;;  %v3841_v50 = vrot.slane %v26120_v4, %v25971_v42  ;;  %v24312_v4 = vld [vmem:[%s25933_s28 + $0x658] sm:$0xff]  }
  0xa3   : > { %21881 = vmatprep.subr.bf16.mxu0 %v24247_v53  ;;  %v24298_v53 = vld [vmem:[%s25933_s28 + $0x6f8] sm:$0xff]  }
  0xa4   : > { %21902 = vmatpush3.bf16.msra.mxu1 %v24246_v52  ;;  %v24297_v52 = vld [vmem:[%s25933_s28 + $0x638] sm:$0xff]  }
  0xa5   : > { %21903 = vmatprep.subr.bf16.mxu1 %v24249_v55  ;;  %v3857_v55 = vcombine.high %v3841_v50, %v3841_v50 }
  0xa6   : > { %21882 = vmatpush3.bf16.msra.mxu0 %v24248_v54  ;;  %v24299_v54 = vld [vmem:[%s25933_s28 + $0x6b8] sm:$0xff]  }
  0xa7   : > { %21883 = vmatprep.subr.bf16.mxu0 %v24251_v57  ;;  %v24301_v57 = vld [vmem:[%s25933_s28 + $0x630] sm:$0xff]  }
  0xa8   : > { %21904 = vmatpush3.bf16.msra.mxu1 %v24250_v56  ;;  %v24300_v56 = vld [vmem:[%s25933_s28 + $0x670] sm:$0xff]  }
  0xa9   : > { %21905 = vmatprep.subr.bf16.mxu1 %v24253_v59  ;;  %v24303_v59 = vld [vmem:[%s25933_s28 + $0x6b0] sm:$0xff]  }
  0xaa   : > { %21884 = vmatpush3.bf16.msra.mxu0 %v24252_v58  ;;  %v24302_v58 = vld [vmem:[%s25933_s28 + $0x6f0] sm:$0xff]  }
  0xab   : > { %21885 = vmatprep.subr.bf16.mxu0 %v24255_v62  ;;  %v24306_v62 = vld [vmem:[%s25933_s28 + $0x6e8] sm:$0xff]  }
  0xac   : > { %21906 = vmatpush3.bf16.msra.mxu1 %v24254_v60  ;;  %v24304_v60 = vld [vmem:[%s25933_s28 + $0x668] sm:$0xff]  }
  0xad   : > { %21907 = vmatprep.subr.bf16.mxu1 %v24257_v2  ;;  %v24310_v2 = vld [vmem:[%s25933_s28 + $0x6e0] sm:$0xff]  }
  0xae   : > { %21886 = vmatpush3.bf16.msra.mxu0 %v24256_v1  ;;  %v24309_v1 = vld [vmem:[%s25933_s28 + $0x620] sm:$0xff]  }
  0xaf   : > { %21887 = vmatprep.subr.bf16.mxu0 %v24259_v6  ;;  %v24314_v6 = vld [vmem:[%s25933_s28 + $0x6d8] sm:$0xff]  }
  0xb0   : > { %21908 = vmatpush3.bf16.msra.mxu1 %v24258_v5  ;;  %v24313_v5 = vld [vmem:[%s25933_s28 + $0x618] sm:$0xff]  }
  0xb1   : > { %21909 = vmatprep.subr.bf16.mxu1 %v24261_v10  ;;  %v24318_v10 = vld [vmem:[%s25933_s28 + $0x6d0] sm:$0xff]  }
  0xb2   : > { %21888 = vmatpush3.bf16.msra.mxu0 %v24260_v8  ;;  %v24316_v8 = vld [vmem:[%s25933_s28 + $0x650] sm:$0xff]  }
  0xb3   : > { %21917 = vmatprep.subr.bf16.mxu0 %v24263_v14  ;;  %v24321_v14 = vld [vmem:[%s25933_s28 + $0x608] sm:$0xff]  }
  0xb4   : > { %21910 = vmatpush3.bf16.msra.mxu1 %v24262_v12  ;;  %v24320_v12 = vld [vmem:[%s25933_s28 + $0x648] sm:$0xff]  }
  0xb5   : > { %15877 = vmatmul.mubr.bf16.vlgmr.msra.gmra.mxu0 %v3834_v13  ;;  %21939 = vmatprep.subr.bf16.mxu1 %v24265_v17  ;;  %v239_v13 = vld [vmem:[%s25928_s25 + $0x18] sm:$0xff]  ;;  %v24322_v17 = vld [vmem:[%s25933_s28 + $0x6c8] sm:$0xff]  }
  0xb6   : > { %21918 = vmatpush3.bf16.msra.mxu0 %v24264_v15  ;;  %15956 = vmatprep.mubr.bf16.mxu0 %v3855_v16  ;;  %v3867_v15 = vrot.slane %v239_v13, %v25971_v42  ;;  %v3860_v16 = vcombine.high %v239_v13, %v239_v13  ;;  %v24361_v13 = vld [vmem:[%s25933_s28 + $0x878] sm:$0xff]  }
  0xb7   : > { %15917 = vmatmul.mubr.bf16.vlgmr.msra.gmra.mxu1 %v3856_v19  ;;  %21919 = vmatprep.subr.bf16.mxu0 %v24267_v20 }
  0xb8   : > { %21940 = vmatpush3.bf16.msra.mxu1 %v24266_v18  ;;  %15996 = vmatprep.mubr.bf16.mxu1 %v3859_v22  ;;  %v24323_v18 = vld [vmem:[%s25933_s28 + $0x688] sm:$0xff]   ;;  %v3875_v19 = vcombine.high %v3867_v15, %v3867_v15  ;;  %v26197_v20 = vrot.slane %v3860_v16, %v25971_v42  ;;  %v24325_v22 = vld [vmem:[%s25933_s28 + $0x600] sm:$0xff]   ;;  %v24364_v16 = vld [vmem:[%s25933_s28 + $0x8b8] sm:$0xff]  }
  0xb9   : > { %21941 = vmatprep.subr.bf16.mxu1 %v24269_v23 }
  0xba   : > { %21920 = vmatpush3.bf16.msra.mxu0 %v24268_v21  ;;  %v24324_v21 = vld [vmem:[%s25933_s28 + $0x640] sm:$0xff]   ;;  %v3897_v23 = vrot.slane %v3875_v19, %v25971_v42  ;;  %v24366_v19 = vld [vmem:[%s25933_s28 + $0x830] sm:$0xff]  }
  0xbb   : > { %21921 = vmatprep.subr.bf16.mxu0 %v24271_v25  ;;  %v24326_v25 = vld [vmem:[%s25933_s28 + $0x6c0] sm:$0xff]  }
  0xbc   : > { %21942 = vmatpush3.bf16.msra.mxu1 %v24270_v24  ;;  %v3876_v24 = vcombine.high %v26197_v20, %v26197_v20 }
  0xbd   : > { %21943 = vmatprep.subr.bf16.mxu1 %v24273_v27  ;;  %v3907_v27 = vcombine.high %v3897_v23, %v3897_v23 }
  0xbe   : > { %21922 = vmatpush3.bf16.msra.mxu0 %v24272_v26  ;;  %v24327_v26 = vld [vmem:[%s25933_s28 + $0x680] sm:$0xff]  }
  0xbf   : > { %21923 = vmatprep.subr.bf16.mxu0 %v24275_v29  ;;  %v24328_v29 = vld [vmem:[%s25933_s28 + $0x778] sm:$0xff]  }
  0xc0   : > { %21944 = vmatpush3.bf16.msra.mxu1 %v24274_v28  ;;  %v3883_v28 = vrot.slane %v3867_v15, %v25971_v42  ;;  %v24363_v15 = vld [vmem:[%s25933_s28 + $0x8f8] sm:$0xff]  }
  0xc1   : > { %21945 = vmatprep.subr.bf16.mxu1 %v24277_v31  ;;  %v3904_v31 = vrot.slane %v3876_v24, %v25971_v42 }
  0xc2   : > { %21924 = vmatpush3.bf16.msra.mxu0 %v24276_v30  ;;  %v24329_v30 = vld [vmem:[%s25933_s28 + $0x738] sm:$0xff]  }
  0xc3   : > { %21925 = vmatprep.subr.bf16.mxu0 %v24279_v33  ;;  %v24331_v33 = vld [vmem:[%s25933_s28 + $0x7b8] sm:$0xff]  }
  0xc4   : > { %21946 = vmatpush3.bf16.msra.mxu1 %v24278_v32  ;;  %v24330_v32 = vld [vmem:[%s25933_s28 + $0x7f8] sm:$0xff]  }
  0xc5   : > { %21947 = vmatprep.subr.bf16.mxu1 %v24281_v35  ;;  %v24332_v35 = vld [vmem:[%s25933_s28 + $0x770] sm:$0xff]  }
  0xc6   : > { %21926 = vmatpush3.bf16.msra.mxu0 %v24280_v34  ;;  %v3905_v34 = vcombine.high %v3883_v28, %v3883_v28 }
  0xc7   : > { %21927 = vmatprep.subr.bf16.mxu0 %v24283_v37  ;;  %v3908_v37 = vcombine.high %v3904_v31, %v3904_v31 }
  0xc8   : > { %21948 = vmatpush3.bf16.msra.mxu1 %v24282_v36  ;;  %v24333_v36 = vld [vmem:[%s25933_s28 + $0x730] sm:$0xff]  }
  0xc9   : > { %21949 = vmatprep.subr.bf16.mxu1 %v24285_v39  ;;  %v24334_v39 = vld [vmem:[%s25933_s28 + $0x7f0] sm:$0xff]  }
  0xca   : > { %21928 = vmatpush3.bf16.msra.mxu0 %v24284_v38 }
  0xcb   : > { %21929 = vmatprep.subr.bf16.mxu0 %v24287_v41 }
  0xcc   : > { %21950 = vmatpush3.bf16.msra.mxu1 %v24286_v40  ;;  %v24335_v40 = vld [vmem:[%s25933_s28 + $0x7b0] sm:$0xff]  }
  0xcd   : > { %21951 = vmatprep.subr.bf16.mxu1 %v24289_v44  ;;  %v24336_v44 = vld [vmem:[%s25933_s28 + $0x768] sm:$0xff]  }
  0xce   : > { %21930 = vmatpush3.bf16.msra.mxu0 %v24288_v43 }
  0xcf   : > { %21931 = vmatprep.subr.bf16.mxu0 %v24291_v46  ;;  %v24337_v46 = vld [vmem:[%s25933_s28 + $0x728] sm:$0xff]  }
  0xd0   : > { %21952 = vmatpush3.bf16.msra.mxu1 %v24290_v45 }
  0xd1   : > { %21953 = vmatprep.subr.bf16.mxu1 %v24293_v48 }
  0xd2   : > { %21932 = vmatpush3.bf16.msra.mxu0 %v24292_v47 }
  0xd3   : > { %21961 = vmatprep.subr.bf16.mxu0 %v24296_v51  ;;  %v24339_v51 = vld [vmem:[%s25933_s28 + $0x7a8] sm:$0xff]  }
  0xd4   : > { %21954 = vmatpush3.bf16.msra.mxu1 %v24295_v49  ;;  %v24338_v49 = vld [vmem:[%s25933_s28 + $0x7e8] sm:$0xff]  }
  0xd5   : > { %15957 = vmatmul.mubr.bf16.vlgmr.msra.gmra.mxu0 %v3841_v50  ;;  %21983 = vmatprep.subr.bf16.mxu1 %v24298_v53  ;;  %v24340_v53 = vld [vmem:[%s25933_s28 + $0x760] sm:$0xff]  }
  0xd6   : > { %21962 = vmatpush3.bf16.msra.mxu0 %v24297_v52  ;;  %16036 = vmatprep.mubr.bf16.mxu0 %v3897_v23 }
  0xd7   : > { %15997 = vmatmul.mubr.bf16.vlgmr.msra.gmra.mxu1 %v3857_v55  ;;  %21963 = vmatprep.subr.bf16.mxu0 %v24300_v56  ;;  %v24341_v56 = vld [vmem:[%s25933_s28 + $0x720] sm:$0xff]  }
  0xd8   : > { %21984 = vmatpush3.bf16.msra.mxu1 %v24299_v54  ;;  %16076 = vmatprep.mubr.bf16.mxu1 %v3907_v27  ;;  %v24370_v27 = vld [vmem:[%s25933_s28 + $0x828] sm:$0xff]  }
  0xd9   : > { %21985 = vmatprep.subr.bf16.mxu1 %v24302_v58 }
  0xda   : > { %21964 = vmatpush3.bf16.msra.mxu0 %v24301_v57  ;;  %v24342_v57 = vld [vmem:[%s25933_s28 + $0x7e0] sm:$0xff]  }
  0xdb   : > { %21965 = vmatprep.subr.bf16.mxu0 %v24304_v60  ;;  %v24344_v60 = vld [vmem:[%s25933_s28 + $0x758] sm:$0xff]  }
  0xdc   : > { %21986 = vmatpush3.bf16.msra.mxu1 %v24303_v59  ;;  %v24343_v59 = vld [vmem:[%s25933_s28 + $0x7a0] sm:$0xff]  }
  0xdd   : > { %21987 = vmatprep.subr.bf16.mxu1 %v24306_v62  ;;  %v24346_v62 = vld [vmem:[%s25933_s28 + $0x7d8] sm:$0xff]  }
  0xde   : > { %21966 = vmatpush3.bf16.msra.mxu0 %v24305_v61  ;;  %v24345_v61 = vld [vmem:[%s25933_s28 + $0x718] sm:$0xff]  }
  0xdf   : > { %21967 = vmatprep.subr.bf16.mxu0 %v24308_v0  ;;  %v24348_v0 = vld [vmem:[%s25933_s28 + $0x750] sm:$0xff]  }
  0xe0   : > { %21988 = vmatpush3.bf16.msra.mxu1 %v24307_v63  ;;  %v24347_v63 = vld [vmem:[%s25933_s28 + $0x798] sm:$0xff]  }
  0xe1   : > { %21989 = vmatprep.subr.bf16.mxu1 %v24310_v2  ;;  %v24350_v2 = vld [vmem:[%s25933_s28 + $0x7d0] sm:$0xff]  }
  0xe2   : > { %21968 = vmatpush3.bf16.msra.mxu0 %v24309_v1  ;;  %v24349_v1 = vld [vmem:[%s25933_s28 + $0x710] sm:$0xff]  }
  0xe3   : > { %21969 = vmatprep.subr.bf16.mxu0 %v24312_v4  ;;  %v24352_v4 = vld [vmem:[%s25933_s28 + $0x748] sm:$0xff]  }
  0xe4   : > { %21990 = vmatpush3.bf16.msra.mxu1 %v24311_v3  ;;  %v24351_v3 = vld [vmem:[%s25933_s28 + $0x790] sm:$0xff]  }
  0xe5   : > { %21991 = vmatprep.subr.bf16.mxu1 %v24314_v6  ;;  %v24354_v6 = vld [vmem:[%s25933_s28 + $0x7c8] sm:$0xff]  }
  0xe6   : > { %21970 = vmatpush3.bf16.msra.mxu0 %v24313_v5  ;;  %v24353_v5 = vld [vmem:[%s25933_s28 + $0x708] sm:$0xff]  }
  0xe7   : > { %21971 = vmatprep.subr.bf16.mxu0 %v24316_v8  ;;  %v24356_v8 = vld [vmem:[%s25933_s28 + $0x740] sm:$0xff]  }
  0xe8   : > { %21992 = vmatpush3.bf16.msra.mxu1 %v24315_v7  ;;  %v24355_v7 = vld [vmem:[%s25933_s28 + $0x788] sm:$0xff]  }
  0xe9   : > { %21993 = vmatprep.subr.bf16.mxu1 %v24318_v10  ;;  %v24358_v10 = vld [vmem:[%s25933_s28 + $0x7c0] sm:$0xff]  }
  0xea   : > { %21972 = vmatpush3.bf16.msra.mxu0 %v24317_v9  ;;  %v24357_v9 = vld [vmem:[%s25933_s28 + $0x700] sm:$0xff]  }
  0xeb   : > { %21973 = vmatprep.subr.bf16.mxu0 %v24320_v12  ;;  %v3890_v12 = vrot.slane %v26197_v20, %v25971_v42  ;;  %v24367_v20 = vld [vmem:[%s25933_s28 + $0x8f0] sm:$0xff]  }
  0xec   : > { %21994 = vmatpush3.bf16.msra.mxu1 %v24319_v11  ;;  %v24360_v11 = vld [vmem:[%s25933_s28 + $0x780] sm:$0xff]  }
  0xed   : > { %21995 = vmatprep.subr.bf16.mxu1 %v24322_v17  ;;  %v3906_v17 = vcombine.high %v3890_v12, %v3890_v12 }
  0xee   : > { %21974 = vmatpush3.bf16.msra.mxu0 %v24321_v14  ;;  %v24362_v14 = vld [vmem:[%s25933_s28 + $0x838] sm:$0xff]  }
  0xef   : > { %21975 = vmatprep.subr.bf16.mxu0 %v24324_v21 }
  0xf0   : > { %21996 = vmatpush3.bf16.msra.mxu1 %v24323_v18  ;;  %v24365_v18 = vld [vmem:[%s25933_s28 + $0x870] sm:$0xff]  }
  0xf1   : > { %21997 = vmatprep.subr.bf16.mxu1 %v24326_v25  ;;  %v24369_v25 = vld [vmem:[%s25933_s28 + $0x868] sm:$0xff]  }
  0xf2   : > { %21976 = vmatpush3.bf16.msra.mxu0 %v24325_v22  ;;  %v24368_v22 = vld [vmem:[%s25933_s28 + $0x8b0] sm:$0xff]  }
  0xf3   : > { %22005 = vmatprep.subr.bf16.mxu0 %v24328_v29 }
  0xf4   : > { %21998 = vmatpush3.bf16.msra.mxu1 %v24327_v26 }
  0xf5   : > { %v21713_v38 = vpop.f32.mrf.mxu0  ;;  %16037 = vmatmul.mubr.bf16.vlgmr.msra.gmra.mxu0 %v3883_v28  ;;  %22027 = vmatprep.subr.bf16.mxu1 %v24330_v32 }
  0xf6   : > { %22006 = vmatpush3.bf16.msra.mxu0 %v24329_v30  ;;  %16116 = vmatprep.mubr.bf16.mxu0 %v3904_v31  ;;  %v21735_v41 = vpop.f32.mrf.mxu1  ;;  %v24371_v30 = vld [vmem:[%s25933_s28 + $0x8e8] sm:$0xff]  }
  0xf7   : > { %v21714_v43 = vpop.f32.mrf.mxu0  ;;  %16077 = vmatmul.mubr.bf16.vlgmr.msra.gmra.mxu1 %v3905_v34  ;;  %22007 = vmatprep.subr.bf16.mxu0 %v24332_v35  ;;  %v24373_v35 = vld [vmem:[%s25933_s28 + $0x860] sm:$0xff]  }
  0xf8   : > { %v21715_v45 = vadd.f32 %v21714_v43, %v21713_v38  ;;  %22028 = vmatpush3.bf16.msra.mxu1 %v24331_v33  ;;  %16156 = vmatprep.mubr.bf16.mxu1 %v3908_v37  ;;  %v21736_v47 = vpop.f32.mrf.mxu1  ;;  %v24372_v33 = vld [vmem:[%s25933_s28 + $0x8a8] sm:$0xff]   ;;  %v24374_v38 = vld [vmem:[%s25933_s28 + $0x820] sm:$0xff]   ;;  %v24377_v43 = vld [vmem:[%s25933_s28 + $0x858] sm:$0xff]  }
  0xf9   : > { %v21716_v48 = vpop.f32.mrf.mxu0  ;;  %22029 = vmatprep.subr.bf16.mxu1 %v24334_v39  ;;  %v21737_v50 = vadd.f32 %v21736_v47, %v21735_v41  ;;  %v24375_v39 = vld [vmem:[%s25933_s28 + $0x8e0] sm:$0xff]   ;;  %v24381_v47 = vld [vmem:[%s25933_s28 + $0x850] sm:$0xff]  }
  0xfa   : > { %22008 = vmatpush3.bf16.msra.mxu0 %v24333_v36  ;;  %v21738_v54 = vpop.f32.mrf.mxu1  ;;  %v24376_v41 = vld [vmem:[%s25933_s28 + $0x8a0] sm:$0xff]   ;;  %v24382_v48 = vld [vmem:[%s25933_s28 + $0x810] sm:$0xff]  }
  0xfb   : > { %v21717_v52 = vpop.f32.mrf.mxu0  ;;  %22009 = vmatprep.subr.bf16.mxu0 %v24336_v44  ;;  %v26221_v55 = vadd.f32 %v21737_v50, %v21715_v45  ;;  %v24378_v44 = vld [vmem:[%s25933_s28 + $0x818] sm:$0xff]   ;;  %v24384_v50 = vld [vmem:[%s25933_s28 + $0x890] sm:$0xff]  }
  0xfc   : > { %22030 = vmatpush3.bf16.msra.mxu1 %v24335_v40  ;;  %v21739_v58 = vpop.f32.mrf.mxu1  ;;  %v24379_v45 = vld [vmem:[%s25933_s28 + $0x8d8] sm:$0xff]   ;;  %v240_v52 = vld [vmem:[%s25928_s25 + $0x20] sm:$0xff] }
  0xfd   : > { %22031 = vmatprep.subr.bf16.mxu1 %v24338_v49  ;;  %v24383_v49 = vld [vmem:[%s25933_s28 + $0x8d0] sm:$0xff]   ;;  %v3916_v54 = vrot.slane %v240_v52, %v25971_v42 }
  0xfe   : > { %22010 = vmatpush3.bf16.msra.mxu0 %v24337_v46  ;;  %v24380_v46 = vld [vmem:[%s25933_s28 + $0x898] sm:$0xff]  }
  0xff   : > { %22011 = vmatprep.subr.bf16.mxu0 %v24340_v53  ;;  %v24386_v53 = vld [vmem:[%s25933_s28 + $0x808] sm:$0xff]   ;;  %v3924_v58 = vcombine.high %v3916_v54, %v3916_v54 }
 0x100   : > { %22032 = vmatpush3.bf16.msra.mxu1 %v24339_v51  ;;  %v24385_v51 = vld [vmem:[%s25933_s28 + $0x848] sm:$0xff]  }
 0x101   : > { %22033 = vmatprep.subr.bf16.mxu1 %v24342_v57  ;;  %v24388_v57 = vld [vmem:[%s25933_s28 + $0x888] sm:$0xff]  }
 0x102   : > { %22012 = vmatpush3.bf16.msra.mxu0 %v24341_v56  ;;  %v24387_v56 = vld [vmem:[%s25933_s28 + $0x8c8] sm:$0xff]  }
 0x103   : > { %22013 = vmatprep.subr.bf16.mxu0 %v24344_v60  ;;  %v24389_v60 = vld [vmem:[%s25933_s28 + $0x840] sm:$0xff]  }
 0x104   : > { %22034 = vmatpush3.bf16.msra.mxu1 %v24343_v59 }
 0x105   : > { %22035 = vmatprep.subr.bf16.mxu1 %v24346_v62  ;;  %v3946_v62 = vrot.slane %v3924_v58, %v25971_v42  ;;  %v24430_v58 = vld [vmem:[%s25933_s28 + $0xa70] sm:$0xff]  }
 0x106   : > { %22014 = vmatpush3.bf16.msra.mxu0 %v24345_v61  ;;  %v24390_v61 = vld [vmem:[%s25933_s28 + $0x800] sm:$0xff]  }
 0x107   : > { %22015 = vmatprep.subr.bf16.mxu0 %v24348_v0  ;;  %v24391_v0 = vld [vmem:[%s25933_s28 + $0x8c0] sm:$0xff]  }
 0x108   : > { %22036 = vmatpush3.bf16.msra.mxu1 %v24347_v63 }
 0x109   : > { %22037 = vmatprep.subr.bf16.mxu1 %v24350_v2  ;;  %v3956_v2 = vcombine.high %v3946_v62, %v3946_v62 }
 0x10a   : > { %22016 = vmatpush3.bf16.msra.mxu0 %v24349_v1  ;;  %v24392_v1 = vld [vmem:[%s25933_s28 + $0x880] sm:$0xff]  }
 0x10b   : > { %22017 = vmatprep.subr.bf16.mxu0 %v24352_v4  ;;  %v24393_v4 = vld [vmem:[%s25933_s28 + $0x978] sm:$0xff]  }
 0x10c   : > { %22038 = vmatpush3.bf16.msra.mxu1 %v24351_v3  ;;  %v3932_v3 = vrot.slane %v3916_v54, %v25971_v42  ;;  %v24427_v54 = vld [vmem:[%s25933_s28 + $0xa38] sm:$0xff]  }
 0x10d   : > { %22039 = vmatprep.subr.bf16.mxu1 %v24354_v6 }
 0x10e   : > { %22018 = vmatpush3.bf16.msra.mxu0 %v24353_v5  ;;  %v24394_v5 = vld [vmem:[%s25933_s28 + $0x938] sm:$0xff]  }
 0x10f   : > { %22019 = vmatprep.subr.bf16.mxu0 %v24356_v8  ;;  %v24396_v8 = vld [vmem:[%s25933_s28 + $0x9b8] sm:$0xff]  }
 0x110   : > { %22040 = vmatpush3.bf16.msra.mxu1 %v24355_v7  ;;  %v24395_v7 = vld [vmem:[%s25933_s28 + $0x9f8] sm:$0xff]  }
 0x111   : > { %22041 = vmatprep.subr.bf16.mxu1 %v24358_v10  ;;  %v24397_v10 = vld [vmem:[%s25933_s28 + $0x970] sm:$0xff]  }
 0x112   : > { %22020 = vmatpush3.bf16.msra.mxu0 %v24357_v9  ;;  %v3954_v9 = vcombine.high %v3932_v3, %v3932_v3 }
 0x113   : > { %22049 = vmatprep.subr.bf16.mxu0 %v24361_v13 }
 0x114   : > { %22042 = vmatpush3.bf16.msra.mxu1 %v24360_v11  ;;  %v24398_v11 = vld [vmem:[%s25933_s28 + $0x930] sm:$0xff]  }
 0x115   : > { %v21757_v21 = vpop.f32.mrf.mxu0  ;;  %16117 = vmatmul.mubr.bf16.vlgmr.msra.gmra.mxu0 %v3890_v12  ;;  %22071 = vmatprep.subr.bf16.mxu1 %v24363_v15  ;;  %v24400_v15 = vld [vmem:[%s25933_s28 + $0x9b0] sm:$0xff]  }
 0x116   : > { %22050 = vmatpush3.bf16.msra.mxu0 %v24362_v14  ;;  %v21779_v24 = vpop.f32.mrf.mxu1  ;;  %16196 = vmatprep.mubr.bf16.mxu0 %v3946_v62  ;;  %v24399_v14 = vld [vmem:[%s25933_s28 + $0x9f0] sm:$0xff]  }
 0x117   : > { %v21758_v23 = vpop.f32.mrf.mxu0  ;;  %16157 = vmatmul.mubr.bf16.vlgmr.msra.gmra.mxu1 %v3906_v17  ;;  %22051 = vmatprep.subr.bf16.mxu0 %v24365_v18  ;;  %v24401_v18 = vld [vmem:[%s25933_s28 + $0x968] sm:$0xff]   ;;  %v24433_v62 = vld [vmem:[%s25933_s28 + $0xab0] sm:$0xff]  }
 0x118   : > { %v21759_v26 = vadd.f32 %v21758_v23, %v21757_v21  ;;  %22072 = vmatpush3.bf16.msra.mxu1 %v24364_v16  ;;  %v21780_v29 = vpop.f32.mrf.mxu1  ;;  %16236 = vmatprep.mubr.bf16.mxu1 %v3956_v2  ;;  %v24402_v21 = vld [vmem:[%s25933_s28 + $0x928] sm:$0xff]  }
 0x119   : > { %v21760_v28 = vpop.f32.mrf.mxu0  ;;  %22073 = vmatprep.subr.bf16.mxu1 %v24367_v20  ;;  %v21781_v32 = vadd.f32 %v21780_v29, %v21779_v24  ;;  %v24403_v23 = vld [vmem:[%s25933_s28 + $0x9e8] sm:$0xff]  }
 0x11a   : > { %v15639_v31 = vadd.f32 %v21759_v26, %v26221_v55  ;;  %22052 = vmatpush3.bf16.msra.mxu0 %v24366_v19  ;;  %v21782_v36 = vpop.f32.mrf.mxu1  ;;  %v3909_v55 = vcombine.high %v240_v52, %v240_v52  ;;  %v24404_v26 = vld [vmem:[%s25933_s28 + $0x9a8] sm:$0xff]   ;;  %v24405_v28 = vld [vmem:[%s25933_s28 + $0x960] sm:$0xff]  }
 0x11b   : > { %v21761_v34 = vpop.f32.mrf.mxu0  ;;  %22053 = vmatprep.subr.bf16.mxu0 %v24369_v25  ;;  %v24410_v36 = vld [vmem:[%s25933_s28 + $0x918] sm:$0xff]  }
 0x11c   : > { %v26258_v37 = vadd.f32 %v21781_v32, %v15639_v31  ;;  %22074 = vmatpush3.bf16.msra.mxu1 %v24368_v22  ;;  %v21783_v40 = vpop.f32.mrf.mxu1  ;;  %v26278_v59 = vrot.slane %v3909_v55, %v25971_v42  ;;  %v24406_v31 = vld [vmem:[%s25933_s28 + $0x920] sm:$0xff]   ;;  %v24428_v55 = vld [vmem:[%s25933_s28 + $0xaf8] sm:$0xff]  }
 0x11d   : > { %22075 = vmatprep.subr.bf16.mxu1 %v24371_v30  ;;  %v24407_v32 = vld [vmem:[%s25933_s28 + $0x9e0] sm:$0xff]   ;;  %v24414_v40 = vld [vmem:[%s25933_s28 + $0x910] sm:$0xff]  }
 0x11e   : > { %22054 = vmatpush3.bf16.msra.mxu0 %v24370_v27  ;;  %v3925_v63 = vcombine.high %v26278_v59, %v26278_v59  ;;  %v24408_v34 = vld [vmem:[%s25933_s28 + $0x9a0] sm:$0xff]   ;;  %v3939_v52 = vrot.slane %v26278_v59, %v25971_v42  ;;  %v24432_v59 = vld [vmem:[%s25933_s28 + $0xaf0] sm:$0xff]  }
 0x11f   : > { %22055 = vmatprep.subr.bf16.mxu0 %v24373_v35  ;;  %v24409_v35 = vld [vmem:[%s25933_s28 + $0x958] sm:$0xff]  }
 0x120   : > { %22076 = vmatpush3.bf16.msra.mxu1 %v24372_v33  ;;  %v3953_v6 = vrot.slane %v3925_v63, %v25971_v42 }
 0x121   : > { %22077 = vmatprep.subr.bf16.mxu1 %v24375_v39  ;;  %v24413_v39 = vld [vmem:[%s25933_s28 + $0x950] sm:$0xff]  }
 0x122   : > { %22056 = vmatpush3.bf16.msra.mxu0 %v24374_v38  ;;  %v3957_v12 = vcombine.high %v3953_v6, %v3953_v6  ;;  %v24412_v38 = vld [vmem:[%s25933_s28 + $0x998] sm:$0xff]  }
 0x123   : > { %22057 = vmatprep.subr.bf16.mxu0 %v24377_v43  ;;  %v24416_v43 = vld [vmem:[%s25933_s28 + $0x990] sm:$0xff]  }
 0x124   : > { %22078 = vmatpush3.bf16.msra.mxu1 %v24376_v41  ;;  %v24415_v41 = vld [vmem:[%s25933_s28 + $0x9d0] sm:$0xff]  }
 0x125   : > { %22079 = vmatprep.subr.bf16.mxu1 %v24379_v45  ;;  %v24418_v45 = vld [vmem:[%s25933_s28 + $0x908] sm:$0xff]  }
 0x126   : > { %22058 = vmatpush3.bf16.msra.mxu0 %v24378_v44  ;;  %v24417_v44 = vld [vmem:[%s25933_s28 + $0x948] sm:$0xff]  }
 0x127   : > { %22059 = vmatprep.subr.bf16.mxu0 %v24381_v47  ;;  %v24420_v47 = vld [vmem:[%s25933_s28 + $0x988] sm:$0xff]  }
 0x128   : > { %22080 = vmatpush3.bf16.msra.mxu1 %v24380_v46  ;;  %v24419_v46 = vld [vmem:[%s25933_s28 + $0x9c8] sm:$0xff]  }
 0x129   : > { %22081 = vmatprep.subr.bf16.mxu1 %v24383_v49  ;;  %v24422_v49 = vld [vmem:[%s25933_s28 + $0x900] sm:$0xff]  }
 0x12a   : > { %22060 = vmatpush3.bf16.msra.mxu0 %v24382_v48  ;;  %v24421_v48 = vld [vmem:[%s25933_s28 + $0x940] sm:$0xff]  }
 0x12b   : > { %22061 = vmatprep.subr.bf16.mxu0 %v24385_v51  ;;  %v24425_v51 = vld [vmem:[%s25933_s28 + $0x980] sm:$0xff]  }
 0x12c   : > { %22082 = vmatpush3.bf16.msra.mxu1 %v24384_v50  ;;  %v24423_v50 = vld [vmem:[%s25933_s28 + $0x9c0] sm:$0xff]  }
 0x12d   : > { %22083 = vmatprep.subr.bf16.mxu1 %v24387_v56  ;;  %v24429_v56 = vld [vmem:[%s25933_s28 + $0xab8] sm:$0xff]  }
 0x12e   : > { %22062 = vmatpush3.bf16.msra.mxu0 %v24386_v53  ;;  %v24426_v53 = vld [vmem:[%s25933_s28 + $0xa78] sm:$0xff]  }
 0x12f   : > { %22063 = vmatprep.subr.bf16.mxu0 %v24389_v60  ;;  %v24431_v60 = vld [vmem:[%s25933_s28 + $0xa30] sm:$0xff]  }
 0x130   : > { %22084 = vmatpush3.bf16.msra.mxu1 %v24388_v57  ;;  %v3955_v57 = vcombine.high %v3939_v52, %v3939_v52 }
 0x131   : > { %22085 = vmatprep.subr.bf16.mxu1 %v24391_v0 }
 0x132   : > { %22064 = vmatpush3.bf16.msra.mxu0 %v24390_v61 }
 0x133   : > { %22093 = vmatprep.subr.bf16.mxu0 %v24393_v4 }
 0x134   : > { %22086 = vmatpush3.bf16.msra.mxu1 %v24392_v1  ;;  %v24434_v1 = vld [vmem:[%s25933_s28 + $0xa68] sm:$0xff]  }
 0x135   : > { %v21801_v13 = vpop.f32.mrf.mxu0  ;;  %16197 = vmatmul.mubr.bf16.vlgmr.msra.gmra.mxu0 %v3932_v3  ;;  %22115 = vmatprep.subr.bf16.mxu1 %v24395_v7  ;;  %v24435_v3 = vld [vmem:[%s25933_s28 + $0xa28] sm:$0xff]  }
 0x136   : > { %22094 = vmatpush3.bf16.msra.mxu0 %v24394_v5  ;;  %16276 = vmatprep.mubr.bf16.mxu0 %v3953_v6  ;;  %v24436_v6 = vld [vmem:[%s25933_s28 + $0xae8] sm:$0xff]  }
 0x137   : > { %v21802_v16 = vpop.f32.mrf.mxu0  ;;  %v21823_v17 = vpop.f32.mrf.mxu1  ;;  %16237 = vmatmul.mubr.bf16.vlgmr.msra.gmra.mxu1 %v3954_v9  ;;  %22095 = vmatprep.subr.bf16.mxu0 %v24397_v10  ;;  %v24437_v9 = vld [vmem:[%s25933_s28 + $0xaa8] sm:$0xff]  }
 0x138   : > { %v21803_v19 = vadd.f32 %v21802_v16, %v21801_v13  ;;  %22116 = vmatpush3.bf16.msra.mxu1 %v24396_v8  ;;  %16316 = vmatprep.mubr.bf16.mxu1 %v3957_v12 }
 0x139   : > { %v21804_v20 = vpop.f32.mrf.mxu0  ;;  %v21824_v22 = vpop.f32.mrf.mxu1  ;;  %22117 = vmatprep.subr.bf16.mxu1 %v24399_v14  ;;  %v24439_v14 = vld [vmem:[%s25933_s28 + $0xa20] sm:$0xff]  }
 0x13a   : > { %v15719_v24 = vadd.f32 %v21803_v19, %v26258_v37  ;;  %v21825_v25 = vadd.f32 %v21824_v22, %v21823_v17  ;;  %22096 = vmatpush3.bf16.msra.mxu0 %v24398_v11  ;;  %v24411_v37 = vld [vmem:[%s25933_s28 + $0x9d8] sm:$0xff]   ;;  %v24438_v11 = vld [vmem:[%s25933_s28 + $0xa60] sm:$0xff]   ;;  %v24446_v22 = vld [vmem:[%s25933_s28 + $0xa50] sm:$0xff]  }
 0x13b   : > { %v21805_v27 = vpop.f32.mrf.mxu0  ;;  %22097 = vmatprep.subr.bf16.mxu0 %v24401_v18  ;;  %v21826_v29 = vpop.f32.mrf.mxu1  ;;  %v24441_v17 = vld [vmem:[%s25933_s28 + $0xaa0] sm:$0xff]   ;;  %v24442_v18 = vld [vmem:[%s25933_s28 + $0xa58] sm:$0xff]  }
 0x13c   : > { %v26303_v30 = vadd.f32 %v21825_v25, %v15719_v24  ;;  %22118 = vmatpush3.bf16.msra.mxu1 %v24400_v15  ;;  %v24440_v15 = vld [vmem:[%s25933_s28 + $0xae0] sm:$0xff]   ;;  %v24443_v19 = vld [vmem:[%s25933_s28 + $0xa18] sm:$0xff]   ;;  %v24448_v24 = vld [vmem:[%s25933_s28 + $0xad0] sm:$0xff]  }
 0x13d   : > { %22119 = vmatprep.subr.bf16.mxu1 %v24403_v23  ;;  %v21827_v33 = vpop.f32.mrf.mxu1  ;;  %v24445_v20 = vld [vmem:[%s25933_s28 + $0xa98] sm:$0xff]   ;;  %v24447_v23 = vld [vmem:[%s25933_s28 + $0xa10] sm:$0xff]   ;;  %v241_v27 = vld [vmem:[%s25928_s25 + $0x28] sm:$0xff] }
 0x13e   : > { %22098 = vmatpush3.bf16.msra.mxu0 %v24402_v21  ;;  %v24444_v21 = vld [vmem:[%s25933_s28 + $0xad8] sm:$0xff]   ;;  %v24449_v25 = vld [vmem:[%s25933_s28 + $0xa90] sm:$0xff]   ;;  %v3965_v29 = vrot.slane %v241_v27, %v25971_v42 }
 0x13f   : > { %22099 = vmatprep.subr.bf16.mxu0 %v24405_v28  ;;  %v24451_v28 = vld [vmem:[%s25933_s28 + $0xa08] sm:$0xff]  }
 0x140   : > { %22120 = vmatpush3.bf16.msra.mxu1 %v24404_v26  ;;  %v24450_v26 = vld [vmem:[%s25933_s28 + $0xa48] sm:$0xff]   ;;  %v3973_v33 = vcombine.high %v3965_v29, %v3965_v29 }
 0x141   : > { %22121 = vmatprep.subr.bf16.mxu1 %v24407_v32  ;;  %v24453_v32 = vld [vmem:[%s25933_s28 + $0xa88] sm:$0xff]  }
 0x142   : > { %22100 = vmatpush3.bf16.msra.mxu0 %v24406_v31  ;;  %v24452_v31 = vld [vmem:[%s25933_s28 + $0xac8] sm:$0xff]  }
 0x143   : > { %22101 = vmatprep.subr.bf16.mxu0 %v24409_v35  ;;  %v24454_v35 = vld [vmem:[%s25933_s28 + $0xa40] sm:$0xff]  }
 0x144   : > { %22122 = vmatpush3.bf16.msra.mxu1 %v24408_v34 }
 0x145   : > { %22123 = vmatprep.subr.bf16.mxu1 %v24411_v37  ;;  %v3995_v37 = vrot.slane %v3973_v33, %v25971_v42  ;;  %v24495_v33 = vld [vmem:[%s25933_s28 + $0xc70] sm:$0xff]  }
 0x146   : > { %22102 = vmatpush3.bf16.msra.mxu0 %v24410_v36  ;;  %v24455_v36 = vld [vmem:[%s25933_s28 + $0xa00] sm:$0xff]  }
 0x147   : > { %22103 = vmatprep.subr.bf16.mxu0 %v24413_v39  ;;  %v24456_v39 = vld [vmem:[%s25933_s28 + $0xac0] sm:$0xff]  }
 0x148   : > { %22124 = vmatpush3.bf16.msra.mxu1 %v24412_v38 }
 0x149   : > { %22125 = vmatprep.subr.bf16.mxu1 %v24415_v41  ;;  %v4005_v41 = vcombine.high %v3995_v37, %v3995_v37 }
 0x14a   : > { %22104 = vmatpush3.bf16.msra.mxu0 %v24414_v40  ;;  %v24457_v40 = vld [vmem:[%s25933_s28 + $0xa80] sm:$0xff]  }
 0x14b   : > { %22105 = vmatprep.subr.bf16.mxu0 %v24417_v44  ;;  %v24458_v44 = vld [vmem:[%s25933_s28 + $0xb78] sm:$0xff]  }
 0x14c   : > { %22126 = vmatpush3.bf16.msra.mxu1 %v24416_v43  ;;  %v3981_v43 = vrot.slane %v3965_v29, %v25971_v42  ;;  %v24492_v29 = vld [vmem:[%s25933_s28 + $0xc38] sm:$0xff]  }
 0x14d   : > { %22127 = vmatprep.subr.bf16.mxu1 %v24419_v46 }
 0x14e   : > { %22106 = vmatpush3.bf16.msra.mxu0 %v24418_v45  ;;  %v24459_v45 = vld [vmem:[%s25933_s28 + $0xb38] sm:$0xff]  }
 0x14f   : > { %22107 = vmatprep.subr.bf16.mxu0 %v24421_v48  ;;  %v24461_v48 = vld [vmem:[%s25933_s28 + $0xbb8] sm:$0xff]  }
 0x150   : > { %22128 = vmatpush3.bf16.msra.mxu1 %v24420_v47  ;;  %v24460_v47 = vld [vmem:[%s25933_s28 + $0xbf8] sm:$0xff]  }
 0x151   : > { %22129 = vmatprep.subr.bf16.mxu1 %v24423_v50  ;;  %v24462_v50 = vld [vmem:[%s25933_s28 + $0xb70] sm:$0xff]  }
 0x152   : > { %22108 = vmatpush3.bf16.msra.mxu0 %v24422_v49  ;;  %v4003_v49 = vcombine.high %v3981_v43, %v3981_v43 }
 0x153   : > { %22137 = vmatprep.subr.bf16.mxu0 %v24426_v53 }
 0x154   : > { %22130 = vmatpush3.bf16.msra.mxu1 %v24425_v51  ;;  %v24463_v51 = vld [vmem:[%s25933_s28 + $0xb30] sm:$0xff]  }
 0x155   : > { %v21845_v61 = vpop.f32.mrf.mxu0  ;;  %16277 = vmatmul.mubr.bf16.vlgmr.msra.gmra.mxu0 %v3939_v52  ;;  %22159 = vmatprep.subr.bf16.mxu1 %v24428_v55  ;;  %v24465_v55 = vld [vmem:[%s25933_s28 + $0xbb0] sm:$0xff]  }
 0x156   : > { %22138 = vmatpush3.bf16.msra.mxu0 %v24427_v54  ;;  %16356 = vmatprep.mubr.bf16.mxu0 %v3995_v37  ;;  %v24464_v54 = vld [vmem:[%s25933_s28 + $0xbf0] sm:$0xff]  }
 0x157   : > { %v21846_v63 = vpop.f32.mrf.mxu0  ;;  %v21867_v0 = vpop.f32.mrf.mxu1  ;;  %16317 = vmatmul.mubr.bf16.vlgmr.msra.gmra.mxu1 %v3955_v57  ;;  %22139 = vmatprep.subr.bf16.mxu0 %v24430_v58  ;;  %v24466_v58 = vld [vmem:[%s25933_s28 + $0xb68] sm:$0xff]   ;;  %v24498_v37 = vld [vmem:[%s25933_s28 + $0xcb0] sm:$0xff]  }
 0x158   : > { %v21847_v2 = vadd.f32 %v21846_v63, %v21845_v61  ;;  %22160 = vmatpush3.bf16.msra.mxu1 %v24429_v56  ;;  %16396 = vmatprep.mubr.bf16.mxu1 %v4005_v41  ;;  %v24467_v61 = vld [vmem:[%s25933_s28 + $0xb28] sm:$0xff]  }
 0x159   : > { %v21848_v4 = vpop.f32.mrf.mxu0  ;;  %v21868_v5 = vpop.f32.mrf.mxu1  ;;  %22161 = vmatprep.subr.bf16.mxu1 %v24432_v59  ;;  %v24468_v63 = vld [vmem:[%s25933_s28 + $0xbe8] sm:$0xff]  }
 0x15a   : > { %v15799_v7 = vadd.f32 %v21847_v2, %v26303_v30  ;;  %v21869_v8 = vadd.f32 %v21868_v5, %v21867_v0  ;;  %22140 = vmatpush3.bf16.msra.mxu0 %v24431_v60  ;;  %v3958_v30 = vcombine.high %v241_v27, %v241_v27  ;;  %v24469_v2 = vld [vmem:[%s25933_s28 + $0xba8] sm:$0xff]   ;;  %v24470_v4 = vld [vmem:[%s25933_s28 + $0xb60] sm:$0xff]  }
 0x15b   : > { %v21849_v10 = vpop.f32.mrf.mxu0  ;;  %22141 = vmatprep.subr.bf16.mxu0 %v24434_v1  ;;  %v21870_v12 = vpop.f32.mrf.mxu1 }
 0x15c   : > { %v26340_v13 = vadd.f32 %v21869_v8, %v15799_v7  ;;  %22162 = vmatpush3.bf16.msra.mxu1 %v24433_v62  ;;  %v26360_v34 = vrot.slane %v3958_v30, %v25971_v42  ;;  %v24471_v7 = vld [vmem:[%s25933_s28 + $0xb20] sm:$0xff]   ;;  %v24475_v12 = vld [vmem:[%s25933_s28 + $0xb18] sm:$0xff]  }
 0x15d   : > { %22163 = vmatprep.subr.bf16.mxu1 %v24436_v6  ;;  %v21871_v16 = vpop.f32.mrf.mxu1  ;;  %v24472_v8 = vld [vmem:[%s25933_s28 + $0xbe0] sm:$0xff]   ;;  %v24493_v30 = vld [vmem:[%s25933_s28 + $0xcf8] sm:$0xff]  }
 0x15e   : > { %22142 = vmatpush3.bf16.msra.mxu0 %v24435_v3  ;;  %v3974_v38 = vcombine.high %v26360_v34, %v26360_v34  ;;  %v24473_v10 = vld [vmem:[%s25933_s28 + $0xba0] sm:$0xff]   ;;  %v24479_v16 = vld [vmem:[%s25933_s28 + $0xb10] sm:$0xff]   ;;  %v3988_v27 = vrot.slane %v26360_v34, %v25971_v42 }
 0x15f   : > { %22143 = vmatprep.subr.bf16.mxu0 %v24438_v11  ;;  %v24474_v11 = vld [vmem:[%s25933_s28 + $0xb58] sm:$0xff]   ;;  %v24497_v34 = vld [vmem:[%s25933_s28 + $0xcf0] sm:$0xff]  }
 0x160   : > { %22164 = vmatpush3.bf16.msra.mxu1 %v24437_v9  ;;  %v4002_v46 = vrot.slane %v3974_v38, %v25971_v42 }
 0x161   : > { %22165 = vmatprep.subr.bf16.mxu1 %v24440_v15  ;;  %v24478_v15 = vld [vmem:[%s25933_s28 + $0xb50] sm:$0xff]  }
 0x162   : > { %22144 = vmatpush3.bf16.msra.mxu0 %v24439_v14  ;;  %v4006_v52 = vcombine.high %v4002_v46, %v4002_v46  ;;  %v24477_v14 = vld [vmem:[%s25933_s28 + $0xb98] sm:$0xff]  }
 0x163   : > { %22145 = vmatprep.subr.bf16.mxu0 %v24442_v18  ;;  %v24481_v18 = vld [vmem:[%s25933_s28 + $0xb90] sm:$0xff]  }
 0x164   : > { %22166 = vmatpush3.bf16.msra.mxu1 %v24441_v17  ;;  %v24480_v17 = vld [vmem:[%s25933_s28 + $0xbd0] sm:$0xff]  }
 0x165   : > { %22167 = vmatprep.subr.bf16.mxu1 %v24444_v21  ;;  %v24483_v21 = vld [vmem:[%s25933_s28 + $0xb08] sm:$0xff]  }
 0x166   : > { %22146 = vmatpush3.bf16.msra.mxu0 %v24443_v19  ;;  %v24482_v19 = vld [vmem:[%s25933_s28 + $0xb48] sm:$0xff]  }
 0x167   : > { %22147 = vmatprep.subr.bf16.mxu0 %v24446_v22  ;;  %v24485_v22 = vld [vmem:[%s25933_s28 + $0xb88] sm:$0xff]  }
 0x168   : > { %22168 = vmatpush3.bf16.msra.mxu1 %v24445_v20  ;;  %v24484_v20 = vld [vmem:[%s25933_s28 + $0xbc8] sm:$0xff]  }
 0x169   : > { %22169 = vmatprep.subr.bf16.mxu1 %v24448_v24  ;;  %v24487_v24 = vld [vmem:[%s25933_s28 + $0xb00] sm:$0xff]  }
 0x16a   : > { %22148 = vmatpush3.bf16.msra.mxu0 %v24447_v23  ;;  %v24486_v23 = vld [vmem:[%s25933_s28 + $0xb40] sm:$0xff]  }
 0x16b   : > { %22149 = vmatprep.subr.bf16.mxu0 %v24450_v26  ;;  %v24490_v26 = vld [vmem:[%s25933_s28 + $0xb80] sm:$0xff]  }
 0x16c   : > { %22170 = vmatpush3.bf16.msra.mxu1 %v24449_v25  ;;  %v24488_v25 = vld [vmem:[%s25933_s28 + $0xbc0] sm:$0xff]  }
 0x16d   : > { %22171 = vmatprep.subr.bf16.mxu1 %v24452_v31  ;;  %v24494_v31 = vld [vmem:[%s25933_s28 + $0xcb8] sm:$0xff]  }
 0x16e   : > { %22150 = vmatpush3.bf16.msra.mxu0 %v24451_v28  ;;  %v24491_v28 = vld [vmem:[%s25933_s28 + $0xc78] sm:$0xff]  }
 0x16f   : > { %22151 = vmatprep.subr.bf16.mxu0 %v24454_v35  ;;  %v24496_v35 = vld [vmem:[%s25933_s28 + $0xc30] sm:$0xff]  }
 0x170   : > { %22172 = vmatpush3.bf16.msra.mxu1 %v24453_v32  ;;  %v4004_v32 = vcombine.high %v3988_v27, %v3988_v27 }
 0x171   : > { %22173 = vmatprep.subr.bf16.mxu1 %v24456_v39 }
 0x172   : > { %22152 = vmatpush3.bf16.msra.mxu0 %v24455_v36 }
 0x173   : > { %22181 = vmatprep.subr.bf16.mxu0 %v24458_v44 }
 0x174   : > { %22174 = vmatpush3.bf16.msra.mxu1 %v24457_v40  ;;  %v24499_v40 = vld [vmem:[%s25933_s28 + $0xc68] sm:$0xff]  }
 0x175   : > { %v21889_v53 = vpop.f32.mrf.mxu0  ;;  %16357 = vmatmul.mubr.bf16.vlgmr.msra.gmra.mxu0 %v3981_v43  ;;  %22203 = vmatprep.subr.bf16.mxu1 %v24460_v47  ;;  %v24500_v43 = vld [vmem:[%s25933_s28 + $0xc28] sm:$0xff]  }
 0x176   : > { %22182 = vmatpush3.bf16.msra.mxu0 %v24459_v45  ;;  %16436 = vmatprep.mubr.bf16.mxu0 %v4002_v46  ;;  %v24501_v46 = vld [vmem:[%s25933_s28 + $0xce8] sm:$0xff]  }
 0x177   : > { %v21890_v56 = vpop.f32.mrf.mxu0  ;;  %v21911_v57 = vpop.f32.mrf.mxu1  ;;  %16397 = vmatmul.mubr.bf16.vlgmr.msra.gmra.mxu1 %v4003_v49  ;;  %22183 = vmatprep.subr.bf16.mxu0 %v24462_v50  ;;  %v24502_v49 = vld [vmem:[%s25933_s28 + $0xca8] sm:$0xff]  }
 0x178   : > { %v21891_v60 = vadd.f32 %v21890_v56, %v21889_v53  ;;  %22204 = vmatpush3.bf16.msra.mxu1 %v24461_v48  ;;  %16476 = vmatprep.mubr.bf16.mxu1 %v4006_v52 }
 0x179   : > { %v21892_v59 = vpop.f32.mrf.mxu0  ;;  %v21912_v62 = vpop.f32.mrf.mxu1  ;;  %22205 = vmatprep.subr.bf16.mxu1 %v24464_v54  ;;  %v24504_v54 = vld [vmem:[%s25933_s28 + $0xc20] sm:$0xff]  }
 0x17a   : > { %v15879_v0 = vadd.f32 %v21891_v60, %v26340_v13  ;;  %v21913_v1 = vadd.f32 %v21912_v62, %v21911_v57  ;;  %22184 = vmatpush3.bf16.msra.mxu0 %v24463_v51  ;;  %v24476_v13 = vld [vmem:[%s25933_s28 + $0xbd8] sm:$0xff]   ;;  %v24503_v51 = vld [vmem:[%s25933_s28 + $0xc60] sm:$0xff]   ;;  %v24511_v62 = vld [vmem:[%s25933_s28 + $0xc50] sm:$0xff]  }
 0x17b   : > { %v21893_v3 = vpop.f32.mrf.mxu0  ;;  %22185 = vmatprep.subr.bf16.mxu0 %v24466_v58  ;;  %v21914_v5 = vpop.f32.mrf.mxu1  ;;  %v24506_v57 = vld [vmem:[%s25933_s28 + $0xca0] sm:$0xff]   ;;  %v24507_v58 = vld [vmem:[%s25933_s28 + $0xc58] sm:$0xff]  }
 0x17c   : > { %v26385_v6 = vadd.f32 %v21913_v1, %v15879_v0  ;;  %22206 = vmatpush3.bf16.msra.mxu1 %v24465_v55  ;;  %v24505_v55 = vld [vmem:[%s25933_s28 + $0xce0] sm:$0xff]   ;;  %v24508_v60 = vld [vmem:[%s25933_s28 + $0xc18] sm:$0xff]   ;;  %v24513_v0 = vld [vmem:[%s25933_s28 + $0xcd0] sm:$0xff]  }
 0x17d   : > { %22207 = vmatprep.subr.bf16.mxu1 %v24468_v63  ;;  %v21915_v9 = vpop.f32.mrf.mxu1  ;;  %v24510_v59 = vld [vmem:[%s25933_s28 + $0xc98] sm:$0xff]   ;;  %v24512_v63 = vld [vmem:[%s25933_s28 + $0xc10] sm:$0xff]   ;;  %v24516_v3 = vld [vmem:[%s25933_s28 + $0xc08] sm:$0xff]  }
 0x17e   : > { %22186 = vmatpush3.bf16.msra.mxu0 %v24467_v61  ;;  %v24509_v61 = vld [vmem:[%s25933_s28 + $0xcd8] sm:$0xff]   ;;  %v24514_v1 = vld [vmem:[%s25933_s28 + $0xc90] sm:$0xff]   ;;  %v24517_v5 = vld [vmem:[%s25933_s28 + $0xcc8] sm:$0xff]  }
 0x17f   : > { %22187 = vmatprep.subr.bf16.mxu0 %v24470_v4  ;;  %v242_v4 = vld [vmem:[%s25928_s25 + $0x30] sm:$0xff]  ;;  %v24519_v9 = vld [vmem:[%s25933_s28 + $0xc40] sm:$0xff]  }
 0x180   : > { %22208 = vmatpush3.bf16.msra.mxu1 %v24469_v2  ;;  %v24515_v2 = vld [vmem:[%s25933_s28 + $0xc48] sm:$0xff]  }
 0x181   : > { %22209 = vmatprep.subr.bf16.mxu1 %v24472_v8  ;;  %v24518_v8 = vld [vmem:[%s25933_s28 + $0xc88] sm:$0xff]  }
 0x182   : > { %22188 = vmatpush3.bf16.msra.mxu0 %v24471_v7  ;;  %v4007_v7 = vcombine.high %v242_v4, %v242_v4 }
 0x183   : > { %22189 = vmatprep.subr.bf16.mxu0 %v24474_v11 }
 0x184   : > { %22210 = vmatpush3.bf16.msra.mxu1 %v24473_v10  ;;  %v26443_v11 = vrot.slane %v4007_v7, %v25971_v42  ;;  %v24559_v7 = vld [vmem:[%s25933_s28 + $0xeb8] sm:$0xff]  }
 0x185   : > { %22211 = vmatprep.subr.bf16.mxu1 %v24476_v13  ;;  %v24521_v13 = vld [vmem:[%s25933_s28 + $0xcc0] sm:$0xff]  }
 0x186   : > { %22190 = vmatpush3.bf16.msra.mxu0 %v24475_v12  ;;  %v24520_v12 = vld [vmem:[%s25933_s28 + $0xc00] sm:$0xff]  }
 0x187   : > { %22191 = vmatprep.subr.bf16.mxu0 %v24478_v15  ;;  %v4023_v15 = vcombine.high %v26443_v11, %v26443_v11 }
 0x188   : > { %22212 = vmatpush3.bf16.msra.mxu1 %v24477_v14 }
 0x189   : > { %22213 = vmatprep.subr.bf16.mxu1 %v24480_v17 }
 0x18a   : > { %22192 = vmatpush3.bf16.msra.mxu0 %v24479_v16  ;;  %v24522_v16 = vld [vmem:[%s25933_s28 + $0xc80] sm:$0xff]  }
 0x18b   : > { %22193 = vmatprep.subr.bf16.mxu0 %v24482_v19 }
 0x18c   : > { %22214 = vmatpush3.bf16.msra.mxu1 %v24481_v18  ;;  %v24523_v18 = vld [vmem:[%s25933_s28 + $0xd78] sm:$0xff]  }
 0x18d   : > { %22215 = vmatprep.subr.bf16.mxu1 %v24484_v20  ;;  %v4051_v20 = vrot.slane %v4023_v15, %v25971_v42 }
 0x18e   : > { %22194 = vmatpush3.bf16.msra.mxu0 %v24483_v21  ;;  %v24524_v21 = vld [vmem:[%s25933_s28 + $0xd38] sm:$0xff]  }
 0x18f   : > { %22195 = vmatprep.subr.bf16.mxu0 %v24486_v23  ;;  %v24526_v23 = vld [vmem:[%s25933_s28 + $0xdb8] sm:$0xff]  }
 0x190   : > { %22216 = vmatpush3.bf16.msra.mxu1 %v24485_v22  ;;  %v24525_v22 = vld [vmem:[%s25933_s28 + $0xdf8] sm:$0xff]  }
 0x191   : > { %22217 = vmatprep.subr.bf16.mxu1 %v24488_v25  ;;  %v24527_v25 = vld [vmem:[%s25933_s28 + $0xd70] sm:$0xff]  }
 0x192   : > { %22196 = vmatpush3.bf16.msra.mxu0 %v24487_v24 }
 0x193   : > { %22225 = vmatprep.subr.bf16.mxu0 %v24491_v28 }
 0x194   : > { %22218 = vmatpush3.bf16.msra.mxu1 %v24490_v26  ;;  %v24528_v26 = vld [vmem:[%s25933_s28 + $0xd30] sm:$0xff]  }
 0x195   : > { %v21933_v36 = vpop.f32.mrf.mxu0  ;;  %16437 = vmatmul.mubr.bf16.vlgmr.msra.gmra.mxu0 %v3988_v27  ;;  %22247 = vmatprep.subr.bf16.mxu1 %v24493_v30  ;;  %v4055_v27 = vcombine.high %v4051_v20, %v4051_v20  ;;  %v24530_v30 = vld [vmem:[%s25933_s28 + $0xdb0] sm:$0xff]  }
 0x196   : > { %22226 = vmatpush3.bf16.msra.mxu0 %v24492_v29  ;;  %v24529_v29 = vld [vmem:[%s25933_s28 + $0xdf0] sm:$0xff]  }
 0x197   : > { %v21934_v38 = vpop.f32.mrf.mxu0  ;;  %v21955_v39 = vpop.f32.mrf.mxu1  ;;  %16477 = vmatmul.mubr.bf16.vlgmr.msra.gmra.mxu1 %v4004_v32  ;;  %22227 = vmatprep.subr.bf16.mxu0 %v24495_v33  ;;  %v24531_v33 = vld [vmem:[%s25933_s28 + $0xd68] sm:$0xff]  }
 0x198   : > { %v21935_v41 = vadd.f32 %v21934_v38, %v21933_v36  ;;  %22248 = vmatpush3.bf16.msra.mxu1 %v24494_v31  ;;  %v24532_v36 = vld [vmem:[%s25933_s28 + $0xd28] sm:$0xff]  }
 0x199   : > { %v21936_v44 = vpop.f32.mrf.mxu0  ;;  %v21956_v45 = vpop.f32.mrf.mxu1  ;;  %22249 = vmatprep.subr.bf16.mxu1 %v24497_v34  ;;  %v24533_v38 = vld [vmem:[%s25933_s28 + $0xde8] sm:$0xff]  }
 0x19a   : > { %v15959_v47 = vadd.f32 %v21935_v41, %v26385_v6  ;;  %v21957_v48 = vadd.f32 %v21956_v45, %v21955_v39  ;;  %22228 = vmatpush3.bf16.msra.mxu0 %v24496_v35  ;;  %v4014_v6 = vrot.slane %v242_v4, %v25971_v42  ;;  %v24534_v41 = vld [vmem:[%s25933_s28 + $0xda8] sm:$0xff]   ;;  %v24535_v44 = vld [vmem:[%s25933_s28 + $0xd60] sm:$0xff]   ;;  %v24556_v4 = vld [vmem:[%s25933_s28 + $0xe78] sm:$0xff]  }
 0x19b   : > { %v21937_v50 = vpop.f32.mrf.mxu0  ;;  %22229 = vmatprep.subr.bf16.mxu0 %v24499_v40  ;;  %v21958_v52 = vpop.f32.mrf.mxu1 }
 0x19c   : > { %v26422_v53 = vadd.f32 %v21957_v48, %v15959_v47  ;;  %22250 = vmatpush3.bf16.msra.mxu1 %v24498_v37  ;;  %v4022_v10 = vcombine.high %v4014_v6, %v4014_v6  ;;  %v4030_v17 = vrot.slane %v4014_v6, %v25971_v42  ;;  %v24536_v47 = vld [vmem:[%s25933_s28 + $0xd20] sm:$0xff]   ;;  %v24540_v52 = vld [vmem:[%s25933_s28 + $0xd18] sm:$0xff]  }
 0x19d   : > { %22251 = vmatprep.subr.bf16.mxu1 %v24501_v46  ;;  %v21959_v56 = vpop.f32.mrf.mxu1  ;;  %v24537_v48 = vld [vmem:[%s25933_s28 + $0xde0] sm:$0xff]   ;;  %v24558_v6 = vld [vmem:[%s25933_s28 + $0xef8] sm:$0xff]  }
 0x19e   : > { %22230 = vmatpush3.bf16.msra.mxu0 %v24500_v43  ;;  %v4044_v14 = vrot.slane %v4022_v10, %v25971_v42  ;;  %v4052_v24 = vcombine.high %v4030_v17, %v4030_v17  ;;  %v24538_v50 = vld [vmem:[%s25933_s28 + $0xda0] sm:$0xff]   ;;  %v24544_v56 = vld [vmem:[%s25933_s28 + $0xd10] sm:$0xff]  }
 0x19f   : > { %22231 = vmatprep.subr.bf16.mxu0 %v24503_v51  ;;  %v24539_v51 = vld [vmem:[%s25933_s28 + $0xd58] sm:$0xff]   ;;  %v24561_v10 = vld [vmem:[%s25933_s28 + $0xe30] sm:$0xff]  }
 0x1a0   : > { %22252 = vmatpush3.bf16.msra.mxu1 %v24502_v49  ;;  %16516 = vmatprep.mubr.bf16.mxu0 %v4044_v14  ;;  %v4054_v19 = vcombine.high %v4044_v14, %v4044_v14 }
 0x1a1   : > { %22253 = vmatprep.subr.bf16.mxu1 %v24505_v55  ;;  %v24543_v55 = vld [vmem:[%s25933_s28 + $0xd50] sm:$0xff]  }
 0x1a2   : > { %22232 = vmatpush3.bf16.msra.mxu0 %v24504_v54  ;;  %16556 = vmatprep.mubr.bf16.mxu1 %v4054_v19  ;;  %v24542_v54 = vld [vmem:[%s25933_s28 + $0xd98] sm:$0xff]  }
 0x1a3   : > { %22233 = vmatprep.subr.bf16.mxu0 %v24507_v58  ;;  %v24546_v58 = vld [vmem:[%s25933_s28 + $0xd90] sm:$0xff]  }
 0x1a4   : > { %22254 = vmatpush3.bf16.msra.mxu1 %v24506_v57  ;;  %v24545_v57 = vld [vmem:[%s25933_s28 + $0xdd0] sm:$0xff]  }
 0x1a5   : > { %22255 = vmatprep.subr.bf16.mxu1 %v24509_v61  ;;  %v24548_v61 = vld [vmem:[%s25933_s28 + $0xd08] sm:$0xff]  }
 0x1a6   : > { %22234 = vmatpush3.bf16.msra.mxu0 %v24508_v60  ;;  %v24547_v60 = vld [vmem:[%s25933_s28 + $0xd48] sm:$0xff]  }
 0x1a7   : > { %22235 = vmatprep.subr.bf16.mxu0 %v24511_v62  ;;  %v24550_v62 = vld [vmem:[%s25933_s28 + $0xd88] sm:$0xff]  }
 0x1a8   : > { %22256 = vmatpush3.bf16.msra.mxu1 %v24510_v59  ;;  %v24549_v59 = vld [vmem:[%s25933_s28 + $0xdc8] sm:$0xff]  }
 0x1a9   : > { %22257 = vmatprep.subr.bf16.mxu1 %v24513_v0  ;;  %v24552_v0 = vld [vmem:[%s25933_s28 + $0xd00] sm:$0xff]  }
 0x1aa   : > { %22236 = vmatpush3.bf16.msra.mxu0 %v24512_v63  ;;  %v24551_v63 = vld [vmem:[%s25933_s28 + $0xd40] sm:$0xff]  }
 0x1ab   : > { %22237 = vmatprep.subr.bf16.mxu0 %v24515_v2  ;;  %v24555_v2 = vld [vmem:[%s25933_s28 + $0xd80] sm:$0xff]  }
 0x1ac   : > { %22258 = vmatpush3.bf16.msra.mxu1 %v24514_v1  ;;  %v24553_v1 = vld [vmem:[%s25933_s28 + $0xdc0] sm:$0xff]  }
 0x1ad   : > { %22259 = vmatprep.subr.bf16.mxu1 %v24517_v5  ;;  %v24557_v5 = vld [vmem:[%s25933_s28 + $0xe38] sm:$0xff]  }
 0x1ae   : > { %22238 = vmatpush3.bf16.msra.mxu0 %v24516_v3  ;;  %v4037_v3 = vrot.slane %v26443_v11, %v25971_v42  ;;  %v24562_v11 = vld [vmem:[%s25933_s28 + $0xef0] sm:$0xff]  }
 0x1af   : > { %22239 = vmatprep.subr.bf16.mxu0 %v24519_v9  ;;  %v24560_v9 = vld [vmem:[%s25933_s28 + $0xe70] sm:$0xff]  }
 0x1b0   : > { %22260 = vmatpush3.bf16.msra.mxu1 %v24518_v8  ;;  %v4053_v8 = vcombine.high %v4037_v3, %v4037_v3 }
 0x1b1   : > { %22261 = vmatprep.subr.bf16.mxu1 %v24521_v13  ;;  %v24563_v13 = vld [vmem:[%s25933_s28 + $0xeb0] sm:$0xff]  }
 0x1b2   : > { %22240 = vmatpush3.bf16.msra.mxu0 %v24520_v12 }
 0x1b3   : > { %22269 = vmatprep.subr.bf16.mxu0 %v24523_v18  ;;  %v24565_v18 = vld [vmem:[%s25933_s28 + $0xe28] sm:$0xff]  }
 0x1b4   : > { %22262 = vmatpush3.bf16.msra.mxu1 %v24522_v16  ;;  %v24564_v16 = vld [vmem:[%s25933_s28 + $0xe68] sm:$0xff]  }
 0x1b5   : > { %v21977_v28 = vpop.f32.mrf.mxu0  ;;  %16517 = vmatmul.mubr.bf16.vlgmr.msra.gmra.mxu0 %v4030_v17  ;;  %22291 = vmatprep.subr.bf16.mxu1 %v24525_v22 }
 0x1b6   : > { %22270 = vmatpush3.bf16.msra.mxu0 %v24524_v21  ;;  %16596 = vmatprep.mubr.bf16.mxu0 %v4051_v20  ;;  %v24566_v20 = vld [vmem:[%s25933_s28 + $0xee8] sm:$0xff]  }
 0x1b7   : > { %v21978_v31 = vpop.f32.mrf.mxu0  ;;  %v21999_v32 = vpop.f32.mrf.mxu1  ;;  %16557 = vmatmul.mubr.bf16.vlgmr.msra.gmra.mxu1 %v4052_v24  ;;  %22271 = vmatprep.subr.bf16.mxu0 %v24527_v25  ;;  %v24567_v24 = vld [vmem:[%s25933_s28 + $0xea8] sm:$0xff]  }
 0x1b8   : > { %v21979_v35 = vadd.f32 %v21978_v31, %v21977_v28  ;;  %22292 = vmatpush3.bf16.msra.mxu1 %v24526_v23  ;;  %16636 = vmatprep.mubr.bf16.mxu1 %v4055_v27 }
 0x1b9   : > { %v21980_v34 = vpop.f32.mrf.mxu0  ;;  %v22000_v37 = vpop.f32.mrf.mxu1  ;;  %22293 = vmatprep.subr.bf16.mxu1 %v24529_v29  ;;  %v24569_v29 = vld [vmem:[%s25933_s28 + $0xe20] sm:$0xff]  }
 0x1ba   : > { %v16039_v39 = vadd.f32 %v21979_v35, %v26422_v53  ;;  %v22001_v40 = vadd.f32 %v22000_v37, %v21999_v32  ;;  %22272 = vmatpush3.bf16.msra.mxu0 %v24528_v26  ;;  %v24541_v53 = vld [vmem:[%s25933_s28 + $0xdd8] sm:$0xff]   ;;  %v24568_v26 = vld [vmem:[%s25933_s28 + $0xe60] sm:$0xff]   ;;  %v24576_v37 = vld [vmem:[%s25933_s28 + $0xe50] sm:$0xff]  }
 0x1bb   : > { %v21981_v43 = vpop.f32.mrf.mxu0  ;;  %22273 = vmatprep.subr.bf16.mxu0 %v24531_v33  ;;  %v22002_v45 = vpop.f32.mrf.mxu1  ;;  %v24571_v32 = vld [vmem:[%s25933_s28 + $0xea0] sm:$0xff]   ;;  %v24572_v33 = vld [vmem:[%s25933_s28 + $0xe58] sm:$0xff]  }
 0x1bc   : > { %v26467_v46 = vadd.f32 %v22001_v40, %v16039_v39  ;;  %22294 = vmatpush3.bf16.msra.mxu1 %v24530_v30  ;;  %v24570_v30 = vld [vmem:[%s25933_s28 + $0xee0] sm:$0xff]   ;;  %v24573_v35 = vld [vmem:[%s25933_s28 + $0xe18] sm:$0xff]   ;;  %v24578_v39 = vld [vmem:[%s25933_s28 + $0xed0] sm:$0xff]  }
 0x1bd   : > { %22295 = vmatprep.subr.bf16.mxu1 %v24533_v38  ;;  %v22003_v49 = vpop.f32.mrf.mxu1  ;;  %v24575_v34 = vld [vmem:[%s25933_s28 + $0xe98] sm:$0xff]   ;;  %v24577_v38 = vld [vmem:[%s25933_s28 + $0xe10] sm:$0xff]   ;;  %v24581_v43 = vld [vmem:[%s25933_s28 + $0xe08] sm:$0xff]  }
 0x1be   : > { %22274 = vmatpush3.bf16.msra.mxu0 %v24532_v36  ;;  %v24574_v36 = vld [vmem:[%s25933_s28 + $0xed8] sm:$0xff]   ;;  %v24579_v40 = vld [vmem:[%s25933_s28 + $0xe90] sm:$0xff]   ;;  %v24582_v45 = vld [vmem:[%s25933_s28 + $0xec8] sm:$0xff]  }
 0x1bf   : > { %22275 = vmatprep.subr.bf16.mxu0 %v24535_v44  ;;  %v243_v44 = vld [vmem:[%s25928_s25 + $0x38] sm:$0xff]  ;;  %v24584_v49 = vld [vmem:[%s25933_s28 + $0xe40] sm:$0xff]  }
 0x1c0   : > { %22296 = vmatpush3.bf16.msra.mxu1 %v24534_v41  ;;  %v24580_v41 = vld [vmem:[%s25933_s28 + $0xe48] sm:$0xff]  }
 0x1c1   : > { %22297 = vmatprep.subr.bf16.mxu1 %v24537_v48  ;;  %v24583_v48 = vld [vmem:[%s25933_s28 + $0xe88] sm:$0xff]  }
 0x1c2   : > { %22276 = vmatpush3.bf16.msra.mxu0 %v24536_v47  ;;  %v4056_v47 = vcombine.high %v243_v44, %v243_v44 }
 0x1c3   : > { %22277 = vmatprep.subr.bf16.mxu0 %v24539_v51 }
 0x1c4   : > { %22298 = vmatpush3.bf16.msra.mxu1 %v24538_v50  ;;  %v26525_v51 = vrot.slane %v4056_v47, %v25971_v42  ;;  %v24624_v47 = vld [vmem:[%s25933_s28 + $0x10b8] sm:$0xff]  }
 0x1c5   : > { %22299 = vmatprep.subr.bf16.mxu1 %v24541_v53  ;;  %v24586_v53 = vld [vmem:[%s25933_s28 + $0xec0] sm:$0xff]  }
 0x1c6   : > { %22278 = vmatpush3.bf16.msra.mxu0 %v24540_v52  ;;  %v24585_v52 = vld [vmem:[%s25933_s28 + $0xe00] sm:$0xff]  }
 0x1c7   : > { %22279 = vmatprep.subr.bf16.mxu0 %v24543_v55  ;;  %v4072_v55 = vcombine.high %v26525_v51, %v26525_v51 }
 0x1c8   : > { %22300 = vmatpush3.bf16.msra.mxu1 %v24542_v54 }
 0x1c9   : > { %22301 = vmatprep.subr.bf16.mxu1 %v24545_v57 }
 0x1ca   : > { %22280 = vmatpush3.bf16.msra.mxu0 %v24544_v56  ;;  %v24587_v56 = vld [vmem:[%s25933_s28 + $0xe80] sm:$0xff]  }
 0x1cb   : > { %22281 = vmatprep.subr.bf16.mxu0 %v24547_v60 }
 0x1cc   : > { %22302 = vmatpush3.bf16.msra.mxu1 %v24546_v58  ;;  %v24588_v58 = vld [vmem:[%s25933_s28 + $0xf78] sm:$0xff]  }
 0x1cd   : > { %22303 = vmatprep.subr.bf16.mxu1 %v24549_v59  ;;  %v4100_v59 = vrot.slane %v4072_v55, %v25971_v42 }
 0x1ce   : > { %22282 = vmatpush3.bf16.msra.mxu0 %v24548_v61  ;;  %v24589_v61 = vld [vmem:[%s25933_s28 + $0xf38] sm:$0xff]  }
 0x1cf   : > { %22283 = vmatprep.subr.bf16.mxu0 %v24551_v63  ;;  %v24591_v63 = vld [vmem:[%s25933_s28 + $0xfb8] sm:$0xff]  }
 0x1d0   : > { %22304 = vmatpush3.bf16.msra.mxu1 %v24550_v62  ;;  %v24590_v62 = vld [vmem:[%s25933_s28 + $0xff8] sm:$0xff]  }
 0x1d1   : > { %22305 = vmatprep.subr.bf16.mxu1 %v24553_v1  ;;  %v24592_v1 = vld [vmem:[%s25933_s28 + $0xf70] sm:$0xff]  }
 0x1d2   : > { %22284 = vmatpush3.bf16.msra.mxu0 %v24552_v0 }
 0x1d3   : > { %22313 = vmatprep.subr.bf16.mxu0 %v24556_v4 }
 0x1d4   : > { %22306 = vmatpush3.bf16.msra.mxu1 %v24555_v2  ;;  %v24593_v2 = vld [vmem:[%s25933_s28 + $0xf30] sm:$0xff]  }
 0x1d5   : > { %v22021_v12 = vpop.f32.mrf.mxu0  ;;  %16597 = vmatmul.mubr.bf16.vlgmr.msra.gmra.mxu0 %v4037_v3  ;;  %22335 = vmatprep.subr.bf16.mxu1 %v24558_v6  ;;  %v4104_v3 = vcombine.high %v4100_v59, %v4100_v59  ;;  %v24595_v6 = vld [vmem:[%s25933_s28 + $0xfb0] sm:$0xff]  }
 0x1d6   : > { %22314 = vmatpush3.bf16.msra.mxu0 %v24557_v5  ;;  %v24594_v5 = vld [vmem:[%s25933_s28 + $0xff0] sm:$0xff]  }
 0x1d7   : > { %v22022_v14 = vpop.f32.mrf.mxu0  ;;  %v22043_v15 = vpop.f32.mrf.mxu1  ;;  %16637 = vmatmul.mubr.bf16.vlgmr.msra.gmra.mxu1 %v4053_v8  ;;  %22315 = vmatprep.subr.bf16.mxu0 %v24560_v9  ;;  %v24596_v9 = vld [vmem:[%s25933_s28 + $0xf68] sm:$0xff]  }
 0x1d8   : > { %v22023_v17 = vadd.f32 %v22022_v14, %v22021_v12  ;;  %22336 = vmatpush3.bf16.msra.mxu1 %v24559_v7  ;;  %v24597_v12 = vld [vmem:[%s25933_s28 + $0xf28] sm:$0xff]  }
 0x1d9   : > { %v22024_v19 = vpop.f32.mrf.mxu0  ;;  %v22044_v21 = vpop.f32.mrf.mxu1  ;;  %22337 = vmatprep.subr.bf16.mxu1 %v24562_v11  ;;  %v24598_v14 = vld [vmem:[%s25933_s28 + $0xfe8] sm:$0xff]  }
 0x1da   : > { %v16119_v22 = vadd.f32 %v22023_v17, %v26467_v46  ;;  %v22045_v23 = vadd.f32 %v22044_v21, %v22043_v15  ;;  %22316 = vmatpush3.bf16.msra.mxu0 %v24561_v10  ;;  %v4063_v46 = vrot.slane %v243_v44, %v25971_v42  ;;  %v24599_v17 = vld [vmem:[%s25933_s28 + $0xfa8] sm:$0xff]   ;;  %v24600_v19 = vld [vmem:[%s25933_s28 + $0xf60] sm:$0xff]   ;;  %v24621_v44 = vld [vmem:[%s25933_s28 + $0x1078] sm:$0xff]  }
 0x1db   : > { %v22025_v25 = vpop.f32.mrf.mxu0  ;;  %22317 = vmatprep.subr.bf16.mxu0 %v24564_v16  ;;  %v22046_v27 = vpop.f32.mrf.mxu1 }
 0x1dc   : > { %v26504_v28 = vadd.f32 %v22045_v23, %v16119_v22  ;;  %22338 = vmatpush3.bf16.msra.mxu1 %v24563_v13  ;;  %v4071_v50 = vcombine.high %v4063_v46, %v4063_v46  ;;  %v4079_v57 = vrot.slane %v4063_v46, %v25971_v42  ;;  %v24601_v22 = vld [vmem:[%s25933_s28 + $0xf20] sm:$0xff]   ;;  %v24605_v27 = vld [vmem:[%s25933_s28 + $0xf18] sm:$0xff]  }
 0x1dd   : > { %22339 = vmatprep.subr.bf16.mxu1 %v24566_v20  ;;  %v22047_v31 = vpop.f32.mrf.mxu1  ;;  %v24602_v23 = vld [vmem:[%s25933_s28 + $0xfe0] sm:$0xff]   ;;  %v24623_v46 = vld [vmem:[%s25933_s28 + $0x10f8] sm:$0xff]  }
 0x1de   : > { %22318 = vmatpush3.bf16.msra.mxu0 %v24565_v18  ;;  %v4093_v54 = vrot.slane %v4071_v50, %v25971_v42  ;;  %v4101_v0 = vcombine.high %v4079_v57, %v4079_v57  ;;  %v24603_v25 = vld [vmem:[%s25933_s28 + $0xfa0] sm:$0xff]   ;;  %v24609_v31 = vld [vmem:[%s25933_s28 + $0xf10] sm:$0xff]  }
 0x1df   : > { %22319 = vmatprep.subr.bf16.mxu0 %v24568_v26  ;;  %v24604_v26 = vld [vmem:[%s25933_s28 + $0xf58] sm:$0xff]   ;;  %v24626_v50 = vld [vmem:[%s25933_s28 + $0x1030] sm:$0xff]  }
 0x1e0   : > { %22340 = vmatpush3.bf16.msra.mxu1 %v24567_v24  ;;  %16676 = vmatprep.mubr.bf16.mxu0 %v4093_v54  ;;  %v4103_v60 = vcombine.high %v4093_v54, %v4093_v54 }
 0x1e1   : > { %22341 = vmatprep.subr.bf16.mxu1 %v24570_v30  ;;  %v24608_v30 = vld [vmem:[%s25933_s28 + $0xf50] sm:$0xff]  }
 0x1e2   : > { %22320 = vmatpush3.bf16.msra.mxu0 %v24569_v29  ;;  %16716 = vmatprep.mubr.bf16.mxu1 %v4103_v60  ;;  %v24607_v29 = vld [vmem:[%s25933_s28 + $0xf98] sm:$0xff]  }
 0x1e3   : > { %22321 = vmatprep.subr.bf16.mxu0 %v24572_v33  ;;  %v24611_v33 = vld [vmem:[%s25933_s28 + $0xf90] sm:$0xff]  }
 0x1e4   : > { %22342 = vmatpush3.bf16.msra.mxu1 %v24571_v32  ;;  %v24610_v32 = vld [vmem:[%s25933_s28 + $0xfd0] sm:$0xff]  }
 0x1e5   : > { %22343 = vmatprep.subr.bf16.mxu1 %v24574_v36  ;;  %v24613_v36 = vld [vmem:[%s25933_s28 + $0xf08] sm:$0xff]  }
 0x1e6   : > { %22322 = vmatpush3.bf16.msra.mxu0 %v24573_v35  ;;  %v24612_v35 = vld [vmem:[%s25933_s28 + $0xf48] sm:$0xff]  }
 0x1e7   : > { %22323 = vmatprep.subr.bf16.mxu0 %v24576_v37  ;;  %v24615_v37 = vld [vmem:[%s25933_s28 + $0xf88] sm:$0xff]  }
 0x1e8   : > { %22344 = vmatpush3.bf16.msra.mxu1 %v24575_v34  ;;  %v24614_v34 = vld [vmem:[%s25933_s28 + $0xfc8] sm:$0xff]  }
 0x1e9   : > { %22345 = vmatprep.subr.bf16.mxu1 %v24578_v39  ;;  %v24617_v39 = vld [vmem:[%s25933_s28 + $0xf00] sm:$0xff]  }
 0x1ea   : > { %22324 = vmatpush3.bf16.msra.mxu0 %v24577_v38  ;;  %v24616_v38 = vld [vmem:[%s25933_s28 + $0xf40] sm:$0xff]  }
 0x1eb   : > { %22325 = vmatprep.subr.bf16.mxu0 %v24580_v41  ;;  %v24620_v41 = vld [vmem:[%s25933_s28 + $0xf80] sm:$0xff]  }
 0x1ec   : > { %22346 = vmatpush3.bf16.msra.mxu1 %v24579_v40  ;;  %v24618_v40 = vld [vmem:[%s25933_s28 + $0xfc0] sm:$0xff]  }
 0x1ed   : > { %22347 = vmatprep.subr.bf16.mxu1 %v24582_v45  ;;  %v24622_v45 = vld [vmem:[%s25933_s28 + $0x1038] sm:$0xff]  }
 0x1ee   : > { %22326 = vmatpush3.bf16.msra.mxu0 %v24581_v43  ;;  %v4086_v43 = vrot.slane %v26525_v51, %v25971_v42  ;;  %v24627_v51 = vld [vmem:[%s25933_s28 + $0x10f0] sm:$0xff]  }
 0x1ef   : > { %22327 = vmatprep.subr.bf16.mxu0 %v24584_v49  ;;  %v24625_v49 = vld [vmem:[%s25933_s28 + $0x1070] sm:$0xff]  }
 0x1f0   : > { %22348 = vmatpush3.bf16.msra.mxu1 %v24583_v48  ;;  %v4102_v48 = vcombine.high %v4086_v43, %v4086_v43 }
 0x1f1   : > { %22349 = vmatprep.subr.bf16.mxu1 %v24586_v53  ;;  %v24628_v53 = vld [vmem:[%s25933_s28 + $0x10b0] sm:$0xff]  }
 0x1f2   : > { %22328 = vmatpush3.bf16.msra.mxu0 %v24585_v52 }
 0x1f3   : > { %22357 = vmatprep.subr.bf16.mxu0 %v24588_v58  ;;  %v24630_v58 = vld [vmem:[%s25933_s28 + $0x1028] sm:$0xff]  }
 0x1f4   : > { %22350 = vmatpush3.bf16.msra.mxu1 %v24587_v56  ;;  %v24629_v56 = vld [vmem:[%s25933_s28 + $0x1068] sm:$0xff]  }
 0x1f5   : > { %v22065_v4 = vpop.f32.mrf.mxu0  ;;  %16677 = vmatmul.mubr.bf16.vlgmr.msra.gmra.mxu0 %v4079_v57  ;;  %22379 = vmatprep.subr.bf16.mxu1 %v24590_v62 }
 0x1f6   : > { %22358 = vmatpush3.bf16.msra.mxu0 %v24589_v61  ;;  %16756 = vmatprep.mubr.bf16.mxu0 %v4100_v59  ;;  %v24631_v59 = vld [vmem:[%s25933_s28 + $0x10e8] sm:$0xff]  }
 0x1f7   : > { %v22066_v7 = vpop.f32.mrf.mxu0  ;;  %v22087_v8 = vpop.f32.mrf.mxu1  ;;  %16717 = vmatmul.mubr.bf16.vlgmr.msra.gmra.mxu1 %v4101_v0  ;;  %22359 = vmatprep.subr.bf16.mxu0 %v24592_v1  ;;  %v24632_v0 = vld [vmem:[%s25933_s28 + $0x10a8] sm:$0xff]  }
 0x1f8   : > { %v22067_v10 = vadd.f32 %v22066_v7, %v22065_v4  ;;  %22380 = vmatpush3.bf16.msra.mxu1 %v24591_v63  ;;  %16796 = vmatprep.mubr.bf16.mxu1 %v4104_v3 }
 0x1f9   : > { %v22068_v11 = vpop.f32.mrf.mxu0  ;;  %v22088_v13 = vpop.f32.mrf.mxu1  ;;  %22381 = vmatprep.subr.bf16.mxu1 %v24594_v5  ;;  %v24634_v5 = vld [vmem:[%s25933_s28 + $0x1020] sm:$0xff]  }
 0x1fa   : > { %v16199_v15 = vadd.f32 %v22067_v10, %v26504_v28  ;;  %v22089_v16 = vadd.f32 %v22088_v13, %v22087_v8  ;;  %22360 = vmatpush3.bf16.msra.mxu0 %v24593_v2  ;;  %v24606_v28 = vld [vmem:[%s25933_s28 + $0xfd8] sm:$0xff]   ;;  %v24633_v2 = vld [vmem:[%s25933_s28 + $0x1060] sm:$0xff]   ;;  %v24641_v13 = vld [vmem:[%s25933_s28 + $0x1050] sm:$0xff]  }
 0x1fb   : > { %v22069_v18 = vpop.f32.mrf.mxu0  ;;  %22361 = vmatprep.subr.bf16.mxu0 %v24596_v9  ;;  %v22090_v21 = vpop.f32.mrf.mxu1  ;;  %v24636_v8 = vld [vmem:[%s25933_s28 + $0x10a0] sm:$0xff]   ;;  %v24637_v9 = vld [vmem:[%s25933_s28 + $0x1058] sm:$0xff]  }
 0x1fc   : > { %v26549_v20 = vadd.f32 %v22089_v16, %v16199_v15  ;;  %22382 = vmatpush3.bf16.msra.mxu1 %v24595_v6  ;;  %v24635_v6 = vld [vmem:[%s25933_s28 + $0x10e0] sm:$0xff]   ;;  %v24638_v10 = vld [vmem:[%s25933_s28 + $0x1018] sm:$0xff]   ;;  %v24643_v15 = vld [vmem:[%s25933_s28 + $0x10d0] sm:$0xff]  }
 0x1fd   : > { %22383 = vmatprep.subr.bf16.mxu1 %v24598_v14  ;;  %v22091_v24 = vpop.f32.mrf.mxu1  ;;  %v24640_v11 = vld [vmem:[%s25933_s28 + $0x1098] sm:$0xff]   ;;  %v24642_v14 = vld [vmem:[%s25933_s28 + $0x1010] sm:$0xff]   ;;  %v24646_v18 = vld [vmem:[%s25933_s28 + $0x1008] sm:$0xff]  }
 0x1fe   : > { %22362 = vmatpush3.bf16.msra.mxu0 %v24597_v12  ;;  %v24639_v12 = vld [vmem:[%s25933_s28 + $0x10d8] sm:$0xff]   ;;  %v24644_v16 = vld [vmem:[%s25933_s28 + $0x1090] sm:$0xff]   ;;  %v24647_v21 = vld [vmem:[%s25933_s28 + $0x10c8] sm:$0xff]  }
 0x1ff   : > { %22363 = vmatprep.subr.bf16.mxu0 %v24600_v19  ;;  %v244_v19 = vld [vmem:[%s25928_s25 + $0x40] sm:$0xff] }
 0x200   : > { %22384 = vmatpush3.bf16.msra.mxu1 %v24599_v17  ;;  %v24645_v17 = vld [vmem:[%s25933_s28 + $0x1048] sm:$0xff]   ;;  %v24649_v24 = vld [vmem:[%s25933_s28 + $0x1040] sm:$0xff]  }
 0x201   : > { %22385 = vmatprep.subr.bf16.mxu1 %v24602_v23  ;;  %v24648_v23 = vld [vmem:[%s25933_s28 + $0x1088] sm:$0xff]  }
 0x202   : > { %22364 = vmatpush3.bf16.msra.mxu0 %v24601_v22  ;;  %v4105_v22 = vcombine.high %v244_v19, %v244_v19 }
 0x203   : > { %22365 = vmatprep.subr.bf16.mxu0 %v24604_v26 }
 0x204   : > { %22386 = vmatpush3.bf16.msra.mxu1 %v24603_v25  ;;  %v26607_v26 = vrot.slane %v4105_v22, %v25971_v42  ;;  %v24689_v22 = vld [vmem:[%s25933_s28 + $0x12b8] sm:$0xff]  }
 0x205   : > { %22387 = vmatprep.subr.bf16.mxu1 %v24606_v28  ;;  %v24651_v28 = vld [vmem:[%s25933_s28 + $0x10c0] sm:$0xff]  }
 0x206   : > { %22366 = vmatpush3.bf16.msra.mxu0 %v24605_v27  ;;  %v24650_v27 = vld [vmem:[%s25933_s28 + $0x1000] sm:$0xff]  }
 0x207   : > { %22367 = vmatprep.subr.bf16.mxu0 %v24608_v30  ;;  %v4121_v30 = vcombine.high %v26607_v26, %v26607_v26 }
 0x208   : > { %22388 = vmatpush3.bf16.msra.mxu1 %v24607_v29 }
 0x209   : > { %22389 = vmatprep.subr.bf16.mxu1 %v24610_v32 }
 0x20a   : > { %22368 = vmatpush3.bf16.msra.mxu0 %v24609_v31  ;;  %v24652_v31 = vld [vmem:[%s25933_s28 + $0x1080] sm:$0xff]  }
 0x20b   : > { %22369 = vmatprep.subr.bf16.mxu0 %v24612_v35 }
 0x20c   : > { %22390 = vmatpush3.bf16.msra.mxu1 %v24611_v33  ;;  %v24653_v33 = vld [vmem:[%s25933_s28 + $0x1178] sm:$0xff]  }
 0x20d   : > { %22391 = vmatprep.subr.bf16.mxu1 %v24614_v34  ;;  %v4149_v34 = vrot.slane %v4121_v30, %v25971_v42 }
 0x20e   : > { %22370 = vmatpush3.bf16.msra.mxu0 %v24613_v36  ;;  %v24654_v36 = vld [vmem:[%s25933_s28 + $0x1138] sm:$0xff]  }
 0x20f   : > { %22371 = vmatprep.subr.bf16.mxu0 %v24616_v38  ;;  %v24656_v38 = vld [vmem:[%s25933_s28 + $0x11b8] sm:$0xff]  }
 0x210   : > { %22392 = vmatpush3.bf16.msra.mxu1 %v24615_v37  ;;  %v24655_v37 = vld [vmem:[%s25933_s28 + $0x11f8] sm:$0xff]  }
 0x211   : > { %22393 = vmatprep.subr.bf16.mxu1 %v24618_v40  ;;  %v24657_v40 = vld [vmem:[%s25933_s28 + $0x1170] sm:$0xff]  }
 0x212   : > { %22372 = vmatpush3.bf16.msra.mxu0 %v24617_v39 }
 0x213   : > { %22401 = vmatprep.subr.bf16.mxu0 %v24621_v44 }
 0x214   : > { %22394 = vmatpush3.bf16.msra.mxu1 %v24620_v41  ;;  %v24658_v41 = vld [vmem:[%s25933_s28 + $0x1130] sm:$0xff]  }
 0x215   : > { %v22109_v52 = vpop.f32.mrf.mxu0  ;;  %16757 = vmatmul.mubr.bf16.vlgmr.msra.gmra.mxu0 %v4086_v43  ;;  %22423 = vmatprep.subr.bf16.mxu1 %v24623_v46  ;;  %v4153_v43 = vcombine.high %v4149_v34, %v4149_v34  ;;  %v24660_v46 = vld [vmem:[%s25933_s28 + $0x11b0] sm:$0xff]  }
 0x216   : > { %22402 = vmatpush3.bf16.msra.mxu0 %v24622_v45  ;;  %v24659_v45 = vld [vmem:[%s25933_s28 + $0x11f0] sm:$0xff]  }
 0x217   : > { %v22110_v54 = vpop.f32.mrf.mxu0  ;;  %v22131_v55 = vpop.f32.mrf.mxu1  ;;  %16797 = vmatmul.mubr.bf16.vlgmr.msra.gmra.mxu1 %v4102_v48  ;;  %22403 = vmatprep.subr.bf16.mxu0 %v24625_v49  ;;  %v24661_v49 = vld [vmem:[%s25933_s28 + $0x1168] sm:$0xff]  }
 0x218   : > { %v22111_v57 = vadd.f32 %v22110_v54, %v22109_v52  ;;  %22424 = vmatpush3.bf16.msra.mxu1 %v24624_v47  ;;  %v24662_v52 = vld [vmem:[%s25933_s28 + $0x1128] sm:$0xff]  }
 0x219   : > { %v22112_v60 = vpop.f32.mrf.mxu0  ;;  %v22132_v61 = vpop.f32.mrf.mxu1  ;;  %22425 = vmatprep.subr.bf16.mxu1 %v24627_v51  ;;  %v24663_v54 = vld [vmem:[%s25933_s28 + $0x11e8] sm:$0xff]  }
 0x21a   : > { %v16279_v62 = vadd.f32 %v22111_v57, %v26549_v20  ;;  %v22133_v63 = vadd.f32 %v22132_v61, %v22131_v55  ;;  %22404 = vmatpush3.bf16.msra.mxu0 %v24626_v50  ;;  %v4112_v20 = vrot.slane %v244_v19, %v25971_v42  ;;  %v24664_v57 = vld [vmem:[%s25933_s28 + $0x11a8] sm:$0xff]   ;;  %v24665_v60 = vld [vmem:[%s25933_s28 + $0x1160] sm:$0xff]   ;;  %v24686_v19 = vld [vmem:[%s25933_s28 + $0x1278] sm:$0xff]  }
 0x21b   : > { %v22113_v1 = vpop.f32.mrf.mxu0  ;;  %22405 = vmatprep.subr.bf16.mxu0 %v24629_v56  ;;  %v22134_v3 = vpop.f32.mrf.mxu1 }
 0x21c   : > { %v26586_v4 = vadd.f32 %v22133_v63, %v16279_v62  ;;  %22426 = vmatpush3.bf16.msra.mxu1 %v24628_v53  ;;  %v4120_v25 = vcombine.high %v4112_v20, %v4112_v20  ;;  %v4128_v32 = vrot.slane %v4112_v20, %v25971_v42  ;;  %v24666_v62 = vld [vmem:[%s25933_s28 + $0x1120] sm:$0xff]   ;;  %v24670_v3 = vld [vmem:[%s25933_s28 + $0x1118] sm:$0xff]  }
 0x21d   : > { %22427 = vmatprep.subr.bf16.mxu1 %v24631_v59  ;;  %v22135_v7 = vpop.f32.mrf.mxu1  ;;  %v24667_v63 = vld [vmem:[%s25933_s28 + $0x11e0] sm:$0xff]   ;;  %v24688_v20 = vld [vmem:[%s25933_s28 + $0x12f8] sm:$0xff]  }
 0x21e   : > { %22406 = vmatpush3.bf16.msra.mxu0 %v24630_v58  ;;  %v4142_v29 = vrot.slane %v4120_v25, %v25971_v42  ;;  %v4150_v39 = vcombine.high %v4128_v32, %v4128_v32  ;;  %v24668_v1 = vld [vmem:[%s25933_s28 + $0x11a0] sm:$0xff]   ;;  %v24674_v7 = vld [vmem:[%s25933_s28 + $0x1110] sm:$0xff]  }
 0x21f   : > { %22407 = vmatprep.subr.bf16.mxu0 %v24633_v2  ;;  %v24669_v2 = vld [vmem:[%s25933_s28 + $0x1158] sm:$0xff]   ;;  %v24691_v25 = vld [vmem:[%s25933_s28 + $0x1230] sm:$0xff]  }
 0x220   : > { %22428 = vmatpush3.bf16.msra.mxu1 %v24632_v0  ;;  %16836 = vmatprep.mubr.bf16.mxu0 %v4142_v29  ;;  %v4152_v35 = vcombine.high %v4142_v29, %v4142_v29 }
 0x221   : > { %22429 = vmatprep.subr.bf16.mxu1 %v24635_v6  ;;  %v24673_v6 = vld [vmem:[%s25933_s28 + $0x1150] sm:$0xff]  }
 0x222   : > { %22408 = vmatpush3.bf16.msra.mxu0 %v24634_v5  ;;  %16876 = vmatprep.mubr.bf16.mxu1 %v4152_v35  ;;  %v24672_v5 = vld [vmem:[%s25933_s28 + $0x1198] sm:$0xff]  }
 0x223   : > { %22409 = vmatprep.subr.bf16.mxu0 %v24637_v9  ;;  %v24676_v9 = vld [vmem:[%s25933_s28 + $0x1190] sm:$0xff]  }
 0x224   : > { %22430 = vmatpush3.bf16.msra.mxu1 %v24636_v8  ;;  %v24675_v8 = vld [vmem:[%s25933_s28 + $0x11d0] sm:$0xff]  }
 0x225   : > { %22431 = vmatprep.subr.bf16.mxu1 %v24639_v12  ;;  %v24678_v12 = vld [vmem:[%s25933_s28 + $0x1108] sm:$0xff]  }
 0x226   : > { %22410 = vmatpush3.bf16.msra.mxu0 %v24638_v10  ;;  %v24677_v10 = vld [vmem:[%s25933_s28 + $0x1148] sm:$0xff]  }
 0x227   : > { %22411 = vmatprep.subr.bf16.mxu0 %v24641_v13  ;;  %v24680_v13 = vld [vmem:[%s25933_s28 + $0x1188] sm:$0xff]  }
 0x228   : > { %22432 = vmatpush3.bf16.msra.mxu1 %v24640_v11  ;;  %v24679_v11 = vld [vmem:[%s25933_s28 + $0x11c8] sm:$0xff]  }
 0x229   : > { %22433 = vmatprep.subr.bf16.mxu1 %v24643_v15  ;;  %v24682_v15 = vld [vmem:[%s25933_s28 + $0x1100] sm:$0xff]  }
 0x22a   : > { %22412 = vmatpush3.bf16.msra.mxu0 %v24642_v14  ;;  %v24681_v14 = vld [vmem:[%s25933_s28 + $0x1140] sm:$0xff]  }
 0x22b   : > { %22413 = vmatprep.subr.bf16.mxu0 %v24645_v17  ;;  %v24685_v17 = vld [vmem:[%s25933_s28 + $0x1180] sm:$0xff]  }
 0x22c   : > { %22434 = vmatpush3.bf16.msra.mxu1 %v24644_v16  ;;  %v24683_v16 = vld [vmem:[%s25933_s28 + $0x11c0] sm:$0xff]  }
 0x22d   : > { %22435 = vmatprep.subr.bf16.mxu1 %v24647_v21  ;;  %v24687_v21 = vld [vmem:[%s25933_s28 + $0x1238] sm:$0xff]  }
 0x22e   : > { %22414 = vmatpush3.bf16.msra.mxu0 %v24646_v18  ;;  %v4135_v18 = vrot.slane %v26607_v26, %v25971_v42  ;;  %v24692_v26 = vld [vmem:[%s25933_s28 + $0x12f0] sm:$0xff]  }
 0x22f   : > { %22415 = vmatprep.subr.bf16.mxu0 %v24649_v24  ;;  %v24690_v24 = vld [vmem:[%s25933_s28 + $0x1270] sm:$0xff]  }
 0x230   : > { %22436 = vmatpush3.bf16.msra.mxu1 %v24648_v23  ;;  %v4151_v23 = vcombine.high %v4135_v18, %v4135_v18 }
 0x231   : > { %22437 = vmatprep.subr.bf16.mxu1 %v24651_v28  ;;  %v24693_v28 = vld [vmem:[%s25933_s28 + $0x12b0] sm:$0xff]  }
 0x232   : > { %22416 = vmatpush3.bf16.msra.mxu0 %v24650_v27 }
 0x233   : > { %22445 = vmatprep.subr.bf16.mxu0 %v24653_v33  ;;  %v24695_v33 = vld [vmem:[%s25933_s28 + $0x1228] sm:$0xff]  }
 0x234   : > { %22438 = vmatpush3.bf16.msra.mxu1 %v24652_v31  ;;  %v24694_v31 = vld [vmem:[%s25933_s28 + $0x1268] sm:$0xff]  }
 0x235   : > { %v22153_v44 = vpop.f32.mrf.mxu0  ;;  %16837 = vmatmul.mubr.bf16.vlgmr.msra.gmra.mxu0 %v4128_v32  ;;  %22467 = vmatprep.subr.bf16.mxu1 %v24655_v37 }
 0x236   : > { %22446 = vmatpush3.bf16.msra.mxu0 %v24654_v36  ;;  %16916 = vmatprep.mubr.bf16.mxu0 %v4149_v34  ;;  %v24696_v34 = vld [vmem:[%s25933_s28 + $0x12e8] sm:$0xff]  }
 0x237   : > { %v22154_v47 = vpop.f32.mrf.mxu0  ;;  %v22175_v48 = vpop.f32.mrf.mxu1  ;;  %16877 = vmatmul.mubr.bf16.vlgmr.msra.gmra.mxu1 %v4150_v39  ;;  %22447 = vmatprep.subr.bf16.mxu0 %v24657_v40  ;;  %v24697_v39 = vld [vmem:[%s25933_s28 + $0x12a8] sm:$0xff]  }
 0x238   : > { %v22155_v50 = vadd.f32 %v22154_v47, %v22153_v44  ;;  %22468 = vmatpush3.bf16.msra.mxu1 %v24656_v38  ;;  %16956 = vmatprep.mubr.bf16.mxu1 %v4153_v43 }
 0x239   : > { %v22156_v51 = vpop.f32.mrf.mxu0  ;;  %v22176_v53 = vpop.f32.mrf.mxu1  ;;  %22469 = vmatprep.subr.bf16.mxu1 %v24659_v45  ;;  %v24699_v45 = vld [vmem:[%s25933_s28 + $0x1220] sm:$0xff]  }
 0x23a   : > { %v16359_v55 = vadd.f32 %v22155_v50, %v26586_v4  ;;  %v22177_v56 = vadd.f32 %v22176_v53, %v22175_v48  ;;  %22448 = vmatpush3.bf16.msra.mxu0 %v24658_v41  ;;  %v24671_v4 = vld [vmem:[%s25933_s28 + $0x11d8] sm:$0xff]   ;;  %v24698_v41 = vld [vmem:[%s25933_s28 + $0x1260] sm:$0xff]   ;;  %v24706_v53 = vld [vmem:[%s25933_s28 + $0x1250] sm:$0xff]  }
 0x23b   : > { %v22157_v58 = vpop.f32.mrf.mxu0  ;;  %22449 = vmatprep.subr.bf16.mxu0 %v24661_v49  ;;  %v22178_v61 = vpop.f32.mrf.mxu1  ;;  %v24701_v48 = vld [vmem:[%s25933_s28 + $0x12a0] sm:$0xff]   ;;  %v24702_v49 = vld [vmem:[%s25933_s28 + $0x1258] sm:$0xff]  }
 0x23c   : > { %v26631_v59 = vadd.f32 %v22177_v56, %v16359_v55  ;;  %22470 = vmatpush3.bf16.msra.mxu1 %v24660_v46  ;;  %v24700_v46 = vld [vmem:[%s25933_s28 + $0x12e0] sm:$0xff]   ;;  %v24703_v50 = vld [vmem:[%s25933_s28 + $0x1218] sm:$0xff]   ;;  %v24708_v55 = vld [vmem:[%s25933_s28 + $0x12d0] sm:$0xff]  }
 0x23d   : > { %22471 = vmatprep.subr.bf16.mxu1 %v24663_v54  ;;  %v22179_v0 = vpop.f32.mrf.mxu1  ;;  %v24705_v51 = vld [vmem:[%s25933_s28 + $0x1298] sm:$0xff]   ;;  %v24707_v54 = vld [vmem:[%s25933_s28 + $0x1210] sm:$0xff]   ;;  %v24711_v58 = vld [vmem:[%s25933_s28 + $0x1208] sm:$0xff]  }
 0x23e   : > { %22450 = vmatpush3.bf16.msra.mxu0 %v24662_v52  ;;  %v24704_v52 = vld [vmem:[%s25933_s28 + $0x12d8] sm:$0xff]   ;;  %v24709_v56 = vld [vmem:[%s25933_s28 + $0x1290] sm:$0xff]   ;;  %v245_v61 = vld [vmem:[%s25928_s25 + $0x48] sm:$0xff] }
 0x23f   : > { %22451 = vmatprep.subr.bf16.mxu0 %v24665_v60  ;;  %v24712_v60 = vld [vmem:[%s25933_s28 + $0x12c8] sm:$0xff]   ;;  %v24714_v0 = vld [vmem:[%s25933_s28 + $0x1240] sm:$0xff]  }
 0x240   : > { %22472 = vmatpush3.bf16.msra.mxu1 %v24664_v57  ;;  %v24710_v57 = vld [vmem:[%s25933_s28 + $0x1248] sm:$0xff]  }
 0x241   : > { %22473 = vmatprep.subr.bf16.mxu1 %v24667_v63  ;;  %v4154_v63 = vcombine.high %v245_v61, %v245_v61 }
 0x242   : > { %22452 = vmatpush3.bf16.msra.mxu0 %v24666_v62  ;;  %v4161_v62 = vrot.slane %v245_v61, %v25971_v42  ;;  %v24752_v61 = vld [vmem:[%s25933_s28 + $0x1438] sm:$0xff]  }
 0x243   : > { %22453 = vmatprep.subr.bf16.mxu0 %v24669_v2 }
 0x244   : > { %22474 = vmatpush3.bf16.msra.mxu1 %v24668_v1  ;;  %v24715_v1 = vld [vmem:[%s25933_s28 + $0x1200] sm:$0xff]   ;;  %v4169_v2 = vcombine.high %v4161_v62, %v4161_v62 }
 0x245   : > { %22475 = vmatprep.subr.bf16.mxu1 %v24671_v4  ;;  %v24716_v4 = vld [vmem:[%s25933_s28 + $0x12c0] sm:$0xff]  }
 0x246   : > { %22454 = vmatpush3.bf16.msra.mxu0 %v24670_v3  ;;  %v26690_v3 = vrot.slane %v4154_v63, %v25971_v42 }
 0x247   : > { %22455 = vmatprep.subr.bf16.mxu0 %v24673_v6  ;;  %v24717_v6 = vld [vmem:[%s25933_s28 + $0x1280] sm:$0xff]  }
 0x248   : > { %22476 = vmatpush3.bf16.msra.mxu1 %v24672_v5  ;;  %v4191_v5 = vrot.slane %v4169_v2, %v25971_v42 }
 0x249   : > { %22477 = vmatprep.subr.bf16.mxu1 %v24675_v8  ;;  %v4177_v8 = vrot.slane %v4161_v62, %v25971_v42  ;;  %v24754_v62 = vld [vmem:[%s25933_s28 + $0x14b8] sm:$0xff]  }
 0x24a   : > { %22456 = vmatpush3.bf16.msra.mxu0 %v24674_v7  ;;  %v4170_v7 = vcombine.high %v26690_v3, %v26690_v3 }
 0x24b   : > { %22457 = vmatprep.subr.bf16.mxu0 %v24677_v10  ;;  %v4201_v10 = vcombine.high %v4191_v5, %v4191_v5 }
 0x24c   : > { %22478 = vmatpush3.bf16.msra.mxu1 %v24676_v9  ;;  %v24718_v9 = vld [vmem:[%s25933_s28 + $0x1378] sm:$0xff]  }
 0x24d   : > { %22479 = vmatprep.subr.bf16.mxu1 %v24679_v11  ;;  %v4198_v11 = vrot.slane %v4170_v7, %v25971_v42  ;;  %v24759_v7 = vld [vmem:[%s25933_s28 + $0x1468] sm:$0xff]  }
 0x24e   : > { %22458 = vmatpush3.bf16.msra.mxu0 %v24678_v12  ;;  %v24719_v12 = vld [vmem:[%s25933_s28 + $0x1338] sm:$0xff]  }
 0x24f   : > { %22459 = vmatprep.subr.bf16.mxu0 %v24681_v14  ;;  %v24721_v14 = vld [vmem:[%s25933_s28 + $0x13b8] sm:$0xff]  }
 0x250   : > { %22480 = vmatpush3.bf16.msra.mxu1 %v24680_v13  ;;  %v24720_v13 = vld [vmem:[%s25933_s28 + $0x13f8] sm:$0xff]  }
 0x251   : > { %22481 = vmatprep.subr.bf16.mxu1 %v24683_v16  ;;  %v24722_v16 = vld [vmem:[%s25933_s28 + $0x1370] sm:$0xff]  }
 0x252   : > { %22460 = vmatpush3.bf16.msra.mxu0 %v24682_v15  ;;  %v4199_v15 = vcombine.high %v4177_v8, %v4177_v8 }
 0x253   : > { %22489 = vmatprep.subr.bf16.mxu0 %v24686_v19 }
 0x254   : > { %22482 = vmatpush3.bf16.msra.mxu1 %v24685_v17  ;;  %v24723_v17 = vld [vmem:[%s25933_s28 + $0x1330] sm:$0xff]  }
 0x255   : > { %v22197_v27 = vpop.f32.mrf.mxu0  ;;  %16917 = vmatmul.mubr.bf16.vlgmr.msra.gmra.mxu0 %v4135_v18  ;;  %22511 = vmatprep.subr.bf16.mxu1 %v24688_v20  ;;  %v4202_v18 = vcombine.high %v4198_v11, %v4198_v11  ;;  %v24725_v20 = vld [vmem:[%s25933_s28 + $0x13b0] sm:$0xff]  }
 0x256   : > { %22490 = vmatpush3.bf16.msra.mxu0 %v24687_v21  ;;  %16996 = vmatprep.mubr.bf16.mxu0 %v4191_v5  ;;  %v24724_v21 = vld [vmem:[%s25933_s28 + $0x13f0] sm:$0xff]  }
 0x257   : > { %v22198_v29 = vpop.f32.mrf.mxu0  ;;  %v22219_v30 = vpop.f32.mrf.mxu1  ;;  %16957 = vmatmul.mubr.bf16.vlgmr.msra.gmra.mxu1 %v4151_v23  ;;  %22491 = vmatprep.subr.bf16.mxu0 %v24690_v24  ;;  %v24726_v24 = vld [vmem:[%s25933_s28 + $0x1368] sm:$0xff]  }
 0x258   : > { %v22199_v32 = vadd.f32 %v22198_v29, %v22197_v27  ;;  %22512 = vmatpush3.bf16.msra.mxu1 %v24689_v22  ;;  %17036 = vmatprep.mubr.bf16.mxu1 %v4201_v10  ;;  %v24727_v27 = vld [vmem:[%s25933_s28 + $0x1328] sm:$0xff]  }
 0x259   : > { %v22200_v35 = vpop.f32.mrf.mxu0  ;;  %v22220_v36 = vpop.f32.mrf.mxu1  ;;  %22513 = vmatprep.subr.bf16.mxu1 %v24692_v26  ;;  %v24728_v29 = vld [vmem:[%s25933_s28 + $0x13e8] sm:$0xff]  }
 0x25a   : > { %v16439_v37 = vadd.f32 %v22199_v32, %v26631_v59  ;;  %v22221_v38 = vadd.f32 %v22220_v36, %v22219_v30  ;;  %22492 = vmatpush3.bf16.msra.mxu0 %v24691_v25  ;;  %v24713_v59 = vld [vmem:[%s25933_s28 + $0x1288] sm:$0xff]   ;;  %v24730_v35 = vld [vmem:[%s25933_s28 + $0x1360] sm:$0xff]  }
 0x25b   : > { %v22201_v40 = vpop.f32.mrf.mxu0  ;;  %22493 = vmatprep.subr.bf16.mxu0 %v24694_v31  ;;  %v22222_v43 = vpop.f32.mrf.mxu1  ;;  %v24729_v32 = vld [vmem:[%s25933_s28 + $0x13a8] sm:$0xff]  }
 0x25c   : > { %v26668_v44 = vadd.f32 %v22221_v38, %v16439_v37  ;;  %22514 = vmatpush3.bf16.msra.mxu1 %v24693_v28  ;;  %v24731_v37 = vld [vmem:[%s25933_s28 + $0x1320] sm:$0xff]   ;;  %v24735_v43 = vld [vmem:[%s25933_s28 + $0x1318] sm:$0xff]  }
 0x25d   : > { %22515 = vmatprep.subr.bf16.mxu1 %v24696_v34  ;;  %v22223_v47 = vpop.f32.mrf.mxu1  ;;  %v24732_v38 = vld [vmem:[%s25933_s28 + $0x13e0] sm:$0xff]  }
 0x25e   : > { %22494 = vmatpush3.bf16.msra.mxu0 %v24695_v33  ;;  %v24733_v40 = vld [vmem:[%s25933_s28 + $0x13a0] sm:$0xff]   ;;  %v24739_v47 = vld [vmem:[%s25933_s28 + $0x1310] sm:$0xff]  }
 0x25f   : > { %22495 = vmatprep.subr.bf16.mxu0 %v24698_v41  ;;  %v24734_v41 = vld [vmem:[%s25933_s28 + $0x1358] sm:$0xff]  }
 0x260   : > { %22516 = vmatpush3.bf16.msra.mxu1 %v24697_v39 }
 0x261   : > { %22517 = vmatprep.subr.bf16.mxu1 %v24700_v46  ;;  %v24738_v46 = vld [vmem:[%s25933_s28 + $0x1350] sm:$0xff]  }
 0x262   : > { %22496 = vmatpush3.bf16.msra.mxu0 %v24699_v45  ;;  %v24737_v45 = vld [vmem:[%s25933_s28 + $0x1398] sm:$0xff]  }
 0x263   : > { %22497 = vmatprep.subr.bf16.mxu0 %v24702_v49  ;;  %v24741_v49 = vld [vmem:[%s25933_s28 + $0x1390] sm:$0xff]  }
 0x264   : > { %22518 = vmatpush3.bf16.msra.mxu1 %v24701_v48  ;;  %v24740_v48 = vld [vmem:[%s25933_s28 + $0x13d0] sm:$0xff]  }
 0x265   : > { %22519 = vmatprep.subr.bf16.mxu1 %v24704_v52  ;;  %v24743_v52 = vld [vmem:[%s25933_s28 + $0x1308] sm:$0xff]  }
 0x266   : > { %22498 = vmatpush3.bf16.msra.mxu0 %v24703_v50  ;;  %v24742_v50 = vld [vmem:[%s25933_s28 + $0x1348] sm:$0xff]  }
 0x267   : > { %22499 = vmatprep.subr.bf16.mxu0 %v24706_v53  ;;  %v24745_v53 = vld [vmem:[%s25933_s28 + $0x1388] sm:$0xff]  }
 0x268   : > { %22520 = vmatpush3.bf16.msra.mxu1 %v24705_v51  ;;  %v24744_v51 = vld [vmem:[%s25933_s28 + $0x13c8] sm:$0xff]  }
 0x269   : > { %22521 = vmatprep.subr.bf16.mxu1 %v24708_v55  ;;  %v24747_v55 = vld [vmem:[%s25933_s28 + $0x1300] sm:$0xff]  }
 0x26a   : > { %22500 = vmatpush3.bf16.msra.mxu0 %v24707_v54  ;;  %v24746_v54 = vld [vmem:[%s25933_s28 + $0x1340] sm:$0xff]  }
 0x26b   : > { %22501 = vmatprep.subr.bf16.mxu0 %v24710_v57  ;;  %v24750_v57 = vld [vmem:[%s25933_s28 + $0x1380] sm:$0xff]  }
 0x26c   : > { %22522 = vmatpush3.bf16.msra.mxu1 %v24709_v56  ;;  %v24748_v56 = vld [vmem:[%s25933_s28 + $0x13c0] sm:$0xff]  }
 0x26d   : > { %22523 = vmatprep.subr.bf16.mxu1 %v24712_v60  ;;  %v24751_v60 = vld [vmem:[%s25933_s28 + $0x1478] sm:$0xff]  }
 0x26e   : > { %22502 = vmatpush3.bf16.msra.mxu0 %v24711_v58  ;;  %v4184_v58 = vrot.slane %v26690_v3, %v25971_v42  ;;  %v24757_v3 = vld [vmem:[%s25933_s28 + $0x14f0] sm:$0xff]  }
 0x26f   : > { %22503 = vmatprep.subr.bf16.mxu0 %v24714_v0  ;;  %v24755_v0 = vld [vmem:[%s25933_s28 + $0x1470] sm:$0xff]  }
 0x270   : > { %22524 = vmatpush3.bf16.msra.mxu1 %v24713_v59  ;;  %v24753_v59 = vld [vmem:[%s25933_s28 + $0x14f8] sm:$0xff]   ;;  %v4200_v63 = vcombine.high %v4184_v58, %v4184_v58 }
 0x271   : > { %22525 = vmatprep.subr.bf16.mxu1 %v24716_v4  ;;  %v24758_v4 = vld [vmem:[%s25933_s28 + $0x14b0] sm:$0xff]  }
 0x272   : > { %22504 = vmatpush3.bf16.msra.mxu0 %v24715_v1  ;;  %v24756_v1 = vld [vmem:[%s25933_s28 + $0x1430] sm:$0xff]  }
 0x273   : > { %22533 = vmatprep.subr.bf16.mxu0 %v24718_v9  ;;  %v24760_v9 = vld [vmem:[%s25933_s28 + $0x1428] sm:$0xff]  }
 0x274   : > { %22526 = vmatpush3.bf16.msra.mxu1 %v24717_v6 }
 0x275   : > { %v22241_v19 = vpop.f32.mrf.mxu0  ;;  %16997 = vmatmul.mubr.bf16.vlgmr.msra.gmra.mxu0 %v4177_v8  ;;  %22555 = vmatprep.subr.bf16.mxu1 %v24720_v13 }
 0x276   : > { %22534 = vmatpush3.bf16.msra.mxu0 %v24719_v12  ;;  %17076 = vmatprep.mubr.bf16.mxu0 %v4198_v11  ;;  %v24761_v11 = vld [vmem:[%s25933_s28 + $0x14e8] sm:$0xff]  }
 0x277   : > { %v22242_v22 = vpop.f32.mrf.mxu0  ;;  %v22263_v23 = vpop.f32.mrf.mxu1  ;;  %17037 = vmatmul.mubr.bf16.vlgmr.msra.gmra.mxu1 %v4199_v15  ;;  %22535 = vmatprep.subr.bf16.mxu0 %v24722_v16  ;;  %v24762_v15 = vld [vmem:[%s25933_s28 + $0x14a8] sm:$0xff]  }
 0x278   : > { %v22243_v25 = vadd.f32 %v22242_v22, %v22241_v19  ;;  %22556 = vmatpush3.bf16.msra.mxu1 %v24721_v14  ;;  %17116 = vmatprep.mubr.bf16.mxu1 %v4202_v18 }
 0x279   : > { %v22244_v26 = vpop.f32.mrf.mxu0  ;;  %v22264_v28 = vpop.f32.mrf.mxu1  ;;  %22557 = vmatprep.subr.bf16.mxu1 %v24724_v21  ;;  %v24764_v21 = vld [vmem:[%s25933_s28 + $0x1420] sm:$0xff]  }
 0x27a   : > { %v16519_v30 = vadd.f32 %v22243_v25, %v26668_v44  ;;  %v22265_v31 = vadd.f32 %v22264_v28, %v22263_v23  ;;  %22536 = vmatpush3.bf16.msra.mxu0 %v24723_v17  ;;  %v24736_v44 = vld [vmem:[%s25933_s28 + $0x13d8] sm:$0xff]   ;;  %v24763_v17 = vld [vmem:[%s25933_s28 + $0x1460] sm:$0xff]   ;;  %v24771_v28 = vld [vmem:[%s25933_s28 + $0x1450] sm:$0xff]  }
 0x27b   : > { %v22245_v33 = vpop.f32.mrf.mxu0  ;;  %22537 = vmatprep.subr.bf16.mxu0 %v24726_v24  ;;  %v22266_v36 = vpop.f32.mrf.mxu1  ;;  %v24766_v23 = vld [vmem:[%s25933_s28 + $0x14a0] sm:$0xff]   ;;  %v24767_v24 = vld [vmem:[%s25933_s28 + $0x1458] sm:$0xff]  }
 0x27c   : > { %v26713_v34 = vadd.f32 %v22265_v31, %v16519_v30  ;;  %22558 = vmatpush3.bf16.msra.mxu1 %v24725_v20  ;;  %v24765_v20 = vld [vmem:[%s25933_s28 + $0x14e0] sm:$0xff]   ;;  %v24768_v25 = vld [vmem:[%s25933_s28 + $0x1418] sm:$0xff]   ;;  %v24773_v30 = vld [vmem:[%s25933_s28 + $0x14d0] sm:$0xff]  }
 0x27d   : > { %22559 = vmatprep.subr.bf16.mxu1 %v24728_v29  ;;  %v22267_v39 = vpop.f32.mrf.mxu1  ;;  %v24770_v26 = vld [vmem:[%s25933_s28 + $0x1498] sm:$0xff]   ;;  %v24772_v29 = vld [vmem:[%s25933_s28 + $0x1410] sm:$0xff]   ;;  %v24776_v33 = vld [vmem:[%s25933_s28 + $0x1408] sm:$0xff]  }
 0x27e   : > { %22538 = vmatpush3.bf16.msra.mxu0 %v24727_v27  ;;  %v24769_v27 = vld [vmem:[%s25933_s28 + $0x14d8] sm:$0xff]   ;;  %v24774_v31 = vld [vmem:[%s25933_s28 + $0x1490] sm:$0xff]   ;;  %v24779_v39 = vld [vmem:[%s25933_s28 + $0x1440] sm:$0xff]  }
 0x27f   : > { %22539 = vmatprep.subr.bf16.mxu0 %v24730_v35  ;;  %v24777_v35 = vld [vmem:[%s25933_s28 + $0x14c8] sm:$0xff]   ;;  %v246_v36 = vld [vmem:[%s25928_s25 + $0x50] sm:$0xff] }
 0x280   : > { %22560 = vmatpush3.bf16.msra.mxu1 %v24729_v32  ;;  %v24775_v32 = vld [vmem:[%s25933_s28 + $0x1448] sm:$0xff]  }
 0x281   : > { %22561 = vmatprep.subr.bf16.mxu1 %v24732_v38  ;;  %v4203_v38 = vcombine.high %v246_v36, %v246_v36 }
 0x282   : > { %22540 = vmatpush3.bf16.msra.mxu0 %v24731_v37  ;;  %v4210_v37 = vrot.slane %v246_v36, %v25971_v42  ;;  %v24817_v36 = vld [vmem:[%s25933_s28 + $0x1638] sm:$0xff]  }
 0x283   : > { %22541 = vmatprep.subr.bf16.mxu0 %v24734_v41 }
 0x284   : > { %22562 = vmatpush3.bf16.msra.mxu1 %v24733_v40  ;;  %v24780_v40 = vld [vmem:[%s25933_s28 + $0x1400] sm:$0xff]   ;;  %v4218_v41 = vcombine.high %v4210_v37, %v4210_v37 }
 0x285   : > { %22563 = vmatprep.subr.bf16.mxu1 %v24736_v44  ;;  %v24781_v44 = vld [vmem:[%s25933_s28 + $0x14c0] sm:$0xff]  }
 0x286   : > { %22542 = vmatpush3.bf16.msra.mxu0 %v24735_v43  ;;  %v26772_v43 = vrot.slane %v4203_v38, %v25971_v42 }
 0x287   : > { %22543 = vmatprep.subr.bf16.mxu0 %v24738_v46  ;;  %v24782_v46 = vld [vmem:[%s25933_s28 + $0x1480] sm:$0xff]  }
 0x288   : > { %22564 = vmatpush3.bf16.msra.mxu1 %v24737_v45  ;;  %v4240_v45 = vrot.slane %v4218_v41, %v25971_v42 }
 0x289   : > { %22565 = vmatprep.subr.bf16.mxu1 %v24740_v48  ;;  %v4226_v48 = vrot.slane %v4210_v37, %v25971_v42  ;;  %v24819_v37 = vld [vmem:[%s25933_s28 + $0x16b8] sm:$0xff]  }
 0x28a   : > { %22544 = vmatpush3.bf16.msra.mxu0 %v24739_v47  ;;  %v4219_v47 = vcombine.high %v26772_v43, %v26772_v43 }
 0x28b   : > { %22545 = vmatprep.subr.bf16.mxu0 %v24742_v50  ;;  %v4250_v50 = vcombine.high %v4240_v45, %v4240_v45 }
 0x28c   : > { %22566 = vmatpush3.bf16.msra.mxu1 %v24741_v49  ;;  %v24783_v49 = vld [vmem:[%s25933_s28 + $0x1578] sm:$0xff]  }
 0x28d   : > { %22567 = vmatprep.subr.bf16.mxu1 %v24744_v51  ;;  %v4247_v51 = vrot.slane %v4219_v47, %v25971_v42  ;;  %v24824_v47 = vld [vmem:[%s25933_s28 + $0x1668] sm:$0xff]  }
 0x28e   : > { %22546 = vmatpush3.bf16.msra.mxu0 %v24743_v52  ;;  %v24784_v52 = vld [vmem:[%s25933_s28 + $0x1538] sm:$0xff]  }
 0x28f   : > { %22547 = vmatprep.subr.bf16.mxu0 %v24746_v54  ;;  %v24786_v54 = vld [vmem:[%s25933_s28 + $0x15b8] sm:$0xff]  }
 0x290   : > { %22568 = vmatpush3.bf16.msra.mxu1 %v24745_v53  ;;  %v24785_v53 = vld [vmem:[%s25933_s28 + $0x15f8] sm:$0xff]  }
 0x291   : > { %22569 = vmatprep.subr.bf16.mxu1 %v24748_v56  ;;  %v24787_v56 = vld [vmem:[%s25933_s28 + $0x1570] sm:$0xff]  }
 0x292   : > { %22548 = vmatpush3.bf16.msra.mxu0 %v24747_v55  ;;  %v4248_v55 = vcombine.high %v4226_v48, %v4226_v48 }
 0x293   : > { %22577 = vmatprep.subr.bf16.mxu0 %v24751_v60 }
 0x294   : > { %22570 = vmatpush3.bf16.msra.mxu1 %v24750_v57  ;;  %v24788_v57 = vld [vmem:[%s25933_s28 + $0x1530] sm:$0xff]  }
 0x295   : > { %v22285_v2 = vpop.f32.mrf.mxu0  ;;  %17077 = vmatmul.mubr.bf16.vlgmr.msra.gmra.mxu0 %v4184_v58  ;;  %22599 = vmatprep.subr.bf16.mxu1 %v24753_v59  ;;  %v4251_v58 = vcombine.high %v4247_v51, %v4247_v51  ;;  %v24790_v59 = vld [vmem:[%s25933_s28 + $0x15b0] sm:$0xff]  }
 0x296   : > { %22578 = vmatpush3.bf16.msra.mxu0 %v24752_v61  ;;  %17156 = vmatprep.mubr.bf16.mxu0 %v4240_v45  ;;  %v24789_v61 = vld [vmem:[%s25933_s28 + $0x15f0] sm:$0xff]  }
 0x297   : > { %v22286_v5 = vpop.f32.mrf.mxu0  ;;  %v22307_v6 = vpop.f32.mrf.mxu1  ;;  %17117 = vmatmul.mubr.bf16.vlgmr.msra.gmra.mxu1 %v4200_v63  ;;  %22579 = vmatprep.subr.bf16.mxu0 %v24755_v0  ;;  %v24791_v0 = vld [vmem:[%s25933_s28 + $0x1568] sm:$0xff]  }
 0x298   : > { %v22287_v8 = vadd.f32 %v22286_v5, %v22285_v2  ;;  %22600 = vmatpush3.bf16.msra.mxu1 %v24754_v62  ;;  %17196 = vmatprep.mubr.bf16.mxu1 %v4250_v50  ;;  %v24792_v2 = vld [vmem:[%s25933_s28 + $0x1528] sm:$0xff]  }
 0x299   : > { %v22288_v10 = vpop.f32.mrf.mxu0  ;;  %v22308_v12 = vpop.f32.mrf.mxu1  ;;  %22601 = vmatprep.subr.bf16.mxu1 %v24757_v3  ;;  %v24793_v5 = vld [vmem:[%s25933_s28 + $0x15e8] sm:$0xff]  }
 0x29a   : > { %v16599_v13 = vadd.f32 %v22287_v8, %v26713_v34  ;;  %v22309_v14 = vadd.f32 %v22308_v12, %v22307_v6  ;;  %22580 = vmatpush3.bf16.msra.mxu0 %v24756_v1  ;;  %v24778_v34 = vld [vmem:[%s25933_s28 + $0x1488] sm:$0xff]   ;;  %v24795_v10 = vld [vmem:[%s25933_s28 + $0x1560] sm:$0xff]  }
 0x29b   : > { %v22289_v16 = vpop.f32.mrf.mxu0  ;;  %22581 = vmatprep.subr.bf16.mxu0 %v24759_v7  ;;  %v22310_v18 = vpop.f32.mrf.mxu1  ;;  %v24794_v8 = vld [vmem:[%s25933_s28 + $0x15a8] sm:$0xff]  }
 0x29c   : > { %v26750_v19 = vadd.f32 %v22309_v14, %v16599_v13  ;;  %22602 = vmatpush3.bf16.msra.mxu1 %v24758_v4  ;;  %v24796_v13 = vld [vmem:[%s25933_s28 + $0x1520] sm:$0xff]   ;;  %v24800_v18 = vld [vmem:[%s25933_s28 + $0x1518] sm:$0xff]  }
 0x29d   : > { %22603 = vmatprep.subr.bf16.mxu1 %v24761_v11  ;;  %v22311_v22 = vpop.f32.mrf.mxu1  ;;  %v24797_v14 = vld [vmem:[%s25933_s28 + $0x15e0] sm:$0xff]  }
 0x29e   : > { %22582 = vmatpush3.bf16.msra.mxu0 %v24760_v9  ;;  %v24798_v16 = vld [vmem:[%s25933_s28 + $0x15a0] sm:$0xff]   ;;  %v24804_v22 = vld [vmem:[%s25933_s28 + $0x1510] sm:$0xff]  }
 0x29f   : > { %22583 = vmatprep.subr.bf16.mxu0 %v24763_v17  ;;  %v24799_v17 = vld [vmem:[%s25933_s28 + $0x1558] sm:$0xff]  }
 0x2a0   : > { %22604 = vmatpush3.bf16.msra.mxu1 %v24762_v15 }
 0x2a1   : > { %22605 = vmatprep.subr.bf16.mxu1 %v24765_v20  ;;  %v24803_v20 = vld [vmem:[%s25933_s28 + $0x1550] sm:$0xff]  }
 0x2a2   : > { %22584 = vmatpush3.bf16.msra.mxu0 %v24764_v21  ;;  %v24802_v21 = vld [vmem:[%s25933_s28 + $0x1598] sm:$0xff]  }
 0x2a3   : > { %22585 = vmatprep.subr.bf16.mxu0 %v24767_v24  ;;  %v24806_v24 = vld [vmem:[%s25933_s28 + $0x1590] sm:$0xff]  }
 0x2a4   : > { %22606 = vmatpush3.bf16.msra.mxu1 %v24766_v23  ;;  %v24805_v23 = vld [vmem:[%s25933_s28 + $0x15d0] sm:$0xff]  }
 0x2a5   : > { %22607 = vmatprep.subr.bf16.mxu1 %v24769_v27  ;;  %v24808_v27 = vld [vmem:[%s25933_s28 + $0x1508] sm:$0xff]  }
 0x2a6   : > { %22586 = vmatpush3.bf16.msra.mxu0 %v24768_v25  ;;  %v24807_v25 = vld [vmem:[%s25933_s28 + $0x1548] sm:$0xff]  }
 0x2a7   : > { %22587 = vmatprep.subr.bf16.mxu0 %v24771_v28  ;;  %v24810_v28 = vld [vmem:[%s25933_s28 + $0x1588] sm:$0xff]  }
 0x2a8   : > { %22608 = vmatpush3.bf16.msra.mxu1 %v24770_v26  ;;  %v24809_v26 = vld [vmem:[%s25933_s28 + $0x15c8] sm:$0xff]  }
 0x2a9   : > { %22609 = vmatprep.subr.bf16.mxu1 %v24773_v30  ;;  %v24812_v30 = vld [vmem:[%s25933_s28 + $0x1500] sm:$0xff]  }
 0x2aa   : > { %22588 = vmatpush3.bf16.msra.mxu0 %v24772_v29  ;;  %v24811_v29 = vld [vmem:[%s25933_s28 + $0x1540] sm:$0xff]  }
 0x2ab   : > { %22589 = vmatprep.subr.bf16.mxu0 %v24775_v32  ;;  %v24815_v32 = vld [vmem:[%s25933_s28 + $0x1580] sm:$0xff]  }
 0x2ac   : > { %22610 = vmatpush3.bf16.msra.mxu1 %v24774_v31  ;;  %v24813_v31 = vld [vmem:[%s25933_s28 + $0x15c0] sm:$0xff]  }
 0x2ad   : > { %22611 = vmatprep.subr.bf16.mxu1 %v24777_v35  ;;  %v24816_v35 = vld [vmem:[%s25933_s28 + $0x1678] sm:$0xff]  }
 0x2ae   : > { %22590 = vmatpush3.bf16.msra.mxu0 %v24776_v33  ;;  %v4233_v33 = vrot.slane %v26772_v43, %v25971_v42  ;;  %v24822_v43 = vld [vmem:[%s25933_s28 + $0x16f0] sm:$0xff]  }
 0x2af   : > { %22591 = vmatprep.subr.bf16.mxu0 %v24779_v39  ;;  %v24820_v39 = vld [vmem:[%s25933_s28 + $0x1670] sm:$0xff]  }
 0x2b0   : > { %22612 = vmatpush3.bf16.msra.mxu1 %v24778_v34  ;;  %v24818_v34 = vld [vmem:[%s25933_s28 + $0x16f8] sm:$0xff]   ;;  %v4249_v38 = vcombine.high %v4233_v33, %v4233_v33 }
 0x2b1   : > { %22613 = vmatprep.subr.bf16.mxu1 %v24781_v44  ;;  %v24823_v44 = vld [vmem:[%s25933_s28 + $0x16b0] sm:$0xff]  }
 0x2b2   : > { %22592 = vmatpush3.bf16.msra.mxu0 %v24780_v40  ;;  %v24821_v40 = vld [vmem:[%s25933_s28 + $0x1630] sm:$0xff]  }
 0x2b3   : > { %22621 = vmatprep.subr.bf16.mxu0 %v24783_v49  ;;  %v24825_v49 = vld [vmem:[%s25933_s28 + $0x1628] sm:$0xff]  }
 0x2b4   : > { %22614 = vmatpush3.bf16.msra.mxu1 %v24782_v46 }
 0x2b5   : > { %v22329_v60 = vpop.f32.mrf.mxu0  ;;  %17157 = vmatmul.mubr.bf16.vlgmr.msra.gmra.mxu0 %v4226_v48  ;;  %22643 = vmatprep.subr.bf16.mxu1 %v24785_v53 }
 0x2b6   : > { %22622 = vmatpush3.bf16.msra.mxu0 %v24784_v52  ;;  %17236 = vmatprep.mubr.bf16.mxu0 %v4247_v51  ;;  %v24826_v51 = vld [vmem:[%s25933_s28 + $0x16e8] sm:$0xff]  }
 0x2b7   : > { %v22330_v62 = vpop.f32.mrf.mxu0  ;;  %v22351_v63 = vpop.f32.mrf.mxu1  ;;  %17197 = vmatmul.mubr.bf16.vlgmr.msra.gmra.mxu1 %v4248_v55  ;;  %22623 = vmatprep.subr.bf16.mxu0 %v24787_v56  ;;  %v24827_v55 = vld [vmem:[%s25933_s28 + $0x16a8] sm:$0xff]  }
 0x2b8   : > { %v22331_v1 = vadd.f32 %v22330_v62, %v22329_v60  ;;  %22644 = vmatpush3.bf16.msra.mxu1 %v24786_v54  ;;  %17276 = vmatprep.mubr.bf16.mxu1 %v4251_v58 }
 0x2b9   : > { %v22332_v3 = vpop.f32.mrf.mxu0  ;;  %v22352_v4 = vpop.f32.mrf.mxu1  ;;  %22645 = vmatprep.subr.bf16.mxu1 %v24789_v61  ;;  %v24829_v61 = vld [vmem:[%s25933_s28 + $0x1620] sm:$0xff]  }
 0x2ba   : > { %v16679_v6 = vadd.f32 %v22331_v1, %v26750_v19  ;;  %v22353_v7 = vadd.f32 %v22352_v4, %v22351_v63  ;;  %22624 = vmatpush3.bf16.msra.mxu0 %v24788_v57  ;;  %v24801_v19 = vld [vmem:[%s25933_s28 + $0x15d8] sm:$0xff]   ;;  %v24828_v57 = vld [vmem:[%s25933_s28 + $0x1660] sm:$0xff]   ;;  %v24836_v4 = vld [vmem:[%s25933_s28 + $0x1650] sm:$0xff]  }
 0x2bb   : > { %v22333_v9 = vpop.f32.mrf.mxu0  ;;  %22625 = vmatprep.subr.bf16.mxu0 %v24791_v0  ;;  %v22354_v12 = vpop.f32.mrf.mxu1  ;;  %v24831_v63 = vld [vmem:[%s25933_s28 + $0x16a0] sm:$0xff]   ;;  %v24832_v0 = vld [vmem:[%s25933_s28 + $0x1658] sm:$0xff]  }
 0x2bc   : > { %v26795_v11 = vadd.f32 %v22353_v7, %v16679_v6  ;;  %22646 = vmatpush3.bf16.msra.mxu1 %v24790_v59  ;;  %v24830_v59 = vld [vmem:[%s25933_s28 + $0x16e0] sm:$0xff]   ;;  %v24833_v1 = vld [vmem:[%s25933_s28 + $0x1618] sm:$0xff]   ;;  %v24838_v6 = vld [vmem:[%s25933_s28 + $0x16d0] sm:$0xff]  }
 0x2bd   : > { %22647 = vmatprep.subr.bf16.mxu1 %v24793_v5  ;;  %v22355_v15 = vpop.f32.mrf.mxu1  ;;  %v24835_v3 = vld [vmem:[%s25933_s28 + $0x1698] sm:$0xff]   ;;  %v24837_v5 = vld [vmem:[%s25933_s28 + $0x1610] sm:$0xff]   ;;  %v24841_v9 = vld [vmem:[%s25933_s28 + $0x1608] sm:$0xff]  }
 0x2be   : > { %22626 = vmatpush3.bf16.msra.mxu0 %v24792_v2  ;;  %v24834_v2 = vld [vmem:[%s25933_s28 + $0x16d8] sm:$0xff]   ;;  %v24839_v7 = vld [vmem:[%s25933_s28 + $0x1690] sm:$0xff]   ;;  %v24844_v15 = vld [vmem:[%s25933_s28 + $0x1640] sm:$0xff]  }
 0x2bf   : > { %22627 = vmatprep.subr.bf16.mxu0 %v24795_v10  ;;  %v24842_v10 = vld [vmem:[%s25933_s28 + $0x16c8] sm:$0xff]   ;;  %v247_v12 = vld [vmem:[%s25928_s25 + $0x58] sm:$0xff] }
 0x2c0   : > { %22648 = vmatpush3.bf16.msra.mxu1 %v24794_v8  ;;  %v24840_v8 = vld [vmem:[%s25933_s28 + $0x1648] sm:$0xff]  }
 0x2c1   : > { %22649 = vmatprep.subr.bf16.mxu1 %v24797_v14  ;;  %v4252_v14 = vcombine.high %v247_v12, %v247_v12 }
 0x2c2   : > { %22628 = vmatpush3.bf16.msra.mxu0 %v24796_v13  ;;  %v4259_v13 = vrot.slane %v247_v12, %v25971_v42  ;;  %v24882_v12 = vld [vmem:[%s25933_s28 + $0x1838] sm:$0xff]  }
 0x2c3   : > { %22629 = vmatprep.subr.bf16.mxu0 %v24799_v17 }
 0x2c4   : > { %22650 = vmatpush3.bf16.msra.mxu1 %v24798_v16  ;;  %v24845_v16 = vld [vmem:[%s25933_s28 + $0x1600] sm:$0xff]   ;;  %v4267_v17 = vcombine.high %v4259_v13, %v4259_v13 }
 0x2c5   : > { %22651 = vmatprep.subr.bf16.mxu1 %v24801_v19  ;;  %v24846_v19 = vld [vmem:[%s25933_s28 + $0x16c0] sm:$0xff]  }
 0x2c6   : > { %22630 = vmatpush3.bf16.msra.mxu0 %v24800_v18  ;;  %v26854_v18 = vrot.slane %v4252_v14, %v25971_v42 }
 0x2c7   : > { %22631 = vmatprep.subr.bf16.mxu0 %v24803_v20  ;;  %v24847_v20 = vld [vmem:[%s25933_s28 + $0x1680] sm:$0xff]  }
 0x2c8   : > { %22652 = vmatpush3.bf16.msra.mxu1 %v24802_v21  ;;  %v4289_v21 = vrot.slane %v4267_v17, %v25971_v42 }
 0x2c9   : > { %22653 = vmatprep.subr.bf16.mxu1 %v24805_v23  ;;  %v4275_v23 = vrot.slane %v4259_v13, %v25971_v42  ;;  %v24884_v13 = vld [vmem:[%s25933_s28 + $0x18b8] sm:$0xff]  }
 0x2ca   : > { %22632 = vmatpush3.bf16.msra.mxu0 %v24804_v22  ;;  %v4268_v22 = vcombine.high %v26854_v18, %v26854_v18 }
 0x2cb   : > { %22633 = vmatprep.subr.bf16.mxu0 %v24807_v25  ;;  %v4299_v25 = vcombine.high %v4289_v21, %v4289_v21 }
 0x2cc   : > { %22654 = vmatpush3.bf16.msra.mxu1 %v24806_v24  ;;  %v24848_v24 = vld [vmem:[%s25933_s28 + $0x1778] sm:$0xff]  }
 0x2cd   : > { %22655 = vmatprep.subr.bf16.mxu1 %v24809_v26  ;;  %v4296_v26 = vrot.slane %v4268_v22, %v25971_v42  ;;  %v24889_v22 = vld [vmem:[%s25933_s28 + $0x1868] sm:$0xff]  }
 0x2ce   : > { %22634 = vmatpush3.bf16.msra.mxu0 %v24808_v27  ;;  %v24849_v27 = vld [vmem:[%s25933_s28 + $0x1738] sm:$0xff]  }
 0x2cf   : > { %22635 = vmatprep.subr.bf16.mxu0 %v24811_v29  ;;  %v24851_v29 = vld [vmem:[%s25933_s28 + $0x17b8] sm:$0xff]  }
 0x2d0   : > { %22656 = vmatpush3.bf16.msra.mxu1 %v24810_v28  ;;  %v24850_v28 = vld [vmem:[%s25933_s28 + $0x17f8] sm:$0xff]  }
 0x2d1   : > { %22657 = vmatprep.subr.bf16.mxu1 %v24813_v31  ;;  %v24852_v31 = vld [vmem:[%s25933_s28 + $0x1770] sm:$0xff]  }
 0x2d2   : > { %22636 = vmatpush3.bf16.msra.mxu0 %v24812_v30  ;;  %v4297_v30 = vcombine.high %v4275_v23, %v4275_v23 }
 0x2d3   : > { %22665 = vmatprep.subr.bf16.mxu0 %v24816_v35 }
 0x2d4   : > { %22658 = vmatpush3.bf16.msra.mxu1 %v24815_v32  ;;  %v24853_v32 = vld [vmem:[%s25933_s28 + $0x1730] sm:$0xff]  }
 0x2d5   : > { %v22373_v41 = vpop.f32.mrf.mxu0  ;;  %17237 = vmatmul.mubr.bf16.vlgmr.msra.gmra.mxu0 %v4233_v33  ;;  %22687 = vmatprep.subr.bf16.mxu1 %v24818_v34  ;;  %v4300_v33 = vcombine.high %v4296_v26, %v4296_v26  ;;  %v24855_v34 = vld [vmem:[%s25933_s28 + $0x17b0] sm:$0xff]  }
 0x2d6   : > { %22666 = vmatpush3.bf16.msra.mxu0 %v24817_v36  ;;  %17316 = vmatprep.mubr.bf16.mxu0 %v4289_v21  ;;  %v24854_v36 = vld [vmem:[%s25933_s28 + $0x17f0] sm:$0xff]  }
 0x2d7   : > { %v22374_v45 = vpop.f32.mrf.mxu0  ;;  %v22395_v46 = vpop.f32.mrf.mxu1  ;;  %17277 = vmatmul.mubr.bf16.vlgmr.msra.gmra.mxu1 %v4249_v38  ;;  %22667 = vmatprep.subr.bf16.mxu0 %v24820_v39  ;;  %v24856_v39 = vld [vmem:[%s25933_s28 + $0x1768] sm:$0xff]  }
 0x2d8   : > { %v22375_v48 = vadd.f32 %v22374_v45, %v22373_v41  ;;  %22688 = vmatpush3.bf16.msra.mxu1 %v24819_v37  ;;  %17356 = vmatprep.mubr.bf16.mxu1 %v4299_v25  ;;  %v24857_v41 = vld [vmem:[%s25933_s28 + $0x1728] sm:$0xff]  }
 0x2d9   : > { %v22376_v50 = vpop.f32.mrf.mxu0  ;;  %v22396_v52 = vpop.f32.mrf.mxu1  ;;  %22689 = vmatprep.subr.bf16.mxu1 %v24822_v43  ;;  %v24858_v45 = vld [vmem:[%s25933_s28 + $0x17e8] sm:$0xff]  }
 0x2da   : > { %v16759_v53 = vadd.f32 %v22375_v48, %v26795_v11  ;;  %v22397_v54 = vadd.f32 %v22396_v52, %v22395_v46  ;;  %22668 = vmatpush3.bf16.msra.mxu0 %v24821_v40  ;;  %v24843_v11 = vld [vmem:[%s25933_s28 + $0x1688] sm:$0xff]   ;;  %v24860_v50 = vld [vmem:[%s25933_s28 + $0x1760] sm:$0xff]  }
 0x2db   : > { %v22377_v56 = vpop.f32.mrf.mxu0  ;;  %22669 = vmatprep.subr.bf16.mxu0 %v24824_v47  ;;  %v22398_v58 = vpop.f32.mrf.mxu1  ;;  %v24859_v48 = vld [vmem:[%s25933_s28 + $0x17a8] sm:$0xff]  }
 0x2dc   : > { %v26832_v60 = vadd.f32 %v22397_v54, %v16759_v53  ;;  %22690 = vmatpush3.bf16.msra.mxu1 %v24823_v44  ;;  %v24861_v53 = vld [vmem:[%s25933_s28 + $0x1720] sm:$0xff]   ;;  %v24865_v58 = vld [vmem:[%s25933_s28 + $0x1718] sm:$0xff]  }
 0x2dd   : > { %22691 = vmatprep.subr.bf16.mxu1 %v24826_v51  ;;  %v22399_v62 = vpop.f32.mrf.mxu1  ;;  %v24862_v54 = vld [vmem:[%s25933_s28 + $0x17e0] sm:$0xff]  }
 0x2de   : > { %22670 = vmatpush3.bf16.msra.mxu0 %v24825_v49  ;;  %v24863_v56 = vld [vmem:[%s25933_s28 + $0x17a0] sm:$0xff]   ;;  %v24869_v62 = vld [vmem:[%s25933_s28 + $0x1710] sm:$0xff]  }
 0x2df   : > { %22671 = vmatprep.subr.bf16.mxu0 %v24828_v57  ;;  %v24864_v57 = vld [vmem:[%s25933_s28 + $0x1758] sm:$0xff]  }
 0x2e0   : > { %22692 = vmatpush3.bf16.msra.mxu1 %v24827_v55 }
 0x2e1   : > { %22693 = vmatprep.subr.bf16.mxu1 %v24830_v59  ;;  %v24868_v59 = vld [vmem:[%s25933_s28 + $0x1750] sm:$0xff]  }
 0x2e2   : > { %22672 = vmatpush3.bf16.msra.mxu0 %v24829_v61  ;;  %v24867_v61 = vld [vmem:[%s25933_s28 + $0x1798] sm:$0xff]  }
 0x2e3   : > { %22673 = vmatprep.subr.bf16.mxu0 %v24832_v0  ;;  %v24871_v0 = vld [vmem:[%s25933_s28 + $0x1790] sm:$0xff]  }
 0x2e4   : > { %22694 = vmatpush3.bf16.msra.mxu1 %v24831_v63  ;;  %v24870_v63 = vld [vmem:[%s25933_s28 + $0x17d0] sm:$0xff]  }
 0x2e5   : > { %22695 = vmatprep.subr.bf16.mxu1 %v24834_v2  ;;  %v24873_v2 = vld [vmem:[%s25933_s28 + $0x1708] sm:$0xff]  }
 0x2e6   : > { %22674 = vmatpush3.bf16.msra.mxu0 %v24833_v1  ;;  %v24872_v1 = vld [vmem:[%s25933_s28 + $0x1748] sm:$0xff]  }
 0x2e7   : > { %22675 = vmatprep.subr.bf16.mxu0 %v24836_v4  ;;  %v24875_v4 = vld [vmem:[%s25933_s28 + $0x1788] sm:$0xff]  }
 0x2e8   : > { %22696 = vmatpush3.bf16.msra.mxu1 %v24835_v3  ;;  %v24874_v3 = vld [vmem:[%s25933_s28 + $0x17c8] sm:$0xff]  }
 0x2e9   : > { %22697 = vmatprep.subr.bf16.mxu1 %v24838_v6  ;;  %v24877_v6 = vld [vmem:[%s25933_s28 + $0x1700] sm:$0xff]  }
 0x2ea   : > { %22676 = vmatpush3.bf16.msra.mxu0 %v24837_v5  ;;  %v24876_v5 = vld [vmem:[%s25933_s28 + $0x1740] sm:$0xff]  }
 0x2eb   : > { %22677 = vmatprep.subr.bf16.mxu0 %v24840_v8  ;;  %v24880_v8 = vld [vmem:[%s25933_s28 + $0x1780] sm:$0xff]  }
 0x2ec   : > { %22698 = vmatpush3.bf16.msra.mxu1 %v24839_v7  ;;  %v24878_v7 = vld [vmem:[%s25933_s28 + $0x17c0] sm:$0xff]  }
 0x2ed   : > { %22699 = vmatprep.subr.bf16.mxu1 %v24842_v10  ;;  %v24881_v10 = vld [vmem:[%s25933_s28 + $0x1878] sm:$0xff]  }
 0x2ee   : > { %22678 = vmatpush3.bf16.msra.mxu0 %v24841_v9  ;;  %v4282_v9 = vrot.slane %v26854_v18, %v25971_v42  ;;  %v24887_v18 = vld [vmem:[%s25933_s28 + $0x18f0] sm:$0xff]  }
 0x2ef   : > { %22679 = vmatprep.subr.bf16.mxu0 %v24844_v15  ;;  %v24885_v15 = vld [vmem:[%s25933_s28 + $0x1870] sm:$0xff]  }
 0x2f0   : > { %22700 = vmatpush3.bf16.msra.mxu1 %v24843_v11  ;;  %v24883_v11 = vld [vmem:[%s25933_s28 + $0x18f8] sm:$0xff]   ;;  %v4298_v14 = vcombine.high %v4282_v9, %v4282_v9 }
 0x2f1   : > { %22701 = vmatprep.subr.bf16.mxu1 %v24846_v19  ;;  %v24888_v19 = vld [vmem:[%s25933_s28 + $0x18b0] sm:$0xff]  }
 0x2f2   : > { %22680 = vmatpush3.bf16.msra.mxu0 %v24845_v16  ;;  %v24886_v16 = vld [vmem:[%s25933_s28 + $0x1830] sm:$0xff]  }
 0x2f3   : > { %22709 = vmatprep.subr.bf16.mxu0 %v24848_v24  ;;  %v24890_v24 = vld [vmem:[%s25933_s28 + $0x1828] sm:$0xff]  }
 0x2f4   : > { %22702 = vmatpush3.bf16.msra.mxu1 %v24847_v20 }
 0x2f5   : > { %v22417_v35 = vpop.f32.mrf.mxu0  ;;  %17317 = vmatmul.mubr.bf16.vlgmr.msra.gmra.mxu0 %v4275_v23  ;;  %22731 = vmatprep.subr.bf16.mxu1 %v24850_v28 }
 0x2f6   : > { %22710 = vmatpush3.bf16.msra.mxu0 %v24849_v27  ;;  %17396 = vmatprep.mubr.bf16.mxu0 %v4296_v26  ;;  %v24891_v26 = vld [vmem:[%s25933_s28 + $0x18e8] sm:$0xff]  }
 0x2f7   : > { %v22418_v37 = vpop.f32.mrf.mxu0  ;;  %v22439_v38 = vpop.f32.mrf.mxu1  ;;  %17357 = vmatmul.mubr.bf16.vlgmr.msra.gmra.mxu1 %v4297_v30  ;;  %22711 = vmatprep.subr.bf16.mxu0 %v24852_v31  ;;  %v24892_v30 = vld [vmem:[%s25933_s28 + $0x18a8] sm:$0xff]  }
 0x2f8   : > { %v22419_v40 = vadd.f32 %v22418_v37, %v22417_v35  ;;  %22732 = vmatpush3.bf16.msra.mxu1 %v24851_v29  ;;  %17436 = vmatprep.mubr.bf16.mxu1 %v4300_v33 }
 0x2f9   : > { %v22420_v43 = vpop.f32.mrf.mxu0  ;;  %v22440_v44 = vpop.f32.mrf.mxu1  ;;  %22733 = vmatprep.subr.bf16.mxu1 %v24854_v36  ;;  %v24894_v36 = vld [vmem:[%s25933_s28 + $0x1820] sm:$0xff]  }
 0x2fa   : > { %v16839_v46 = vadd.f32 %v22419_v40, %v26832_v60  ;;  %v22441_v47 = vadd.f32 %v22440_v44, %v22439_v38  ;;  %22712 = vmatpush3.bf16.msra.mxu0 %v24853_v32  ;;  %v24866_v60 = vld [vmem:[%s25933_s28 + $0x17d8] sm:$0xff]   ;;  %v24893_v32 = vld [vmem:[%s25933_s28 + $0x1860] sm:$0xff]   ;;  %v24901_v44 = vld [vmem:[%s25933_s28 + $0x1850] sm:$0xff]  }
 0x2fb   : > { %v22421_v49 = vpop.f32.mrf.mxu0  ;;  %22713 = vmatprep.subr.bf16.mxu0 %v24856_v39  ;;  %v22442_v52 = vpop.f32.mrf.mxu1  ;;  %v24896_v38 = vld [vmem:[%s25933_s28 + $0x18a0] sm:$0xff]   ;;  %v24897_v39 = vld [vmem:[%s25933_s28 + $0x1858] sm:$0xff]  }
 0x2fc   : > { %v26877_v51 = vadd.f32 %v22441_v47, %v16839_v46  ;;  %22734 = vmatpush3.bf16.msra.mxu1 %v24855_v34  ;;  %v24895_v34 = vld [vmem:[%s25933_s28 + $0x18e0] sm:$0xff]   ;;  %v24898_v40 = vld [vmem:[%s25933_s28 + $0x1818] sm:$0xff]   ;;  %v24903_v46 = vld [vmem:[%s25933_s28 + $0x18d0] sm:$0xff]  }
 0x2fd   : > { %22735 = vmatprep.subr.bf16.mxu1 %v24858_v45  ;;  %v22443_v55 = vpop.f32.mrf.mxu1  ;;  %v24900_v43 = vld [vmem:[%s25933_s28 + $0x1898] sm:$0xff]   ;;  %v24902_v45 = vld [vmem:[%s25933_s28 + $0x1810] sm:$0xff]   ;;  %v24906_v49 = vld [vmem:[%s25933_s28 + $0x1808] sm:$0xff]  }
 0x2fe   : > { %22714 = vmatpush3.bf16.msra.mxu0 %v24857_v41  ;;  %v24899_v41 = vld [vmem:[%s25933_s28 + $0x18d8] sm:$0xff]   ;;  %v24904_v47 = vld [vmem:[%s25933_s28 + $0x1890] sm:$0xff]   ;;  %v24908_v52 = vld [vmem:[%s25933_s28 + $0x1888] sm:$0xff]  }
 0x2ff   : > { %22715 = vmatprep.subr.bf16.mxu0 %v24860_v50  ;;  %v24907_v50 = vld [vmem:[%s25933_s28 + $0x18c8] sm:$0xff]  }
 0x300   : > { %22736 = vmatpush3.bf16.msra.mxu1 %v24859_v48  ;;  %v24905_v48 = vld [vmem:[%s25933_s28 + $0x1848] sm:$0xff]  }
 0x301   : > { %22737 = vmatprep.subr.bf16.mxu1 %v24862_v54 }
 0x302   : > { %22716 = vmatpush3.bf16.msra.mxu0 %v24861_v53  ;;  %v24909_v53 = vld [vmem:[%s25933_s28 + $0x1840] sm:$0xff]  }
 0x303   : > { %22717 = vmatprep.subr.bf16.mxu0 %v24864_v57  ;;  %v24911_v57 = vld [vmem:[%s25933_s28 + $0x18c0] sm:$0xff]  }
 0x304   : > { %22738 = vmatpush3.bf16.msra.mxu1 %v24863_v56  ;;  %v24910_v56 = vld [vmem:[%s25933_s28 + $0x1800] sm:$0xff]  }
 0x305   : > { %22739 = vmatprep.subr.bf16.mxu1 %v24866_v60 }
 0x306   : > { %22718 = vmatpush3.bf16.msra.mxu0 %v24865_v58 }
 0x307   : > { %22719 = vmatprep.subr.bf16.mxu0 %v24868_v59 }
 0x308   : > { %22740 = vmatpush3.bf16.msra.mxu1 %v24867_v61  ;;  %v24912_v61 = vld [vmem:[%s25933_s28 + $0x1880] sm:$0xff]  }
 0x309   : > { %22741 = vmatprep.subr.bf16.mxu1 %v24870_v63  ;;  %v24913_v63 = vld [vmem:[%s25933_s28 + $0x1978] sm:$0xff]  }
 0x30a   : > { %22720 = vmatpush3.bf16.msra.mxu0 %v24869_v62 }
 0x30b   : > { %22721 = vmatprep.subr.bf16.mxu0 %v24872_v1  ;;  %v24914_v1 = vld [vmem:[%s25933_s28 + $0x1938] sm:$0xff]  }
 0x30c   : > { %22742 = vmatpush3.bf16.msra.mxu1 %v24871_v0 }
 0x30d   : > { %22743 = vmatprep.subr.bf16.mxu1 %v24874_v3  ;;  %v24915_v3 = vld [vmem:[%s25933_s28 + $0x19f8] sm:$0xff]  }
 0x30e   : > { %22722 = vmatpush3.bf16.msra.mxu0 %v24873_v2 }
 0x30f   : > { %22723 = vmatprep.subr.bf16.mxu0 %v24876_v5  ;;  %v24916_v5 = vld [vmem:[%s25933_s28 + $0x19b8] sm:$0xff]  }
 0x310   : > { %22744 = vmatpush3.bf16.msra.mxu1 %v24875_v4 }
 0x311   : > { %22745 = vmatprep.subr.bf16.mxu1 %v24878_v7  ;;  %v24917_v7 = vld [vmem:[%s25933_s28 + $0x1970] sm:$0xff]  }
 0x312   : > { %22724 = vmatpush3.bf16.msra.mxu0 %v24877_v6 }
 0x313   : > { %22753 = vmatprep.subr.bf16.mxu0 %v24881_v10 }
 0x314   : > { %22746 = vmatpush3.bf16.msra.mxu1 %v24880_v8  ;;  %v24918_v8 = vld [vmem:[%s25933_s28 + $0x1930] sm:$0xff]  }
 0x315   : > { %v22461_v17 = vpop.f32.mrf.mxu0  ;;  %17397 = vmatmul.mubr.bf16.vlgmr.msra.gmra.mxu0 %v4282_v9  ;;  %22775 = vmatprep.subr.bf16.mxu1 %v24883_v11  ;;  %v24920_v11 = vld [vmem:[%s25933_s28 + $0x19b0] sm:$0xff]  }
 0x316   : > { %22754 = vmatpush3.bf16.msra.mxu0 %v24882_v12  ;;  %v24919_v12 = vld [vmem:[%s25933_s28 + $0x19f0] sm:$0xff]  }
 0x317   : > { %v22462_v21 = vpop.f32.mrf.mxu0  ;;  %v22483_v20 = vpop.f32.mrf.mxu1  ;;  %17437 = vmatmul.mubr.bf16.vlgmr.msra.gmra.mxu1 %v4298_v14  ;;  %22755 = vmatprep.subr.bf16.mxu0 %v24885_v15  ;;  %v24921_v15 = vld [vmem:[%s25933_s28 + $0x1968] sm:$0xff]  }
 0x318   : > { %v22463_v23 = vadd.f32 %v22462_v21, %v22461_v17  ;;  %22776 = vmatpush3.bf16.msra.mxu1 %v24884_v13  ;;  %v24922_v17 = vld [vmem:[%s25933_s28 + $0x1928] sm:$0xff]  }
 0x319   : > { %v22464_v25 = vpop.f32.mrf.mxu0  ;;  %v22484_v27 = vpop.f32.mrf.mxu1  ;;  %22777 = vmatprep.subr.bf16.mxu1 %v24887_v18  ;;  %v24923_v21 = vld [vmem:[%s25933_s28 + $0x19e8] sm:$0xff]  }
 0x31a   : > { %v16919_v28 = vadd.f32 %v22463_v23, %v26877_v51  ;;  %v22485_v29 = vadd.f32 %v22484_v27, %v22483_v20  ;;  %22756 = vmatpush3.bf16.msra.mxu0 %v24886_v16  ;;  %v248_v51 = vld [vmem:[%s25928_s25 + $0x60] sm:$0xff]  ;;  %v24924_v23 = vld [vmem:[%s25933_s28 + $0x19a8] sm:$0xff]  }
 0x31b   : > { %v22465_v31 = vpop.f32.mrf.mxu0  ;;  %22757 = vmatprep.subr.bf16.mxu0 %v24889_v22  ;;  %v22486_v33 = vpop.f32.mrf.mxu1  ;;  %v4308_v54 = vrot.slane %v248_v51, %v25971_v42  ;;  %v4301_v55 = vcombine.high %v248_v51, %v248_v51  ;;  %v24925_v25 = vld [vmem:[%s25933_s28 + $0x1960] sm:$0xff]   ;;  %v24948_v51 = vld [vmem:[%s25933_s28 + $0x1af8] sm:$0xff]  }
 0x31c   : > { %v26914_v35 = vadd.f32 %v22485_v29, %v16919_v28  ;;  %22778 = vmatpush3.bf16.msra.mxu1 %v24888_v19  ;;  %v24926_v28 = vld [vmem:[%s25933_s28 + $0x1920] sm:$0xff]   ;;  %v24930_v33 = vld [vmem:[%s25933_s28 + $0x1918] sm:$0xff]  }
 0x31d   : > { %22779 = vmatprep.subr.bf16.mxu1 %v24891_v26  ;;  %v22487_v37 = vpop.f32.mrf.mxu1  ;;  %v4316_v58 = vcombine.high %v4308_v54, %v4308_v54  ;;  %v26937_v60 = vrot.slane %v4301_v55, %v25971_v42  ;;  %v4324_v62 = vrot.slane %v4308_v54, %v25971_v42  ;;  %v24927_v29 = vld [vmem:[%s25933_s28 + $0x19e0] sm:$0xff]   ;;  %v24950_v55 = vld [vmem:[%s25933_s28 + $0x1a70] sm:$0xff]  }
 0x31e   : > { %22758 = vmatpush3.bf16.msra.mxu0 %v24890_v24  ;;  %v24928_v31 = vld [vmem:[%s25933_s28 + $0x19a0] sm:$0xff]   ;;  %v24934_v37 = vld [vmem:[%s25933_s28 + $0x1910] sm:$0xff]  }
 0x31f   : > { %22759 = vmatprep.subr.bf16.mxu0 %v24893_v32  ;;  %v4338_v59 = vrot.slane %v4316_v58, %v25971_v42  ;;  %v4317_v0 = vcombine.high %v26937_v60, %v26937_v60  ;;  %v4346_v6 = vcombine.high %v4324_v62, %v4324_v62  ;;  %v24929_v32 = vld [vmem:[%s25933_s28 + $0x1958] sm:$0xff]   ;;  %v24952_v58 = vld [vmem:[%s25933_s28 + $0x1af0] sm:$0xff]  }
 0x320   : > { %22780 = vmatpush3.bf16.msra.mxu1 %v24892_v30 }
 0x321   : > { %22781 = vmatprep.subr.bf16.mxu1 %v24895_v34  ;;  %17476 = vmatprep.mubr.bf16.mxu0 %v4338_v59  ;;  %v4348_v2 = vcombine.high %v4338_v59, %v4338_v59  ;;  %v4345_v4 = vrot.slane %v4317_v0, %v25971_v42  ;;  %v24933_v34 = vld [vmem:[%s25933_s28 + $0x1950] sm:$0xff]   ;;  %v24955_v0 = vld [vmem:[%s25933_s28 + $0x1a28] sm:$0xff]  }
 0x322   : > { %22760 = vmatpush3.bf16.msra.mxu0 %v24894_v36  ;;  %v24932_v36 = vld [vmem:[%s25933_s28 + $0x1998] sm:$0xff]  }
 0x323   : > { %22761 = vmatprep.subr.bf16.mxu0 %v24897_v39  ;;  %17516 = vmatprep.mubr.bf16.mxu1 %v4348_v2  ;;  %v4349_v9 = vcombine.high %v4345_v4, %v4345_v4  ;;  %v24936_v39 = vld [vmem:[%s25933_s28 + $0x1990] sm:$0xff]  }
 0x324   : > { %22782 = vmatpush3.bf16.msra.mxu1 %v24896_v38  ;;  %v24935_v38 = vld [vmem:[%s25933_s28 + $0x19d0] sm:$0xff]  }
 0x325   : > { %22783 = vmatprep.subr.bf16.mxu1 %v24899_v41  ;;  %v24938_v41 = vld [vmem:[%s25933_s28 + $0x1908] sm:$0xff]  }
 0x326   : > { %22762 = vmatpush3.bf16.msra.mxu0 %v24898_v40  ;;  %v24937_v40 = vld [vmem:[%s25933_s28 + $0x1948] sm:$0xff]  }
 0x327   : > { %22763 = vmatprep.subr.bf16.mxu0 %v24901_v44  ;;  %v24940_v44 = vld [vmem:[%s25933_s28 + $0x1988] sm:$0xff]  }
 0x328   : > { %22784 = vmatpush3.bf16.msra.mxu1 %v24900_v43  ;;  %v24939_v43 = vld [vmem:[%s25933_s28 + $0x19c8] sm:$0xff]  }
 0x329   : > { %22785 = vmatprep.subr.bf16.mxu1 %v24903_v46  ;;  %v24942_v46 = vld [vmem:[%s25933_s28 + $0x1900] sm:$0xff]  }
 0x32a   : > { %22764 = vmatpush3.bf16.msra.mxu0 %v24902_v45  ;;  %v24941_v45 = vld [vmem:[%s25933_s28 + $0x1940] sm:$0xff]  }
 0x32b   : > { %22765 = vmatprep.subr.bf16.mxu0 %v24905_v48  ;;  %v24945_v48 = vld [vmem:[%s25933_s28 + $0x1980] sm:$0xff]  }
 0x32c   : > { %22786 = vmatpush3.bf16.msra.mxu1 %v24904_v47  ;;  %v24943_v47 = vld [vmem:[%s25933_s28 + $0x19c0] sm:$0xff]  }
 0x32d   : > { %22787 = vmatprep.subr.bf16.mxu1 %v24907_v50  ;;  %v24946_v50 = vld [vmem:[%s25933_s28 + $0x1a78] sm:$0xff]  }
 0x32e   : > { %22766 = vmatpush3.bf16.msra.mxu0 %v24906_v49  ;;  %v4331_v49 = vrot.slane %v26937_v60, %v25971_v42  ;;  %v24953_v60 = vld [vmem:[%s25933_s28 + $0x1ab0] sm:$0xff]  }
 0x32f   : > { %22767 = vmatprep.subr.bf16.mxu0 %v24909_v53  ;;  %v24949_v53 = vld [vmem:[%s25933_s28 + $0x1ab8] sm:$0xff]  }
 0x330   : > { %22788 = vmatpush3.bf16.msra.mxu1 %v24908_v52  ;;  %v24947_v52 = vld [vmem:[%s25933_s28 + $0x1a38] sm:$0xff]   ;;  %v4347_v54 = vcombine.high %v4331_v49, %v4331_v49 }
 0x331   : > { %22789 = vmatprep.subr.bf16.mxu1 %v24911_v57 }
 0x332   : > { %22768 = vmatpush3.bf16.msra.mxu0 %v24910_v56  ;;  %v24951_v56 = vld [vmem:[%s25933_s28 + $0x1a30] sm:$0xff]  }
 0x333   : > { %22797 = vmatprep.subr.bf16.mxu0 %v24913_v63 }
 0x334   : > { %22790 = vmatpush3.bf16.msra.mxu1 %v24912_v61 }
 0x335   : > { %v22505_v10 = vpop.f32.mrf.mxu0  ;;  %17477 = vmatmul.mubr.bf16.vlgmr.msra.gmra.mxu0 %v4324_v62  ;;  %22819 = vmatprep.subr.bf16.mxu1 %v24915_v3  ;;  %v24954_v62 = vld [vmem:[%s25933_s28 + $0x1a68] sm:$0xff]  }
 0x336   : > { %22798 = vmatpush3.bf16.msra.mxu0 %v24914_v1  ;;  %17556 = vmatprep.mubr.bf16.mxu0 %v4345_v4  ;;  %v24956_v3 = vld [vmem:[%s25933_s28 + $0x1ae8] sm:$0xff]  }
 0x337   : > { %v22506_v13 = vpop.f32.mrf.mxu0  ;;  %v22527_v14 = vpop.f32.mrf.mxu1  ;;  %17517 = vmatmul.mubr.bf16.vlgmr.msra.gmra.mxu1 %v4346_v6  ;;  %22799 = vmatprep.subr.bf16.mxu0 %v24917_v7  ;;  %v24957_v6 = vld [vmem:[%s25933_s28 + $0x1aa8] sm:$0xff]  }
 0x338   : > { %v22507_v16 = vadd.f32 %v22506_v13, %v22505_v10  ;;  %22820 = vmatpush3.bf16.msra.mxu1 %v24916_v5  ;;  %17596 = vmatprep.mubr.bf16.mxu1 %v4349_v9 }
 0x339   : > { %v22508_v18 = vpop.f32.mrf.mxu0  ;;  %v22528_v19 = vpop.f32.mrf.mxu1  ;;  %22821 = vmatprep.subr.bf16.mxu1 %v24919_v12  ;;  %v24959_v12 = vld [vmem:[%s25933_s28 + $0x1a20] sm:$0xff]  }
 0x33a   : > { %v16999_v20 = vadd.f32 %v22507_v16, %v26914_v35  ;;  %v22529_v22 = vadd.f32 %v22528_v19, %v22527_v14  ;;  %22800 = vmatpush3.bf16.msra.mxu0 %v24918_v8  ;;  %v24931_v35 = vld [vmem:[%s25933_s28 + $0x19d8] sm:$0xff]   ;;  %v24958_v8 = vld [vmem:[%s25933_s28 + $0x1a60] sm:$0xff]   ;;  %v24966_v19 = vld [vmem:[%s25933_s28 + $0x1a50] sm:$0xff]  }
 0x33b   : > { %v22509_v24 = vpop.f32.mrf.mxu0  ;;  %22801 = vmatprep.subr.bf16.mxu0 %v24921_v15  ;;  %v22530_v27 = vpop.f32.mrf.mxu1  ;;  %v24961_v14 = vld [vmem:[%s25933_s28 + $0x1aa0] sm:$0xff]   ;;  %v24962_v15 = vld [vmem:[%s25933_s28 + $0x1a58] sm:$0xff]  }
 0x33c   : > { %v26959_v26 = vadd.f32 %v22529_v22, %v16999_v20  ;;  %22822 = vmatpush3.bf16.msra.mxu1 %v24920_v11  ;;  %v24960_v11 = vld [vmem:[%s25933_s28 + $0x1ae0] sm:$0xff]   ;;  %v24963_v16 = vld [vmem:[%s25933_s28 + $0x1a18] sm:$0xff]   ;;  %v24968_v20 = vld [vmem:[%s25933_s28 + $0x1ad0] sm:$0xff]  }
 0x33d   : > { %22823 = vmatprep.subr.bf16.mxu1 %v24923_v21  ;;  %v22531_v30 = vpop.f32.mrf.mxu1  ;;  %v24965_v18 = vld [vmem:[%s25933_s28 + $0x1a98] sm:$0xff]   ;;  %v24967_v21 = vld [vmem:[%s25933_s28 + $0x1a10] sm:$0xff]   ;;  %v24971_v24 = vld [vmem:[%s25933_s28 + $0x1a08] sm:$0xff]  }
 0x33e   : > { %22802 = vmatpush3.bf16.msra.mxu0 %v24922_v17  ;;  %v24964_v17 = vld [vmem:[%s25933_s28 + $0x1ad8] sm:$0xff]   ;;  %v24969_v22 = vld [vmem:[%s25933_s28 + $0x1a90] sm:$0xff]   ;;  %v24973_v27 = vld [vmem:[%s25933_s28 + $0x1a88] sm:$0xff]  }
 0x33f   : > { %22803 = vmatprep.subr.bf16.mxu0 %v24925_v25  ;;  %v24972_v25 = vld [vmem:[%s25933_s28 + $0x1ac8] sm:$0xff]  }
 0x340   : > { %22824 = vmatpush3.bf16.msra.mxu1 %v24924_v23  ;;  %v24970_v23 = vld [vmem:[%s25933_s28 + $0x1a48] sm:$0xff]  }
 0x341   : > { %22825 = vmatprep.subr.bf16.mxu1 %v24927_v29 }
 0x342   : > { %22804 = vmatpush3.bf16.msra.mxu0 %v24926_v28  ;;  %v24974_v28 = vld [vmem:[%s25933_s28 + $0x1a40] sm:$0xff]  }
 0x343   : > { %22805 = vmatprep.subr.bf16.mxu0 %v24929_v32  ;;  %v24976_v32 = vld [vmem:[%s25933_s28 + $0x1ac0] sm:$0xff]  }
 0x344   : > { %22826 = vmatpush3.bf16.msra.mxu1 %v24928_v31  ;;  %v24975_v31 = vld [vmem:[%s25933_s28 + $0x1a00] sm:$0xff]  }
 0x345   : > { %22827 = vmatprep.subr.bf16.mxu1 %v24931_v35 }
 0x346   : > { %22806 = vmatpush3.bf16.msra.mxu0 %v24930_v33 }
 0x347   : > { %22807 = vmatprep.subr.bf16.mxu0 %v24933_v34 }
 0x348   : > { %22828 = vmatpush3.bf16.msra.mxu1 %v24932_v36  ;;  %v24977_v36 = vld [vmem:[%s25933_s28 + $0x1a80] sm:$0xff]  }
 0x349   : > { %22829 = vmatprep.subr.bf16.mxu1 %v24935_v38  ;;  %v24978_v38 = vld [vmem:[%s25933_s28 + $0x1b78] sm:$0xff]  }
 0x34a   : > { %22808 = vmatpush3.bf16.msra.mxu0 %v24934_v37 }
 0x34b   : > { %22809 = vmatprep.subr.bf16.mxu0 %v24937_v40  ;;  %v24979_v40 = vld [vmem:[%s25933_s28 + $0x1b38] sm:$0xff]  }
 0x34c   : > { %22830 = vmatpush3.bf16.msra.mxu1 %v24936_v39 }
 0x34d   : > { %22831 = vmatprep.subr.bf16.mxu1 %v24939_v43  ;;  %v24980_v43 = vld [vmem:[%s25933_s28 + $0x1bf8] sm:$0xff]  }
 0x34e   : > { %22810 = vmatpush3.bf16.msra.mxu0 %v24938_v41 }
 0x34f   : > { %22811 = vmatprep.subr.bf16.mxu0 %v24941_v45  ;;  %v24981_v45 = vld [vmem:[%s25933_s28 + $0x1bb8] sm:$0xff]  }
 0x350   : > { %22832 = vmatpush3.bf16.msra.mxu1 %v24940_v44 }
 0x351   : > { %22833 = vmatprep.subr.bf16.mxu1 %v24943_v47  ;;  %v24982_v47 = vld [vmem:[%s25933_s28 + $0x1b70] sm:$0xff]  }
 0x352   : > { %22812 = vmatpush3.bf16.msra.mxu0 %v24942_v46 }
 0x353   : > { %22841 = vmatprep.subr.bf16.mxu0 %v24946_v50 }
 0x354   : > { %22834 = vmatpush3.bf16.msra.mxu1 %v24945_v48  ;;  %v24983_v48 = vld [vmem:[%s25933_s28 + $0x1b30] sm:$0xff]  }
 0x355   : > { %v22549_v57 = vpop.f32.mrf.mxu0  ;;  %17557 = vmatmul.mubr.bf16.vlgmr.msra.gmra.mxu0 %v4331_v49  ;;  %22863 = vmatprep.subr.bf16.mxu1 %v24948_v51  ;;  %v24985_v51 = vld [vmem:[%s25933_s28 + $0x1bb0] sm:$0xff]  }
 0x356   : > { %22842 = vmatpush3.bf16.msra.mxu0 %v24947_v52  ;;  %v24984_v52 = vld [vmem:[%s25933_s28 + $0x1bf0] sm:$0xff]  }
 0x357   : > { %v22550_v61 = vpop.f32.mrf.mxu0  ;;  %v22571_v59 = vpop.f32.mrf.mxu1  ;;  %17597 = vmatmul.mubr.bf16.vlgmr.msra.gmra.mxu1 %v4347_v54  ;;  %22843 = vmatprep.subr.bf16.mxu0 %v24950_v55  ;;  %v24986_v55 = vld [vmem:[%s25933_s28 + $0x1b68] sm:$0xff]  }
 0x358   : > { %v22551_v63 = vadd.f32 %v22550_v61, %v22549_v57  ;;  %22864 = vmatpush3.bf16.msra.mxu1 %v24949_v53  ;;  %v24987_v57 = vld [vmem:[%s25933_s28 + $0x1b28] sm:$0xff]  }
 0x359   : > { %v22552_v1 = vpop.f32.mrf.mxu0  ;;  %v22572_v2 = vpop.f32.mrf.mxu1  ;;  %22865 = vmatprep.subr.bf16.mxu1 %v24952_v58  ;;  %v24988_v61 = vld [vmem:[%s25933_s28 + $0x1be8] sm:$0xff]  }
 0x35a   : > { %v17079_v4 = vadd.f32 %v22551_v63, %v26959_v26  ;;  %v22573_v5 = vadd.f32 %v22572_v2, %v22571_v59  ;;  %22844 = vmatpush3.bf16.msra.mxu0 %v24951_v56  ;;  %v249_v26 = vld [vmem:[%s25928_s25 + $0x68] sm:$0xff]  ;;  %v24990_v1 = vld [vmem:[%s25933_s28 + $0x1b60] sm:$0xff]  }
 0x35b   : > { %v22553_v7 = vpop.f32.mrf.mxu0  ;;  %22845 = vmatprep.subr.bf16.mxu0 %v24954_v62  ;;  %v22574_v9 = vpop.f32.mrf.mxu1  ;;  %v4357_v29 = vrot.slane %v249_v26, %v25971_v42  ;;  %v4350_v30 = vcombine.high %v249_v26, %v249_v26  ;;  %v24989_v63 = vld [vmem:[%s25933_s28 + $0x1ba8] sm:$0xff]   ;;  %v25013_v26 = vld [vmem:[%s25933_s28 + $0x1cf8] sm:$0xff]  }
 0x35c   : > { %v26996_v10 = vadd.f32 %v22573_v5, %v17079_v4  ;;  %22866 = vmatpush3.bf16.msra.mxu1 %v24953_v60  ;;  %v24991_v4 = vld [vmem:[%s25933_s28 + $0x1b20] sm:$0xff]   ;;  %v24995_v9 = vld [vmem:[%s25933_s28 + $0x1b18] sm:$0xff]  }
 0x35d   : > { %22867 = vmatprep.subr.bf16.mxu1 %v24956_v3  ;;  %v22575_v13 = vpop.f32.mrf.mxu1  ;;  %v4365_v33 = vcombine.high %v4357_v29, %v4357_v29  ;;  %v27019_v35 = vrot.slane %v4350_v30, %v25971_v42  ;;  %v4373_v37 = vrot.slane %v4357_v29, %v25971_v42  ;;  %v24992_v5 = vld [vmem:[%s25933_s28 + $0x1be0] sm:$0xff]   ;;  %v25015_v30 = vld [vmem:[%s25933_s28 + $0x1c70] sm:$0xff]  }
 0x35e   : > { %22846 = vmatpush3.bf16.msra.mxu0 %v24955_v0  ;;  %v24993_v7 = vld [vmem:[%s25933_s28 + $0x1ba0] sm:$0xff]   ;;  %v24999_v13 = vld [vmem:[%s25933_s28 + $0x1b10] sm:$0xff]  }
 0x35f   : > { %22847 = vmatprep.subr.bf16.mxu0 %v24958_v8  ;;  %v4387_v34 = vrot.slane %v4365_v33, %v25971_v42  ;;  %v4366_v39 = vcombine.high %v27019_v35, %v27019_v35  ;;  %v4395_v46 = vcombine.high %v4373_v37, %v4373_v37  ;;  %v24994_v8 = vld [vmem:[%s25933_s28 + $0x1b58] sm:$0xff]   ;;  %v25017_v33 = vld [vmem:[%s25933_s28 + $0x1cf0] sm:$0xff]  }
 0x360   : > { %22868 = vmatpush3.bf16.msra.mxu1 %v24957_v6 }
 0x361   : > { %22869 = vmatprep.subr.bf16.mxu1 %v24960_v11  ;;  %17636 = vmatprep.mubr.bf16.mxu0 %v4387_v34  ;;  %v4397_v41 = vcombine.high %v4387_v34, %v4387_v34  ;;  %v4394_v44 = vrot.slane %v4366_v39, %v25971_v42  ;;  %v24998_v11 = vld [vmem:[%s25933_s28 + $0x1b50] sm:$0xff]   ;;  %v25020_v39 = vld [vmem:[%s25933_s28 + $0x1c28] sm:$0xff]  }
 0x362   : > { %22848 = vmatpush3.bf16.msra.mxu0 %v24959_v12  ;;  %v24997_v12 = vld [vmem:[%s25933_s28 + $0x1b98] sm:$0xff]  }
 0x363   : > { %22849 = vmatprep.subr.bf16.mxu0 %v24962_v15  ;;  %17676 = vmatprep.mubr.bf16.mxu1 %v4397_v41  ;;  %v4398_v49 = vcombine.high %v4394_v44, %v4394_v44  ;;  %v25001_v15 = vld [vmem:[%s25933_s28 + $0x1b90] sm:$0xff]  }
 0x364   : > { %22870 = vmatpush3.bf16.msra.mxu1 %v24961_v14  ;;  %v25000_v14 = vld [vmem:[%s25933_s28 + $0x1bd0] sm:$0xff]  }
 0x365   : > { %22871 = vmatprep.subr.bf16.mxu1 %v24964_v17  ;;  %v25003_v17 = vld [vmem:[%s25933_s28 + $0x1b08] sm:$0xff]  }
 0x366   : > { %22850 = vmatpush3.bf16.msra.mxu0 %v24963_v16  ;;  %v25002_v16 = vld [vmem:[%s25933_s28 + $0x1b48] sm:$0xff]  }
 0x367   : > { %22851 = vmatprep.subr.bf16.mxu0 %v24966_v19  ;;  %v25005_v19 = vld [vmem:[%s25933_s28 + $0x1b88] sm:$0xff]  }
 0x368   : > { %22872 = vmatpush3.bf16.msra.mxu1 %v24965_v18  ;;  %v25004_v18 = vld [vmem:[%s25933_s28 + $0x1bc8] sm:$0xff]  }
 0x369   : > { %22873 = vmatprep.subr.bf16.mxu1 %v24968_v20  ;;  %v25007_v20 = vld [vmem:[%s25933_s28 + $0x1b00] sm:$0xff]  }
 0x36a   : > { %22852 = vmatpush3.bf16.msra.mxu0 %v24967_v21  ;;  %v25006_v21 = vld [vmem:[%s25933_s28 + $0x1b40] sm:$0xff]  }
 0x36b   : > { %22853 = vmatprep.subr.bf16.mxu0 %v24970_v23  ;;  %v25010_v23 = vld [vmem:[%s25933_s28 + $0x1b80] sm:$0xff]  }
 0x36c   : > { %22874 = vmatpush3.bf16.msra.mxu1 %v24969_v22  ;;  %v25008_v22 = vld [vmem:[%s25933_s28 + $0x1bc0] sm:$0xff]  }
 0x36d   : > { %22875 = vmatprep.subr.bf16.mxu1 %v24972_v25  ;;  %v25011_v25 = vld [vmem:[%s25933_s28 + $0x1c78] sm:$0xff]  }
 0x36e   : > { %22854 = vmatpush3.bf16.msra.mxu0 %v24971_v24  ;;  %v4380_v24 = vrot.slane %v27019_v35, %v25971_v42  ;;  %v25018_v35 = vld [vmem:[%s25933_s28 + $0x1cb0] sm:$0xff]  }
 0x36f   : > { %22855 = vmatprep.subr.bf16.mxu0 %v24974_v28  ;;  %v25014_v28 = vld [vmem:[%s25933_s28 + $0x1cb8] sm:$0xff]  }
 0x370   : > { %22876 = vmatpush3.bf16.msra.mxu1 %v24973_v27  ;;  %v25012_v27 = vld [vmem:[%s25933_s28 + $0x1c38] sm:$0xff]   ;;  %v4396_v29 = vcombine.high %v4380_v24, %v4380_v24 }
 0x371   : > { %22877 = vmatprep.subr.bf16.mxu1 %v24976_v32 }
 0x372   : > { %22856 = vmatpush3.bf16.msra.mxu0 %v24975_v31  ;;  %v25016_v31 = vld [vmem:[%s25933_s28 + $0x1c30] sm:$0xff]  }
 0x373   : > { %22885 = vmatprep.subr.bf16.mxu0 %v24978_v38 }
 0x374   : > { %22878 = vmatpush3.bf16.msra.mxu1 %v24977_v36 }
 0x375   : > { %v22593_v50 = vpop.f32.mrf.mxu0  ;;  %17637 = vmatmul.mubr.bf16.vlgmr.msra.gmra.mxu0 %v4373_v37  ;;  %22907 = vmatprep.subr.bf16.mxu1 %v24980_v43  ;;  %v25019_v37 = vld [vmem:[%s25933_s28 + $0x1c68] sm:$0xff]  }
 0x376   : > { %22886 = vmatpush3.bf16.msra.mxu0 %v24979_v40  ;;  %17716 = vmatprep.mubr.bf16.mxu0 %v4394_v44  ;;  %v25021_v43 = vld [vmem:[%s25933_s28 + $0x1ce8] sm:$0xff]  }
 0x377   : > { %v22594_v53 = vpop.f32.mrf.mxu0  ;;  %v22615_v54 = vpop.f32.mrf.mxu1  ;;  %17677 = vmatmul.mubr.bf16.vlgmr.msra.gmra.mxu1 %v4395_v46  ;;  %22887 = vmatprep.subr.bf16.mxu0 %v24982_v47  ;;  %v25022_v46 = vld [vmem:[%s25933_s28 + $0x1ca8] sm:$0xff]  }
 0x378   : > { %v22595_v56 = vadd.f32 %v22594_v53, %v22593_v50  ;;  %22908 = vmatpush3.bf16.msra.mxu1 %v24981_v45  ;;  %17756 = vmatprep.mubr.bf16.mxu1 %v4398_v49 }
 0x379   : > { %v22596_v58 = vpop.f32.mrf.mxu0  ;;  %v22616_v60 = vpop.f32.mrf.mxu1  ;;  %22909 = vmatprep.subr.bf16.mxu1 %v24984_v52  ;;  %v25024_v52 = vld [vmem:[%s25933_s28 + $0x1c20] sm:$0xff]  }
 0x37a   : > { %v17159_v59 = vadd.f32 %v22595_v56, %v26996_v10  ;;  %v22617_v62 = vadd.f32 %v22616_v60, %v22615_v54  ;;  %22888 = vmatpush3.bf16.msra.mxu0 %v24983_v48  ;;  %v24996_v10 = vld [vmem:[%s25933_s28 + $0x1bd8] sm:$0xff]   ;;  %v25023_v48 = vld [vmem:[%s25933_s28 + $0x1c60] sm:$0xff]   ;;  %v25031_v60 = vld [vmem:[%s25933_s28 + $0x1c50] sm:$0xff]  }
 0x37b   : > { %v22597_v0 = vpop.f32.mrf.mxu0  ;;  %22889 = vmatprep.subr.bf16.mxu0 %v24986_v55  ;;  %v22618_v2 = vpop.f32.mrf.mxu1  ;;  %v25026_v54 = vld [vmem:[%s25933_s28 + $0x1ca0] sm:$0xff]   ;;  %v25027_v55 = vld [vmem:[%s25933_s28 + $0x1c58] sm:$0xff]  }
 0x37c   : > { %v27041_v3 = vadd.f32 %v22617_v62, %v17159_v59  ;;  %22910 = vmatpush3.bf16.msra.mxu1 %v24985_v51  ;;  %v25025_v51 = vld [vmem:[%s25933_s28 + $0x1ce0] sm:$0xff]   ;;  %v25028_v56 = vld [vmem:[%s25933_s28 + $0x1c18] sm:$0xff]   ;;  %v25033_v59 = vld [vmem:[%s25933_s28 + $0x1cd0] sm:$0xff]  }
 0x37d   : > { %22911 = vmatprep.subr.bf16.mxu1 %v24988_v61  ;;  %v22619_v6 = vpop.f32.mrf.mxu1  ;;  %v25030_v58 = vld [vmem:[%s25933_s28 + $0x1c98] sm:$0xff]   ;;  %v25032_v61 = vld [vmem:[%s25933_s28 + $0x1c10] sm:$0xff]   ;;  %v25036_v0 = vld [vmem:[%s25933_s28 + $0x1c08] sm:$0xff]  }
 0x37e   : > { %22890 = vmatpush3.bf16.msra.mxu0 %v24987_v57  ;;  %v25029_v57 = vld [vmem:[%s25933_s28 + $0x1cd8] sm:$0xff]   ;;  %v25034_v62 = vld [vmem:[%s25933_s28 + $0x1c90] sm:$0xff]   ;;  %v25038_v2 = vld [vmem:[%s25933_s28 + $0x1c88] sm:$0xff]  }
 0x37f   : > { %22891 = vmatprep.subr.bf16.mxu0 %v24990_v1  ;;  %v25037_v1 = vld [vmem:[%s25933_s28 + $0x1cc8] sm:$0xff]  }
 0x380   : > { %22912 = vmatpush3.bf16.msra.mxu1 %v24989_v63  ;;  %v25035_v63 = vld [vmem:[%s25933_s28 + $0x1c48] sm:$0xff]  }
 0x381   : > { %22913 = vmatprep.subr.bf16.mxu1 %v24992_v5 }
 0x382   : > { %22892 = vmatpush3.bf16.msra.mxu0 %v24991_v4  ;;  %v25039_v4 = vld [vmem:[%s25933_s28 + $0x1c40] sm:$0xff]  }
 0x383   : > { %22893 = vmatprep.subr.bf16.mxu0 %v24994_v8  ;;  %v25041_v8 = vld [vmem:[%s25933_s28 + $0x1cc0] sm:$0xff]  }
 0x384   : > { %22914 = vmatpush3.bf16.msra.mxu1 %v24993_v7  ;;  %v25040_v7 = vld [vmem:[%s25933_s28 + $0x1c00] sm:$0xff]  }
 0x385   : > { %22915 = vmatprep.subr.bf16.mxu1 %v24996_v10 }
 0x386   : > { %22894 = vmatpush3.bf16.msra.mxu0 %v24995_v9 }
 0x387   : > { %22895 = vmatprep.subr.bf16.mxu0 %v24998_v11 }
 0x388   : > { %22916 = vmatpush3.bf16.msra.mxu1 %v24997_v12  ;;  %v25042_v12 = vld [vmem:[%s25933_s28 + $0x1c80] sm:$0xff]  }
 0x389   : > { %22917 = vmatprep.subr.bf16.mxu1 %v25000_v14  ;;  %v25043_v14 = vld [vmem:[%s25933_s28 + $0x1d78] sm:$0xff]  }
 0x38a   : > { %22896 = vmatpush3.bf16.msra.mxu0 %v24999_v13 }
 0x38b   : > { %22897 = vmatprep.subr.bf16.mxu0 %v25002_v16  ;;  %v25044_v16 = vld [vmem:[%s25933_s28 + $0x1d38] sm:$0xff]  }
 0x38c   : > { %22918 = vmatpush3.bf16.msra.mxu1 %v25001_v15 }
 0x38d   : > { %22919 = vmatprep.subr.bf16.mxu1 %v25004_v18  ;;  %v25045_v18 = vld [vmem:[%s25933_s28 + $0x1df8] sm:$0xff]  }
 0x38e   : > { %22898 = vmatpush3.bf16.msra.mxu0 %v25003_v17 }
 0x38f   : > { %22899 = vmatprep.subr.bf16.mxu0 %v25006_v21  ;;  %v25046_v21 = vld [vmem:[%s25933_s28 + $0x1db8] sm:$0xff]  }
 0x390   : > { %22920 = vmatpush3.bf16.msra.mxu1 %v25005_v19 }
 0x391   : > { %22921 = vmatprep.subr.bf16.mxu1 %v25008_v22  ;;  %v25047_v22 = vld [vmem:[%s25933_s28 + $0x1d70] sm:$0xff]  }
 0x392   : > { %22900 = vmatpush3.bf16.msra.mxu0 %v25007_v20 }
 0x393   : > { %22929 = vmatprep.subr.bf16.mxu0 %v25011_v25 }
 0x394   : > { %22922 = vmatpush3.bf16.msra.mxu1 %v25010_v23  ;;  %v25048_v23 = vld [vmem:[%s25933_s28 + $0x1d30] sm:$0xff]  }
 0x395   : > { %v22637_v32 = vpop.f32.mrf.mxu0  ;;  %17717 = vmatmul.mubr.bf16.vlgmr.msra.gmra.mxu0 %v4380_v24  ;;  %22951 = vmatprep.subr.bf16.mxu1 %v25013_v26  ;;  %v25050_v26 = vld [vmem:[%s25933_s28 + $0x1db0] sm:$0xff]  }
 0x396   : > { %22930 = vmatpush3.bf16.msra.mxu0 %v25012_v27  ;;  %v25049_v27 = vld [vmem:[%s25933_s28 + $0x1df0] sm:$0xff]  }
 0x397   : > { %v22638_v36 = vpop.f32.mrf.mxu0  ;;  %v22659_v34 = vpop.f32.mrf.mxu1  ;;  %17757 = vmatmul.mubr.bf16.vlgmr.msra.gmra.mxu1 %v4396_v29  ;;  %22931 = vmatprep.subr.bf16.mxu0 %v25015_v30  ;;  %v25051_v30 = vld [vmem:[%s25933_s28 + $0x1d68] sm:$0xff]  }
 0x398   : > { %v22639_v38 = vadd.f32 %v22638_v36, %v22637_v32  ;;  %22952 = vmatpush3.bf16.msra.mxu1 %v25014_v28  ;;  %v25052_v32 = vld [vmem:[%s25933_s28 + $0x1d28] sm:$0xff]  }
 0x399   : > { %v22640_v40 = vpop.f32.mrf.mxu0  ;;  %v22660_v41 = vpop.f32.mrf.mxu1  ;;  %22953 = vmatprep.subr.bf16.mxu1 %v25017_v33  ;;  %v25053_v36 = vld [vmem:[%s25933_s28 + $0x1de8] sm:$0xff]  }
 0x39a   : > { %v17239_v44 = vadd.f32 %v22639_v38, %v27041_v3  ;;  %v22661_v45 = vadd.f32 %v22660_v41, %v22659_v34  ;;  %22932 = vmatpush3.bf16.msra.mxu0 %v25016_v31  ;;  %v250_v3 = vld [vmem:[%s25928_s25 + $0x70] sm:$0xff]  ;;  %v25054_v38 = vld [vmem:[%s25933_s28 + $0x1da8] sm:$0xff]   ;;  %v25055_v40 = vld [vmem:[%s25933_s28 + $0x1d60] sm:$0xff]  }
 0x39b   : > { %v22641_v47 = vpop.f32.mrf.mxu0  ;;  %22933 = vmatprep.subr.bf16.mxu0 %v25019_v37  ;;  %v22662_v49 = vpop.f32.mrf.mxu1  ;;  %v4406_v5 = vrot.slane %v250_v3, %v25971_v42  ;;  %v4399_v6 = vcombine.high %v250_v3, %v250_v3  ;;  %v25078_v3 = vld [vmem:[%s25933_s28 + $0x1ef8] sm:$0xff]  }
 0x39c   : > { %v27078_v50 = vadd.f32 %v22661_v45, %v17239_v44  ;;  %22954 = vmatpush3.bf16.msra.mxu1 %v25018_v35  ;;  %v25056_v44 = vld [vmem:[%s25933_s28 + $0x1d20] sm:$0xff]   ;;  %v25060_v49 = vld [vmem:[%s25933_s28 + $0x1d18] sm:$0xff]  }
 0x39d   : > { %22955 = vmatprep.subr.bf16.mxu1 %v25021_v43  ;;  %v22663_v53 = vpop.f32.mrf.mxu1  ;;  %v4414_v9 = vcombine.high %v4406_v5, %v4406_v5  ;;  %v27101_v10 = vrot.slane %v4399_v6, %v25971_v42  ;;  %v4422_v11 = vrot.slane %v4406_v5, %v25971_v42  ;;  %v25057_v45 = vld [vmem:[%s25933_s28 + $0x1de0] sm:$0xff]   ;;  %v25080_v6 = vld [vmem:[%s25933_s28 + $0x1e70] sm:$0xff]  }
 0x39e   : > { %22934 = vmatpush3.bf16.msra.mxu0 %v25020_v39  ;;  %v25058_v47 = vld [vmem:[%s25933_s28 + $0x1da0] sm:$0xff]   ;;  %v25064_v53 = vld [vmem:[%s25933_s28 + $0x1d10] sm:$0xff]  }
 0x39f   : > { %22935 = vmatprep.subr.bf16.mxu0 %v25023_v48  ;;  %v4436_v13 = vrot.slane %v4414_v9, %v25971_v42  ;;  %v4415_v15 = vcombine.high %v27101_v10, %v27101_v10  ;;  %v4444_v20 = vcombine.high %v4422_v11, %v4422_v11  ;;  %v25059_v48 = vld [vmem:[%s25933_s28 + $0x1d58] sm:$0xff]   ;;  %v25082_v9 = vld [vmem:[%s25933_s28 + $0x1ef0] sm:$0xff]  }
 0x3a0   : > { %22956 = vmatpush3.bf16.msra.mxu1 %v25022_v46 }
 0x3a1   : > { %22957 = vmatprep.subr.bf16.mxu1 %v25025_v51  ;;  %17796 = vmatprep.mubr.bf16.mxu0 %v4436_v13  ;;  %v4446_v17 = vcombine.high %v4436_v13, %v4436_v13  ;;  %v4443_v19 = vrot.slane %v4415_v15, %v25971_v42  ;;  %v25063_v51 = vld [vmem:[%s25933_s28 + $0x1d50] sm:$0xff]   ;;  %v25084_v13 = vld [vmem:[%s25933_s28 + $0x1e68] sm:$0xff]  }
 0x3a2   : > { %22936 = vmatpush3.bf16.msra.mxu0 %v25024_v52  ;;  %v25062_v52 = vld [vmem:[%s25933_s28 + $0x1d98] sm:$0xff]   ;;  %v25085_v15 = vld [vmem:[%s25933_s28 + $0x1e28] sm:$0xff]  }
 0x3a3   : > { %22937 = vmatprep.subr.bf16.mxu0 %v25027_v55  ;;  %17836 = vmatprep.mubr.bf16.mxu1 %v4446_v17  ;;  %v4447_v24 = vcombine.high %v4443_v19, %v4443_v19  ;;  %v25066_v55 = vld [vmem:[%s25933_s28 + $0x1d90] sm:$0xff]  }
 0x3a4   : > { %22958 = vmatpush3.bf16.msra.mxu1 %v25026_v54  ;;  %v25065_v54 = vld [vmem:[%s25933_s28 + $0x1dd0] sm:$0xff]  }
 0x3a5   : > { %22959 = vmatprep.subr.bf16.mxu1 %v25029_v57  ;;  %v25068_v57 = vld [vmem:[%s25933_s28 + $0x1d08] sm:$0xff]  }
 0x3a6   : > { %22938 = vmatpush3.bf16.msra.mxu0 %v25028_v56  ;;  %v25067_v56 = vld [vmem:[%s25933_s28 + $0x1d48] sm:$0xff]  }
 0x3a7   : > { %22939 = vmatprep.subr.bf16.mxu0 %v25031_v60  ;;  %v25070_v60 = vld [vmem:[%s25933_s28 + $0x1d88] sm:$0xff]  }
 0x3a8   : > { %22960 = vmatpush3.bf16.msra.mxu1 %v25030_v58  ;;  %v25069_v58 = vld [vmem:[%s25933_s28 + $0x1dc8] sm:$0xff]  }
 0x3a9   : > { %22961 = vmatprep.subr.bf16.mxu1 %v25033_v59  ;;  %v25072_v59 = vld [vmem:[%s25933_s28 + $0x1d00] sm:$0xff]  }
 0x3aa   : > { %22940 = vmatpush3.bf16.msra.mxu0 %v25032_v61  ;;  %v25071_v61 = vld [vmem:[%s25933_s28 + $0x1d40] sm:$0xff]  }
 0x3ab   : > { %22941 = vmatprep.subr.bf16.mxu0 %v25035_v63  ;;  %v25075_v63 = vld [vmem:[%s25933_s28 + $0x1d80] sm:$0xff]  }
 0x3ac   : > { %22962 = vmatpush3.bf16.msra.mxu1 %v25034_v62  ;;  %v25073_v62 = vld [vmem:[%s25933_s28 + $0x1dc0] sm:$0xff]  }
 0x3ad   : > { %22963 = vmatprep.subr.bf16.mxu1 %v25037_v1  ;;  %v25076_v1 = vld [vmem:[%s25933_s28 + $0x1e78] sm:$0xff]  }
 0x3ae   : > { %22942 = vmatpush3.bf16.msra.mxu0 %v25036_v0  ;;  %v4429_v0 = vrot.slane %v27101_v10, %v25971_v42  ;;  %v25083_v10 = vld [vmem:[%s25933_s28 + $0x1eb0] sm:$0xff]  }
 0x3af   : > { %22943 = vmatprep.subr.bf16.mxu0 %v25039_v4  ;;  %v25079_v4 = vld [vmem:[%s25933_s28 + $0x1eb8] sm:$0xff]  }
 0x3b0   : > { %22964 = vmatpush3.bf16.msra.mxu1 %v25038_v2  ;;  %v25077_v2 = vld [vmem:[%s25933_s28 + $0x1e38] sm:$0xff]   ;;  %v4445_v5 = vcombine.high %v4429_v0, %v4429_v0 }
 0x3b1   : > { %22965 = vmatprep.subr.bf16.mxu1 %v25041_v8 }
 0x3b2   : > { %22944 = vmatpush3.bf16.msra.mxu0 %v25040_v7  ;;  %v25081_v7 = vld [vmem:[%s25933_s28 + $0x1e30] sm:$0xff]  }
 0x3b3   : > { %22973 = vmatprep.subr.bf16.mxu0 %v25043_v14 }
 0x3b4   : > { %22966 = vmatpush3.bf16.msra.mxu1 %v25042_v12 }
 0x3b5   : > { %v22681_v25 = vpop.f32.mrf.mxu0  ;;  %17797 = vmatmul.mubr.bf16.vlgmr.msra.gmra.mxu0 %v4422_v11  ;;  %22995 = vmatprep.subr.bf16.mxu1 %v25045_v18  ;;  %v25086_v18 = vld [vmem:[%s25933_s28 + $0x1ee8] sm:$0xff]  }
 0x3b6   : > { %22974 = vmatpush3.bf16.msra.mxu0 %v25044_v16  ;;  %17876 = vmatprep.mubr.bf16.mxu0 %v4443_v19 }
 0x3b7   : > { %v22682_v28 = vpop.f32.mrf.mxu0  ;;  %v22703_v29 = vpop.f32.mrf.mxu1  ;;  %17837 = vmatmul.mubr.bf16.vlgmr.msra.gmra.mxu1 %v4444_v20  ;;  %22975 = vmatprep.subr.bf16.mxu0 %v25047_v22  ;;  %v25087_v20 = vld [vmem:[%s25933_s28 + $0x1ea8] sm:$0xff]  }
 0x3b8   : > { %v22683_v31 = vadd.f32 %v22682_v28, %v22681_v25  ;;  %22996 = vmatpush3.bf16.msra.mxu1 %v25046_v21  ;;  %17916 = vmatprep.mubr.bf16.mxu1 %v4447_v24 }
 0x3b9   : > { %v22684_v33 = vpop.f32.mrf.mxu0  ;;  %v22704_v35 = vpop.f32.mrf.mxu1  ;;  %22997 = vmatprep.subr.bf16.mxu1 %v25049_v27  ;;  %v25089_v27 = vld [vmem:[%s25933_s28 + $0x1e20] sm:$0xff]  }
 0x3ba   : > { %v17319_v34 = vadd.f32 %v22683_v31, %v27078_v50  ;;  %v22705_v37 = vadd.f32 %v22704_v35, %v22703_v29  ;;  %22976 = vmatpush3.bf16.msra.mxu0 %v25048_v23  ;;  %v25061_v50 = vld [vmem:[%s25933_s28 + $0x1dd8] sm:$0xff]   ;;  %v25088_v23 = vld [vmem:[%s25933_s28 + $0x1e60] sm:$0xff]   ;;  %v25096_v35 = vld [vmem:[%s25933_s28 + $0x1e50] sm:$0xff]  }
 0x3bb   : > { %v22685_v39 = vpop.f32.mrf.mxu0  ;;  %22977 = vmatprep.subr.bf16.mxu0 %v25051_v30  ;;  %v22706_v41 = vpop.f32.mrf.mxu1  ;;  %v25091_v29 = vld [vmem:[%s25933_s28 + $0x1ea0] sm:$0xff]   ;;  %v25092_v30 = vld [vmem:[%s25933_s28 + $0x1e58] sm:$0xff]  }
 0x3bc   : > { %v27123_v43 = vadd.f32 %v22705_v37, %v17319_v34  ;;  %22998 = vmatpush3.bf16.msra.mxu1 %v25050_v26  ;;  %v25090_v26 = vld [vmem:[%s25933_s28 + $0x1ee0] sm:$0xff]   ;;  %v25093_v31 = vld [vmem:[%s25933_s28 + $0x1e18] sm:$0xff]   ;;  %v25098_v34 = vld [vmem:[%s25933_s28 + $0x1ed0] sm:$0xff]  }
 0x3bd   : > { %22999 = vmatprep.subr.bf16.mxu1 %v25053_v36  ;;  %v22707_v46 = vpop.f32.mrf.mxu1  ;;  %v25095_v33 = vld [vmem:[%s25933_s28 + $0x1e98] sm:$0xff]   ;;  %v25097_v36 = vld [vmem:[%s25933_s28 + $0x1e10] sm:$0xff]   ;;  %v25101_v39 = vld [vmem:[%s25933_s28 + $0x1e08] sm:$0xff]  }
 0x3be   : > { %22978 = vmatpush3.bf16.msra.mxu0 %v25052_v32  ;;  %v25094_v32 = vld [vmem:[%s25933_s28 + $0x1ed8] sm:$0xff]   ;;  %v25099_v37 = vld [vmem:[%s25933_s28 + $0x1e90] sm:$0xff]   ;;  %v25103_v41 = vld [vmem:[%s25933_s28 + $0x1e88] sm:$0xff]  }
 0x3bf   : > { %22979 = vmatprep.subr.bf16.mxu0 %v25055_v40  ;;  %v25102_v40 = vld [vmem:[%s25933_s28 + $0x1ec8] sm:$0xff]  }
 0x3c0   : > { %23000 = vmatpush3.bf16.msra.mxu1 %v25054_v38  ;;  %v25100_v38 = vld [vmem:[%s25933_s28 + $0x1e48] sm:$0xff]  }
 0x3c1   : > { %23001 = vmatprep.subr.bf16.mxu1 %v25057_v45  ;;  %v25105_v45 = vld [vmem:[%s25933_s28 + $0x1e00] sm:$0xff]  }
 0x3c2   : > { %22980 = vmatpush3.bf16.msra.mxu0 %v25056_v44  ;;  %v251_v44 = vld [vmem:[%s25928_s25 + $0x78] sm:$0xff] }
 0x3c3   : > { %22981 = vmatprep.subr.bf16.mxu0 %v25059_v48  ;;  %v4455_v46 = vrot.slane %v251_v44, %v25971_v42  ;;  %v25106_v48 = vld [vmem:[%s25933_s28 + $0x1ec0] sm:$0xff]  }
 0x3c4   : > { %23002 = vmatpush3.bf16.msra.mxu1 %v25058_v47  ;;  %v4448_v47 = vcombine.high %v251_v44, %v251_v44  ;;  %v25144_v44 = vld [vmem:[%s25933_s28 + $0x20b8] sm:$0xff]  }
 0x3c5   : > { %23003 = vmatprep.subr.bf16.mxu1 %v25061_v50  ;;  %v25107_v50 = vld [vmem:[%s25933_s28 + $0x1e80] sm:$0xff]  }
 0x3c6   : > { %22982 = vmatpush3.bf16.msra.mxu0 %v25060_v49  ;;  %v4463_v49 = vcombine.high %v4455_v46, %v4455_v46 }
 0x3c7   : > { %22983 = vmatprep.subr.bf16.mxu0 %v25063_v51  ;;  %v4471_v51 = vrot.slane %v4455_v46, %v25971_v42  ;;  %v25145_v46 = vld [vmem:[%s25933_s28 + $0x2070] sm:$0xff]  }
 0x3c8   : > { %23004 = vmatpush3.bf16.msra.mxu1 %v25062_v52  ;;  %v27184_v52 = vrot.slane %v4448_v47, %v25971_v42  ;;  %v25146_v47 = vld [vmem:[%s25933_s28 + $0x2030] sm:$0xff]  }
 0x3c9   : > { %23005 = vmatprep.subr.bf16.mxu1 %v25065_v54  ;;  %v4485_v54 = vrot.slane %v4463_v49, %v25971_v42  ;;  %v25147_v49 = vld [vmem:[%s25933_s28 + $0x20f0] sm:$0xff]  }
 0x3ca   : > { %22984 = vmatpush3.bf16.msra.mxu0 %v25064_v53  ;;  %v25108_v53 = vld [vmem:[%s25933_s28 + $0x1f78] sm:$0xff]  }
 0x3cb   : > { %22985 = vmatprep.subr.bf16.mxu0 %v25067_v56  ;;  %v4464_v56 = vcombine.high %v27184_v52, %v27184_v52 }
 0x3cc   : > { %23006 = vmatpush3.bf16.msra.mxu1 %v25066_v55  ;;  %v25109_v55 = vld [vmem:[%s25933_s28 + $0x1f38] sm:$0xff]  }
 0x3cd   : > { %23007 = vmatprep.subr.bf16.mxu1 %v25069_v58  ;;  %v4495_v58 = vcombine.high %v4485_v54, %v4485_v54 }
 0x3ce   : > { %22986 = vmatpush3.bf16.msra.mxu0 %v25068_v57  ;;  %v25110_v57 = vld [vmem:[%s25933_s28 + $0x1ff8] sm:$0xff]  }
 0x3cf   : > { %22987 = vmatprep.subr.bf16.mxu0 %v25071_v61  ;;  %v4492_v61 = vrot.slane %v4464_v56, %v25971_v42 }
 0x3d0   : > { %23008 = vmatpush3.bf16.msra.mxu1 %v25070_v60  ;;  %v25111_v60 = vld [vmem:[%s25933_s28 + $0x1fb8] sm:$0xff]  }
 0x3d1   : > { %23009 = vmatprep.subr.bf16.mxu1 %v25073_v62  ;;  %v25112_v62 = vld [vmem:[%s25933_s28 + $0x1f70] sm:$0xff]  }
 0x3d2   : > { %22988 = vmatpush3.bf16.msra.mxu0 %v25072_v59  ;;  %v4493_v59 = vcombine.high %v4471_v51, %v4471_v51 }
 0x3d3   : > { %23017 = vmatprep.subr.bf16.mxu0 %v25076_v1 }
 0x3d4   : > { %23010 = vmatpush3.bf16.msra.mxu1 %v25075_v63  ;;  %v25113_v63 = vld [vmem:[%s25933_s28 + $0x1f30] sm:$0xff]  }
 0x3d5   : > { %v22725_v8 = vpop.f32.mrf.mxu0  ;;  %17877 = vmatmul.mubr.bf16.vlgmr.msra.gmra.mxu0 %v4429_v0  ;;  %23039 = vmatprep.subr.bf16.mxu1 %v25078_v3  ;;  %v4496_v0 = vcombine.high %v4492_v61, %v4492_v61  ;;  %v25115_v3 = vld [vmem:[%s25933_s28 + $0x1fb0] sm:$0xff]  }
 0x3d6   : > { %23018 = vmatpush3.bf16.msra.mxu0 %v25077_v2  ;;  %17956 = vmatprep.mubr.bf16.mxu0 %v4485_v54  ;;  %v25114_v2 = vld [vmem:[%s25933_s28 + $0x1ff0] sm:$0xff]  }
 0x3d7   : > { %v22726_v12 = vpop.f32.mrf.mxu0  ;;  %v22747_v11 = vpop.f32.mrf.mxu1  ;;  %17917 = vmatmul.mubr.bf16.vlgmr.msra.gmra.mxu1 %v4445_v5  ;;  %23019 = vmatprep.subr.bf16.mxu0 %v25080_v6  ;;  %v25116_v6 = vld [vmem:[%s25933_s28 + $0x1f68] sm:$0xff]  }
 0x3d8   : > { %v22727_v14 = vadd.f32 %v22726_v12, %v22725_v8  ;;  %23040 = vmatpush3.bf16.msra.mxu1 %v25079_v4  ;;  %17996 = vmatprep.mubr.bf16.mxu1 %v4495_v58  ;;  %v25117_v8 = vld [vmem:[%s25933_s28 + $0x1f28] sm:$0xff]  }
 0x3d9   : > { %v22728_v16 = vpop.f32.mrf.mxu0  ;;  %v22748_v17 = vpop.f32.mrf.mxu1  ;;  %23041 = vmatprep.subr.bf16.mxu1 %v25082_v9  ;;  %v25118_v12 = vld [vmem:[%s25933_s28 + $0x1fe8] sm:$0xff]  }
 0x3da   : > { %v17399_v19 = vadd.f32 %v22727_v14, %v27123_v43  ;;  %v22749_v21 = vadd.f32 %v22748_v17, %v22747_v11  ;;  %23020 = vmatpush3.bf16.msra.mxu0 %v25081_v7  ;;  %v25104_v43 = vld [vmem:[%s25933_s28 + $0x1e40] sm:$0xff]   ;;  %v25119_v14 = vld [vmem:[%s25933_s28 + $0x1fa8] sm:$0xff]  }
 0x3db   : > { %v22729_v22 = vpop.f32.mrf.mxu0  ;;  %23021 = vmatprep.subr.bf16.mxu0 %v25084_v13  ;;  %v22750_v24 = vpop.f32.mrf.mxu1  ;;  %v25120_v16 = vld [vmem:[%s25933_s28 + $0x1f60] sm:$0xff]   ;;  %v25151_v58 = vld [vmem:[%s25933_s28 + $0x20e8] sm:$0xff]  }
 0x3dc   : > { %v27160_v25 = vadd.f32 %v22749_v21, %v17399_v19  ;;  %23042 = vmatpush3.bf16.msra.mxu1 %v25083_v10  ;;  %v25121_v19 = vld [vmem:[%s25933_s28 + $0x1f20] sm:$0xff]   ;;  %v25125_v24 = vld [vmem:[%s25933_s28 + $0x1f18] sm:$0xff]  }
 0x3dd   : > { %23043 = vmatprep.subr.bf16.mxu1 %v25086_v18  ;;  %v22751_v28 = vpop.f32.mrf.mxu1  ;;  %v25122_v21 = vld [vmem:[%s25933_s28 + $0x1fe0] sm:$0xff]  }
 0x3de   : > { %23022 = vmatpush3.bf16.msra.mxu0 %v25085_v15  ;;  %v25123_v22 = vld [vmem:[%s25933_s28 + $0x1fa0] sm:$0xff]   ;;  %v25129_v28 = vld [vmem:[%s25933_s28 + $0x1f10] sm:$0xff]  }
 0x3df   : > { %23023 = vmatprep.subr.bf16.mxu0 %v25088_v23  ;;  %v25124_v23 = vld [vmem:[%s25933_s28 + $0x1f58] sm:$0xff]  }
 0x3e0   : > { %23044 = vmatpush3.bf16.msra.mxu1 %v25087_v20 }
 0x3e1   : > { %23045 = vmatprep.subr.bf16.mxu1 %v25090_v26  ;;  %v25128_v26 = vld [vmem:[%s25933_s28 + $0x1f50] sm:$0xff]  }
 0x3e2   : > { %23024 = vmatpush3.bf16.msra.mxu0 %v25089_v27  ;;  %v25127_v27 = vld [vmem:[%s25933_s28 + $0x1f98] sm:$0xff]  }
 0x3e3   : > { %23025 = vmatprep.subr.bf16.mxu0 %v25092_v30  ;;  %v25131_v30 = vld [vmem:[%s25933_s28 + $0x1f90] sm:$0xff]  }
 0x3e4   : > { %23046 = vmatpush3.bf16.msra.mxu1 %v25091_v29  ;;  %v25130_v29 = vld [vmem:[%s25933_s28 + $0x1fd0] sm:$0xff]  }
 0x3e5   : > { %23047 = vmatprep.subr.bf16.mxu1 %v25094_v32  ;;  %v25133_v32 = vld [vmem:[%s25933_s28 + $0x1f08] sm:$0xff]  }
 0x3e6   : > { %23026 = vmatpush3.bf16.msra.mxu0 %v25093_v31  ;;  %v25132_v31 = vld [vmem:[%s25933_s28 + $0x1f48] sm:$0xff]  }
 0x3e7   : > { %23027 = vmatprep.subr.bf16.mxu0 %v25096_v35  ;;  %v25135_v35 = vld [vmem:[%s25933_s28 + $0x1f88] sm:$0xff]  }
 0x3e8   : > { %23048 = vmatpush3.bf16.msra.mxu1 %v25095_v33  ;;  %v25134_v33 = vld [vmem:[%s25933_s28 + $0x1fc8] sm:$0xff]  }
 0x3e9   : > { %23049 = vmatprep.subr.bf16.mxu1 %v25098_v34  ;;  %v25137_v34 = vld [vmem:[%s25933_s28 + $0x1f00] sm:$0xff]  }
 0x3ea   : > { %23028 = vmatpush3.bf16.msra.mxu0 %v25097_v36  ;;  %v25136_v36 = vld [vmem:[%s25933_s28 + $0x1f40] sm:$0xff]  }
 0x3eb   : > { %23029 = vmatprep.subr.bf16.mxu0 %v25100_v38  ;;  %v25140_v38 = vld [vmem:[%s25933_s28 + $0x1f80] sm:$0xff]  }
 0x3ec   : > { %23050 = vmatpush3.bf16.msra.mxu1 %v25099_v37  ;;  %v25138_v37 = vld [vmem:[%s25933_s28 + $0x1fc0] sm:$0xff]  }
 0x3ed   : > { %23051 = vmatprep.subr.bf16.mxu1 %v25102_v40  ;;  %v25141_v40 = vld [vmem:[%s25933_s28 + $0x2078] sm:$0xff]  }
 0x3ee   : > { %23030 = vmatpush3.bf16.msra.mxu0 %v25101_v39  ;;  %v4478_v39 = vrot.slane %v27184_v52, %v25971_v42 }
 0x3ef   : > { %23031 = vmatprep.subr.bf16.mxu0 %v25104_v43  ;;  %v25143_v43 = vld [vmem:[%s25933_s28 + $0x20f8] sm:$0xff]  }
 0x3f0   : > { %23052 = vmatpush3.bf16.msra.mxu1 %v25103_v41  ;;  %v25142_v41 = vld [vmem:[%s25933_s28 + $0x2038] sm:$0xff]  }
 0x3f1   : > { %23053 = vmatprep.subr.bf16.mxu1 %v25106_v48 }
 0x3f2   : > { %23032 = vmatpush3.bf16.msra.mxu0 %v25105_v45  ;;  %v4494_v45 = vcombine.high %v4478_v39, %v4478_v39 }
 0x3f3   : > { %23061 = vmatprep.subr.bf16.mxu0 %v25108_v53  ;;  %v25149_v53 = vld [vmem:[%s25933_s28 + $0x2068] sm:$0xff]  }
 0x3f4   : > { %23054 = vmatpush3.bf16.msra.mxu1 %v25107_v50  ;;  %v25148_v50 = vld [vmem:[%s25933_s28 + $0x20b0] sm:$0xff]  }
 0x3f5   : > { %v22769_v1 = vpop.f32.mrf.mxu0  ;;  %17957 = vmatmul.mubr.bf16.vlgmr.msra.gmra.mxu0 %v4471_v51  ;;  %23083 = vmatprep.subr.bf16.mxu1 %v25110_v57 }
 0x3f6   : > { %23062 = vmatpush3.bf16.msra.mxu0 %v25109_v55  ;;  %18036 = vmatprep.mubr.bf16.mxu0 %v4492_v61  ;;  %v25150_v55 = vld [vmem:[%s25933_s28 + $0x2028] sm:$0xff]  }
 0x3f7   : > { %v22770_v4 = vpop.f32.mrf.mxu0  ;;  %v22791_v5 = vpop.f32.mrf.mxu1  ;;  %17997 = vmatmul.mubr.bf16.vlgmr.msra.gmra.mxu1 %v4493_v59  ;;  %23063 = vmatprep.subr.bf16.mxu0 %v25112_v62  ;;  %v25152_v59 = vld [vmem:[%s25933_s28 + $0x20a8] sm:$0xff]  }
 0x3f8   : > { %v22771_v7 = vadd.f32 %v22770_v4, %v22769_v1  ;;  %23084 = vmatpush3.bf16.msra.mxu1 %v25111_v60  ;;  %18076 = vmatprep.mubr.bf16.mxu1 %v4496_v0 }
 0x3f9   : > { %v22772_v9 = vpop.f32.mrf.mxu0  ;;  %v22792_v10 = vpop.f32.mrf.mxu1  ;;  %23085 = vmatprep.subr.bf16.mxu1 %v25114_v2  ;;  %v25154_v2 = vld [vmem:[%s25933_s28 + $0x2020] sm:$0xff]  }
 0x3fa   : > { %v17479_v11 = vadd.f32 %v22771_v7, %v27160_v25  ;;  %v22793_v13 = vadd.f32 %v22792_v10, %v22791_v5  ;;  %23064 = vmatpush3.bf16.msra.mxu0 %v25113_v63  ;;  %v25126_v25 = vld [vmem:[%s25933_s28 + $0x1fd8] sm:$0xff]   ;;  %v25153_v63 = vld [vmem:[%s25933_s28 + $0x2060] sm:$0xff]   ;;  %v25161_v10 = vld [vmem:[%s25933_s28 + $0x2050] sm:$0xff]  }
 0x3fb   : > { %v22773_v15 = vpop.f32.mrf.mxu0  ;;  %23065 = vmatprep.subr.bf16.mxu0 %v25116_v6  ;;  %v22794_v17 = vpop.f32.mrf.mxu1  ;;  %v25156_v5 = vld [vmem:[%s25933_s28 + $0x20a0] sm:$0xff]   ;;  %v25157_v6 = vld [vmem:[%s25933_s28 + $0x2058] sm:$0xff]  }
 0x3fc   : > { %v27205_v18 = vadd.f32 %v22793_v13, %v17479_v11  ;;  %23086 = vmatpush3.bf16.msra.mxu1 %v25115_v3  ;;  %v25155_v3 = vld [vmem:[%s25933_s28 + $0x20e0] sm:$0xff]   ;;  %v25158_v7 = vld [vmem:[%s25933_s28 + $0x2018] sm:$0xff]   ;;  %v25163_v11 = vld [vmem:[%s25933_s28 + $0x20d0] sm:$0xff]  }
 0x3fd   : > { %23087 = vmatprep.subr.bf16.mxu1 %v25118_v12  ;;  %v22795_v20 = vpop.f32.mrf.mxu1  ;;  %v25160_v9 = vld [vmem:[%s25933_s28 + $0x2098] sm:$0xff]   ;;  %v25162_v12 = vld [vmem:[%s25933_s28 + $0x2010] sm:$0xff]   ;;  %v25166_v15 = vld [vmem:[%s25933_s28 + $0x2008] sm:$0xff]  }
 0x3fe   : > { %23066 = vmatpush3.bf16.msra.mxu0 %v25117_v8  ;;  %v25159_v8 = vld [vmem:[%s25933_s28 + $0x20d8] sm:$0xff]   ;;  %v25164_v13 = vld [vmem:[%s25933_s28 + $0x2090] sm:$0xff]   ;;  %v25168_v17 = vld [vmem:[%s25933_s28 + $0x2088] sm:$0xff]  }
 0x3ff   : > { %23067 = vmatprep.subr.bf16.mxu0 %v25120_v16  ;;  %v25167_v16 = vld [vmem:[%s25933_s28 + $0x20c8] sm:$0xff]  }
 0x400   : > { %23088 = vmatpush3.bf16.msra.mxu1 %v25119_v14  ;;  %v25165_v14 = vld [vmem:[%s25933_s28 + $0x2048] sm:$0xff]  }
 0x401   : > { %23089 = vmatprep.subr.bf16.mxu1 %v25122_v21  ;;  %v25170_v21 = vld [vmem:[%s25933_s28 + $0x2000] sm:$0xff]  }
 0x402   : > { %23068 = vmatpush3.bf16.msra.mxu0 %v25121_v19  ;;  %v252_v19 = vld [vmem:[%s25928_s25 + $0x80] sm:$0xff] }
 0x403   : > { %23069 = vmatprep.subr.bf16.mxu0 %v25124_v23  ;;  %v4504_v20 = vrot.slane %v252_v19, %v25971_v42  ;;  %v25171_v23 = vld [vmem:[%s25933_s28 + $0x20c0] sm:$0xff]  }
 0x404   : > { %23090 = vmatpush3.bf16.msra.mxu1 %v25123_v22  ;;  %v4497_v22 = vcombine.high %v252_v19, %v252_v19  ;;  %v25209_v19 = vld [vmem:[%s25933_s28 + $0x22b8] sm:$0xff]  }
 0x405   : > { %23091 = vmatprep.subr.bf16.mxu1 %v25126_v25  ;;  %v25172_v25 = vld [vmem:[%s25933_s28 + $0x2080] sm:$0xff]  }
 0x406   : > { %23070 = vmatpush3.bf16.msra.mxu0 %v25125_v24  ;;  %v4512_v24 = vcombine.high %v4504_v20, %v4504_v20 }
 0x407   : > { %23071 = vmatprep.subr.bf16.mxu0 %v25128_v26  ;;  %v4520_v26 = vrot.slane %v4504_v20, %v25971_v42  ;;  %v25210_v20 = vld [vmem:[%s25933_s28 + $0x2270] sm:$0xff]  }
 0x408   : > { %23092 = vmatpush3.bf16.msra.mxu1 %v25127_v27  ;;  %v27266_v27 = vrot.slane %v4497_v22, %v25971_v42  ;;  %v25211_v22 = vld [vmem:[%s25933_s28 + $0x2230] sm:$0xff]  }
 0x409   : > { %23093 = vmatprep.subr.bf16.mxu1 %v25130_v29  ;;  %v4534_v29 = vrot.slane %v4512_v24, %v25971_v42  ;;  %v25212_v24 = vld [vmem:[%s25933_s28 + $0x22f0] sm:$0xff]  }
 0x40a   : > { %23072 = vmatpush3.bf16.msra.mxu0 %v25129_v28  ;;  %v25173_v28 = vld [vmem:[%s25933_s28 + $0x2178] sm:$0xff]  }
 0x40b   : > { %23073 = vmatprep.subr.bf16.mxu0 %v25132_v31  ;;  %v4513_v31 = vcombine.high %v27266_v27, %v27266_v27 }
 0x40c   : > { %23094 = vmatpush3.bf16.msra.mxu1 %v25131_v30  ;;  %v25174_v30 = vld [vmem:[%s25933_s28 + $0x2138] sm:$0xff]  }
 0x40d   : > { %23095 = vmatprep.subr.bf16.mxu1 %v25134_v33  ;;  %v4544_v33 = vcombine.high %v4534_v29, %v4534_v29 }
 0x40e   : > { %23074 = vmatpush3.bf16.msra.mxu0 %v25133_v32  ;;  %v25175_v32 = vld [vmem:[%s25933_s28 + $0x21f8] sm:$0xff]  }
 0x40f   : > { %23075 = vmatprep.subr.bf16.mxu0 %v25136_v36  ;;  %v4541_v36 = vrot.slane %v4513_v31, %v25971_v42 }
 0x410   : > { %23096 = vmatpush3.bf16.msra.mxu1 %v25135_v35  ;;  %v25176_v35 = vld [vmem:[%s25933_s28 + $0x21b8] sm:$0xff]  }
 0x411   : > { %23097 = vmatprep.subr.bf16.mxu1 %v25138_v37  ;;  %v25177_v37 = vld [vmem:[%s25933_s28 + $0x2170] sm:$0xff]  }
 0x412   : > { %23076 = vmatpush3.bf16.msra.mxu0 %v25137_v34  ;;  %v4542_v34 = vcombine.high %v4520_v26, %v4520_v26 }
 0x413   : > { %23105 = vmatprep.subr.bf16.mxu0 %v25141_v40 }
 0x414   : > { %23098 = vmatpush3.bf16.msra.mxu1 %v25140_v38  ;;  %v25178_v38 = vld [vmem:[%s25933_s28 + $0x2130] sm:$0xff]  }
 0x415   : > { %v22813_v48 = vpop.f32.mrf.mxu0  ;;  %18037 = vmatmul.mubr.bf16.vlgmr.msra.gmra.mxu0 %v4478_v39  ;;  %23127 = vmatprep.subr.bf16.mxu1 %v25143_v43  ;;  %v4545_v39 = vcombine.high %v4541_v36, %v4541_v36  ;;  %v25180_v43 = vld [vmem:[%s25933_s28 + $0x21b0] sm:$0xff]  }
 0x416   : > { %23106 = vmatpush3.bf16.msra.mxu0 %v25142_v41  ;;  %18116 = vmatprep.mubr.bf16.mxu0 %v4534_v29  ;;  %v25179_v41 = vld [vmem:[%s25933_s28 + $0x21f0] sm:$0xff]  }
 0x417   : > { %v22814_v52 = vpop.f32.mrf.mxu0  ;;  %v22835_v51 = vpop.f32.mrf.mxu1  ;;  %18077 = vmatmul.mubr.bf16.vlgmr.msra.gmra.mxu1 %v4494_v45  ;;  %23107 = vmatprep.subr.bf16.mxu0 %v25145_v46  ;;  %v25181_v46 = vld [vmem:[%s25933_s28 + $0x2168] sm:$0xff]  }
 0x418   : > { %v22815_v54 = vadd.f32 %v22814_v52, %v22813_v48  ;;  %23128 = vmatpush3.bf16.msra.mxu1 %v25144_v44  ;;  %18156 = vmatprep.mubr.bf16.mxu1 %v4544_v33  ;;  %v25182_v48 = vld [vmem:[%s25933_s28 + $0x2128] sm:$0xff]  }
 0x419   : > { %v22816_v56 = vpop.f32.mrf.mxu0  ;;  %v22836_v57 = vpop.f32.mrf.mxu1  ;;  %23129 = vmatprep.subr.bf16.mxu1 %v25147_v49  ;;  %v25183_v52 = vld [vmem:[%s25933_s28 + $0x21e8] sm:$0xff]  }
 0x41a   : > { %v17559_v60 = vadd.f32 %v22815_v54, %v27205_v18  ;;  %v22837_v61 = vadd.f32 %v22836_v57, %v22835_v51  ;;  %23108 = vmatpush3.bf16.msra.mxu0 %v25146_v47  ;;  %v25169_v18 = vld [vmem:[%s25933_s28 + $0x2040] sm:$0xff]   ;;  %v25184_v54 = vld [vmem:[%s25933_s28 + $0x21a8] sm:$0xff]  }
 0x41b   : > { %v22817_v62 = vpop.f32.mrf.mxu0  ;;  %23109 = vmatprep.subr.bf16.mxu0 %v25149_v53  ;;  %v22838_v0 = vpop.f32.mrf.mxu1  ;;  %v25185_v56 = vld [vmem:[%s25933_s28 + $0x2160] sm:$0xff]   ;;  %v25216_v33 = vld [vmem:[%s25933_s28 + $0x22e8] sm:$0xff]  }
 0x41c   : > { %v27242_v1 = vadd.f32 %v22837_v61, %v17559_v60  ;;  %23130 = vmatpush3.bf16.msra.mxu1 %v25148_v50  ;;  %v25186_v60 = vld [vmem:[%s25933_s28 + $0x2120] sm:$0xff]   ;;  %v25190_v0 = vld [vmem:[%s25933_s28 + $0x2118] sm:$0xff]  }
 0x41d   : > { %23131 = vmatprep.subr.bf16.mxu1 %v25151_v58  ;;  %v22839_v4 = vpop.f32.mrf.mxu1  ;;  %v25187_v61 = vld [vmem:[%s25933_s28 + $0x21e0] sm:$0xff]  }
 0x41e   : > { %23110 = vmatpush3.bf16.msra.mxu0 %v25150_v55  ;;  %v25188_v62 = vld [vmem:[%s25933_s28 + $0x21a0] sm:$0xff]   ;;  %v25194_v4 = vld [vmem:[%s25933_s28 + $0x2110] sm:$0xff]  }
 0x41f   : > { %23111 = vmatprep.subr.bf16.mxu0 %v25153_v63  ;;  %v25189_v63 = vld [vmem:[%s25933_s28 + $0x2158] sm:$0xff]  }
 0x420   : > { %23132 = vmatpush3.bf16.msra.mxu1 %v25152_v59 }
 0x421   : > { %23133 = vmatprep.subr.bf16.mxu1 %v25155_v3  ;;  %v25193_v3 = vld [vmem:[%s25933_s28 + $0x2150] sm:$0xff]  }
 0x422   : > { %23112 = vmatpush3.bf16.msra.mxu0 %v25154_v2  ;;  %v25192_v2 = vld [vmem:[%s25933_s28 + $0x2198] sm:$0xff]  }
 0x423   : > { %23113 = vmatprep.subr.bf16.mxu0 %v25157_v6  ;;  %v25196_v6 = vld [vmem:[%s25933_s28 + $0x2190] sm:$0xff]  }
 0x424   : > { %23134 = vmatpush3.bf16.msra.mxu1 %v25156_v5  ;;  %v25195_v5 = vld [vmem:[%s25933_s28 + $0x21d0] sm:$0xff]  }
 0x425   : > { %23135 = vmatprep.subr.bf16.mxu1 %v25159_v8  ;;  %v25198_v8 = vld [vmem:[%s25933_s28 + $0x2108] sm:$0xff]  }
 0x426   : > { %23114 = vmatpush3.bf16.msra.mxu0 %v25158_v7  ;;  %v25197_v7 = vld [vmem:[%s25933_s28 + $0x2148] sm:$0xff]  }
 0x427   : > { %23115 = vmatprep.subr.bf16.mxu0 %v25161_v10  ;;  %v25200_v10 = vld [vmem:[%s25933_s28 + $0x2188] sm:$0xff]  }
 0x428   : > { %23136 = vmatpush3.bf16.msra.mxu1 %v25160_v9  ;;  %v25199_v9 = vld [vmem:[%s25933_s28 + $0x21c8] sm:$0xff]  }
 0x429   : > { %23137 = vmatprep.subr.bf16.mxu1 %v25163_v11  ;;  %v25202_v11 = vld [vmem:[%s25933_s28 + $0x2100] sm:$0xff]  }
 0x42a   : > { %23116 = vmatpush3.bf16.msra.mxu0 %v25162_v12  ;;  %v25201_v12 = vld [vmem:[%s25933_s28 + $0x2140] sm:$0xff]  }
 0x42b   : > { %23117 = vmatprep.subr.bf16.mxu0 %v25165_v14  ;;  %v25205_v14 = vld [vmem:[%s25933_s28 + $0x2180] sm:$0xff]  }
 0x42c   : > { %23138 = vmatpush3.bf16.msra.mxu1 %v25164_v13  ;;  %v25203_v13 = vld [vmem:[%s25933_s28 + $0x21c0] sm:$0xff]  }
 0x42d   : > { %23139 = vmatprep.subr.bf16.mxu1 %v25167_v16  ;;  %v25206_v16 = vld [vmem:[%s25933_s28 + $0x2278] sm:$0xff]  }
 0x42e   : > { %23118 = vmatpush3.bf16.msra.mxu0 %v25166_v15  ;;  %v4527_v15 = vrot.slane %v27266_v27, %v25971_v42 }
 0x42f   : > { %23119 = vmatprep.subr.bf16.mxu0 %v25169_v18  ;;  %v25208_v18 = vld [vmem:[%s25933_s28 + $0x22f8] sm:$0xff]  }
 0x430   : > { %23140 = vmatpush3.bf16.msra.mxu1 %v25168_v17  ;;  %v25207_v17 = vld [vmem:[%s25933_s28 + $0x2238] sm:$0xff]  }
 0x431   : > { %23141 = vmatprep.subr.bf16.mxu1 %v25171_v23 }
 0x432   : > { %23120 = vmatpush3.bf16.msra.mxu0 %v25170_v21  ;;  %v4543_v21 = vcombine.high %v4527_v15, %v4527_v15 }
 0x433   : > { %23149 = vmatprep.subr.bf16.mxu0 %v25173_v28  ;;  %v25214_v28 = vld [vmem:[%s25933_s28 + $0x2268] sm:$0xff]  }
 0x434   : > { %23142 = vmatpush3.bf16.msra.mxu1 %v25172_v25  ;;  %v25213_v25 = vld [vmem:[%s25933_s28 + $0x22b0] sm:$0xff]  }
 0x435   : > { %v22857_v40 = vpop.f32.mrf.mxu0  ;;  %18117 = vmatmul.mubr.bf16.vlgmr.msra.gmra.mxu0 %v4520_v26  ;;  %23171 = vmatprep.subr.bf16.mxu1 %v25175_v32 }
 0x436   : > { %23150 = vmatpush3.bf16.msra.mxu0 %v25174_v30  ;;  %18196 = vmatprep.mubr.bf16.mxu0 %v4541_v36  ;;  %v25215_v30 = vld [vmem:[%s25933_s28 + $0x2228] sm:$0xff]  }
 0x437   : > { %v22858_v44 = vpop.f32.mrf.mxu0  ;;  %v22879_v45 = vpop.f32.mrf.mxu1  ;;  %18157 = vmatmul.mubr.bf16.vlgmr.msra.gmra.mxu1 %v4542_v34  ;;  %23151 = vmatprep.subr.bf16.mxu0 %v25177_v37  ;;  %v25217_v34 = vld [vmem:[%s25933_s28 + $0x22a8] sm:$0xff]  }
 0x438   : > { %v22859_v47 = vadd.f32 %v22858_v44, %v22857_v40  ;;  %23172 = vmatpush3.bf16.msra.mxu1 %v25176_v35  ;;  %18236 = vmatprep.mubr.bf16.mxu1 %v4545_v39 }
 0x439   : > { %v22860_v49 = vpop.f32.mrf.mxu0  ;;  %v22880_v50 = vpop.f32.mrf.mxu1  ;;  %23173 = vmatprep.subr.bf16.mxu1 %v25179_v41  ;;  %v25219_v41 = vld [vmem:[%s25933_s28 + $0x2220] sm:$0xff]  }
 0x43a   : > { %v17639_v51 = vadd.f32 %v22859_v47, %v27242_v1  ;;  %v22881_v53 = vadd.f32 %v22880_v50, %v22879_v45  ;;  %23152 = vmatpush3.bf16.msra.mxu0 %v25178_v38  ;;  %v25191_v1 = vld [vmem:[%s25933_s28 + $0x21d8] sm:$0xff]   ;;  %v25218_v38 = vld [vmem:[%s25933_s28 + $0x2260] sm:$0xff]   ;;  %v25226_v50 = vld [vmem:[%s25933_s28 + $0x2250] sm:$0xff]  }
 0x43b   : > { %v22861_v55 = vpop.f32.mrf.mxu0  ;;  %23153 = vmatprep.subr.bf16.mxu0 %v25181_v46  ;;  %v22882_v57 = vpop.f32.mrf.mxu1  ;;  %v25221_v45 = vld [vmem:[%s25933_s28 + $0x22a0] sm:$0xff]   ;;  %v25222_v46 = vld [vmem:[%s25933_s28 + $0x2258] sm:$0xff]  }
 0x43c   : > { %v27287_v58 = vadd.f32 %v22881_v53, %v17639_v51  ;;  %23174 = vmatpush3.bf16.msra.mxu1 %v25180_v43  ;;  %v25220_v43 = vld [vmem:[%s25933_s28 + $0x22e0] sm:$0xff]   ;;  %v25223_v47 = vld [vmem:[%s25933_s28 + $0x2218] sm:$0xff]   ;;  %v25228_v51 = vld [vmem:[%s25933_s28 + $0x22d0] sm:$0xff]  }
 0x43d   : > { %23175 = vmatprep.subr.bf16.mxu1 %v25183_v52  ;;  %v22883_v59 = vpop.f32.mrf.mxu1  ;;  %v25225_v49 = vld [vmem:[%s25933_s28 + $0x2298] sm:$0xff]   ;;  %v25227_v52 = vld [vmem:[%s25933_s28 + $0x2210] sm:$0xff]   ;;  %v25231_v55 = vld [vmem:[%s25933_s28 + $0x2208] sm:$0xff]  }
 0x43e   : > { %23154 = vmatpush3.bf16.msra.mxu0 %v25182_v48  ;;  %v25224_v48 = vld [vmem:[%s25933_s28 + $0x22d8] sm:$0xff]   ;;  %v25229_v53 = vld [vmem:[%s25933_s28 + $0x2290] sm:$0xff]   ;;  %v25233_v57 = vld [vmem:[%s25933_s28 + $0x2288] sm:$0xff]  }
 0x43f   : > { %23155 = vmatprep.subr.bf16.mxu0 %v25185_v56  ;;  %v25232_v56 = vld [vmem:[%s25933_s28 + $0x22c8] sm:$0xff]  }
 0x440   : > { %23176 = vmatpush3.bf16.msra.mxu1 %v25184_v54  ;;  %v25230_v54 = vld [vmem:[%s25933_s28 + $0x2248] sm:$0xff]  }
 0x441   : > { %23177 = vmatprep.subr.bf16.mxu1 %v25187_v61  ;;  %v25235_v61 = vld [vmem:[%s25933_s28 + $0x2200] sm:$0xff]  }
 0x442   : > { %23156 = vmatpush3.bf16.msra.mxu0 %v25186_v60  ;;  %v253_v60 = vld [vmem:[%s25928_s25 + $0x88] sm:$0xff] }
 0x443   : > { %23157 = vmatprep.subr.bf16.mxu0 %v25189_v63  ;;  %v4553_v59 = vrot.slane %v253_v60, %v25971_v42  ;;  %v25236_v63 = vld [vmem:[%s25933_s28 + $0x22c0] sm:$0xff]  }
 0x444   : > { %23178 = vmatpush3.bf16.msra.mxu1 %v25188_v62  ;;  %v4546_v62 = vcombine.high %v253_v60, %v253_v60  ;;  %v25274_v60 = vld [vmem:[%s25933_s28 + $0x24b8] sm:$0xff]  }
 0x445   : > { %23179 = vmatprep.subr.bf16.mxu1 %v25191_v1  ;;  %v25237_v1 = vld [vmem:[%s25933_s28 + $0x2280] sm:$0xff]  }
 0x446   : > { %23158 = vmatpush3.bf16.msra.mxu0 %v25190_v0  ;;  %v4561_v0 = vcombine.high %v4553_v59, %v4553_v59 }
 0x447   : > { %23159 = vmatprep.subr.bf16.mxu0 %v25193_v3  ;;  %v4569_v3 = vrot.slane %v4553_v59, %v25971_v42  ;;  %v25275_v59 = vld [vmem:[%s25933_s28 + $0x2470] sm:$0xff]  }
 0x448   : > { %23180 = vmatpush3.bf16.msra.mxu1 %v25192_v2  ;;  %v27348_v2 = vrot.slane %v4546_v62, %v25971_v42  ;;  %v25276_v62 = vld [vmem:[%s25933_s28 + $0x2430] sm:$0xff]  }
 0x449   : > { %23181 = vmatprep.subr.bf16.mxu1 %v25195_v5  ;;  %v4583_v5 = vrot.slane %v4561_v0, %v25971_v42  ;;  %v25277_v0 = vld [vmem:[%s25933_s28 + $0x24f0] sm:$0xff]  }
 0x44a   : > { %23160 = vmatpush3.bf16.msra.mxu0 %v25194_v4  ;;  %v25238_v4 = vld [vmem:[%s25933_s28 + $0x2378] sm:$0xff]  }
 0x44b   : > { %23161 = vmatprep.subr.bf16.mxu0 %v25197_v7  ;;  %v4562_v7 = vcombine.high %v27348_v2, %v27348_v2 }
 0x44c   : > { %23182 = vmatpush3.bf16.msra.mxu1 %v25196_v6  ;;  %v25239_v6 = vld [vmem:[%s25933_s28 + $0x2338] sm:$0xff]  }
 0x44d   : > { %23183 = vmatprep.subr.bf16.mxu1 %v25199_v9  ;;  %v4593_v9 = vcombine.high %v4583_v5, %v4583_v5 }
 0x44e   : > { %23162 = vmatpush3.bf16.msra.mxu0 %v25198_v8  ;;  %v25240_v8 = vld [vmem:[%s25933_s28 + $0x23f8] sm:$0xff]  }
 0x44f   : > { %23163 = vmatprep.subr.bf16.mxu0 %v25201_v12  ;;  %v4590_v12 = vrot.slane %v4562_v7, %v25971_v42 }
 0x450   : > { %23184 = vmatpush3.bf16.msra.mxu1 %v25200_v10  ;;  %v25241_v10 = vld [vmem:[%s25933_s28 + $0x23b8] sm:$0xff]  }
 0x451   : > { %23185 = vmatprep.subr.bf16.mxu1 %v25203_v13  ;;  %v25242_v13 = vld [vmem:[%s25933_s28 + $0x2370] sm:$0xff]  }
 0x452   : > { %23164 = vmatpush3.bf16.msra.mxu0 %v25202_v11  ;;  %v4591_v11 = vcombine.high %v4569_v3, %v4569_v3 }
 0x453   : > { %23193 = vmatprep.subr.bf16.mxu0 %v25206_v16 }
 0x454   : > { %23186 = vmatpush3.bf16.msra.mxu1 %v25205_v14  ;;  %v25243_v14 = vld [vmem:[%s25933_s28 + $0x2330] sm:$0xff]  }
 0x455   : > { %v22901_v23 = vpop.f32.mrf.mxu0  ;;  %18197 = vmatmul.mubr.bf16.vlgmr.msra.gmra.mxu0 %v4527_v15  ;;  %23215 = vmatprep.subr.bf16.mxu1 %v25208_v18  ;;  %v4594_v15 = vcombine.high %v4590_v12, %v4590_v12  ;;  %v25245_v18 = vld [vmem:[%s25933_s28 + $0x23b0] sm:$0xff]  }
 0x456   : > { %23194 = vmatpush3.bf16.msra.mxu0 %v25207_v17  ;;  %18276 = vmatprep.mubr.bf16.mxu0 %v4583_v5  ;;  %v25244_v17 = vld [vmem:[%s25933_s28 + $0x23f0] sm:$0xff]  }
 0x457   : > { %v22902_v27 = vpop.f32.mrf.mxu0  ;;  %v22923_v26 = vpop.f32.mrf.mxu1  ;;  %18237 = vmatmul.mubr.bf16.vlgmr.msra.gmra.mxu1 %v4543_v21  ;;  %23195 = vmatprep.subr.bf16.mxu0 %v25210_v20  ;;  %v25246_v20 = vld [vmem:[%s25933_s28 + $0x2368] sm:$0xff]  }
 0x458   : > { %v22903_v29 = vadd.f32 %v22902_v27, %v22901_v23  ;;  %23216 = vmatpush3.bf16.msra.mxu1 %v25209_v19  ;;  %18316 = vmatprep.mubr.bf16.mxu1 %v4593_v9  ;;  %v25247_v23 = vld [vmem:[%s25933_s28 + $0x2328] sm:$0xff]  }
 0x459   : > { %v22904_v31 = vpop.f32.mrf.mxu0  ;;  %v22924_v32 = vpop.f32.mrf.mxu1  ;;  %23217 = vmatprep.subr.bf16.mxu1 %v25212_v24  ;;  %v25248_v27 = vld [vmem:[%s25933_s28 + $0x23e8] sm:$0xff]  }
 0x45a   : > { %v17719_v35 = vadd.f32 %v22903_v29, %v27287_v58  ;;  %v22925_v36 = vadd.f32 %v22924_v32, %v22923_v26  ;;  %23196 = vmatpush3.bf16.msra.mxu0 %v25211_v22  ;;  %v25234_v58 = vld [vmem:[%s25933_s28 + $0x2240] sm:$0xff]   ;;  %v25249_v29 = vld [vmem:[%s25933_s28 + $0x23a8] sm:$0xff]  }
 0x45b   : > { %v22905_v37 = vpop.f32.mrf.mxu0  ;;  %23197 = vmatprep.subr.bf16.mxu0 %v25214_v28  ;;  %v22926_v39 = vpop.f32.mrf.mxu1  ;;  %v25250_v31 = vld [vmem:[%s25933_s28 + $0x2360] sm:$0xff]   ;;  %v25281_v9 = vld [vmem:[%s25933_s28 + $0x24e8] sm:$0xff]  }
 0x45c   : > { %v27324_v40 = vadd.f32 %v22925_v36, %v17719_v35  ;;  %23218 = vmatpush3.bf16.msra.mxu1 %v25213_v25  ;;  %v25251_v35 = vld [vmem:[%s25933_s28 + $0x2320] sm:$0xff]   ;;  %v25255_v39 = vld [vmem:[%s25933_s28 + $0x2318] sm:$0xff]  }
 0x45d   : > { %23219 = vmatprep.subr.bf16.mxu1 %v25216_v33  ;;  %v22927_v44 = vpop.f32.mrf.mxu1  ;;  %v25252_v36 = vld [vmem:[%s25933_s28 + $0x23e0] sm:$0xff]  }
 0x45e   : > { %23198 = vmatpush3.bf16.msra.mxu0 %v25215_v30  ;;  %v25253_v37 = vld [vmem:[%s25933_s28 + $0x23a0] sm:$0xff]   ;;  %v25259_v44 = vld [vmem:[%s25933_s28 + $0x2310] sm:$0xff]  }
 0x45f   : > { %23199 = vmatprep.subr.bf16.mxu0 %v25218_v38  ;;  %v25254_v38 = vld [vmem:[%s25933_s28 + $0x2358] sm:$0xff]  }
 0x460   : > { %23220 = vmatpush3.bf16.msra.mxu1 %v25217_v34 }
 0x461   : > { %23221 = vmatprep.subr.bf16.mxu1 %v25220_v43  ;;  %v25258_v43 = vld [vmem:[%s25933_s28 + $0x2350] sm:$0xff]  }
 0x462   : > { %23200 = vmatpush3.bf16.msra.mxu0 %v25219_v41  ;;  %v25257_v41 = vld [vmem:[%s25933_s28 + $0x2398] sm:$0xff]  }
 0x463   : > { %23201 = vmatprep.subr.bf16.mxu0 %v25222_v46  ;;  %v25261_v46 = vld [vmem:[%s25933_s28 + $0x2390] sm:$0xff]  }
 0x464   : > { %23222 = vmatpush3.bf16.msra.mxu1 %v25221_v45  ;;  %v25260_v45 = vld [vmem:[%s25933_s28 + $0x23d0] sm:$0xff]  }
 0x465   : > { %23223 = vmatprep.subr.bf16.mxu1 %v25224_v48  ;;  %v25263_v48 = vld [vmem:[%s25933_s28 + $0x2308] sm:$0xff]  }
 0x466   : > { %23202 = vmatpush3.bf16.msra.mxu0 %v25223_v47  ;;  %v25262_v47 = vld [vmem:[%s25933_s28 + $0x2348] sm:$0xff]  }
 0x467   : > { %23203 = vmatprep.subr.bf16.mxu0 %v25226_v50  ;;  %v25265_v50 = vld [vmem:[%s25933_s28 + $0x2388] sm:$0xff]  }
 0x468   : > { %23224 = vmatpush3.bf16.msra.mxu1 %v25225_v49  ;;  %v25264_v49 = vld [vmem:[%s25933_s28 + $0x23c8] sm:$0xff]  }
 0x469   : > { %23225 = vmatprep.subr.bf16.mxu1 %v25228_v51  ;;  %v25267_v51 = vld [vmem:[%s25933_s28 + $0x2300] sm:$0xff]  }
 0x46a   : > { %23204 = vmatpush3.bf16.msra.mxu0 %v25227_v52  ;;  %v25266_v52 = vld [vmem:[%s25933_s28 + $0x2340] sm:$0xff]  }
 0x46b   : > { %23205 = vmatprep.subr.bf16.mxu0 %v25230_v54  ;;  %v25270_v54 = vld [vmem:[%s25933_s28 + $0x2380] sm:$0xff]  }
 0x46c   : > { %23226 = vmatpush3.bf16.msra.mxu1 %v25229_v53  ;;  %v25268_v53 = vld [vmem:[%s25933_s28 + $0x23c0] sm:$0xff]  }
 0x46d   : > { %23227 = vmatprep.subr.bf16.mxu1 %v25232_v56  ;;  %v25271_v56 = vld [vmem:[%s25933_s28 + $0x2478] sm:$0xff]  }
 0x46e   : > { %23206 = vmatpush3.bf16.msra.mxu0 %v25231_v55  ;;  %v4576_v55 = vrot.slane %v27348_v2, %v25971_v42 }
 0x46f   : > { %23207 = vmatprep.subr.bf16.mxu0 %v25234_v58  ;;  %v25273_v58 = vld [vmem:[%s25933_s28 + $0x24f8] sm:$0xff]  }
 0x470   : > { %23228 = vmatpush3.bf16.msra.mxu1 %v25233_v57  ;;  %v25272_v57 = vld [vmem:[%s25933_s28 + $0x2438] sm:$0xff]  }
 0x471   : > { %23229 = vmatprep.subr.bf16.mxu1 %v25236_v63 }
 0x472   : > { %23208 = vmatpush3.bf16.msra.mxu0 %v25235_v61  ;;  %v4592_v61 = vcombine.high %v4576_v55, %v4576_v55 }
 0x473   : > { %23237 = vmatprep.subr.bf16.mxu0 %v25238_v4  ;;  %v25279_v4 = vld [vmem:[%s25933_s28 + $0x2468] sm:$0xff]  }
 0x474   : > { %23230 = vmatpush3.bf16.msra.mxu1 %v25237_v1  ;;  %v25278_v1 = vld [vmem:[%s25933_s28 + $0x24b0] sm:$0xff]  }
 0x475   : > { %v22945_v16 = vpop.f32.mrf.mxu0  ;;  %18277 = vmatmul.mubr.bf16.vlgmr.msra.gmra.mxu0 %v4569_v3  ;;  %23259 = vmatprep.subr.bf16.mxu1 %v25240_v8 }
 0x476   : > { %23238 = vmatpush3.bf16.msra.mxu0 %v25239_v6  ;;  %18356 = vmatprep.mubr.bf16.mxu0 %v4590_v12  ;;  %v25280_v6 = vld [vmem:[%s25933_s28 + $0x2428] sm:$0xff]  }
 0x477   : > { %v22946_v19 = vpop.f32.mrf.mxu0  ;;  %v22967_v21 = vpop.f32.mrf.mxu1  ;;  %18317 = vmatmul.mubr.bf16.vlgmr.msra.gmra.mxu1 %v4591_v11  ;;  %23239 = vmatprep.subr.bf16.mxu0 %v25242_v13  ;;  %v25282_v11 = vld [vmem:[%s25933_s28 + $0x24a8] sm:$0xff]  }
 0x478   : > { %v22947_v22 = vadd.f32 %v22946_v19, %v22945_v16  ;;  %23260 = vmatpush3.bf16.msra.mxu1 %v25241_v10  ;;  %18396 = vmatprep.mubr.bf16.mxu1 %v4594_v15 }
 0x479   : > { %v22948_v24 = vpop.f32.mrf.mxu0  ;;  %v22968_v25 = vpop.f32.mrf.mxu1  ;;  %23261 = vmatprep.subr.bf16.mxu1 %v25244_v17  ;;  %v25284_v17 = vld [vmem:[%s25933_s28 + $0x2420] sm:$0xff]  }
 0x47a   : > { %v17799_v26 = vadd.f32 %v22947_v22, %v27324_v40  ;;  %v22969_v28 = vadd.f32 %v22968_v25, %v22967_v21  ;;  %23240 = vmatpush3.bf16.msra.mxu0 %v25243_v14  ;;  %v25256_v40 = vld [vmem:[%s25933_s28 + $0x23d8] sm:$0xff]   ;;  %v25283_v14 = vld [vmem:[%s25933_s28 + $0x2460] sm:$0xff]   ;;  %v25291_v25 = vld [vmem:[%s25933_s28 + $0x2450] sm:$0xff]  }
 0x47b   : > { %v22949_v30 = vpop.f32.mrf.mxu0  ;;  %23241 = vmatprep.subr.bf16.mxu0 %v25246_v20  ;;  %v22970_v32 = vpop.f32.mrf.mxu1  ;;  %v25286_v21 = vld [vmem:[%s25933_s28 + $0x24a0] sm:$0xff]   ;;  %v25287_v20 = vld [vmem:[%s25933_s28 + $0x2458] sm:$0xff]  }
 0x47c   : > { %v27369_v33 = vadd.f32 %v22969_v28, %v17799_v26  ;;  %23262 = vmatpush3.bf16.msra.mxu1 %v25245_v18  ;;  %v25285_v18 = vld [vmem:[%s25933_s28 + $0x24e0] sm:$0xff]   ;;  %v25288_v22 = vld [vmem:[%s25933_s28 + $0x2418] sm:$0xff]   ;;  %v25293_v26 = vld [vmem:[%s25933_s28 + $0x24d0] sm:$0xff]  }
 0x47d   : > { %23263 = vmatprep.subr.bf16.mxu1 %v25248_v27  ;;  %v22971_v34 = vpop.f32.mrf.mxu1  ;;  %v25290_v24 = vld [vmem:[%s25933_s28 + $0x2498] sm:$0xff]   ;;  %v25292_v27 = vld [vmem:[%s25933_s28 + $0x2410] sm:$0xff]   ;;  %v25296_v30 = vld [vmem:[%s25933_s28 + $0x2408] sm:$0xff]  }
 0x47e   : > { %23242 = vmatpush3.bf16.msra.mxu0 %v25247_v23  ;;  %v25289_v23 = vld [vmem:[%s25933_s28 + $0x24d8] sm:$0xff]   ;;  %v25294_v28 = vld [vmem:[%s25933_s28 + $0x2490] sm:$0xff]   ;;  %v25298_v32 = vld [vmem:[%s25933_s28 + $0x2488] sm:$0xff]  }
 0x47f   : > { %23243 = vmatprep.subr.bf16.mxu0 %v25250_v31  ;;  %v25297_v31 = vld [vmem:[%s25933_s28 + $0x24c8] sm:$0xff]   ;;  %v25301_v34 = vld [vmem:[%s25933_s28 + $0x24c0] sm:$0xff]  }
 0x480   : > { %23264 = vmatpush3.bf16.msra.mxu1 %v25249_v29  ;;  %v25295_v29 = vld [vmem:[%s25933_s28 + $0x2448] sm:$0xff]  }
 0x481   : > { %23265 = vmatprep.subr.bf16.mxu1 %v25252_v36  ;;  %v254_v36 = vld [vmem:[%s25928_s25 + $0x90] sm:$0xff] }
 0x482   : > { %23244 = vmatpush3.bf16.msra.mxu0 %v25251_v35  ;;  %v25300_v35 = vld [vmem:[%s25933_s28 + $0x2400] sm:$0xff]  }
 0x483   : > { %23245 = vmatprep.subr.bf16.mxu0 %v25254_v38  ;;  %v4595_v38 = vcombine.high %v254_v36, %v254_v36 }
 0x484   : > { %23266 = vmatpush3.bf16.msra.mxu1 %v25253_v37  ;;  %v4602_v37 = vrot.slane %v254_v36, %v25971_v42 }
 0x485   : > { %23267 = vmatprep.subr.bf16.mxu1 %v25256_v40 }
 0x486   : > { %23246 = vmatpush3.bf16.msra.mxu0 %v25255_v39  ;;  %v25302_v39 = vld [vmem:[%s25933_s28 + $0x2480] sm:$0xff]   ;;  %v4610_v40 = vcombine.high %v4602_v37, %v4602_v37 }
 0x487   : > { %23247 = vmatprep.subr.bf16.mxu0 %v25258_v43  ;;  %v25303_v43 = vld [vmem:[%s25933_s28 + $0x2578] sm:$0xff]  }
 0x488   : > { %23268 = vmatpush3.bf16.msra.mxu1 %v25257_v41  ;;  %v4618_v41 = vrot.slane %v4602_v37, %v25971_v42  ;;  %v25341_v37 = vld [vmem:[%s25933_s28 + $0x2630] sm:$0xff]  }
 0x489   : > { %23269 = vmatprep.subr.bf16.mxu1 %v25260_v45  ;;  %v25304_v45 = vld [vmem:[%s25933_s28 + $0x2538] sm:$0xff]  }
 0x48a   : > { %23248 = vmatpush3.bf16.msra.mxu0 %v25259_v44  ;;  %v27432_v44 = vrot.slane %v4595_v38, %v25971_v42 }
 0x48b   : > { %23249 = vmatprep.subr.bf16.mxu0 %v25262_v47  ;;  %v25305_v47 = vld [vmem:[%s25933_s28 + $0x25f8] sm:$0xff]  }
 0x48c   : > { %23270 = vmatpush3.bf16.msra.mxu1 %v25261_v46  ;;  %v4632_v46 = vrot.slane %v4610_v40, %v25971_v42  ;;  %v25343_v40 = vld [vmem:[%s25933_s28 + $0x26b0] sm:$0xff]  }
 0x48d   : > { %23271 = vmatprep.subr.bf16.mxu1 %v25264_v49  ;;  %v25306_v49 = vld [vmem:[%s25933_s28 + $0x25b8] sm:$0xff]  }
 0x48e   : > { %23250 = vmatpush3.bf16.msra.mxu0 %v25263_v48  ;;  %v4611_v48 = vcombine.high %v27432_v44, %v27432_v44 }
 0x48f   : > { %23251 = vmatprep.subr.bf16.mxu0 %v25266_v52  ;;  %v4640_v52 = vcombine.high %v4618_v41, %v4618_v41 }
 0x490   : > { %23272 = vmatpush3.bf16.msra.mxu1 %v25265_v50  ;;  %v4642_v50 = vcombine.high %v4632_v46, %v4632_v46 }
 0x491   : > { %23273 = vmatprep.subr.bf16.mxu1 %v25268_v53  ;;  %v4639_v53 = vrot.slane %v4611_v48, %v25971_v42 }
 0x492   : > { %23252 = vmatpush3.bf16.msra.mxu0 %v25267_v51  ;;  %v25307_v51 = vld [vmem:[%s25933_s28 + $0x2570] sm:$0xff]  }
 0x493   : > { %23281 = vmatprep.subr.bf16.mxu0 %v25271_v56  ;;  %v25309_v56 = vld [vmem:[%s25933_s28 + $0x25f0] sm:$0xff]  }
 0x494   : > { %23274 = vmatpush3.bf16.msra.mxu1 %v25270_v54  ;;  %v25308_v54 = vld [vmem:[%s25933_s28 + $0x2530] sm:$0xff]  }
 0x495   : > { %v22989_v63 = vpop.f32.mrf.mxu0  ;;  %18357 = vmatmul.mubr.bf16.vlgmr.msra.gmra.mxu0 %v4576_v55  ;;  %23303 = vmatprep.subr.bf16.mxu1 %v25273_v58  ;;  %v25310_v58 = vld [vmem:[%s25933_s28 + $0x25b0] sm:$0xff]  }
 0x496   : > { %23282 = vmatpush3.bf16.msra.mxu0 %v25272_v57  ;;  %18436 = vmatprep.mubr.bf16.mxu0 %v4632_v46  ;;  %v4643_v57 = vcombine.high %v4639_v53, %v4639_v53  ;;  %v25345_v46 = vld [vmem:[%s25933_s28 + $0x2628] sm:$0xff]  }
 0x497   : > { %v22990_v2 = vpop.f32.mrf.mxu0  ;;  %v23011_v3 = vpop.f32.mrf.mxu1  ;;  %18397 = vmatmul.mubr.bf16.vlgmr.msra.gmra.mxu1 %v4592_v61  ;;  %23283 = vmatprep.subr.bf16.mxu0 %v25275_v59  ;;  %v25311_v59 = vld [vmem:[%s25933_s28 + $0x2568] sm:$0xff]  }
 0x498   : > { %v22991_v5 = vadd.f32 %v22990_v2, %v22989_v63  ;;  %23304 = vmatpush3.bf16.msra.mxu1 %v25274_v60  ;;  %18476 = vmatprep.mubr.bf16.mxu1 %v4642_v50  ;;  %v25312_v63 = vld [vmem:[%s25933_s28 + $0x2528] sm:$0xff]  }
 0x499   : > { %v22992_v7 = vpop.f32.mrf.mxu0  ;;  %v23012_v8 = vpop.f32.mrf.mxu1  ;;  %23305 = vmatprep.subr.bf16.mxu1 %v25277_v0  ;;  %v25313_v2 = vld [vmem:[%s25933_s28 + $0x25e8] sm:$0xff]  }
 0x49a   : > { %v17879_v10 = vadd.f32 %v22991_v5, %v27369_v33  ;;  %v23013_v12 = vadd.f32 %v23012_v8, %v23011_v3  ;;  %23284 = vmatpush3.bf16.msra.mxu0 %v25276_v62  ;;  %v25299_v33 = vld [vmem:[%s25933_s28 + $0x2440] sm:$0xff]   ;;  %v25314_v5 = vld [vmem:[%s25933_s28 + $0x25a8] sm:$0xff]  }
 0x49b   : > { %v22993_v13 = vpop.f32.mrf.mxu0  ;;  %23285 = vmatprep.subr.bf16.mxu0 %v25279_v4  ;;  %v23014_v15 = vpop.f32.mrf.mxu1  ;;  %v25315_v7 = vld [vmem:[%s25933_s28 + $0x2560] sm:$0xff]  }
 0x49c   : > { %v27406_v16 = vadd.f32 %v23013_v12, %v17879_v10  ;;  %23306 = vmatpush3.bf16.msra.mxu1 %v25278_v1  ;;  %v25316_v10 = vld [vmem:[%s25933_s28 + $0x2520] sm:$0xff]   ;;  %v25320_v15 = vld [vmem:[%s25933_s28 + $0x2518] sm:$0xff]  }
 0x49d   : > { %23307 = vmatprep.subr.bf16.mxu1 %v25281_v9  ;;  %v23015_v19 = vpop.f32.mrf.mxu1  ;;  %v25317_v12 = vld [vmem:[%s25933_s28 + $0x25e0] sm:$0xff]  }
 0x49e   : > { %23286 = vmatpush3.bf16.msra.mxu0 %v25280_v6  ;;  %v25318_v13 = vld [vmem:[%s25933_s28 + $0x25a0] sm:$0xff]   ;;  %v25324_v19 = vld [vmem:[%s25933_s28 + $0x2510] sm:$0xff]  }
 0x49f   : > { %23287 = vmatprep.subr.bf16.mxu0 %v25283_v14  ;;  %v25319_v14 = vld [vmem:[%s25933_s28 + $0x2558] sm:$0xff]  }
 0x4a0   : > { %23308 = vmatpush3.bf16.msra.mxu1 %v25282_v11 }
 0x4a1   : > { %23309 = vmatprep.subr.bf16.mxu1 %v25285_v18  ;;  %v25323_v18 = vld [vmem:[%s25933_s28 + $0x2550] sm:$0xff]  }
 0x4a2   : > { %23288 = vmatpush3.bf16.msra.mxu0 %v25284_v17  ;;  %v25322_v17 = vld [vmem:[%s25933_s28 + $0x2598] sm:$0xff]  }
 0x4a3   : > { %23289 = vmatprep.subr.bf16.mxu0 %v25287_v20  ;;  %v25326_v20 = vld [vmem:[%s25933_s28 + $0x2590] sm:$0xff]  }
 0x4a4   : > { %23310 = vmatpush3.bf16.msra.mxu1 %v25286_v21  ;;  %v25325_v21 = vld [vmem:[%s25933_s28 + $0x25d0] sm:$0xff]  }
 0x4a5   : > { %23311 = vmatprep.subr.bf16.mxu1 %v25289_v23  ;;  %v25328_v23 = vld [vmem:[%s25933_s28 + $0x2508] sm:$0xff]  }
 0x4a6   : > { %23290 = vmatpush3.bf16.msra.mxu0 %v25288_v22  ;;  %v25327_v22 = vld [vmem:[%s25933_s28 + $0x2548] sm:$0xff]  }
 0x4a7   : > { %23291 = vmatprep.subr.bf16.mxu0 %v25291_v25  ;;  %v25330_v25 = vld [vmem:[%s25933_s28 + $0x2588] sm:$0xff]  }
 0x4a8   : > { %23312 = vmatpush3.bf16.msra.mxu1 %v25290_v24  ;;  %v25329_v24 = vld [vmem:[%s25933_s28 + $0x25c8] sm:$0xff]  }
 0x4a9   : > { %23313 = vmatprep.subr.bf16.mxu1 %v25293_v26  ;;  %v25332_v26 = vld [vmem:[%s25933_s28 + $0x2500] sm:$0xff]  }
 0x4aa   : > { %23292 = vmatpush3.bf16.msra.mxu0 %v25292_v27  ;;  %v25331_v27 = vld [vmem:[%s25933_s28 + $0x2540] sm:$0xff]  }
 0x4ab   : > { %23293 = vmatprep.subr.bf16.mxu0 %v25295_v29  ;;  %v25335_v29 = vld [vmem:[%s25933_s28 + $0x2580] sm:$0xff]  }
 0x4ac   : > { %23314 = vmatpush3.bf16.msra.mxu1 %v25294_v28  ;;  %v25333_v28 = vld [vmem:[%s25933_s28 + $0x25c0] sm:$0xff]  }
 0x4ad   : > { %23315 = vmatprep.subr.bf16.mxu1 %v25297_v31  ;;  %v25336_v31 = vld [vmem:[%s25933_s28 + $0x2678] sm:$0xff]  }
 0x4ae   : > { %23294 = vmatpush3.bf16.msra.mxu0 %v25296_v30  ;;  %v4625_v30 = vrot.slane %v27432_v44, %v25971_v42  ;;  %v25344_v44 = vld [vmem:[%s25933_s28 + $0x2668] sm:$0xff]  }
 0x4af   : > { %23295 = vmatprep.subr.bf16.mxu0 %v25299_v33  ;;  %v25338_v33 = vld [vmem:[%s25933_s28 + $0x26f8] sm:$0xff]  }
 0x4b0   : > { %23316 = vmatpush3.bf16.msra.mxu1 %v25298_v32  ;;  %v25337_v32 = vld [vmem:[%s25933_s28 + $0x2638] sm:$0xff]   ;;  %v4641_v36 = vcombine.high %v4625_v30, %v4625_v30 }
 0x4b1   : > { %23317 = vmatprep.subr.bf16.mxu1 %v25301_v34  ;;  %v25340_v34 = vld [vmem:[%s25933_s28 + $0x2670] sm:$0xff]  }
 0x4b2   : > { %23296 = vmatpush3.bf16.msra.mxu0 %v25300_v35  ;;  %v25339_v35 = vld [vmem:[%s25933_s28 + $0x26b8] sm:$0xff]  }
 0x4b3   : > { %23325 = vmatprep.subr.bf16.mxu0 %v25303_v43 }
 0x4b4   : > { %23318 = vmatpush3.bf16.msra.mxu1 %v25302_v39  ;;  %v25342_v39 = vld [vmem:[%s25933_s28 + $0x26f0] sm:$0xff]  }
 0x4b5   : > { %v23033_v55 = vpop.f32.mrf.mxu0  ;;  %18437 = vmatmul.mubr.bf16.vlgmr.msra.gmra.mxu0 %v4618_v41  ;;  %23347 = vmatprep.subr.bf16.mxu1 %v25305_v47 }
 0x4b6   : > { %23326 = vmatpush3.bf16.msra.mxu0 %v25304_v45  ;;  %18516 = vmatprep.mubr.bf16.mxu0 %v4639_v53 }
 0x4b7   : > { %v23034_v60 = vpop.f32.mrf.mxu0  ;;  %v23055_v61 = vpop.f32.mrf.mxu1  ;;  %18477 = vmatmul.mubr.bf16.vlgmr.msra.gmra.mxu1 %v4640_v52  ;;  %23327 = vmatprep.subr.bf16.mxu0 %v25307_v51  ;;  %v25347_v51 = vld [vmem:[%s25933_s28 + $0x26a8] sm:$0xff]  }
 0x4b8   : > { %v23035_v62 = vadd.f32 %v23034_v60, %v23033_v55  ;;  %23348 = vmatpush3.bf16.msra.mxu1 %v25306_v49  ;;  %18556 = vmatprep.mubr.bf16.mxu1 %v4643_v57  ;;  %v25346_v49 = vld [vmem:[%s25933_s28 + $0x26e8] sm:$0xff]   ;;  %v25349_v57 = vld [vmem:[%s25933_s28 + $0x2620] sm:$0xff]  }
 0x4b9   : > { %v23036_v0 = vpop.f32.mrf.mxu0  ;;  %v23056_v1 = vpop.f32.mrf.mxu1  ;;  %23349 = vmatprep.subr.bf16.mxu1 %v25309_v56 }
 0x4ba   : > { %v17959_v3 = vadd.f32 %v23035_v62, %v27406_v16  ;;  %v23057_v4 = vadd.f32 %v23056_v1, %v23055_v61  ;;  %23328 = vmatpush3.bf16.msra.mxu0 %v25308_v54  ;;  %v25321_v16 = vld [vmem:[%s25933_s28 + $0x25d8] sm:$0xff]   ;;  %v25348_v54 = vld [vmem:[%s25933_s28 + $0x2660] sm:$0xff]   ;;  %v25356_v1 = vld [vmem:[%s25933_s28 + $0x2650] sm:$0xff]  }
 0x4bb   : > { %v23037_v6 = vpop.f32.mrf.mxu0  ;;  %23329 = vmatprep.subr.bf16.mxu0 %v25311_v59  ;;  %v23058_v8 = vpop.f32.mrf.mxu1  ;;  %v25351_v61 = vld [vmem:[%s25933_s28 + $0x26a0] sm:$0xff]   ;;  %v25352_v59 = vld [vmem:[%s25933_s28 + $0x2658] sm:$0xff]  }
 0x4bc   : > { %v27451_v9 = vadd.f32 %v23057_v4, %v17959_v3  ;;  %23350 = vmatpush3.bf16.msra.mxu1 %v25310_v58  ;;  %v25350_v58 = vld [vmem:[%s25933_s28 + $0x26e0] sm:$0xff]   ;;  %v25353_v62 = vld [vmem:[%s25933_s28 + $0x2618] sm:$0xff]   ;;  %v25358_v3 = vld [vmem:[%s25933_s28 + $0x26d0] sm:$0xff]  }
 0x4bd   : > { %23351 = vmatprep.subr.bf16.mxu1 %v25313_v2  ;;  %v23059_v11 = vpop.f32.mrf.mxu1  ;;  %v25355_v0 = vld [vmem:[%s25933_s28 + $0x2698] sm:$0xff]   ;;  %v25357_v2 = vld [vmem:[%s25933_s28 + $0x2610] sm:$0xff]   ;;  %v25361_v6 = vld [vmem:[%s25933_s28 + $0x2608] sm:$0xff]  }
 0x4be   : > { %23330 = vmatpush3.bf16.msra.mxu0 %v25312_v63  ;;  %v25354_v63 = vld [vmem:[%s25933_s28 + $0x26d8] sm:$0xff]   ;;  %v25359_v4 = vld [vmem:[%s25933_s28 + $0x2690] sm:$0xff]   ;;  %v25363_v8 = vld [vmem:[%s25933_s28 + $0x2688] sm:$0xff]  }
 0x4bf   : > { %23331 = vmatprep.subr.bf16.mxu0 %v25315_v7  ;;  %v25362_v7 = vld [vmem:[%s25933_s28 + $0x26c8] sm:$0xff]   ;;  %v25366_v11 = vld [vmem:[%s25933_s28 + $0x26c0] sm:$0xff]  }
 0x4c0   : > { %23352 = vmatpush3.bf16.msra.mxu1 %v25314_v5  ;;  %v25360_v5 = vld [vmem:[%s25933_s28 + $0x2648] sm:$0xff]  }
 0x4c1   : > { %23353 = vmatprep.subr.bf16.mxu1 %v25317_v12  ;;  %v255_v12 = vld [vmem:[%s25928_s25 + $0x98] sm:$0xff] }
 0x4c2   : > { %23332 = vmatpush3.bf16.msra.mxu0 %v25316_v10  ;;  %v25365_v10 = vld [vmem:[%s25933_s28 + $0x2600] sm:$0xff]  }
 0x4c3   : > { %23333 = vmatprep.subr.bf16.mxu0 %v25319_v14  ;;  %v4644_v14 = vcombine.high %v255_v12, %v255_v12 }
 0x4c4   : > { %23354 = vmatpush3.bf16.msra.mxu1 %v25318_v13  ;;  %v4651_v13 = vrot.slane %v255_v12, %v25971_v42 }
 0x4c5   : > { %23355 = vmatprep.subr.bf16.mxu1 %v25321_v16 }
 0x4c6   : > { %23334 = vmatpush3.bf16.msra.mxu0 %v25320_v15  ;;  %v25367_v15 = vld [vmem:[%s25933_s28 + $0x2680] sm:$0xff]   ;;  %v4659_v16 = vcombine.high %v4651_v13, %v4651_v13 }
 0x4c7   : > { %23335 = vmatprep.subr.bf16.mxu0 %v25323_v18  ;;  %v25368_v18 = vld [vmem:[%s25933_s28 + $0x2778] sm:$0xff]  }
 0x4c8   : > { %23356 = vmatpush3.bf16.msra.mxu1 %v25322_v17  ;;  %v4667_v17 = vrot.slane %v4651_v13, %v25971_v42  ;;  %v25406_v13 = vld [vmem:[%s25933_s28 + $0x2830] sm:$0xff]  }
 0x4c9   : > { %23357 = vmatprep.subr.bf16.mxu1 %v25325_v21  ;;  %v25369_v21 = vld [vmem:[%s25933_s28 + $0x2738] sm:$0xff]  }
 0x4ca   : > { %23336 = vmatpush3.bf16.msra.mxu0 %v25324_v19  ;;  %v27514_v19 = vrot.slane %v4644_v14, %v25971_v42 }
 0x4cb   : > { %23337 = vmatprep.subr.bf16.mxu0 %v25327_v22  ;;  %v25370_v22 = vld [vmem:[%s25933_s28 + $0x27f8] sm:$0xff]  }
 0x4cc   : > { %23358 = vmatpush3.bf16.msra.mxu1 %v25326_v20  ;;  %v4681_v20 = vrot.slane %v4659_v16, %v25971_v42  ;;  %v25408_v16 = vld [vmem:[%s25933_s28 + $0x28b0] sm:$0xff]  }
 0x4cd   : > { %23359 = vmatprep.subr.bf16.mxu1 %v25329_v24  ;;  %v25371_v24 = vld [vmem:[%s25933_s28 + $0x27b8] sm:$0xff]  }
 0x4ce   : > { %23338 = vmatpush3.bf16.msra.mxu0 %v25328_v23  ;;  %v4660_v23 = vcombine.high %v27514_v19, %v27514_v19 }
 0x4cf   : > { %23339 = vmatprep.subr.bf16.mxu0 %v25331_v27  ;;  %v4689_v27 = vcombine.high %v4667_v17, %v4667_v17 }
 0x4d0   : > { %23360 = vmatpush3.bf16.msra.mxu1 %v25330_v25  ;;  %v4691_v25 = vcombine.high %v4681_v20, %v4681_v20 }
 0x4d1   : > { %23361 = vmatprep.subr.bf16.mxu1 %v25333_v28  ;;  %v4688_v28 = vrot.slane %v4660_v23, %v25971_v42 }
 0x4d2   : > { %23340 = vmatpush3.bf16.msra.mxu0 %v25332_v26  ;;  %v25372_v26 = vld [vmem:[%s25933_s28 + $0x2770] sm:$0xff]  }
 0x4d3   : > { %23369 = vmatprep.subr.bf16.mxu0 %v25336_v31  ;;  %v25374_v31 = vld [vmem:[%s25933_s28 + $0x27f0] sm:$0xff]  }
 0x4d4   : > { %23362 = vmatpush3.bf16.msra.mxu1 %v25335_v29  ;;  %v25373_v29 = vld [vmem:[%s25933_s28 + $0x2730] sm:$0xff]  }
 0x4d5   : > { %v23077_v38 = vpop.f32.mrf.mxu0  ;;  %18517 = vmatmul.mubr.bf16.vlgmr.msra.gmra.mxu0 %v4625_v30  ;;  %23391 = vmatprep.subr.bf16.mxu1 %v25338_v33  ;;  %v25375_v33 = vld [vmem:[%s25933_s28 + $0x27b0] sm:$0xff]  }
 0x4d6   : > { %23370 = vmatpush3.bf16.msra.mxu0 %v25337_v32  ;;  %18596 = vmatprep.mubr.bf16.mxu0 %v4681_v20  ;;  %v4692_v32 = vcombine.high %v4688_v28, %v4688_v28  ;;  %v25410_v20 = vld [vmem:[%s25933_s28 + $0x2828] sm:$0xff]  }
 0x4d7   : > { %v23078_v41 = vpop.f32.mrf.mxu0  ;;  %v23099_v43 = vpop.f32.mrf.mxu1  ;;  %18557 = vmatmul.mubr.bf16.vlgmr.msra.gmra.mxu1 %v4641_v36  ;;  %23371 = vmatprep.subr.bf16.mxu0 %v25340_v34  ;;  %v25376_v34 = vld [vmem:[%s25933_s28 + $0x2768] sm:$0xff]  }
 0x4d8   : > { %v23079_v45 = vadd.f32 %v23078_v41, %v23077_v38  ;;  %23392 = vmatpush3.bf16.msra.mxu1 %v25339_v35  ;;  %18636 = vmatprep.mubr.bf16.mxu1 %v4691_v25  ;;  %v25377_v38 = vld [vmem:[%s25933_s28 + $0x2728] sm:$0xff]  }
 0x4d9   : > { %v23080_v47 = vpop.f32.mrf.mxu0  ;;  %v23100_v48 = vpop.f32.mrf.mxu1  ;;  %23393 = vmatprep.subr.bf16.mxu1 %v25342_v39  ;;  %v25378_v41 = vld [vmem:[%s25933_s28 + $0x27e8] sm:$0xff]  }
 0x4da   : > { %v18039_v50 = vadd.f32 %v23079_v45, %v27451_v9  ;;  %v23101_v52 = vadd.f32 %v23100_v48, %v23099_v43  ;;  %23372 = vmatpush3.bf16.msra.mxu0 %v25341_v37  ;;  %v25364_v9 = vld [vmem:[%s25933_s28 + $0x2640] sm:$0xff]   ;;  %v25379_v45 = vld [vmem:[%s25933_s28 + $0x27a8] sm:$0xff]  }
 0x4db   : > { %v23081_v53 = vpop.f32.mrf.mxu0  ;;  %23373 = vmatprep.subr.bf16.mxu0 %v25344_v44  ;;  %v23102_v55 = vpop.f32.mrf.mxu1  ;;  %v25380_v47 = vld [vmem:[%s25933_s28 + $0x2760] sm:$0xff]  }
 0x4dc   : > { %v27488_v56 = vadd.f32 %v23101_v52, %v18039_v50  ;;  %23394 = vmatpush3.bf16.msra.mxu1 %v25343_v40  ;;  %v25381_v50 = vld [vmem:[%s25933_s28 + $0x2720] sm:$0xff]   ;;  %v25385_v55 = vld [vmem:[%s25933_s28 + $0x2718] sm:$0xff]  }
 0x4dd   : > { %23395 = vmatprep.subr.bf16.mxu1 %v25346_v49  ;;  %v23103_v60 = vpop.f32.mrf.mxu1  ;;  %v25382_v52 = vld [vmem:[%s25933_s28 + $0x27e0] sm:$0xff]  }
 0x4de   : > { %23374 = vmatpush3.bf16.msra.mxu0 %v25345_v46  ;;  %v25383_v53 = vld [vmem:[%s25933_s28 + $0x27a0] sm:$0xff]   ;;  %v25389_v60 = vld [vmem:[%s25933_s28 + $0x2710] sm:$0xff]  }
 0x4df   : > { %23375 = vmatprep.subr.bf16.mxu0 %v25348_v54  ;;  %v25384_v54 = vld [vmem:[%s25933_s28 + $0x2758] sm:$0xff]  }
 0x4e0   : > { %23396 = vmatpush3.bf16.msra.mxu1 %v25347_v51 }
 0x4e1   : > { %23397 = vmatprep.subr.bf16.mxu1 %v25350_v58  ;;  %v25388_v58 = vld [vmem:[%s25933_s28 + $0x2750] sm:$0xff]  }
 0x4e2   : > { %23376 = vmatpush3.bf16.msra.mxu0 %v25349_v57  ;;  %v25387_v57 = vld [vmem:[%s25933_s28 + $0x2798] sm:$0xff]  }
 0x4e3   : > { %23377 = vmatprep.subr.bf16.mxu0 %v25352_v59  ;;  %v25391_v59 = vld [vmem:[%s25933_s28 + $0x2790] sm:$0xff]  }
 0x4e4   : > { %23398 = vmatpush3.bf16.msra.mxu1 %v25351_v61  ;;  %v25390_v61 = vld [vmem:[%s25933_s28 + $0x27d0] sm:$0xff]  }
 0x4e5   : > { %23399 = vmatprep.subr.bf16.mxu1 %v25354_v63  ;;  %v25393_v63 = vld [vmem:[%s25933_s28 + $0x2708] sm:$0xff]  }
 0x4e6   : > { %23378 = vmatpush3.bf16.msra.mxu0 %v25353_v62  ;;  %v25392_v62 = vld [vmem:[%s25933_s28 + $0x2748] sm:$0xff]  }
 0x4e7   : > { %23379 = vmatprep.subr.bf16.mxu0 %v25356_v1  ;;  %v25395_v1 = vld [vmem:[%s25933_s28 + $0x2788] sm:$0xff]  }
 0x4e8   : > { %23400 = vmatpush3.bf16.msra.mxu1 %v25355_v0  ;;  %v25394_v0 = vld [vmem:[%s25933_s28 + $0x27c8] sm:$0xff]  }
 0x4e9   : > { %23401 = vmatprep.subr.bf16.mxu1 %v25358_v3  ;;  %v25397_v3 = vld [vmem:[%s25933_s28 + $0x2700] sm:$0xff]  }
 0x4ea   : > { %23380 = vmatpush3.bf16.msra.mxu0 %v25357_v2  ;;  %v25396_v2 = vld [vmem:[%s25933_s28 + $0x2740] sm:$0xff]  }
 0x4eb   : > { %23381 = vmatprep.subr.bf16.mxu0 %v25360_v5  ;;  %v25400_v5 = vld [vmem:[%s25933_s28 + $0x2780] sm:$0xff]  }
 0x4ec   : > { %23402 = vmatpush3.bf16.msra.mxu1 %v25359_v4  ;;  %v25398_v4 = vld [vmem:[%s25933_s28 + $0x27c0] sm:$0xff]  }
 0x4ed   : > { %23403 = vmatprep.subr.bf16.mxu1 %v25362_v7  ;;  %v25401_v7 = vld [vmem:[%s25933_s28 + $0x2878] sm:$0xff]  }
 0x4ee   : > { %23382 = vmatpush3.bf16.msra.mxu0 %v25361_v6  ;;  %v4674_v6 = vrot.slane %v27514_v19, %v25971_v42  ;;  %v25409_v19 = vld [vmem:[%s25933_s28 + $0x2868] sm:$0xff]  }
 0x4ef   : > { %23383 = vmatprep.subr.bf16.mxu0 %v25364_v9  ;;  %v25403_v9 = vld [vmem:[%s25933_s28 + $0x28f8] sm:$0xff]  }
 0x4f0   : > { %23404 = vmatpush3.bf16.msra.mxu1 %v25363_v8  ;;  %v25402_v8 = vld [vmem:[%s25933_s28 + $0x2838] sm:$0xff]   ;;  %v4690_v12 = vcombine.high %v4674_v6, %v4674_v6 }
 0x4f1   : > { %23405 = vmatprep.subr.bf16.mxu1 %v25366_v11  ;;  %v25405_v11 = vld [vmem:[%s25933_s28 + $0x2870] sm:$0xff]  }
 0x4f2   : > { %23384 = vmatpush3.bf16.msra.mxu0 %v25365_v10  ;;  %v25404_v10 = vld [vmem:[%s25933_s28 + $0x28b8] sm:$0xff]  }
 0x4f3   : > { %23413 = vmatprep.subr.bf16.mxu0 %v25368_v18 }
 0x4f4   : > { %23406 = vmatpush3.bf16.msra.mxu1 %v25367_v15  ;;  %v25407_v15 = vld [vmem:[%s25933_s28 + $0x28f0] sm:$0xff]  }
 0x4f5   : > { %v23121_v30 = vpop.f32.mrf.mxu0  ;;  %18597 = vmatmul.mubr.bf16.vlgmr.msra.gmra.mxu0 %v4667_v17  ;;  %23435 = vmatprep.subr.bf16.mxu1 %v25370_v22 }
 0x4f6   : > { %23414 = vmatpush3.bf16.msra.mxu0 %v25369_v21  ;;  %18676 = vmatprep.mubr.bf16.mxu0 %v4688_v28 }
 0x4f7   : > { %v23122_v35 = vpop.f32.mrf.mxu0  ;;  %v23143_v36 = vpop.f32.mrf.mxu1  ;;  %18637 = vmatmul.mubr.bf16.vlgmr.msra.gmra.mxu1 %v4689_v27  ;;  %23415 = vmatprep.subr.bf16.mxu0 %v25372_v26  ;;  %v25412_v26 = vld [vmem:[%s25933_s28 + $0x28a8] sm:$0xff]  }
 0x4f8   : > { %v23123_v37 = vadd.f32 %v23122_v35, %v23121_v30  ;;  %23436 = vmatpush3.bf16.msra.mxu1 %v25371_v24  ;;  %18716 = vmatprep.mubr.bf16.mxu1 %v4692_v32  ;;  %v25411_v24 = vld [vmem:[%s25933_s28 + $0x28e8] sm:$0xff]   ;;  %v25414_v32 = vld [vmem:[%s25933_s28 + $0x2820] sm:$0xff]  }
 0x4f9   : > { %v23124_v39 = vpop.f32.mrf.mxu0  ;;  %v23144_v40 = vpop.f32.mrf.mxu1  ;;  %23437 = vmatprep.subr.bf16.mxu1 %v25374_v31 }
 0x4fa   : > { %v18119_v43 = vadd.f32 %v23123_v37, %v27488_v56  ;;  %v23145_v44 = vadd.f32 %v23144_v40, %v23143_v36  ;;  %23416 = vmatpush3.bf16.msra.mxu0 %v25373_v29  ;;  %v25386_v56 = vld [vmem:[%s25933_s28 + $0x27d8] sm:$0xff]   ;;  %v25413_v29 = vld [vmem:[%s25933_s28 + $0x2860] sm:$0xff]   ;;  %v25421_v40 = vld [vmem:[%s25933_s28 + $0x2850] sm:$0xff]  }
 0x4fb   : > { %v23125_v46 = vpop.f32.mrf.mxu0  ;;  %23417 = vmatprep.subr.bf16.mxu0 %v25376_v34  ;;  %v23146_v48 = vpop.f32.mrf.mxu1  ;;  %v25416_v36 = vld [vmem:[%s25933_s28 + $0x28a0] sm:$0xff]   ;;  %v25417_v34 = vld [vmem:[%s25933_s28 + $0x2858] sm:$0xff]  }
 0x4fc   : > { %v27533_v49 = vadd.f32 %v23145_v44, %v18119_v43  ;;  %23438 = vmatpush3.bf16.msra.mxu1 %v25375_v33  ;;  %v25415_v33 = vld [vmem:[%s25933_s28 + $0x28e0] sm:$0xff]   ;;  %v25418_v37 = vld [vmem:[%s25933_s28 + $0x2818] sm:$0xff]   ;;  %v25423_v43 = vld [vmem:[%s25933_s28 + $0x28d0] sm:$0xff]  }
 0x4fd   : > { %23439 = vmatprep.subr.bf16.mxu1 %v25378_v41  ;;  %v23147_v51 = vpop.f32.mrf.mxu1  ;;  %v25420_v39 = vld [vmem:[%s25933_s28 + $0x2898] sm:$0xff]   ;;  %v25422_v41 = vld [vmem:[%s25933_s28 + $0x2810] sm:$0xff]   ;;  %v25426_v46 = vld [vmem:[%s25933_s28 + $0x2808] sm:$0xff]  }
 0x4fe   : > { %23418 = vmatpush3.bf16.msra.mxu0 %v25377_v38  ;;  %v25419_v38 = vld [vmem:[%s25933_s28 + $0x28d8] sm:$0xff]   ;;  %v25424_v44 = vld [vmem:[%s25933_s28 + $0x2890] sm:$0xff]   ;;  %v25428_v48 = vld [vmem:[%s25933_s28 + $0x2888] sm:$0xff]  }
 0x4ff   : > { %23419 = vmatprep.subr.bf16.mxu0 %v25380_v47  ;;  %v25427_v47 = vld [vmem:[%s25933_s28 + $0x28c8] sm:$0xff]   ;;  %v25431_v51 = vld [vmem:[%s25933_s28 + $0x28c0] sm:$0xff]  }
 0x500   : > { %23440 = vmatpush3.bf16.msra.mxu1 %v25379_v45  ;;  %v25425_v45 = vld [vmem:[%s25933_s28 + $0x2848] sm:$0xff]  }
 0x501   : > { %23441 = vmatprep.subr.bf16.mxu1 %v25382_v52  ;;  %v256_v52 = vld [vmem:[%s25928_s25 + $0xa0] sm:$0xff] }
 0x502   : > { %23420 = vmatpush3.bf16.msra.mxu0 %v25381_v50  ;;  %v25430_v50 = vld [vmem:[%s25933_s28 + $0x2800] sm:$0xff]  }
 0x503   : > { %23421 = vmatprep.subr.bf16.mxu0 %v25384_v54  ;;  %v4693_v54 = vcombine.high %v256_v52, %v256_v52 }
 0x504   : > { %23442 = vmatpush3.bf16.msra.mxu1 %v25383_v53  ;;  %v4700_v53 = vrot.slane %v256_v52, %v25971_v42 }
 0x505   : > { %23443 = vmatprep.subr.bf16.mxu1 %v25386_v56 }
 0x506   : > { %23422 = vmatpush3.bf16.msra.mxu0 %v25385_v55  ;;  %v25432_v55 = vld [vmem:[%s25933_s28 + $0x2880] sm:$0xff]   ;;  %v4708_v56 = vcombine.high %v4700_v53, %v4700_v53 }
 0x507   : > { %23423 = vmatprep.subr.bf16.mxu0 %v25388_v58  ;;  %v25433_v58 = vld [vmem:[%s25933_s28 + $0x2978] sm:$0xff]  }
 0x508   : > { %23444 = vmatpush3.bf16.msra.mxu1 %v25387_v57  ;;  %v4716_v57 = vrot.slane %v4700_v53, %v25971_v42  ;;  %v25471_v53 = vld [vmem:[%s25933_s28 + $0x2a30] sm:$0xff]  }
 0x509   : > { %23445 = vmatprep.subr.bf16.mxu1 %v25390_v61  ;;  %v25434_v61 = vld [vmem:[%s25933_s28 + $0x2938] sm:$0xff]  }
 0x50a   : > { %23424 = vmatpush3.bf16.msra.mxu0 %v25389_v60  ;;  %v27596_v60 = vrot.slane %v4693_v54, %v25971_v42 }
 0x50b   : > { %23425 = vmatprep.subr.bf16.mxu0 %v25392_v62  ;;  %v25435_v62 = vld [vmem:[%s25933_s28 + $0x29f8] sm:$0xff]  }
 0x50c   : > { %23446 = vmatpush3.bf16.msra.mxu1 %v25391_v59  ;;  %v4730_v59 = vrot.slane %v4708_v56, %v25971_v42  ;;  %v25473_v56 = vld [vmem:[%s25933_s28 + $0x2ab0] sm:$0xff]  }
 0x50d   : > { %23447 = vmatprep.subr.bf16.mxu1 %v25394_v0  ;;  %v25436_v0 = vld [vmem:[%s25933_s28 + $0x29b8] sm:$0xff]  }
 0x50e   : > { %23426 = vmatpush3.bf16.msra.mxu0 %v25393_v63  ;;  %v4709_v63 = vcombine.high %v27596_v60, %v27596_v60 }
 0x50f   : > { %23427 = vmatprep.subr.bf16.mxu0 %v25396_v2  ;;  %v4738_v2 = vcombine.high %v4716_v57, %v4716_v57 }
 0x510   : > { %23448 = vmatpush3.bf16.msra.mxu1 %v25395_v1  ;;  %v4740_v1 = vcombine.high %v4730_v59, %v4730_v59 }
 0x511   : > { %23449 = vmatprep.subr.bf16.mxu1 %v25398_v4  ;;  %v4737_v4 = vrot.slane %v4709_v63, %v25971_v42 }
 0x512   : > { %23428 = vmatpush3.bf16.msra.mxu0 %v25397_v3  ;;  %v25437_v3 = vld [vmem:[%s25933_s28 + $0x2970] sm:$0xff]  }
 0x513   : > { %23457 = vmatprep.subr.bf16.mxu0 %v25401_v7  ;;  %v25439_v7 = vld [vmem:[%s25933_s28 + $0x29f0] sm:$0xff]  }
 0x514   : > { %23450 = vmatpush3.bf16.msra.mxu1 %v25400_v5  ;;  %v25438_v5 = vld [vmem:[%s25933_s28 + $0x2930] sm:$0xff]  }
 0x515   : > { %v23165_v14 = vpop.f32.mrf.mxu0  ;;  %18677 = vmatmul.mubr.bf16.vlgmr.msra.gmra.mxu0 %v4674_v6  ;;  %23479 = vmatprep.subr.bf16.mxu1 %v25403_v9  ;;  %v25440_v9 = vld [vmem:[%s25933_s28 + $0x29b0] sm:$0xff]  }
 0x516   : > { %23458 = vmatpush3.bf16.msra.mxu0 %v25402_v8  ;;  %18756 = vmatprep.mubr.bf16.mxu0 %v4730_v59  ;;  %v4741_v8 = vcombine.high %v4737_v4, %v4737_v4  ;;  %v25475_v59 = vld [vmem:[%s25933_s28 + $0x2a28] sm:$0xff]  }
 0x517   : > { %v23166_v17 = vpop.f32.mrf.mxu0  ;;  %v23187_v18 = vpop.f32.mrf.mxu1  ;;  %18717 = vmatmul.mubr.bf16.vlgmr.msra.gmra.mxu1 %v4690_v12  ;;  %23459 = vmatprep.subr.bf16.mxu0 %v25405_v11  ;;  %v25441_v11 = vld [vmem:[%s25933_s28 + $0x2968] sm:$0xff]  }
 0x518   : > { %v23167_v21 = vadd.f32 %v23166_v17, %v23165_v14  ;;  %23480 = vmatpush3.bf16.msra.mxu1 %v25404_v10  ;;  %18796 = vmatprep.mubr.bf16.mxu1 %v4740_v1  ;;  %v25442_v14 = vld [vmem:[%s25933_s28 + $0x2928] sm:$0xff]  }
 0x519   : > { %v23168_v22 = vpop.f32.mrf.mxu0  ;;  %v23188_v23 = vpop.f32.mrf.mxu1  ;;  %23481 = vmatprep.subr.bf16.mxu1 %v25407_v15  ;;  %v25443_v17 = vld [vmem:[%s25933_s28 + $0x29e8] sm:$0xff]  }
 0x51a   : > { %v18199_v25 = vadd.f32 %v23167_v21, %v27533_v49  ;;  %v23189_v27 = vadd.f32 %v23188_v23, %v23187_v18  ;;  %23460 = vmatpush3.bf16.msra.mxu0 %v25406_v13  ;;  %v25429_v49 = vld [vmem:[%s25933_s28 + $0x2840] sm:$0xff]   ;;  %v25444_v21 = vld [vmem:[%s25933_s28 + $0x29a8] sm:$0xff]  }
 0x51b   : > { %v23169_v28 = vpop.f32.mrf.mxu0  ;;  %23461 = vmatprep.subr.bf16.mxu0 %v25409_v19  ;;  %v23190_v30 = vpop.f32.mrf.mxu1  ;;  %v25445_v22 = vld [vmem:[%s25933_s28 + $0x2960] sm:$0xff]  }
 0x51c   : > { %v27570_v31 = vadd.f32 %v23189_v27, %v18199_v25  ;;  %23482 = vmatpush3.bf16.msra.mxu1 %v25408_v16  ;;  %v25446_v25 = vld [vmem:[%s25933_s28 + $0x2920] sm:$0xff]   ;;  %v25450_v30 = vld [vmem:[%s25933_s28 + $0x2918] sm:$0xff]  }
 0x51d   : > { %23483 = vmatprep.subr.bf16.mxu1 %v25411_v24  ;;  %v23191_v35 = vpop.f32.mrf.mxu1  ;;  %v25447_v27 = vld [vmem:[%s25933_s28 + $0x29e0] sm:$0xff]  }
 0x51e   : > { %23462 = vmatpush3.bf16.msra.mxu0 %v25410_v20  ;;  %v25448_v28 = vld [vmem:[%s25933_s28 + $0x29a0] sm:$0xff]   ;;  %v25454_v35 = vld [vmem:[%s25933_s28 + $0x2910] sm:$0xff]  }
 0x51f   : > { %23463 = vmatprep.subr.bf16.mxu0 %v25413_v29  ;;  %v25449_v29 = vld [vmem:[%s25933_s28 + $0x2958] sm:$0xff]  }
 0x520   : > { %23484 = vmatpush3.bf16.msra.mxu1 %v25412_v26 }
 0x521   : > { %23485 = vmatprep.subr.bf16.mxu1 %v25415_v33  ;;  %v25453_v33 = vld [vmem:[%s25933_s28 + $0x2950] sm:$0xff]  }
 0x522   : > { %23464 = vmatpush3.bf16.msra.mxu0 %v25414_v32  ;;  %v25452_v32 = vld [vmem:[%s25933_s28 + $0x2998] sm:$0xff]  }
 0x523   : > { %23465 = vmatprep.subr.bf16.mxu0 %v25417_v34  ;;  %v25456_v34 = vld [vmem:[%s25933_s28 + $0x2990] sm:$0xff]  }
 0x524   : > { %23486 = vmatpush3.bf16.msra.mxu1 %v25416_v36  ;;  %v25455_v36 = vld [vmem:[%s25933_s28 + $0x29d0] sm:$0xff]  }
 0x525   : > { %23487 = vmatprep.subr.bf16.mxu1 %v25419_v38  ;;  %v25458_v38 = vld [vmem:[%s25933_s28 + $0x2908] sm:$0xff]  }
 0x526   : > { %23466 = vmatpush3.bf16.msra.mxu0 %v25418_v37  ;;  %v25457_v37 = vld [vmem:[%s25933_s28 + $0x2948] sm:$0xff]  }
 0x527   : > { %23467 = vmatprep.subr.bf16.mxu0 %v25421_v40  ;;  %v25460_v40 = vld [vmem:[%s25933_s28 + $0x2988] sm:$0xff]  }
 0x528   : > { %23488 = vmatpush3.bf16.msra.mxu1 %v25420_v39  ;;  %v25459_v39 = vld [vmem:[%s25933_s28 + $0x29c8] sm:$0xff]  }
 0x529   : > { %23489 = vmatprep.subr.bf16.mxu1 %v25423_v43  ;;  %v25462_v43 = vld [vmem:[%s25933_s28 + $0x2900] sm:$0xff]  }
 0x52a   : > { %23468 = vmatpush3.bf16.msra.mxu0 %v25422_v41  ;;  %v25461_v41 = vld [vmem:[%s25933_s28 + $0x2940] sm:$0xff]  }
 0x52b   : > { %23469 = vmatprep.subr.bf16.mxu0 %v25425_v45  ;;  %v25465_v45 = vld [vmem:[%s25933_s28 + $0x2980] sm:$0xff]  }
 0x52c   : > { %23490 = vmatpush3.bf16.msra.mxu1 %v25424_v44  ;;  %v25463_v44 = vld [vmem:[%s25933_s28 + $0x29c0] sm:$0xff]  }
 0x52d   : > { %23491 = vmatprep.subr.bf16.mxu1 %v25427_v47  ;;  %v25466_v47 = vld [vmem:[%s25933_s28 + $0x2a78] sm:$0xff]  }
 0x52e   : > { %23470 = vmatpush3.bf16.msra.mxu0 %v25426_v46  ;;  %v4723_v46 = vrot.slane %v27596_v60, %v25971_v42  ;;  %v25474_v60 = vld [vmem:[%s25933_s28 + $0x2a68] sm:$0xff]  }
 0x52f   : > { %23471 = vmatprep.subr.bf16.mxu0 %v25429_v49  ;;  %v25468_v49 = vld [vmem:[%s25933_s28 + $0x2af8] sm:$0xff]  }
 0x530   : > { %23492 = vmatpush3.bf16.msra.mxu1 %v25428_v48  ;;  %v25467_v48 = vld [vmem:[%s25933_s28 + $0x2a38] sm:$0xff]   ;;  %v4739_v52 = vcombine.high %v4723_v46, %v4723_v46 }
 0x531   : > { %23493 = vmatprep.subr.bf16.mxu1 %v25431_v51  ;;  %v25470_v51 = vld [vmem:[%s25933_s28 + $0x2a70] sm:$0xff]  }
 0x532   : > { %23472 = vmatpush3.bf16.msra.mxu0 %v25430_v50  ;;  %v25469_v50 = vld [vmem:[%s25933_s28 + $0x2ab8] sm:$0xff]  }
 0x533   : > { %23501 = vmatprep.subr.bf16.mxu0 %v25433_v58 }
 0x534   : > { %23494 = vmatpush3.bf16.msra.mxu1 %v25432_v55  ;;  %v25472_v55 = vld [vmem:[%s25933_s28 + $0x2af0] sm:$0xff]  }
 0x535   : > { %v23209_v6 = vpop.f32.mrf.mxu0  ;;  %18757 = vmatmul.mubr.bf16.vlgmr.msra.gmra.mxu0 %v4716_v57  ;;  %23523 = vmatprep.subr.bf16.mxu1 %v25435_v62 }
 0x536   : > { %23502 = vmatpush3.bf16.msra.mxu0 %v25434_v61  ;;  %18836 = vmatprep.mubr.bf16.mxu0 %v4737_v4 }
 0x537   : > { %v23210_v10 = vpop.f32.mrf.mxu0  ;;  %v23231_v12 = vpop.f32.mrf.mxu1  ;;  %18797 = vmatmul.mubr.bf16.vlgmr.msra.gmra.mxu1 %v4738_v2  ;;  %23503 = vmatprep.subr.bf16.mxu0 %v25437_v3  ;;  %v25477_v3 = vld [vmem:[%s25933_s28 + $0x2aa8] sm:$0xff]  }
 0x538   : > { %v23211_v13 = vadd.f32 %v23210_v10, %v23209_v6  ;;  %23524 = vmatpush3.bf16.msra.mxu1 %v25436_v0  ;;  %18876 = vmatprep.mubr.bf16.mxu1 %v4741_v8  ;;  %v25476_v0 = vld [vmem:[%s25933_s28 + $0x2ae8] sm:$0xff]   ;;  %v25479_v8 = vld [vmem:[%s25933_s28 + $0x2a20] sm:$0xff]  }
 0x539   : > { %v23212_v15 = vpop.f32.mrf.mxu0  ;;  %v23232_v16 = vpop.f32.mrf.mxu1  ;;  %23525 = vmatprep.subr.bf16.mxu1 %v25439_v7 }
 0x53a   : > { %v18279_v18 = vadd.f32 %v23211_v13, %v27570_v31  ;;  %v23233_v19 = vadd.f32 %v23232_v16, %v23231_v12  ;;  %23504 = vmatpush3.bf16.msra.mxu0 %v25438_v5  ;;  %v25451_v31 = vld [vmem:[%s25933_s28 + $0x29d8] sm:$0xff]   ;;  %v25478_v5 = vld [vmem:[%s25933_s28 + $0x2a60] sm:$0xff]   ;;  %v25486_v16 = vld [vmem:[%s25933_s28 + $0x2a50] sm:$0xff]  }
 0x53b   : > { %v23213_v20 = vpop.f32.mrf.mxu0  ;;  %23505 = vmatprep.subr.bf16.mxu0 %v25441_v11  ;;  %v23234_v23 = vpop.f32.mrf.mxu1  ;;  %v25481_v12 = vld [vmem:[%s25933_s28 + $0x2aa0] sm:$0xff]   ;;  %v25482_v11 = vld [vmem:[%s25933_s28 + $0x2a58] sm:$0xff]  }
 0x53c   : > { %v27615_v24 = vadd.f32 %v23233_v19, %v18279_v18  ;;  %23526 = vmatpush3.bf16.msra.mxu1 %v25440_v9  ;;  %v25480_v9 = vld [vmem:[%s25933_s28 + $0x2ae0] sm:$0xff]   ;;  %v25483_v13 = vld [vmem:[%s25933_s28 + $0x2a18] sm:$0xff]   ;;  %v25488_v18 = vld [vmem:[%s25933_s28 + $0x2ad0] sm:$0xff]  }
 0x53d   : > { %23527 = vmatprep.subr.bf16.mxu1 %v25443_v17  ;;  %v23235_v26 = vpop.f32.mrf.mxu1  ;;  %v25485_v15 = vld [vmem:[%s25933_s28 + $0x2a98] sm:$0xff]   ;;  %v25487_v17 = vld [vmem:[%s25933_s28 + $0x2a10] sm:$0xff]   ;;  %v25491_v20 = vld [vmem:[%s25933_s28 + $0x2a08] sm:$0xff]  }
 0x53e   : > { %23506 = vmatpush3.bf16.msra.mxu0 %v25442_v14  ;;  %v25484_v14 = vld [vmem:[%s25933_s28 + $0x2ad8] sm:$0xff]   ;;  %v25489_v19 = vld [vmem:[%s25933_s28 + $0x2a90] sm:$0xff]   ;;  %v25493_v23 = vld [vmem:[%s25933_s28 + $0x2a88] sm:$0xff]  }
 0x53f   : > { %23507 = vmatprep.subr.bf16.mxu0 %v25445_v22  ;;  %v25492_v22 = vld [vmem:[%s25933_s28 + $0x2ac8] sm:$0xff]  }
 0x540   : > { %23528 = vmatpush3.bf16.msra.mxu1 %v25444_v21  ;;  %v25490_v21 = vld [vmem:[%s25933_s28 + $0x2a48] sm:$0xff]  }
 0x541   : > { %23529 = vmatprep.subr.bf16.mxu1 %v25447_v27  ;;  %v25496_v27 = vld [vmem:[%s25933_s28 + $0x2ac0] sm:$0xff]   ;;  %v257_v26 = vld [vmem:[%s25928_s25 + $0xa8] sm:$0xff] }
 0x542   : > { %23508 = vmatpush3.bf16.msra.mxu0 %v25446_v25  ;;  %v25495_v25 = vld [vmem:[%s25933_s28 + $0x2a00] sm:$0xff]  }
 0x543   : > { %23509 = vmatprep.subr.bf16.mxu0 %v25449_v29  ;;  %v25497_v29 = vld [vmem:[%s25933_s28 + $0x2a80] sm:$0xff]  }
 0x544   : > { %23530 = vmatpush3.bf16.msra.mxu1 %v25448_v28  ;;  %v4749_v28 = vrot.slane %v257_v26, %v25971_v42 }
 0x545   : > { %23531 = vmatprep.subr.bf16.mxu1 %v25451_v31  ;;  %v25498_v31 = vld [vmem:[%s25933_s28 + $0x2b78] sm:$0xff]  }
 0x546   : > { %23510 = vmatpush3.bf16.msra.mxu0 %v25450_v30  ;;  %v4742_v30 = vcombine.high %v257_v26, %v257_v26  ;;  %v25535_v26 = vld [vmem:[%s25933_s28 + $0x2c70] sm:$0xff]  }
 0x547   : > { %23511 = vmatprep.subr.bf16.mxu0 %v25453_v33  ;;  %v4765_v33 = vrot.slane %v4749_v28, %v25971_v42 }
 0x548   : > { %23532 = vmatpush3.bf16.msra.mxu1 %v25452_v32  ;;  %v4757_v32 = vcombine.high %v4749_v28, %v4749_v28  ;;  %v25536_v28 = vld [vmem:[%s25933_s28 + $0x2c30] sm:$0xff]  }
 0x549   : > { %23533 = vmatprep.subr.bf16.mxu1 %v25455_v36  ;;  %v27679_v36 = vrot.slane %v4742_v30, %v25971_v42  ;;  %v25537_v30 = vld [vmem:[%s25933_s28 + $0x2cf0] sm:$0xff]  }
 0x54a   : > { %23512 = vmatpush3.bf16.msra.mxu0 %v25454_v35  ;;  %v25499_v35 = vld [vmem:[%s25933_s28 + $0x2b38] sm:$0xff]  }
 0x54b   : > { %23513 = vmatprep.subr.bf16.mxu0 %v25457_v37  ;;  %v4779_v37 = vrot.slane %v4757_v32, %v25971_v42 }
 0x54c   : > { %23534 = vmatpush3.bf16.msra.mxu1 %v25456_v34  ;;  %v25500_v34 = vld [vmem:[%s25933_s28 + $0x2bf8] sm:$0xff]  }
 0x54d   : > { %23535 = vmatprep.subr.bf16.mxu1 %v25459_v39  ;;  %v4758_v39 = vcombine.high %v27679_v36, %v27679_v36 }
 0x54e   : > { %23514 = vmatpush3.bf16.msra.mxu0 %v25458_v38  ;;  %v25501_v38 = vld [vmem:[%s25933_s28 + $0x2bb8] sm:$0xff]  }
 0x54f   : > { %23515 = vmatprep.subr.bf16.mxu0 %v25461_v41  ;;  %v25502_v41 = vld [vmem:[%s25933_s28 + $0x2b70] sm:$0xff]  }
 0x550   : > { %23536 = vmatpush3.bf16.msra.mxu1 %v25460_v40  ;;  %v4787_v40 = vcombine.high %v4765_v33, %v4765_v33 }
 0x551   : > { %23537 = vmatprep.subr.bf16.mxu1 %v25463_v44  ;;  %v25503_v44 = vld [vmem:[%s25933_s28 + $0x2b30] sm:$0xff]  }
 0x552   : > { %23516 = vmatpush3.bf16.msra.mxu0 %v25462_v43  ;;  %v4789_v43 = vcombine.high %v4779_v37, %v4779_v37 }
 0x553   : > { %23545 = vmatprep.subr.bf16.mxu0 %v25466_v47  ;;  %v25504_v47 = vld [vmem:[%s25933_s28 + $0x2bf0] sm:$0xff]  }
 0x554   : > { %23538 = vmatpush3.bf16.msra.mxu1 %v25465_v45  ;;  %v4786_v45 = vrot.slane %v4758_v39, %v25971_v42  ;;  %v25541_v39 = vld [vmem:[%s25933_s28 + $0x2ce8] sm:$0xff]  }
 0x555   : > { %v23253_v54 = vpop.f32.mrf.mxu0  ;;  %18837 = vmatmul.mubr.bf16.vlgmr.msra.gmra.mxu0 %v4723_v46  ;;  %23567 = vmatprep.subr.bf16.mxu1 %v25468_v49 }
 0x556   : > { %23546 = vmatpush3.bf16.msra.mxu0 %v25467_v48  ;;  %18916 = vmatprep.mubr.bf16.mxu0 %v4779_v37  ;;  %v25505_v48 = vld [vmem:[%s25933_s28 + $0x2bb0] sm:$0xff]   ;;  %v4790_v49 = vcombine.high %v4786_v45, %v4786_v45 }
 0x557   : > { %v23254_v57 = vpop.f32.mrf.mxu0  ;;  %v23275_v58 = vpop.f32.mrf.mxu1  ;;  %18877 = vmatmul.mubr.bf16.vlgmr.msra.gmra.mxu1 %v4739_v52  ;;  %23547 = vmatprep.subr.bf16.mxu0 %v25470_v51  ;;  %v25506_v51 = vld [vmem:[%s25933_s28 + $0x2b68] sm:$0xff]  }
 0x558   : > { %v23255_v61 = vadd.f32 %v23254_v57, %v23253_v54  ;;  %23568 = vmatpush3.bf16.msra.mxu1 %v25469_v50  ;;  %18956 = vmatprep.mubr.bf16.mxu1 %v4789_v43  ;;  %v25507_v54 = vld [vmem:[%s25933_s28 + $0x2b28] sm:$0xff]  }
 0x559   : > { %v23256_v62 = vpop.f32.mrf.mxu0  ;;  %v23276_v63 = vpop.f32.mrf.mxu1  ;;  %23569 = vmatprep.subr.bf16.mxu1 %v25472_v55  ;;  %v25508_v57 = vld [vmem:[%s25933_s28 + $0x2be8] sm:$0xff]  }
 0x55a   : > { %v18359_v1 = vadd.f32 %v23255_v61, %v27615_v24  ;;  %v23277_v2 = vadd.f32 %v23276_v63, %v23275_v58  ;;  %23548 = vmatpush3.bf16.msra.mxu0 %v25471_v53  ;;  %v25494_v24 = vld [vmem:[%s25933_s28 + $0x2a40] sm:$0xff]   ;;  %v25509_v61 = vld [vmem:[%s25933_s28 + $0x2ba8] sm:$0xff]  }
 0x55b   : > { %v23257_v4 = vpop.f32.mrf.mxu0  ;;  %23549 = vmatprep.subr.bf16.mxu0 %v25474_v60  ;;  %v23278_v6 = vpop.f32.mrf.mxu1  ;;  %v25510_v62 = vld [vmem:[%s25933_s28 + $0x2b60] sm:$0xff]   ;;  %v25542_v43 = vld [vmem:[%s25933_s28 + $0x2ca8] sm:$0xff]  }
 0x55c   : > { %v27652_v7 = vadd.f32 %v23277_v2, %v18359_v1  ;;  %23570 = vmatpush3.bf16.msra.mxu1 %v25473_v56  ;;  %v25511_v1 = vld [vmem:[%s25933_s28 + $0x2b20] sm:$0xff]   ;;  %v25515_v6 = vld [vmem:[%s25933_s28 + $0x2b18] sm:$0xff]  }
 0x55d   : > { %23571 = vmatprep.subr.bf16.mxu1 %v25476_v0  ;;  %v23279_v10 = vpop.f32.mrf.mxu1  ;;  %v25512_v2 = vld [vmem:[%s25933_s28 + $0x2be0] sm:$0xff]  }
 0x55e   : > { %23550 = vmatpush3.bf16.msra.mxu0 %v25475_v59  ;;  %v25513_v4 = vld [vmem:[%s25933_s28 + $0x2ba0] sm:$0xff]   ;;  %v25519_v10 = vld [vmem:[%s25933_s28 + $0x2b10] sm:$0xff]  }
 0x55f   : > { %23551 = vmatprep.subr.bf16.mxu0 %v25478_v5  ;;  %v25514_v5 = vld [vmem:[%s25933_s28 + $0x2b58] sm:$0xff]  }
 0x560   : > { %23572 = vmatpush3.bf16.msra.mxu1 %v25477_v3 }
 0x561   : > { %23573 = vmatprep.subr.bf16.mxu1 %v25480_v9  ;;  %v25518_v9 = vld [vmem:[%s25933_s28 + $0x2b50] sm:$0xff]  }
 0x562   : > { %23552 = vmatpush3.bf16.msra.mxu0 %v25479_v8  ;;  %v25517_v8 = vld [vmem:[%s25933_s28 + $0x2b98] sm:$0xff]  }
 0x563   : > { %23553 = vmatprep.subr.bf16.mxu0 %v25482_v11  ;;  %v25521_v11 = vld [vmem:[%s25933_s28 + $0x2b90] sm:$0xff]  }
 0x564   : > { %23574 = vmatpush3.bf16.msra.mxu1 %v25481_v12  ;;  %v25520_v12 = vld [vmem:[%s25933_s28 + $0x2bd0] sm:$0xff]  }
 0x565   : > { %23575 = vmatprep.subr.bf16.mxu1 %v25484_v14  ;;  %v25523_v14 = vld [vmem:[%s25933_s28 + $0x2b08] sm:$0xff]  }
 0x566   : > { %23554 = vmatpush3.bf16.msra.mxu0 %v25483_v13  ;;  %v25522_v13 = vld [vmem:[%s25933_s28 + $0x2b48] sm:$0xff]  }
 0x567   : > { %23555 = vmatprep.subr.bf16.mxu0 %v25486_v16  ;;  %v25525_v16 = vld [vmem:[%s25933_s28 + $0x2b88] sm:$0xff]  }
 0x568   : > { %23576 = vmatpush3.bf16.msra.mxu1 %v25485_v15  ;;  %v25524_v15 = vld [vmem:[%s25933_s28 + $0x2bc8] sm:$0xff]  }
 0x569   : > { %23577 = vmatprep.subr.bf16.mxu1 %v25488_v18  ;;  %v25527_v18 = vld [vmem:[%s25933_s28 + $0x2b00] sm:$0xff]  }
 0x56a   : > { %23556 = vmatpush3.bf16.msra.mxu0 %v25487_v17  ;;  %v25526_v17 = vld [vmem:[%s25933_s28 + $0x2b40] sm:$0xff]  }
 0x56b   : > { %23557 = vmatprep.subr.bf16.mxu0 %v25490_v21  ;;  %v25530_v21 = vld [vmem:[%s25933_s28 + $0x2b80] sm:$0xff]  }
 0x56c   : > { %23578 = vmatpush3.bf16.msra.mxu1 %v25489_v19  ;;  %v25528_v19 = vld [vmem:[%s25933_s28 + $0x2bc0] sm:$0xff]  }
 0x56d   : > { %23579 = vmatprep.subr.bf16.mxu1 %v25492_v22  ;;  %v25531_v22 = vld [vmem:[%s25933_s28 + $0x2c78] sm:$0xff]  }
 0x56e   : > { %23558 = vmatpush3.bf16.msra.mxu0 %v25491_v20  ;;  %v4772_v20 = vrot.slane %v27679_v36, %v25971_v42 }
 0x56f   : > { %23559 = vmatprep.subr.bf16.mxu0 %v25494_v24  ;;  %v25533_v24 = vld [vmem:[%s25933_s28 + $0x2cf8] sm:$0xff]  }
 0x570   : > { %23580 = vmatpush3.bf16.msra.mxu1 %v25493_v23  ;;  %v25532_v23 = vld [vmem:[%s25933_s28 + $0x2c38] sm:$0xff]  }
 0x571   : > { %23581 = vmatprep.subr.bf16.mxu1 %v25496_v27  ;;  %v4788_v27 = vcombine.high %v4772_v20, %v4772_v20 }
 0x572   : > { %23560 = vmatpush3.bf16.msra.mxu0 %v25495_v25  ;;  %v25534_v25 = vld [vmem:[%s25933_s28 + $0x2cb8] sm:$0xff]  }
 0x573   : > { %23589 = vmatprep.subr.bf16.mxu0 %v25498_v31  ;;  %v25538_v31 = vld [vmem:[%s25933_s28 + $0x2cb0] sm:$0xff]  }
 0x574   : > { %23582 = vmatpush3.bf16.msra.mxu1 %v25497_v29 }
 0x575   : > { %v23297_v46 = vpop.f32.mrf.mxu0  ;;  %18917 = vmatmul.mubr.bf16.vlgmr.msra.gmra.mxu0 %v4765_v33  ;;  %23611 = vmatprep.subr.bf16.mxu1 %v25500_v34  ;;  %v25540_v34 = vld [vmem:[%s25933_s28 + $0x2c28] sm:$0xff]  }
 0x576   : > { %23590 = vmatpush3.bf16.msra.mxu0 %v25499_v35  ;;  %18996 = vmatprep.mubr.bf16.mxu0 %v4786_v45  ;;  %v25539_v35 = vld [vmem:[%s25933_s28 + $0x2c68] sm:$0xff]   ;;  %v25543_v45 = vld [vmem:[%s25933_s28 + $0x2c60] sm:$0xff]  }
 0x577   : > { %v23298_v50 = vpop.f32.mrf.mxu0  ;;  %v23319_v52 = vpop.f32.mrf.mxu1  ;;  %18957 = vmatmul.mubr.bf16.vlgmr.msra.gmra.mxu1 %v4787_v40  ;;  %23591 = vmatprep.subr.bf16.mxu0 %v25502_v41 }
 0x578   : > { %v23299_v53 = vadd.f32 %v23298_v50, %v23297_v46  ;;  %23612 = vmatpush3.bf16.msra.mxu1 %v25501_v38  ;;  %19036 = vmatprep.mubr.bf16.mxu1 %v4790_v49  ;;  %v25545_v49 = vld [vmem:[%s25933_s28 + $0x2ce0] sm:$0xff]  }
 0x579   : > { %v23300_v55 = vpop.f32.mrf.mxu0  ;;  %v23320_v56 = vpop.f32.mrf.mxu1  ;;  %23613 = vmatprep.subr.bf16.mxu1 %v25504_v47 }
 0x57a   : > { %v18439_v58 = vadd.f32 %v23299_v53, %v27652_v7  ;;  %v23321_v60 = vadd.f32 %v23320_v56, %v23319_v52  ;;  %23592 = vmatpush3.bf16.msra.mxu0 %v25503_v44  ;;  %v25516_v7 = vld [vmem:[%s25933_s28 + $0x2bd8] sm:$0xff]   ;;  %v25546_v52 = vld [vmem:[%s25933_s28 + $0x2ca0] sm:$0xff]   ;;  %v25551_v56 = vld [vmem:[%s25933_s28 + $0x2c50] sm:$0xff]  }
 0x57b   : > { %v23301_v59 = vpop.f32.mrf.mxu0  ;;  %23593 = vmatprep.subr.bf16.mxu0 %v25506_v51  ;;  %v23322_v63 = vpop.f32.mrf.mxu1  ;;  %v25547_v51 = vld [vmem:[%s25933_s28 + $0x2c58] sm:$0xff]  }
 0x57c   : > { %v27697_v0 = vadd.f32 %v23321_v60, %v18439_v58  ;;  %23614 = vmatpush3.bf16.msra.mxu1 %v25505_v48  ;;  %v25544_v48 = vld [vmem:[%s25933_s28 + $0x2c20] sm:$0xff]   ;;  %v25548_v53 = vld [vmem:[%s25933_s28 + $0x2c18] sm:$0xff]   ;;  %v25553_v58 = vld [vmem:[%s25933_s28 + $0x2cd0] sm:$0xff]  }
 0x57d   : > { %23615 = vmatprep.subr.bf16.mxu1 %v25508_v57  ;;  %v23323_v3 = vpop.f32.mrf.mxu1  ;;  %v25550_v55 = vld [vmem:[%s25933_s28 + $0x2c98] sm:$0xff]   ;;  %v25552_v57 = vld [vmem:[%s25933_s28 + $0x2c10] sm:$0xff]   ;;  %v25556_v59 = vld [vmem:[%s25933_s28 + $0x2c08] sm:$0xff]  }
 0x57e   : > { %23594 = vmatpush3.bf16.msra.mxu0 %v25507_v54  ;;  %v25549_v54 = vld [vmem:[%s25933_s28 + $0x2cd8] sm:$0xff]   ;;  %v25554_v60 = vld [vmem:[%s25933_s28 + $0x2c90] sm:$0xff]   ;;  %v25558_v63 = vld [vmem:[%s25933_s28 + $0x2c88] sm:$0xff]  }
 0x57f   : > { %23595 = vmatprep.subr.bf16.mxu0 %v25510_v62  ;;  %v25557_v62 = vld [vmem:[%s25933_s28 + $0x2cc8] sm:$0xff]   ;;  %v258_v3 = vld [vmem:[%s25928_s25 + $0xb0] sm:$0xff] }
 0x580   : > { %23616 = vmatpush3.bf16.msra.mxu1 %v25509_v61  ;;  %v25555_v61 = vld [vmem:[%s25933_s28 + $0x2c48] sm:$0xff]  }
 0x581   : > { %23617 = vmatprep.subr.bf16.mxu1 %v25512_v2  ;;  %v25561_v2 = vld [vmem:[%s25933_s28 + $0x2cc0] sm:$0xff]  }
 0x582   : > { %23596 = vmatpush3.bf16.msra.mxu0 %v25511_v1  ;;  %v25560_v1 = vld [vmem:[%s25933_s28 + $0x2c00] sm:$0xff]  }
 0x583   : > { %23597 = vmatprep.subr.bf16.mxu0 %v25514_v5  ;;  %v25562_v5 = vld [vmem:[%s25933_s28 + $0x2c80] sm:$0xff]  }
 0x584   : > { %23618 = vmatpush3.bf16.msra.mxu1 %v25513_v4  ;;  %v4798_v4 = vrot.slane %v258_v3, %v25971_v42 }
 0x585   : > { %23619 = vmatprep.subr.bf16.mxu1 %v25516_v7  ;;  %v25563_v7 = vld [vmem:[%s25933_s28 + $0x2d78] sm:$0xff]  }
 0x586   : > { %23598 = vmatpush3.bf16.msra.mxu0 %v25515_v6  ;;  %v4791_v6 = vcombine.high %v258_v3, %v258_v3  ;;  %v25600_v3 = vld [vmem:[%s25933_s28 + $0x2e70] sm:$0xff]  }
 0x587   : > { %23599 = vmatprep.subr.bf16.mxu0 %v25518_v9  ;;  %v4814_v9 = vrot.slane %v4798_v4, %v25971_v42 }
 0x588   : > { %23620 = vmatpush3.bf16.msra.mxu1 %v25517_v8  ;;  %v4806_v8 = vcombine.high %v4798_v4, %v4798_v4  ;;  %v25601_v4 = vld [vmem:[%s25933_s28 + $0x2e30] sm:$0xff]  }
 0x589   : > { %23621 = vmatprep.subr.bf16.mxu1 %v25520_v12  ;;  %v27761_v12 = vrot.slane %v4791_v6, %v25971_v42  ;;  %v25602_v6 = vld [vmem:[%s25933_s28 + $0x2ef0] sm:$0xff]  }
 0x58a   : > { %23600 = vmatpush3.bf16.msra.mxu0 %v25519_v10  ;;  %v25564_v10 = vld [vmem:[%s25933_s28 + $0x2d38] sm:$0xff]  }
 0x58b   : > { %23601 = vmatprep.subr.bf16.mxu0 %v25522_v13  ;;  %v4828_v13 = vrot.slane %v4806_v8, %v25971_v42 }
 0x58c   : > { %23622 = vmatpush3.bf16.msra.mxu1 %v25521_v11  ;;  %v25565_v11 = vld [vmem:[%s25933_s28 + $0x2df8] sm:$0xff]  }
 0x58d   : > { %23623 = vmatprep.subr.bf16.mxu1 %v25524_v15  ;;  %v4807_v15 = vcombine.high %v27761_v12, %v27761_v12 }
 0x58e   : > { %23602 = vmatpush3.bf16.msra.mxu0 %v25523_v14  ;;  %v25566_v14 = vld [vmem:[%s25933_s28 + $0x2db8] sm:$0xff]  }
 0x58f   : > { %23603 = vmatprep.subr.bf16.mxu0 %v25526_v17  ;;  %v25567_v17 = vld [vmem:[%s25933_s28 + $0x2d70] sm:$0xff]  }
 0x590   : > { %23624 = vmatpush3.bf16.msra.mxu1 %v25525_v16  ;;  %v4836_v16 = vcombine.high %v4814_v9, %v4814_v9 }
 0x591   : > { %23625 = vmatprep.subr.bf16.mxu1 %v25528_v19  ;;  %v25568_v19 = vld [vmem:[%s25933_s28 + $0x2d30] sm:$0xff]  }
 0x592   : > { %23604 = vmatpush3.bf16.msra.mxu0 %v25527_v18  ;;  %v4838_v18 = vcombine.high %v4828_v13, %v4828_v13 }
 0x593   : > { %23633 = vmatprep.subr.bf16.mxu0 %v25531_v22  ;;  %v25569_v22 = vld [vmem:[%s25933_s28 + $0x2df0] sm:$0xff]  }
 0x594   : > { %23626 = vmatpush3.bf16.msra.mxu1 %v25530_v21  ;;  %v4835_v21 = vrot.slane %v4807_v15, %v25971_v42  ;;  %v25606_v15 = vld [vmem:[%s25933_s28 + $0x2ee8] sm:$0xff]  }
 0x595   : > { %v23341_v29 = vpop.f32.mrf.mxu0  ;;  %18997 = vmatmul.mubr.bf16.vlgmr.msra.gmra.mxu0 %v4772_v20  ;;  %23655 = vmatprep.subr.bf16.mxu1 %v25533_v24 }
 0x596   : > { %23634 = vmatpush3.bf16.msra.mxu0 %v25532_v23  ;;  %19076 = vmatprep.mubr.bf16.mxu0 %v4828_v13  ;;  %v25570_v23 = vld [vmem:[%s25933_s28 + $0x2db0] sm:$0xff]   ;;  %v4839_v24 = vcombine.high %v4835_v21, %v4835_v21 }
 0x597   : > { %v23342_v32 = vpop.f32.mrf.mxu0  ;;  %v23363_v33 = vpop.f32.mrf.mxu1  ;;  %19037 = vmatmul.mubr.bf16.vlgmr.msra.gmra.mxu1 %v4788_v27  ;;  %23635 = vmatprep.subr.bf16.mxu0 %v25535_v26  ;;  %v25571_v26 = vld [vmem:[%s25933_s28 + $0x2d68] sm:$0xff]  }
 0x598   : > { %v23343_v36 = vadd.f32 %v23342_v32, %v23341_v29  ;;  %23656 = vmatpush3.bf16.msra.mxu1 %v25534_v25  ;;  %19116 = vmatprep.mubr.bf16.mxu1 %v4838_v18  ;;  %v25572_v29 = vld [vmem:[%s25933_s28 + $0x2d28] sm:$0xff]  }
 0x599   : > { %v23344_v37 = vpop.f32.mrf.mxu0  ;;  %v23364_v38 = vpop.f32.mrf.mxu1  ;;  %23657 = vmatprep.subr.bf16.mxu1 %v25537_v30  ;;  %v25573_v32 = vld [vmem:[%s25933_s28 + $0x2de8] sm:$0xff]  }
 0x59a   : > { %v18519_v40 = vadd.f32 %v23343_v36, %v27697_v0  ;;  %v23365_v41 = vadd.f32 %v23364_v38, %v23363_v33  ;;  %23636 = vmatpush3.bf16.msra.mxu0 %v25536_v28  ;;  %v25559_v0 = vld [vmem:[%s25933_s28 + $0x2c40] sm:$0xff]   ;;  %v25574_v36 = vld [vmem:[%s25933_s28 + $0x2da8] sm:$0xff]  }
 0x59b   : > { %v23345_v44 = vpop.f32.mrf.mxu0  ;;  %23637 = vmatprep.subr.bf16.mxu0 %v25539_v35  ;;  %v23366_v46 = vpop.f32.mrf.mxu1  ;;  %v25575_v37 = vld [vmem:[%s25933_s28 + $0x2d60] sm:$0xff]   ;;  %v25607_v18 = vld [vmem:[%s25933_s28 + $0x2ea8] sm:$0xff]  }
 0x59c   : > { %v27734_v47 = vadd.f32 %v23365_v41, %v18519_v40  ;;  %23658 = vmatpush3.bf16.msra.mxu1 %v25538_v31  ;;  %v25576_v40 = vld [vmem:[%s25933_s28 + $0x2d20] sm:$0xff]   ;;  %v25580_v46 = vld [vmem:[%s25933_s28 + $0x2d18] sm:$0xff]  }
 0x59d   : > { %23659 = vmatprep.subr.bf16.mxu1 %v25541_v39  ;;  %v23367_v50 = vpop.f32.mrf.mxu1  ;;  %v25577_v41 = vld [vmem:[%s25933_s28 + $0x2de0] sm:$0xff]  }
 0x59e   : > { %23638 = vmatpush3.bf16.msra.mxu0 %v25540_v34  ;;  %v25578_v44 = vld [vmem:[%s25933_s28 + $0x2da0] sm:$0xff]   ;;  %v25584_v50 = vld [vmem:[%s25933_s28 + $0x2d10] sm:$0xff]  }
 0x59f   : > { %23639 = vmatprep.subr.bf16.mxu0 %v25543_v45  ;;  %v25579_v45 = vld [vmem:[%s25933_s28 + $0x2d58] sm:$0xff]  }
 0x5a0   : > { %23660 = vmatpush3.bf16.msra.mxu1 %v25542_v43 }
 0x5a1   : > { %23661 = vmatprep.subr.bf16.mxu1 %v25545_v49  ;;  %v25583_v49 = vld [vmem:[%s25933_s28 + $0x2d50] sm:$0xff]  }
 0x5a2   : > { %23640 = vmatpush3.bf16.msra.mxu0 %v25544_v48  ;;  %v25582_v48 = vld [vmem:[%s25933_s28 + $0x2d98] sm:$0xff]  }
 0x5a3   : > { %23641 = vmatprep.subr.bf16.mxu0 %v25547_v51  ;;  %v25586_v51 = vld [vmem:[%s25933_s28 + $0x2d90] sm:$0xff]  }
 0x5a4   : > { %23662 = vmatpush3.bf16.msra.mxu1 %v25546_v52  ;;  %v25585_v52 = vld [vmem:[%s25933_s28 + $0x2dd0] sm:$0xff]  }
 0x5a5   : > { %23663 = vmatprep.subr.bf16.mxu1 %v25549_v54  ;;  %v25588_v54 = vld [vmem:[%s25933_s28 + $0x2d08] sm:$0xff]  }
 0x5a6   : > { %23642 = vmatpush3.bf16.msra.mxu0 %v25548_v53  ;;  %v25587_v53 = vld [vmem:[%s25933_s28 + $0x2d48] sm:$0xff]  }
 0x5a7   : > { %23643 = vmatprep.subr.bf16.mxu0 %v25551_v56  ;;  %v25590_v56 = vld [vmem:[%s25933_s28 + $0x2d88] sm:$0xff]  }
 0x5a8   : > { %23664 = vmatpush3.bf16.msra.mxu1 %v25550_v55  ;;  %v25589_v55 = vld [vmem:[%s25933_s28 + $0x2dc8] sm:$0xff]  }
 0x5a9   : > { %23665 = vmatprep.subr.bf16.mxu1 %v25553_v58  ;;  %v25592_v58 = vld [vmem:[%s25933_s28 + $0x2d00] sm:$0xff]  }
 0x5aa   : > { %23644 = vmatpush3.bf16.msra.mxu0 %v25552_v57  ;;  %v25591_v57 = vld [vmem:[%s25933_s28 + $0x2d40] sm:$0xff]  }
 0x5ab   : > { %23645 = vmatprep.subr.bf16.mxu0 %v25555_v61  ;;  %v25595_v61 = vld [vmem:[%s25933_s28 + $0x2d80] sm:$0xff]  }
 0x5ac   : > { %23666 = vmatpush3.bf16.msra.mxu1 %v25554_v60  ;;  %v25593_v60 = vld [vmem:[%s25933_s28 + $0x2dc0] sm:$0xff]  }
 0x5ad   : > { %23667 = vmatprep.subr.bf16.mxu1 %v25557_v62  ;;  %v25596_v62 = vld [vmem:[%s25933_s28 + $0x2e78] sm:$0xff]  }
 0x5ae   : > { %23646 = vmatpush3.bf16.msra.mxu0 %v25556_v59  ;;  %v4821_v59 = vrot.slane %v27761_v12, %v25971_v42 }
 0x5af   : > { %23647 = vmatprep.subr.bf16.mxu0 %v25559_v0  ;;  %v25598_v0 = vld [vmem:[%s25933_s28 + $0x2ef8] sm:$0xff]  }
 0x5b0   : > { %23668 = vmatpush3.bf16.msra.mxu1 %v25558_v63  ;;  %v25597_v63 = vld [vmem:[%s25933_s28 + $0x2e38] sm:$0xff]  }
 0x5b1   : > { %23669 = vmatprep.subr.bf16.mxu1 %v25561_v2  ;;  %v4837_v2 = vcombine.high %v4821_v59, %v4821_v59 }
 0x5b2   : > { %23648 = vmatpush3.bf16.msra.mxu0 %v25560_v1  ;;  %v25599_v1 = vld [vmem:[%s25933_s28 + $0x2eb8] sm:$0xff]  }
 0x5b3   : > { %23677 = vmatprep.subr.bf16.mxu0 %v25563_v7  ;;  %v25603_v7 = vld [vmem:[%s25933_s28 + $0x2eb0] sm:$0xff]  }
 0x5b4   : > { %23670 = vmatpush3.bf16.msra.mxu1 %v25562_v5 }
 0x5b5   : > { %v23385_v20 = vpop.f32.mrf.mxu0  ;;  %19077 = vmatmul.mubr.bf16.vlgmr.msra.gmra.mxu0 %v4814_v9  ;;  %23699 = vmatprep.subr.bf16.mxu1 %v25565_v11  ;;  %v25605_v11 = vld [vmem:[%s25933_s28 + $0x2e28] sm:$0xff]  }
 0x5b6   : > { %23678 = vmatpush3.bf16.msra.mxu0 %v25564_v10  ;;  %19156 = vmatprep.mubr.bf16.mxu0 %v4835_v21  ;;  %v25604_v10 = vld [vmem:[%s25933_s28 + $0x2e68] sm:$0xff]   ;;  %v25608_v21 = vld [vmem:[%s25933_s28 + $0x2e60] sm:$0xff]  }
 0x5b7   : > { %v23386_v25 = vpop.f32.mrf.mxu0  ;;  %v23407_v27 = vpop.f32.mrf.mxu1  ;;  %19117 = vmatmul.mubr.bf16.vlgmr.msra.gmra.mxu1 %v4836_v16  ;;  %23679 = vmatprep.subr.bf16.mxu0 %v25567_v17 }
 0x5b8   : > { %v23387_v28 = vadd.f32 %v23386_v25, %v23385_v20  ;;  %23700 = vmatpush3.bf16.msra.mxu1 %v25566_v14  ;;  %19196 = vmatprep.mubr.bf16.mxu1 %v4839_v24  ;;  %v25610_v24 = vld [vmem:[%s25933_s28 + $0x2ee0] sm:$0xff]  }
 0x5b9   : > { %v23388_v30 = vpop.f32.mrf.mxu0  ;;  %v23408_v31 = vpop.f32.mrf.mxu1  ;;  %23701 = vmatprep.subr.bf16.mxu1 %v25569_v22 }
 0x5ba   : > { %v18599_v33 = vadd.f32 %v23387_v28, %v27734_v47  ;;  %v23409_v35 = vadd.f32 %v23408_v31, %v23407_v27  ;;  %23680 = vmatpush3.bf16.msra.mxu0 %v25568_v19  ;;  %v25581_v47 = vld [vmem:[%s25933_s28 + $0x2dd8] sm:$0xff]   ;;  %v25611_v27 = vld [vmem:[%s25933_s28 + $0x2ea0] sm:$0xff]   ;;  %v25616_v31 = vld [vmem:[%s25933_s28 + $0x2e50] sm:$0xff]  }
 0x5bb   : > { %v23389_v34 = vpop.f32.mrf.mxu0  ;;  %23681 = vmatprep.subr.bf16.mxu0 %v25571_v26  ;;  %v23410_v38 = vpop.f32.mrf.mxu1  ;;  %v25612_v26 = vld [vmem:[%s25933_s28 + $0x2e58] sm:$0xff]  }
 0x5bc   : > { %v27779_v39 = vadd.f32 %v23409_v35, %v18599_v33  ;;  %23702 = vmatpush3.bf16.msra.mxu1 %v25570_v23  ;;  %v25609_v23 = vld [vmem:[%s25933_s28 + $0x2e20] sm:$0xff]   ;;  %v25613_v28 = vld [vmem:[%s25933_s28 + $0x2e18] sm:$0xff]   ;;  %v25618_v33 = vld [vmem:[%s25933_s28 + $0x2ed0] sm:$0xff]  }
 0x5bd   : > { %23703 = vmatprep.subr.bf16.mxu1 %v25573_v32  ;;  %v23411_v43 = vpop.f32.mrf.mxu1  ;;  %v25615_v30 = vld [vmem:[%s25933_s28 + $0x2e98] sm:$0xff]   ;;  %v25617_v32 = vld [vmem:[%s25933_s28 + $0x2e10] sm:$0xff]   ;;  %v25621_v34 = vld [vmem:[%s25933_s28 + $0x2e08] sm:$0xff]  }
 0x5be   : > { %23682 = vmatpush3.bf16.msra.mxu0 %v25572_v29  ;;  %v25614_v29 = vld [vmem:[%s25933_s28 + $0x2ed8] sm:$0xff]   ;;  %v25619_v35 = vld [vmem:[%s25933_s28 + $0x2e90] sm:$0xff]   ;;  %v25623_v38 = vld [vmem:[%s25933_s28 + $0x2e88] sm:$0xff]  }
 0x5bf   : > { %23683 = vmatprep.subr.bf16.mxu0 %v25575_v37  ;;  %v25622_v37 = vld [vmem:[%s25933_s28 + $0x2ec8] sm:$0xff]   ;;  %v259_v43 = vld [vmem:[%s25928_s25 + $0xb8] sm:$0xff] }
 0x5c0   : > { %23704 = vmatpush3.bf16.msra.mxu1 %v25574_v36  ;;  %v25620_v36 = vld [vmem:[%s25933_s28 + $0x2e48] sm:$0xff]  }
 0x5c1   : > { %23705 = vmatprep.subr.bf16.mxu1 %v25577_v41  ;;  %v25626_v41 = vld [vmem:[%s25933_s28 + $0x2ec0] sm:$0xff]  }
 0x5c2   : > { %23684 = vmatpush3.bf16.msra.mxu0 %v25576_v40  ;;  %v25625_v40 = vld [vmem:[%s25933_s28 + $0x2e00] sm:$0xff]  }
 0x5c3   : > { %23685 = vmatprep.subr.bf16.mxu0 %v25579_v45  ;;  %v25627_v45 = vld [vmem:[%s25933_s28 + $0x2e80] sm:$0xff]  }
 0x5c4   : > { %23706 = vmatpush3.bf16.msra.mxu1 %v25578_v44  ;;  %v4847_v44 = vrot.slane %v259_v43, %v25971_v42 }
 0x5c5   : > { %23707 = vmatprep.subr.bf16.mxu1 %v25581_v47  ;;  %v25628_v47 = vld [vmem:[%s25933_s28 + $0x2f78] sm:$0xff]  }
 0x5c6   : > { %23686 = vmatpush3.bf16.msra.mxu0 %v25580_v46  ;;  %v4840_v46 = vcombine.high %v259_v43, %v259_v43  ;;  %v25665_v43 = vld [vmem:[%s25933_s28 + $0x3070] sm:$0xff]  }
 0x5c7   : > { %23687 = vmatprep.subr.bf16.mxu0 %v25583_v49  ;;  %v4863_v49 = vrot.slane %v4847_v44, %v25971_v42 }
 0x5c8   : > { %23708 = vmatpush3.bf16.msra.mxu1 %v25582_v48  ;;  %v4855_v48 = vcombine.high %v4847_v44, %v4847_v44  ;;  %v25666_v44 = vld [vmem:[%s25933_s28 + $0x3030] sm:$0xff]  }
 0x5c9   : > { %23709 = vmatprep.subr.bf16.mxu1 %v25585_v52  ;;  %v27843_v52 = vrot.slane %v4840_v46, %v25971_v42  ;;  %v25667_v46 = vld [vmem:[%s25933_s28 + $0x30f0] sm:$0xff]  }
 0x5ca   : > { %23688 = vmatpush3.bf16.msra.mxu0 %v25584_v50  ;;  %v25629_v50 = vld [vmem:[%s25933_s28 + $0x2f38] sm:$0xff]  }
 0x5cb   : > { %23689 = vmatprep.subr.bf16.mxu0 %v25587_v53  ;;  %v4877_v53 = vrot.slane %v4855_v48, %v25971_v42 }
 0x5cc   : > { %23710 = vmatpush3.bf16.msra.mxu1 %v25586_v51  ;;  %v25630_v51 = vld [vmem:[%s25933_s28 + $0x2ff8] sm:$0xff]  }
 0x5cd   : > { %23711 = vmatprep.subr.bf16.mxu1 %v25589_v55  ;;  %v4856_v55 = vcombine.high %v27843_v52, %v27843_v52 }
 0x5ce   : > { %23690 = vmatpush3.bf16.msra.mxu0 %v25588_v54  ;;  %v25631_v54 = vld [vmem:[%s25933_s28 + $0x2fb8] sm:$0xff]  }
 0x5cf   : > { %23691 = vmatprep.subr.bf16.mxu0 %v25591_v57  ;;  %v25632_v57 = vld [vmem:[%s25933_s28 + $0x2f70] sm:$0xff]  }
 0x5d0   : > { %23712 = vmatpush3.bf16.msra.mxu1 %v25590_v56  ;;  %v4885_v56 = vcombine.high %v4863_v49, %v4863_v49 }
 0x5d1   : > { %23713 = vmatprep.subr.bf16.mxu1 %v25593_v60  ;;  %v25633_v60 = vld [vmem:[%s25933_s28 + $0x2f30] sm:$0xff]  }
 0x5d2   : > { %23692 = vmatpush3.bf16.msra.mxu0 %v25592_v58  ;;  %v4887_v58 = vcombine.high %v4877_v53, %v4877_v53 }
 0x5d3   : > { %23721 = vmatprep.subr.bf16.mxu0 %v25596_v62  ;;  %v25634_v62 = vld [vmem:[%s25933_s28 + $0x2ff0] sm:$0xff]  }
 0x5d4   : > { %23714 = vmatpush3.bf16.msra.mxu1 %v25595_v61  ;;  %v4884_v61 = vrot.slane %v4856_v55, %v25971_v42  ;;  %v25671_v55 = vld [vmem:[%s25933_s28 + $0x30e8] sm:$0xff]  }
 0x5d5   : > { %v23429_v5 = vpop.f32.mrf.mxu0  ;;  %19157 = vmatmul.mubr.bf16.vlgmr.msra.gmra.mxu0 %v4821_v59  ;;  %23743 = vmatprep.subr.bf16.mxu1 %v25598_v0 }
 0x5d6   : > { %23722 = vmatpush3.bf16.msra.mxu0 %v25597_v63  ;;  %19236 = vmatprep.mubr.bf16.mxu0 %v4877_v53  ;;  %v25635_v63 = vld [vmem:[%s25933_s28 + $0x2fb0] sm:$0xff]   ;;  %v4888_v0 = vcombine.high %v4884_v61, %v4884_v61 }
 0x5d7   : > { %v23430_v8 = vpop.f32.mrf.mxu0  ;;  %v23451_v9 = vpop.f32.mrf.mxu1  ;;  %19197 = vmatmul.mubr.bf16.vlgmr.msra.gmra.mxu1 %v4837_v2  ;;  %23723 = vmatprep.subr.bf16.mxu0 %v25600_v3  ;;  %v25636_v3 = vld [vmem:[%s25933_s28 + $0x2f68] sm:$0xff]  }
 0x5d8   : > { %v23431_v12 = vadd.f32 %v23430_v8, %v23429_v5  ;;  %23744 = vmatpush3.bf16.msra.mxu1 %v25599_v1  ;;  %19276 = vmatprep.mubr.bf16.mxu1 %v4887_v58  ;;  %v25637_v5 = vld [vmem:[%s25933_s28 + $0x2f28] sm:$0xff]  }
 0x5d9   : > { %v23432_v13 = vpop.f32.mrf.mxu0  ;;  %v23452_v14 = vpop.f32.mrf.mxu1  ;;  %23745 = vmatprep.subr.bf16.mxu1 %v25602_v6  ;;  %v25638_v8 = vld [vmem:[%s25933_s28 + $0x2fe8] sm:$0xff]  }
 0x5da   : > { %v18679_v16 = vadd.f32 %v23431_v12, %v27779_v39  ;;  %v23453_v17 = vadd.f32 %v23452_v14, %v23451_v9  ;;  %23724 = vmatpush3.bf16.msra.mxu0 %v25601_v4  ;;  %v25624_v39 = vld [vmem:[%s25933_s28 + $0x2e40] sm:$0xff]   ;;  %v25639_v12 = vld [vmem:[%s25933_s28 + $0x2fa8] sm:$0xff]  }
 0x5db   : > { %v23433_v19 = vpop.f32.mrf.mxu0  ;;  %23725 = vmatprep.subr.bf16.mxu0 %v25604_v10  ;;  %v23454_v20 = vpop.f32.mrf.mxu1  ;;  %v25640_v13 = vld [vmem:[%s25933_s28 + $0x2f60] sm:$0xff]   ;;  %v25672_v58 = vld [vmem:[%s25933_s28 + $0x30a8] sm:$0xff]  }
 0x5dc   : > { %v27816_v22 = vadd.f32 %v23453_v17, %v18679_v16  ;;  %23746 = vmatpush3.bf16.msra.mxu1 %v25603_v7  ;;  %v25641_v16 = vld [vmem:[%s25933_s28 + $0x2f20] sm:$0xff]   ;;  %v25645_v20 = vld [vmem:[%s25933_s28 + $0x2f18] sm:$0xff]  }
 0x5dd   : > { %23747 = vmatprep.subr.bf16.mxu1 %v25606_v15  ;;  %v23455_v25 = vpop.f32.mrf.mxu1  ;;  %v25642_v17 = vld [vmem:[%s25933_s28 + $0x2fe0] sm:$0xff]  }
 0x5de   : > { %23726 = vmatpush3.bf16.msra.mxu0 %v25605_v11  ;;  %v25643_v19 = vld [vmem:[%s25933_s28 + $0x2fa0] sm:$0xff]   ;;  %v25649_v25 = vld [vmem:[%s25933_s28 + $0x2f10] sm:$0xff]  }
 0x5df   : > { %23727 = vmatprep.subr.bf16.mxu0 %v25608_v21  ;;  %v25644_v21 = vld [vmem:[%s25933_s28 + $0x2f58] sm:$0xff]  }
 0x5e0   : > { %23748 = vmatpush3.bf16.msra.mxu1 %v25607_v18 }
 0x5e1   : > { %23749 = vmatprep.subr.bf16.mxu1 %v25610_v24  ;;  %v25648_v24 = vld [vmem:[%s25933_s28 + $0x2f50] sm:$0xff]  }
 0x5e2   : > { %23728 = vmatpush3.bf16.msra.mxu0 %v25609_v23  ;;  %v25647_v23 = vld [vmem:[%s25933_s28 + $0x2f98] sm:$0xff]  }
 0x5e3   : > { %23729 = vmatprep.subr.bf16.mxu0 %v25612_v26  ;;  %v25651_v26 = vld [vmem:[%s25933_s28 + $0x2f90] sm:$0xff]  }
 0x5e4   : > { %23750 = vmatpush3.bf16.msra.mxu1 %v25611_v27  ;;  %v25650_v27 = vld [vmem:[%s25933_s28 + $0x2fd0] sm:$0xff]  }
 0x5e5   : > { %23751 = vmatprep.subr.bf16.mxu1 %v25614_v29  ;;  %v25653_v29 = vld [vmem:[%s25933_s28 + $0x2f08] sm:$0xff]  }
 0x5e6   : > { %23730 = vmatpush3.bf16.msra.mxu0 %v25613_v28  ;;  %v25652_v28 = vld [vmem:[%s25933_s28 + $0x2f48] sm:$0xff]  }
 0x5e7   : > { %23731 = vmatprep.subr.bf16.mxu0 %v25616_v31  ;;  %v25655_v31 = vld [vmem:[%s25933_s28 + $0x2f88] sm:$0xff]  }
 0x5e8   : > { %23752 = vmatpush3.bf16.msra.mxu1 %v25615_v30  ;;  %v25654_v30 = vld [vmem:[%s25933_s28 + $0x2fc8] sm:$0xff]  }
 0x5e9   : > { %23753 = vmatprep.subr.bf16.mxu1 %v25618_v33  ;;  %v25657_v33 = vld [vmem:[%s25933_s28 + $0x2f00] sm:$0xff]  }
 0x5ea   : > { %23732 = vmatpush3.bf16.msra.mxu0 %v25617_v32  ;;  %v25656_v32 = vld [vmem:[%s25933_s28 + $0x2f40] sm:$0xff]  }
 0x5eb   : > { %23733 = vmatprep.subr.bf16.mxu0 %v25620_v36  ;;  %v25660_v36 = vld [vmem:[%s25933_s28 + $0x2f80] sm:$0xff]  }
 0x5ec   : > { %23754 = vmatpush3.bf16.msra.mxu1 %v25619_v35  ;;  %v25658_v35 = vld [vmem:[%s25933_s28 + $0x2fc0] sm:$0xff]  }
 0x5ed   : > { %23755 = vmatprep.subr.bf16.mxu1 %v25622_v37  ;;  %v25661_v37 = vld [vmem:[%s25933_s28 + $0x3078] sm:$0xff]  }
 0x5ee   : > { %23734 = vmatpush3.bf16.msra.mxu0 %v25621_v34  ;;  %v4870_v34 = vrot.slane %v27843_v52, %v25971_v42 }
 0x5ef   : > { %23735 = vmatprep.subr.bf16.mxu0 %v25624_v39  ;;  %v25663_v39 = vld [vmem:[%s25933_s28 + $0x30f8] sm:$0xff]  }
 0x5f0   : > { %23756 = vmatpush3.bf16.msra.mxu1 %v25623_v38  ;;  %v25662_v38 = vld [vmem:[%s25933_s28 + $0x3038] sm:$0xff]  }
 0x5f1   : > { %23757 = vmatprep.subr.bf16.mxu1 %v25626_v41  ;;  %v4886_v41 = vcombine.high %v4870_v34, %v4870_v34 }
 0x5f2   : > { %23736 = vmatpush3.bf16.msra.mxu0 %v25625_v40  ;;  %v25664_v40 = vld [vmem:[%s25933_s28 + $0x30b8] sm:$0xff]  }
 0x5f3   : > { %23765 = vmatprep.subr.bf16.mxu0 %v25628_v47  ;;  %v25668_v47 = vld [vmem:[%s25933_s28 + $0x30b0] sm:$0xff]  }
 0x5f4   : > { %23758 = vmatpush3.bf16.msra.mxu1 %v25627_v45 }
 0x5f5   : > { %v23473_v59 = vpop.f32.mrf.mxu0  ;;  %19237 = vmatmul.mubr.bf16.vlgmr.msra.gmra.mxu0 %v4863_v49  ;;  %23787 = vmatprep.subr.bf16.mxu1 %v25630_v51  ;;  %v25670_v51 = vld [vmem:[%s25933_s28 + $0x3028] sm:$0xff]  }
 0x5f6   : > { %23766 = vmatpush3.bf16.msra.mxu0 %v25629_v50  ;;  %19316 = vmatprep.mubr.bf16.mxu0 %v4884_v61  ;;  %v25669_v50 = vld [vmem:[%s25933_s28 + $0x3068] sm:$0xff]   ;;  %v25673_v61 = vld [vmem:[%s25933_s28 + $0x3060] sm:$0xff]  }
 0x5f7   : > { %v23474_v1 = vpop.f32.mrf.mxu0  ;;  %v23495_v2 = vpop.f32.mrf.mxu1  ;;  %19277 = vmatmul.mubr.bf16.vlgmr.msra.gmra.mxu1 %v4885_v56  ;;  %23767 = vmatprep.subr.bf16.mxu0 %v25632_v57 }
 0x5f8   : > { %v23475_v4 = vadd.f32 %v23474_v1, %v23473_v59  ;;  %23788 = vmatpush3.bf16.msra.mxu1 %v25631_v54  ;;  %19356 = vmatprep.mubr.bf16.mxu1 %v4888_v0  ;;  %v25675_v0 = vld [vmem:[%s25933_s28 + $0x30e0] sm:$0xff]  }
 0x5f9   : > { %v23476_v6 = vpop.f32.mrf.mxu0  ;;  %v23496_v7 = vpop.f32.mrf.mxu1  ;;  %23789 = vmatprep.subr.bf16.mxu1 %v25634_v62 }
 0x5fa   : > { %v18759_v9 = vadd.f32 %v23475_v4, %v27816_v22  ;;  %v23497_v10 = vadd.f32 %v23496_v7, %v23495_v2  ;;  %23768 = vmatpush3.bf16.msra.mxu0 %v25633_v60  ;;  %v25646_v22 = vld [vmem:[%s25933_s28 + $0x2fd8] sm:$0xff]   ;;  %v25676_v2 = vld [vmem:[%s25933_s28 + $0x30a0] sm:$0xff]   ;;  %v25681_v7 = vld [vmem:[%s25933_s28 + $0x3050] sm:$0xff]  }
 0x5fb   : > { %v23477_v11 = vpop.f32.mrf.mxu0  ;;  %23769 = vmatprep.subr.bf16.mxu0 %v25636_v3  ;;  %v23498_v14 = vpop.f32.mrf.mxu1  ;;  %v25677_v3 = vld [vmem:[%s25933_s28 + $0x3058] sm:$0xff]  }
 0x5fc   : > { %v27861_v15 = vadd.f32 %v23497_v10, %v18759_v9  ;;  %23790 = vmatpush3.bf16.msra.mxu1 %v25635_v63  ;;  %v25674_v63 = vld [vmem:[%s25933_s28 + $0x3020] sm:$0xff]   ;;  %v25678_v4 = vld [vmem:[%s25933_s28 + $0x3018] sm:$0xff]   ;;  %v25683_v9 = vld [vmem:[%s25933_s28 + $0x30d0] sm:$0xff]  }
 0x5fd   : > { %23791 = vmatprep.subr.bf16.mxu1 %v25638_v8  ;;  %v23499_v18 = vpop.f32.mrf.mxu1  ;;  %v25680_v6 = vld [vmem:[%s25933_s28 + $0x3098] sm:$0xff]   ;;  %v25682_v8 = vld [vmem:[%s25933_s28 + $0x3010] sm:$0xff]   ;;  %v25686_v11 = vld [vmem:[%s25933_s28 + $0x3008] sm:$0xff]  }
 0x5fe   : > { %23770 = vmatpush3.bf16.msra.mxu0 %v25637_v5  ;;  %v25679_v5 = vld [vmem:[%s25933_s28 + $0x30d8] sm:$0xff]   ;;  %v25684_v10 = vld [vmem:[%s25933_s28 + $0x3090] sm:$0xff]   ;;  %v25688_v14 = vld [vmem:[%s25933_s28 + $0x3088] sm:$0xff]  }
 0x5ff   : > { %23771 = vmatprep.subr.bf16.mxu0 %v25640_v13  ;;  %v25687_v13 = vld [vmem:[%s25933_s28 + $0x30c8] sm:$0xff]   ;;  %v260_v18 = vld [vmem:[%s25928_s25 + $0xc0] sm:$0xff] }
 0x600   : > { %23792 = vmatpush3.bf16.msra.mxu1 %v25639_v12  ;;  %v25685_v12 = vld [vmem:[%s25933_s28 + $0x3048] sm:$0xff]  }
 0x601   : > { %23793 = vmatprep.subr.bf16.mxu1 %v25642_v17  ;;  %v25691_v17 = vld [vmem:[%s25933_s28 + $0x30c0] sm:$0xff]  }
 0x602   : > { %23772 = vmatpush3.bf16.msra.mxu0 %v25641_v16  ;;  %v25690_v16 = vld [vmem:[%s25933_s28 + $0x3000] sm:$0xff]  }
 0x603   : > { %23773 = vmatprep.subr.bf16.mxu0 %v25644_v21  ;;  %v25692_v21 = vld [vmem:[%s25933_s28 + $0x3080] sm:$0xff]  }
 0x604   : > { %23794 = vmatpush3.bf16.msra.mxu1 %v25643_v19  ;;  %v4896_v19 = vrot.slane %v260_v18, %v25971_v42 }
 0x605   : > { %23795 = vmatprep.subr.bf16.mxu1 %v25646_v22  ;;  %v25693_v22 = vld [vmem:[%s25933_s28 + $0x3178] sm:$0xff]  }
 0x606   : > { %23774 = vmatpush3.bf16.msra.mxu0 %v25645_v20  ;;  %v4889_v20 = vcombine.high %v260_v18, %v260_v18 }
 0x607   : > { %23775 = vmatprep.subr.bf16.mxu0 %v25648_v24  ;;  %v4912_v24 = vrot.slane %v4896_v19, %v25971_v42 }
 0x608   : > { %23796 = vmatpush3.bf16.msra.mxu1 %v25647_v23  ;;  %v4904_v23 = vcombine.high %v4896_v19, %v4896_v19  ;;  %v25729_v19 = vld [vmem:[%s25933_s28 + $0x32b8] sm:$0xff]  }
 0x609   : > { %23797 = vmatprep.subr.bf16.mxu1 %v25650_v27  ;;  %v25695_v27 = vld [vmem:[%s25933_s28 + $0x31f8] sm:$0xff]  }
 0x60a   : > { %23776 = vmatpush3.bf16.msra.mxu0 %v25649_v25  ;;  %v27924_v25 = vrot.slane %v4889_v20, %v25971_v42 }
 0x60b   : > { %23777 = vmatprep.subr.bf16.mxu0 %v25652_v28  ;;  %v25694_v28 = vld [vmem:[%s25933_s28 + $0x3138] sm:$0xff]  }
 0x60c   : > { %23798 = vmatpush3.bf16.msra.mxu1 %v25651_v26  ;;  %v4926_v26 = vrot.slane %v4904_v23, %v25971_v42  ;;  %v25731_v23 = vld [vmem:[%s25933_s28 + $0x3230] sm:$0xff]  }
 0x60d   : > { %23799 = vmatprep.subr.bf16.mxu1 %v25654_v30  ;;  %v4934_v30 = vcombine.high %v4912_v24, %v4912_v24 }
 0x60e   : > { %23778 = vmatpush3.bf16.msra.mxu0 %v25653_v29  ;;  %v4905_v29 = vcombine.high %v27924_v25, %v27924_v25 }
 0x60f   : > { %23779 = vmatprep.subr.bf16.mxu0 %v25656_v32 }
 0x610   : > { %23800 = vmatpush3.bf16.msra.mxu1 %v25655_v31  ;;  %v25697_v31 = vld [vmem:[%s25933_s28 + $0x3170] sm:$0xff]  }
 0x611   : > { %23801 = vmatprep.subr.bf16.mxu1 %v25658_v35  ;;  %v25696_v35 = vld [vmem:[%s25933_s28 + $0x31b8] sm:$0xff]  }
 0x612   : > { %23780 = vmatpush3.bf16.msra.mxu0 %v25657_v33  ;;  %v4936_v33 = vcombine.high %v4926_v26, %v4926_v26 }
 0x613   : > { %23809 = vmatprep.subr.bf16.mxu0 %v25661_v37 }
 0x614   : > { %23802 = vmatpush3.bf16.msra.mxu1 %v25660_v36  ;;  %v4933_v36 = vrot.slane %v4905_v29, %v25971_v42 }
 0x615   : > { %v23517_v45 = vpop.f32.mrf.mxu0  ;;  %19317 = vmatmul.mubr.bf16.vlgmr.msra.gmra.mxu0 %v4870_v34  ;;  %23831 = vmatprep.subr.bf16.mxu1 %v25663_v39  ;;  %v25699_v34 = vld [vmem:[%s25933_s28 + $0x31f0] sm:$0xff]  }
 0x616   : > { %23810 = vmatpush3.bf16.msra.mxu0 %v25662_v38  ;;  %19396 = vmatprep.mubr.bf16.mxu0 %v4926_v26  ;;  %v25698_v39 = vld [vmem:[%s25933_s28 + $0x3130] sm:$0xff]  }
 0x617   : > { %v23518_v48 = vpop.f32.mrf.mxu0  ;;  %v23539_v49 = vpop.f32.mrf.mxu1  ;;  %19357 = vmatmul.mubr.bf16.vlgmr.msra.gmra.mxu1 %v4886_v41  ;;  %23811 = vmatprep.subr.bf16.mxu0 %v25665_v43  ;;  %v25701_v43 = vld [vmem:[%s25933_s28 + $0x3168] sm:$0xff]  }
 0x618   : > { %v23519_v52 = vadd.f32 %v23518_v48, %v23517_v45  ;;  %23832 = vmatpush3.bf16.msra.mxu1 %v25664_v40  ;;  %19436 = vmatprep.mubr.bf16.mxu1 %v4936_v33  ;;  %v4937_v40 = vcombine.high %v4933_v36, %v4933_v36  ;;  %v25735_v33 = vld [vmem:[%s25933_s28 + $0x3228] sm:$0xff]  }
 0x619   : > { %v23520_v53 = vpop.f32.mrf.mxu0  ;;  %v23540_v54 = vpop.f32.mrf.mxu1  ;;  %23833 = vmatprep.subr.bf16.mxu1 %v25667_v46  ;;  %v25700_v46 = vld [vmem:[%s25933_s28 + $0x31b0] sm:$0xff]  }
 0x61a   : > { %v18839_v56 = vadd.f32 %v23519_v52, %v27861_v15  ;;  %v23541_v57 = vadd.f32 %v23540_v54, %v23539_v49  ;;  %23812 = vmatpush3.bf16.msra.mxu0 %v25666_v44  ;;  %v25689_v15 = vld [vmem:[%s25933_s28 + $0x3040] sm:$0xff]   ;;  %v25703_v49 = vld [vmem:[%s25933_s28 + $0x31e8] sm:$0xff]  }
 0x61b   : > { %v23521_v60 = vpop.f32.mrf.mxu0  ;;  %23813 = vmatprep.subr.bf16.mxu0 %v25669_v50  ;;  %v23542_v59 = vpop.f32.mrf.mxu1  ;;  %v25702_v52 = vld [vmem:[%s25933_s28 + $0x3128] sm:$0xff]   ;;  %v25705_v54 = vld [vmem:[%s25933_s28 + $0x3160] sm:$0xff]  }
 0x61c   : > { %v27898_v62 = vadd.f32 %v23541_v57, %v18839_v56  ;;  %23834 = vmatpush3.bf16.msra.mxu1 %v25668_v47  ;;  %v25707_v57 = vld [vmem:[%s25933_s28 + $0x31e0] sm:$0xff]   ;;  %v25709_v60 = vld [vmem:[%s25933_s28 + $0x3158] sm:$0xff]  }
 0x61d   : > { %23835 = vmatprep.subr.bf16.mxu1 %v25671_v55  ;;  %v23543_v1 = vpop.f32.mrf.mxu1  ;;  %v25704_v55 = vld [vmem:[%s25933_s28 + $0x31a8] sm:$0xff]   ;;  %v25711_v59 = vld [vmem:[%s25933_s28 + $0x31d8] sm:$0xff]  }
 0x61e   : > { %23814 = vmatpush3.bf16.msra.mxu0 %v25670_v51  ;;  %v25715_v1 = vld [vmem:[%s25933_s28 + $0x31d0] sm:$0xff]  }
 0x61f   : > { %23815 = vmatprep.subr.bf16.mxu0 %v25673_v61  ;;  %v25708_v61 = vld [vmem:[%s25933_s28 + $0x31a0] sm:$0xff]  }
 0x620   : > { %23836 = vmatpush3.bf16.msra.mxu1 %v25672_v58  ;;  %v25706_v58 = vld [vmem:[%s25933_s28 + $0x3120] sm:$0xff]  }
 0x621   : > { %23837 = vmatprep.subr.bf16.mxu1 %v25675_v0  ;;  %v25712_v0 = vld [vmem:[%s25933_s28 + $0x3198] sm:$0xff]  }
 0x622   : > { %23816 = vmatpush3.bf16.msra.mxu0 %v25674_v63  ;;  %v25713_v63 = vld [vmem:[%s25933_s28 + $0x3150] sm:$0xff]  }
 0x623   : > { %23817 = vmatprep.subr.bf16.mxu0 %v25677_v3  ;;  %v25717_v3 = vld [vmem:[%s25933_s28 + $0x3148] sm:$0xff]  }
 0x624   : > { %23838 = vmatpush3.bf16.msra.mxu1 %v25676_v2  ;;  %v25714_v2 = vld [vmem:[%s25933_s28 + $0x3110] sm:$0xff]  }
 0x625   : > { %23839 = vmatprep.subr.bf16.mxu1 %v25679_v5  ;;  %v25719_v5 = vld [vmem:[%s25933_s28 + $0x31c8] sm:$0xff]  }
 0x626   : > { %23818 = vmatpush3.bf16.msra.mxu0 %v25678_v4  ;;  %v25716_v4 = vld [vmem:[%s25933_s28 + $0x3190] sm:$0xff]  }
 0x627   : > { %23819 = vmatprep.subr.bf16.mxu0 %v25681_v7  ;;  %v25721_v7 = vld [vmem:[%s25933_s28 + $0x3140] sm:$0xff]  }
 0x628   : > { %23840 = vmatpush3.bf16.msra.mxu1 %v25680_v6  ;;  %v25718_v6 = vld [vmem:[%s25933_s28 + $0x3108] sm:$0xff]  }
 0x629   : > { %23841 = vmatprep.subr.bf16.mxu1 %v25683_v9  ;;  %v25723_v9 = vld [vmem:[%s25933_s28 + $0x31c0] sm:$0xff]  }
 0x62a   : > { %23820 = vmatpush3.bf16.msra.mxu0 %v25682_v8  ;;  %v25720_v8 = vld [vmem:[%s25933_s28 + $0x3188] sm:$0xff]  }
 0x62b   : > { %23821 = vmatprep.subr.bf16.mxu0 %v25685_v12  ;;  %v4919_v12 = vrot.slane %v27924_v25, %v25971_v42  ;;  %v25734_v25 = vld [vmem:[%s25933_s28 + $0x3268] sm:$0xff]  }
 0x62c   : > { %23842 = vmatpush3.bf16.msra.mxu1 %v25684_v10  ;;  %v25722_v10 = vld [vmem:[%s25933_s28 + $0x3100] sm:$0xff]  }
 0x62d   : > { %23843 = vmatprep.subr.bf16.mxu1 %v25687_v13  ;;  %v25725_v13 = vld [vmem:[%s25933_s28 + $0x3180] sm:$0xff]  }
 0x62e   : > { %23822 = vmatpush3.bf16.msra.mxu0 %v25686_v11  ;;  %v25726_v11 = vld [vmem:[%s25933_s28 + $0x3278] sm:$0xff]  }
 0x62f   : > { %23823 = vmatprep.subr.bf16.mxu0 %v25689_v15  ;;  %v25727_v15 = vld [vmem:[%s25933_s28 + $0x3238] sm:$0xff]  }
 0x630   : > { %23844 = vmatpush3.bf16.msra.mxu1 %v25688_v14  ;;  %v25728_v14 = vld [vmem:[%s25933_s28 + $0x32f8] sm:$0xff]  }
 0x631   : > { %23845 = vmatprep.subr.bf16.mxu1 %v25691_v17  ;;  %v25730_v17 = vld [vmem:[%s25933_s28 + $0x3270] sm:$0xff]  }
 0x632   : > { %23824 = vmatpush3.bf16.msra.mxu0 %v25690_v16  ;;  %v4935_v16 = vcombine.high %v4919_v12, %v4919_v12 }
 0x633   : > { %23853 = vmatprep.subr.bf16.mxu0 %v25693_v22 }
 0x634   : > { %23846 = vmatpush3.bf16.msra.mxu1 %v25692_v21  ;;  %v25732_v21 = vld [vmem:[%s25933_s28 + $0x32f0] sm:$0xff]  }
 0x635   : > { %v23561_v32 = vpop.f32.mrf.mxu0  ;;  %23875 = vmatprep.subr.bf16.mxu1 %v25695_v27  ;;  %19397 = vmatmul.mubr.bf16.vlgmr.msra.gmra.mxu0 %v4912_v24 }
 0x636   : > { %23854 = vmatpush3.bf16.msra.mxu0 %v25694_v28  ;;  %19476 = vmatprep.mubr.bf16.mxu0 %v4933_v36  ;;  %v25733_v28 = vld [vmem:[%s25933_s28 + $0x32b0] sm:$0xff]  }
 0x637   : > { %v23562_v37 = vpop.f32.mrf.mxu0  ;;  %v23583_v38 = vpop.f32.mrf.mxu1  ;;  %19437 = vmatmul.mubr.bf16.vlgmr.msra.gmra.mxu1 %v4934_v30  ;;  %23855 = vmatprep.subr.bf16.mxu0 %v25697_v31  ;;  %v25736_v31 = vld [vmem:[%s25933_s28 + $0x32e8] sm:$0xff]  }
 0x638   : > { %v23563_v41 = vadd.f32 %v23562_v37, %v23561_v32  ;;  %23876 = vmatpush3.bf16.msra.mxu1 %v25696_v35  ;;  %19516 = vmatprep.mubr.bf16.mxu1 %v4937_v40  ;;  %v25737_v37 = vld [vmem:[%s25933_s28 + $0x32a8] sm:$0xff]   ;;  %v25739_v40 = vld [vmem:[%s25933_s28 + $0x3220] sm:$0xff]  }
 0x639   : > { %v23564_v44 = vpop.f32.mrf.mxu0  ;;  %v23584_v45 = vpop.f32.mrf.mxu1  ;;  %23877 = vmatprep.subr.bf16.mxu1 %v25699_v34  ;;  %v25738_v34 = vld [vmem:[%s25933_s28 + $0x3260] sm:$0xff]  }
 0x63a   : > { %v18919_v47 = vadd.f32 %v23563_v41, %v27898_v62  ;;  %v23585_v48 = vadd.f32 %v23584_v45, %v23583_v38  ;;  %23856 = vmatpush3.bf16.msra.mxu0 %v25698_v39  ;;  %v25710_v62 = vld [vmem:[%s25933_s28 + $0x3118] sm:$0xff]   ;;  %v25740_v39 = vld [vmem:[%s25933_s28 + $0x32e0] sm:$0xff]  }
 0x63b   : > { %v23565_v50 = vpop.f32.mrf.mxu0  ;;  %v23586_v51 = vpop.f32.mrf.mxu1  ;;  %23857 = vmatprep.subr.bf16.mxu0 %v25701_v43  ;;  %v25742_v41 = vld [vmem:[%s25933_s28 + $0x3258] sm:$0xff]   ;;  %v25741_v43 = vld [vmem:[%s25933_s28 + $0x32a0] sm:$0xff]  }
 0x63c   : > { %v27941_v53 = vadd.f32 %v23585_v48, %v18919_v47  ;;  %23878 = vmatpush3.bf16.msra.mxu1 %v25700_v46  ;;  %v25744_v44 = vld [vmem:[%s25933_s28 + $0x32d8] sm:$0xff]   ;;  %v25746_v46 = vld [vmem:[%s25933_s28 + $0x3250] sm:$0xff]   ;;  %v25750_v50 = vld [vmem:[%s25933_s28 + $0x3248] sm:$0xff]  }
 0x63d   : > { %v23587_v56 = vpop.f32.mrf.mxu1  ;;  %23879 = vmatprep.subr.bf16.mxu1 %v25703_v49  ;;  %v25743_v45 = vld [vmem:[%s25933_s28 + $0x3218] sm:$0xff]   ;;  %v25748_v48 = vld [vmem:[%s25933_s28 + $0x32d0] sm:$0xff]   ;;  %v25752_v51 = vld [vmem:[%s25933_s28 + $0x32c8] sm:$0xff]  }
 0x63e   : > { %23858 = vmatpush3.bf16.msra.mxu0 %v25702_v52  ;;  %v25745_v47 = vld [vmem:[%s25933_s28 + $0x3298] sm:$0xff]   ;;  %v25747_v49 = vld [vmem:[%s25933_s28 + $0x3210] sm:$0xff]   ;;  %v25756_v56 = vld [vmem:[%s25933_s28 + $0x32c0] sm:$0xff]  }
 0x63f   : > { %23859 = vmatprep.subr.bf16.mxu0 %v25705_v54  ;;  %v25749_v52 = vld [vmem:[%s25933_s28 + $0x3290] sm:$0xff]   ;;  %v25754_v54 = vld [vmem:[%s25933_s28 + $0x3240] sm:$0xff]  }
 0x640   : > { %23880 = vmatpush3.bf16.msra.mxu1 %v25704_v55  ;;  %v25753_v55 = vld [vmem:[%s25933_s28 + $0x3288] sm:$0xff]  }
 0x641   : > { %23881 = vmatprep.subr.bf16.mxu1 %v25707_v57  ;;  %v261_v57 = vld [vmem:[%s25928_s25 + $0xc8] sm:$0xff] }
 0x642   : > { %23860 = vmatpush3.bf16.msra.mxu0 %v25706_v58  ;;  %v25755_v58 = vld [vmem:[%s25933_s28 + $0x3200] sm:$0xff]  }
 0x643   : > { %23861 = vmatprep.subr.bf16.mxu0 %v25709_v60  ;;  %v4945_v60 = vrot.slane %v261_v57, %v25971_v42 }
 0x644   : > { %23882 = vmatpush3.bf16.msra.mxu1 %v25708_v61  ;;  %v4938_v61 = vcombine.high %v261_v57, %v261_v57  ;;  %v25795_v57 = vld [vmem:[%s25933_s28 + $0x3470] sm:$0xff]  }
 0x645   : > { %23883 = vmatprep.subr.bf16.mxu1 %v25711_v59  ;;  %v25758_v59 = vld [vmem:[%s25933_s28 + $0x3378] sm:$0xff]  }
 0x646   : > { %23862 = vmatpush3.bf16.msra.mxu0 %v25710_v62  ;;  %v4953_v62 = vcombine.high %v4945_v60, %v4945_v60 }
 0x647   : > { %23863 = vmatprep.subr.bf16.mxu0 %v25713_v63  ;;  %v4961_v63 = vrot.slane %v4945_v60, %v25971_v42  ;;  %v25794_v60 = vld [vmem:[%s25933_s28 + $0x34b8] sm:$0xff]  }
 0x648   : > { %23884 = vmatpush3.bf16.msra.mxu1 %v25712_v0  ;;  %v25757_v0 = vld [vmem:[%s25933_s28 + $0x3280] sm:$0xff]  }
 0x649   : > { %23885 = vmatprep.subr.bf16.mxu1 %v25715_v1  ;;  %v28006_v1 = vrot.slane %v4938_v61, %v25971_v42  ;;  %v25797_v61 = vld [vmem:[%s25933_s28 + $0x34f0] sm:$0xff]  }
 0x64a   : > { %23864 = vmatpush3.bf16.msra.mxu0 %v25714_v2  ;;  %v25760_v2 = vld [vmem:[%s25933_s28 + $0x33f8] sm:$0xff]  }
 0x64b   : > { %23865 = vmatprep.subr.bf16.mxu0 %v25717_v3  ;;  %v4975_v3 = vrot.slane %v4953_v62, %v25971_v42 }
 0x64c   : > { %23886 = vmatpush3.bf16.msra.mxu1 %v25716_v4  ;;  %v25759_v4 = vld [vmem:[%s25933_s28 + $0x3338] sm:$0xff]  }
 0x64d   : > { %23887 = vmatprep.subr.bf16.mxu1 %v25719_v5  ;;  %v4954_v5 = vcombine.high %v28006_v1, %v28006_v1 }
 0x64e   : > { %23866 = vmatpush3.bf16.msra.mxu0 %v25718_v6  ;;  %v4983_v6 = vcombine.high %v4961_v63, %v4961_v63 }
 0x64f   : > { %23867 = vmatprep.subr.bf16.mxu0 %v25721_v7  ;;  %v25762_v7 = vld [vmem:[%s25933_s28 + $0x3370] sm:$0xff]  }
 0x650   : > { %23888 = vmatpush3.bf16.msra.mxu1 %v25720_v8 }
 0x651   : > { %23889 = vmatprep.subr.bf16.mxu1 %v25723_v9  ;;  %v4985_v9 = vcombine.high %v4975_v3, %v4975_v3 }
 0x652   : > { %23868 = vmatpush3.bf16.msra.mxu0 %v25722_v10  ;;  %v25761_v10 = vld [vmem:[%s25933_s28 + $0x33b8] sm:$0xff]  }
 0x653   : > { %23897 = vmatprep.subr.bf16.mxu0 %v25726_v11  ;;  %v25764_v11 = vld [vmem:[%s25933_s28 + $0x33f0] sm:$0xff]  }
 0x654   : > { %23890 = vmatpush3.bf16.msra.mxu1 %v25725_v13 }
 0x655   : > { %v23605_v18 = vpop.f32.mrf.mxu0  ;;  %19477 = vmatmul.mubr.bf16.vlgmr.msra.gmra.mxu0 %v4919_v12  ;;  %23919 = vmatprep.subr.bf16.mxu1 %v25728_v14  ;;  %v4982_v12 = vrot.slane %v4954_v5, %v25971_v42 }
 0x656   : > { %23898 = vmatpush3.bf16.msra.mxu0 %v25727_v15  ;;  %19556 = vmatprep.mubr.bf16.mxu0 %v4975_v3  ;;  %v25763_v15 = vld [vmem:[%s25933_s28 + $0x3330] sm:$0xff]  }
 0x657   : > { %v23606_v20 = vpop.f32.mrf.mxu0  ;;  %v23627_v22 = vpop.f32.mrf.mxu1  ;;  %19517 = vmatmul.mubr.bf16.vlgmr.msra.gmra.mxu1 %v4935_v16  ;;  %23899 = vmatprep.subr.bf16.mxu0 %v25730_v17  ;;  %v4986_v16 = vcombine.high %v4982_v12, %v4982_v12 }
 0x658   : > { %v23607_v24 = vadd.f32 %v23606_v20, %v23605_v18  ;;  %23920 = vmatpush3.bf16.msra.mxu1 %v25729_v19  ;;  %19596 = vmatprep.mubr.bf16.mxu1 %v4985_v9  ;;  %v25766_v18 = vld [vmem:[%s25933_s28 + $0x3368] sm:$0xff]   ;;  %v25765_v20 = vld [vmem:[%s25933_s28 + $0x33b0] sm:$0xff]  }
 0x659   : > { %v23608_v27 = vpop.f32.mrf.mxu0  ;;  %v23628_v26 = vpop.f32.mrf.mxu1  ;;  %23921 = vmatprep.subr.bf16.mxu1 %v25732_v21  ;;  %v25800_v9 = vld [vmem:[%s25933_s28 + $0x3428] sm:$0xff]  }
 0x65a   : > { %v18999_v29 = vadd.f32 %v23607_v24, %v27941_v53  ;;  %v23629_v30 = vadd.f32 %v23628_v26, %v23627_v22  ;;  %23900 = vmatpush3.bf16.msra.mxu0 %v25731_v23  ;;  %v25751_v53 = vld [vmem:[%s25933_s28 + $0x3208] sm:$0xff]  }
 0x65b   : > { %v23609_v32 = vpop.f32.mrf.mxu0  ;;  %v23630_v35 = vpop.f32.mrf.mxu1  ;;  %23901 = vmatprep.subr.bf16.mxu0 %v25734_v25  ;;  %v25768_v24 = vld [vmem:[%s25933_s28 + $0x33e8] sm:$0xff]  }
 0x65c   : > { %v27978_v36 = vadd.f32 %v23629_v30, %v18999_v29  ;;  %23922 = vmatpush3.bf16.msra.mxu1 %v25733_v28  ;;  %v25767_v27 = vld [vmem:[%s25933_s28 + $0x3328] sm:$0xff]   ;;  %v25770_v29 = vld [vmem:[%s25933_s28 + $0x3360] sm:$0xff]   ;;  %v25774_v35 = vld [vmem:[%s25933_s28 + $0x3358] sm:$0xff]  }
 0x65d   : > { %v23631_v38 = vpop.f32.mrf.mxu1  ;;  %23923 = vmatprep.subr.bf16.mxu1 %v25736_v31  ;;  %v25769_v30 = vld [vmem:[%s25933_s28 + $0x33a8] sm:$0xff]   ;;  %v25772_v32 = vld [vmem:[%s25933_s28 + $0x33e0] sm:$0xff]  }
 0x65e   : > { %23902 = vmatpush3.bf16.msra.mxu0 %v25735_v33  ;;  %v25771_v33 = vld [vmem:[%s25933_s28 + $0x3320] sm:$0xff]   ;;  %v25778_v38 = vld [vmem:[%s25933_s28 + $0x3350] sm:$0xff]  }
 0x65f   : > { %23903 = vmatprep.subr.bf16.mxu0 %v25738_v34  ;;  %v25776_v34 = vld [vmem:[%s25933_s28 + $0x33d8] sm:$0xff]  }
 0x660   : > { %23924 = vmatpush3.bf16.msra.mxu1 %v25737_v37  ;;  %v25775_v37 = vld [vmem:[%s25933_s28 + $0x3318] sm:$0xff]  }
 0x661   : > { %23925 = vmatprep.subr.bf16.mxu1 %v25740_v39  ;;  %v25777_v39 = vld [vmem:[%s25933_s28 + $0x3398] sm:$0xff]  }
 0x662   : > { %23904 = vmatpush3.bf16.msra.mxu0 %v25739_v40  ;;  %v25780_v40 = vld [vmem:[%s25933_s28 + $0x33d0] sm:$0xff]  }
 0x663   : > { %23905 = vmatprep.subr.bf16.mxu0 %v25742_v41  ;;  %v25779_v41 = vld [vmem:[%s25933_s28 + $0x3310] sm:$0xff]  }
 0x664   : > { %23926 = vmatpush3.bf16.msra.mxu1 %v25741_v43  ;;  %v25782_v43 = vld [vmem:[%s25933_s28 + $0x3348] sm:$0xff]  }
 0x665   : > { %23927 = vmatprep.subr.bf16.mxu1 %v25744_v44  ;;  %v25781_v44 = vld [vmem:[%s25933_s28 + $0x3390] sm:$0xff]  }
 0x666   : > { %23906 = vmatpush3.bf16.msra.mxu0 %v25743_v45  ;;  %v25784_v45 = vld [vmem:[%s25933_s28 + $0x33c8] sm:$0xff]  }
 0x667   : > { %23907 = vmatprep.subr.bf16.mxu0 %v25746_v46  ;;  %v25783_v46 = vld [vmem:[%s25933_s28 + $0x3308] sm:$0xff]  }
 0x668   : > { %23928 = vmatpush3.bf16.msra.mxu1 %v25745_v47  ;;  %v25786_v47 = vld [vmem:[%s25933_s28 + $0x3340] sm:$0xff]  }
 0x669   : > { %23929 = vmatprep.subr.bf16.mxu1 %v25748_v48  ;;  %v25785_v48 = vld [vmem:[%s25933_s28 + $0x3388] sm:$0xff]  }
 0x66a   : > { %23908 = vmatpush3.bf16.msra.mxu0 %v25747_v49  ;;  %v25788_v49 = vld [vmem:[%s25933_s28 + $0x33c0] sm:$0xff]  }
 0x66b   : > { %23909 = vmatprep.subr.bf16.mxu0 %v25750_v50  ;;  %v25787_v50 = vld [vmem:[%s25933_s28 + $0x3300] sm:$0xff]  }
 0x66c   : > { %23930 = vmatpush3.bf16.msra.mxu1 %v25749_v52  ;;  %v4968_v52 = vrot.slane %v28006_v1, %v25971_v42  ;;  %v25799_v1 = vld [vmem:[%s25933_s28 + $0x3468] sm:$0xff]  }
 0x66d   : > { %23931 = vmatprep.subr.bf16.mxu1 %v25752_v51  ;;  %v25791_v51 = vld [vmem:[%s25933_s28 + $0x3478] sm:$0xff]  }
 0x66e   : > { %23910 = vmatpush3.bf16.msra.mxu0 %v25751_v53  ;;  %v25790_v53 = vld [vmem:[%s25933_s28 + $0x3380] sm:$0xff]  }
 0x66f   : > { %23911 = vmatprep.subr.bf16.mxu0 %v25754_v54  ;;  %v25793_v54 = vld [vmem:[%s25933_s28 + $0x34f8] sm:$0xff]  }
 0x670   : > { %23932 = vmatpush3.bf16.msra.mxu1 %v25753_v55  ;;  %v25792_v55 = vld [vmem:[%s25933_s28 + $0x3438] sm:$0xff]  }
 0x671   : > { %23933 = vmatprep.subr.bf16.mxu1 %v25756_v56  ;;  %v4984_v56 = vcombine.high %v4968_v52, %v4968_v52 }
 0x672   : > { %23912 = vmatpush3.bf16.msra.mxu0 %v25755_v58 }
 0x673   : > { %23941 = vmatprep.subr.bf16.mxu0 %v25758_v59 }
 0x674   : > { %23934 = vmatpush3.bf16.msra.mxu1 %v25757_v0 }
 0x675   : > { %v23649_v8 = vpop.f32.mrf.mxu0  ;;  %19557 = vmatmul.mubr.bf16.vlgmr.msra.gmra.mxu0 %v4961_v63  ;;  %23963 = vmatprep.subr.bf16.mxu1 %v25760_v2  ;;  %v25796_v63 = vld [vmem:[%s25933_s28 + $0x3430] sm:$0xff]  }
 0x676   : > { %23942 = vmatpush3.bf16.msra.mxu0 %v25759_v4  ;;  %19636 = vmatprep.mubr.bf16.mxu0 %v4982_v12  ;;  %v25798_v4 = vld [vmem:[%s25933_s28 + $0x34b0] sm:$0xff]  }
 0x677   : > { %v23650_v13 = vpop.f32.mrf.mxu0  ;;  %v23671_v14 = vpop.f32.mrf.mxu1  ;;  %19597 = vmatmul.mubr.bf16.vlgmr.msra.gmra.mxu1 %v4983_v6  ;;  %23943 = vmatprep.subr.bf16.mxu0 %v25762_v7  ;;  %v25801_v7 = vld [vmem:[%s25933_s28 + $0x34e8] sm:$0xff]  }
 0x678   : > { %v23651_v17 = vadd.f32 %v23650_v13, %v23649_v8  ;;  %23964 = vmatpush3.bf16.msra.mxu1 %v25761_v10  ;;  %19676 = vmatprep.mubr.bf16.mxu1 %v4986_v16  ;;  %v25802_v13 = vld [vmem:[%s25933_s28 + $0x34a8] sm:$0xff]   ;;  %v25804_v16 = vld [vmem:[%s25933_s28 + $0x3420] sm:$0xff]  }
 0x679   : > { %v23652_v19 = vpop.f32.mrf.mxu0  ;;  %v23672_v21 = vpop.f32.mrf.mxu1  ;;  %23965 = vmatprep.subr.bf16.mxu1 %v25764_v11  ;;  %v25803_v11 = vld [vmem:[%s25933_s28 + $0x3460] sm:$0xff]  }
 0x67a   : > { %v19079_v22 = vadd.f32 %v23651_v17, %v27978_v36  ;;  %v23673_v23 = vadd.f32 %v23672_v21, %v23671_v14  ;;  %23944 = vmatpush3.bf16.msra.mxu0 %v25763_v15  ;;  %v25773_v36 = vld [vmem:[%s25933_s28 + $0x33a0] sm:$0xff]   ;;  %v25807_v17 = vld [vmem:[%s25933_s28 + $0x3458] sm:$0xff]  }
 0x67b   : > { %v23653_v25 = vpop.f32.mrf.mxu0  ;;  %v23674_v26 = vpop.f32.mrf.mxu1  ;;  %23945 = vmatprep.subr.bf16.mxu0 %v25766_v18  ;;  %v25805_v15 = vld [vmem:[%s25933_s28 + $0x34e0] sm:$0xff]   ;;  %v25809_v19 = vld [vmem:[%s25933_s28 + $0x34d8] sm:$0xff]  }
 0x67c   : > { %v28023_v28 = vadd.f32 %v23673_v23, %v19079_v22  ;;  %23966 = vmatpush3.bf16.msra.mxu1 %v25765_v20  ;;  %v25806_v18 = vld [vmem:[%s25933_s28 + $0x34a0] sm:$0xff]   ;;  %v25808_v21 = vld [vmem:[%s25933_s28 + $0x3418] sm:$0xff]   ;;  %v25811_v20 = vld [vmem:[%s25933_s28 + $0x3450] sm:$0xff]  }
 0x67d   : > { %v23675_v31 = vpop.f32.mrf.mxu1  ;;  %23967 = vmatprep.subr.bf16.mxu1 %v25768_v24  ;;  %v25810_v22 = vld [vmem:[%s25933_s28 + $0x3498] sm:$0xff]   ;;  %v25813_v23 = vld [vmem:[%s25933_s28 + $0x34d0] sm:$0xff]   ;;  %v25815_v25 = vld [vmem:[%s25933_s28 + $0x3448] sm:$0xff]  }
 0x67e   : > { %23946 = vmatpush3.bf16.msra.mxu0 %v25767_v27  ;;  %v25812_v24 = vld [vmem:[%s25933_s28 + $0x3410] sm:$0xff]   ;;  %v25817_v26 = vld [vmem:[%s25933_s28 + $0x34c8] sm:$0xff]   ;;  %v25821_v31 = vld [vmem:[%s25933_s28 + $0x34c0] sm:$0xff]  }
 0x67f   : > { %23947 = vmatprep.subr.bf16.mxu0 %v25770_v29  ;;  %v25814_v27 = vld [vmem:[%s25933_s28 + $0x3490] sm:$0xff]   ;;  %v25819_v29 = vld [vmem:[%s25933_s28 + $0x3440] sm:$0xff]  }
 0x680   : > { %23968 = vmatpush3.bf16.msra.mxu1 %v25769_v30  ;;  %v25818_v30 = vld [vmem:[%s25933_s28 + $0x3488] sm:$0xff]  }
 0x681   : > { %23969 = vmatprep.subr.bf16.mxu1 %v25772_v32  ;;  %v262_v32 = vld [vmem:[%s25928_s25 + $0xd0] sm:$0x3f] }
 0x682   : > { %23948 = vmatpush3.bf16.msra.mxu0 %v25771_v33  ;;  %v25820_v33 = vld [vmem:[%s25933_s28 + $0x3400] sm:$0xff]  }
 0x683   : > { %23949 = vmatprep.subr.bf16.mxu0 %v25774_v35  ;;  %v4987_v35 = vcombine.high %v262_v32, %v262_v32 }
 0x684   : > { %23970 = vmatpush3.bf16.msra.mxu1 %v25773_v36  ;;  %v4994_v36 = vrot.slane %v262_v32, %v25971_v42 }
 0x685   : > { %23971 = vmatprep.subr.bf16.mxu1 %v25776_v34  ;;  %v25823_v34 = vld [vmem:[%s25933_s28 + $0x3480] sm:$0xff]  }
 0x686   : > { %23950 = vmatpush3.bf16.msra.mxu0 %v25775_v37  ;;  %v25824_v37 = vld [vmem:[%s25933_s28 + $0x3578] ss:$0 sps:$4 sm:$0x33]  }
 0x687   : > { %23951 = vmatprep.subr.bf16.mxu0 %v25778_v38  ;;  %v5002_v38 = vcombine.high %v4994_v36, %v4994_v36 }
 0x688   : > { %23972 = vmatpush3.bf16.msra.mxu1 %v25777_v39  ;;  %v5010_v39 = vrot.slane %v4994_v36, %v25971_v42 }
 0x689   : > { %23973 = vmatprep.subr.bf16.mxu1 %v25780_v40  ;;  %v5001_v40 = vrot.slane %v4987_v35, %v25971_v42 }
 0x68a   : > { %23952 = vmatpush3.bf16.msra.mxu0 %v25779_v41  ;;  %v5024_v41 = vrot.slane %v5002_v38, %v25971_v42 }
 0x68b   : > { %23953 = vmatprep.subr.bf16.mxu0 %v25782_v43  ;;  %v25825_v43 = vld [vmem:[%s25933_s28 + $0x3538] sm:$0xff]  }
 0x68c   : > { %23974 = vmatpush3.bf16.msra.mxu1 %v25781_v44  ;;  %v5003_v44 = vcombine.high %v5001_v40, %v5001_v40 }
 0x68d   : > { %23975 = vmatprep.subr.bf16.mxu1 %v25784_v45  ;;  %v5032_v45 = vcombine.high %v5010_v39, %v5010_v39 }
 0x68e   : > { %23954 = vmatpush3.bf16.msra.mxu0 %v25783_v46  ;;  %v25826_v46 = vld [vmem:[%s25933_s28 + $0x3570] sm:$0xff]  }
 0x68f   : > { %23955 = vmatprep.subr.bf16.mxu0 %v25786_v47 }
 0x690   : > { %23976 = vmatpush3.bf16.msra.mxu1 %v25785_v48  ;;  %v5033_v48 = vcombine.high %v5024_v41, %v5024_v41 }
 0x691   : > { %23977 = vmatprep.subr.bf16.mxu1 %v25788_v49  ;;  %v5031_v49 = vrot.slane %v5003_v44, %v25971_v42 }
 0x692   : > { %23956 = vmatpush3.bf16.msra.mxu0 %v25787_v50 }
 0x693   : > { %23985 = vmatprep.subr.bf16.mxu0 %v25791_v51  ;;  %v25827_v51 = vld [vmem:[%s25933_s28 + $0x3530] sm:$0xff]  }
 0x694   : > { %23978 = vmatpush3.bf16.msra.mxu1 %v25790_v53 }
 0x695   : > { %v23693_v58 = vpop.f32.mrf.mxu0  ;;  %19637 = vmatmul.mubr.bf16.vlgmr.msra.gmra.mxu0 %v4968_v52  ;;  %24007 = vmatprep.subr.bf16.mxu1 %v25793_v54  ;;  %v25828_v54 = vld [vmem:[%s25933_s28 + $0x3568] sm:$0xff]  }
 0x696   : > { %23986 = vmatpush3.bf16.msra.mxu0 %v25792_v55  ;;  %19716 = vmatprep.mubr.bf16.mxu0 %v5024_v41 }
 0x697   : > { %v23694_v59 = vpop.f32.mrf.mxu0  ;;  %v23715_v62 = vpop.f32.mrf.mxu1  ;;  %19677 = vmatmul.mubr.bf16.vlgmr.msra.gmra.mxu1 %v4984_v56  ;;  %23987 = vmatprep.subr.bf16.mxu0 %v25795_v57 }
 0x698   : > { %v23695_v0 = vadd.f32 %v23694_v59, %v23693_v58  ;;  %24008 = vmatpush3.bf16.msra.mxu1 %v25794_v60  ;;  %19756 = vmatprep.mubr.bf16.mxu1 %v5033_v48 }
 0x699   : > { %v23696_v2 = vpop.f32.mrf.mxu0  ;;  %v23716_v3 = vpop.f32.mrf.mxu1  ;;  %24009 = vmatprep.subr.bf16.mxu1 %v25797_v61  ;;  %v25829_v61 = vld [vmem:[%s25933_s28 + $0x3528] sm:$0xff]  }
 0x69a   : > { %v19159_v5 = vadd.f32 %v23695_v0, %v28023_v28  ;;  %v23717_v6 = vadd.f32 %v23716_v3, %v23715_v62  ;;  %23988 = vmatpush3.bf16.msra.mxu0 %v25796_v63  ;;  %v25816_v28 = vld [vmem:[%s25933_s28 + $0x3408] sm:$0xff]   ;;  %v25830_v63 = vld [vmem:[%s25933_s28 + $0x3560] sm:$0xff]   ;;  %v25832_v2 = vld [vmem:[%s25933_s28 + $0x3558] sm:$0xff]  }
 0x69b   : > { %v23697_v8 = vpop.f32.mrf.mxu0  ;;  %v23718_v10 = vpop.f32.mrf.mxu1  ;;  %23989 = vmatprep.subr.bf16.mxu0 %v25799_v1  ;;  %v25831_v1 = vld [vmem:[%s25933_s28 + $0x3520] sm:$0xff]   ;;  %v25833_v3 = vld [vmem:[%s25933_s28 + $0x3518] sm:$0xff]  }
 0x69c   : > { %v28060_v12 = vadd.f32 %v23717_v6, %v19159_v5  ;;  %24010 = vmatpush3.bf16.msra.mxu1 %v25798_v4  ;;  %v25834_v4 = vld [vmem:[%s25933_s28 + $0x3550] sm:$0xff]   ;;  %v25836_v6 = vld [vmem:[%s25933_s28 + $0x3548] sm:$0xff]   ;;  %v25838_v8 = vld [vmem:[%s25933_s28 + $0x3540] sm:$0xff]   ;;  %v5017_v10 = vrot.slane %v5001_v40, %v25971_v42 }
 0x69d   : > { %v23719_v14 = vpop.f32.mrf.mxu1  ;;  %24011 = vmatprep.subr.bf16.mxu1 %v25801_v7  ;;  %v25835_v5 = vld [vmem:[%s25933_s28 + $0x3510] sm:$0xff]   ;;  %v25837_v7 = vld [vmem:[%s25933_s28 + $0x3508] sm:$0xff]  }
 0x69e   : > { %23990 = vmatpush3.bf16.msra.mxu0 %v25800_v9  ;;  %v25839_v9 = vld [vmem:[%s25933_s28 + $0x3500] sm:$0xff]  }
 0x69f   : > { %23991 = vmatprep.subr.bf16.mxu0 %v25803_v11 }
 0x6a0   : > { %24012 = vmatpush3.bf16.msra.mxu1 %v25802_v13 }
 0x6a1   : > { %24013 = vmatprep.subr.bf16.mxu1 %v25805_v15 }
 0x6a2   : > { %23992 = vmatpush3.bf16.msra.mxu0 %v25804_v16 }
 0x6a3   : > { %23993 = vmatprep.subr.bf16.mxu0 %v25807_v17 }
 0x6a4   : > { %24014 = vmatpush3.bf16.msra.mxu1 %v25806_v18 }
 0x6a5   : > { %24015 = vmatprep.subr.bf16.mxu1 %v25809_v19 }
 0x6a6   : > { %23994 = vmatpush3.bf16.msra.mxu0 %v25808_v21 }
 0x6a7   : > { %23995 = vmatprep.subr.bf16.mxu0 %v25811_v20 }
 0x6a8   : > { %24016 = vmatpush3.bf16.msra.mxu1 %v25810_v22 }
 0x6a9   : > { %24017 = vmatprep.subr.bf16.mxu1 %v25813_v23 }
 0x6aa   : > { %23996 = vmatpush3.bf16.msra.mxu0 %v25812_v24 }
 0x6ab   : > { %23997 = vmatprep.subr.bf16.mxu0 %v25815_v25 }
 0x6ac   : > { %24018 = vmatpush3.bf16.msra.mxu1 %v25814_v27 }
 0x6ad   : > { %24019 = vmatprep.subr.bf16.mxu1 %v25817_v26 }
 0x6ae   : > { %23998 = vmatpush3.bf16.msra.mxu0 %v25816_v28 }
 0x6af   : > { %23999 = vmatprep.subr.bf16.mxu0 %v25819_v29 }
 0x6b0   : > { %24020 = vmatpush3.bf16.msra.mxu1 %v25818_v30 }
 0x6b1   : > { %24021 = vmatprep.subr.bf16.mxu1 %v25821_v31 }
 0x6b2   : > { %24000 = vmatpush3.bf16.msra.mxu0 %v25820_v33 }
 0x6b3   : > { %24079 = vmatprep.subr.msk.bf16.mxu0 %vm15520_vm1, %v25824_v37 }
 0x6b4   : > { %24022 = vmatpush3.bf16.msra.mxu1 %v25823_v34 }
 0x6b5   : > { %v23737_v47 = vpop.f32.mrf.mxu0  ;;  %19717 = vmatmul.mubr.bf16.vlgmr.msra.gmra.mxu0 %v5010_v39 }
 0x6b6   : > { %24030 = vmatpush3.bf16.msra.mxu0 %v25825_v43  ;;  %21688 = vmatprep.mubr.msk.bf16.mxu0 %vm15516_vm2, %v5031_v49 }
 0x6b7   : > { %v23738_v50 = vpop.f32.mrf.mxu0  ;;  %v23759_v52 = vpop.f32.mrf.mxu1  ;;  %19757 = vmatmul.mubr.bf16.vlgmr.msra.gmra.mxu1 %v5032_v45  ;;  %24031 = vmatprep.subr.bf16.mxu0 %v25826_v46 }
 0x6b8   : > { %v23739_v53 = vadd.f32 %v23738_v50, %v23737_v47 }
 0x6b9   : > { %v23740_v55 = vpop.f32.mrf.mxu0  ;;  %v23760_v56 = vpop.f32.mrf.mxu1 }
 0x6ba   : > { %v19239_v57 = vadd.f32 %v23739_v53, %v28060_v12  ;;  %v23761_v58 = vadd.f32 %v23760_v56, %v23759_v52  ;;  %24032 = vmatpush3.bf16.msra.mxu0 %v25827_v51 }
 0x6bb   : > { %v23741_v60 = vpop.f32.mrf.mxu0  ;;  %v23762_v59 = vpop.f32.mrf.mxu1  ;;  %24033 = vmatprep.subr.bf16.mxu0 %v25828_v54 }
 0x6bc   : > { %v19279_v62 = vadd.f32 %v23761_v58, %v19239_v57 }
 0x6bd   : > { %v23763_v0 = vpop.f32.mrf.mxu1 }
 0x6be   : > { %24034 = vmatpush3.bf16.msra.mxu0 %v25829_v61 }
 0x6bf   : > { %24035 = vmatprep.subr.bf16.mxu0 %v25830_v63 }
 0x6c2   : > { %24036 = vmatpush3.bf16.msra.mxu0 %v25831_v1 }
 0x6c3   : > { %24037 = vmatprep.subr.bf16.mxu0 %v25832_v2 }
 0x6c6   : > { %24038 = vmatpush3.bf16.msra.mxu0 %v25833_v3 }
 0x6c7   : > { %24039 = vmatprep.subr.bf16.mxu0 %v25834_v4 }
 0x6ca   : > { %24040 = vmatpush3.bf16.msra.mxu0 %v25835_v5 }
 0x6cb   : > { %24041 = vmatprep.subr.bf16.mxu0 %v25836_v6 }
 0x6ce   : > { %24042 = vmatpush3.bf16.msra.mxu0 %v25837_v7 }
 0x6cf   : > { %24043 = vmatprep.subr.bf16.mxu0 %v25838_v8 }
 0x6d2   : > { %24044 = vmatpush3.bf16.msra.mxu0 %v25839_v9 }
 0x6d5   : > { %v23781_v12 = vpop.f32.mrf.mxu0  ;;  %19797 = vmatmul.mubr.bf16.vlgmr.msra.gmra.mxu0 %v5017_v10 }
 0x6d7   : > { %v23782_v11 = vpop.f32.mrf.mxu0  ;;  %v23803_v13 = vpop.f32.mrf.mxu1 }
 0x6d8   : > { %v23783_v14 = vadd.f32 %v23782_v11, %v23781_v12 }
 0x6d9   : > { %v23784_v15 = vpop.f32.mrf.mxu0  ;;  %v23804_v16 = vpop.f32.mrf.mxu1 }
 0x6da   : > { %v19319_v17 = vadd.f32 %v23783_v14, %v19279_v62  ;;  %v23805_v18 = vadd.f32 %v23804_v16, %v23803_v13 }
 0x6db   : > { %v23785_v19 = vpop.f32.mrf.mxu0  ;;  %v23806_v21 = vpop.f32.mrf.mxu1 }
 0x6dc   : > { %v19359_v20 = vadd.f32 %v23805_v18, %v19319_v17 }
 0x6dd   : > { %v23807_v22 = vpop.f32.mrf.mxu1 }
 0x6de   : > { %v235_v22 = vld [vmem:[#allocation2] sm:$0x3] }
 0x6f5   : > { %v23825_v23 = vpop.f32.mrf.mxu0 }
 0x6f7   : > { %v23826_v24 = vpop.f32.mrf.mxu0  ;;  %v23847_v25 = vpop.f32.mrf.mxu1 }
 0x6f8   : > { %v23827_v27 = vadd.f32 %v23826_v24, %v23825_v23 }
 0x6f9   : > { %v23828_v26 = vpop.f32.mrf.mxu0  ;;  %v23848_v42 = vpop.f32.mrf.mxu1 }
 0x6fa   : > { %v19399_v28 = vadd.f32 %v23827_v27, %v19359_v20  ;;  %v23849_v29 = vadd.f32 %v23848_v42, %v23847_v25 }
 0x6fb   : > { %v23829_v30 = vpop.f32.mrf.mxu0  ;;  %v23850_v31 = vpop.f32.mrf.mxu1 }
 0x6fc   : > { %v19439_v32 = vadd.f32 %v23849_v29, %v19399_v28 }
 0x6fd   : > { %v23851_v33 = vpop.f32.mrf.mxu1 }
 0x715   : > { %v23869_v35 = vpop.f32.mrf.mxu0 }
 0x717   : > { %v23870_v36 = vpop.f32.mrf.mxu0  ;;  %v23891_v34 = vpop.f32.mrf.mxu1 }
 0x718   : > { %v23871_v37 = vadd.f32 %v23870_v36, %v23869_v35 }
 0x719   : > { %v23872_v38 = vpop.f32.mrf.mxu0  ;;  %v23892_v39 = vpop.f32.mrf.mxu1 }
 0x71a   : > { %v19479_v40 = vadd.f32 %v23871_v37, %v19439_v32  ;;  %v23893_v41 = vadd.f32 %v23892_v39, %v23891_v34 }
 0x71b   : > { %v23873_v43 = vpop.f32.mrf.mxu0  ;;  %v23894_v44 = vpop.f32.mrf.mxu1 }
 0x71c   : > { %v19519_v45 = vadd.f32 %v23893_v41, %v19479_v40 }
 0x71d   : > { %v23895_v46 = vpop.f32.mrf.mxu1 }
 0x735   : > { %v23913_v47 = vpop.f32.mrf.mxu0 }
 0x737   : > { %v23914_v48 = vpop.f32.mrf.mxu0  ;;  %v23935_v49 = vpop.f32.mrf.mxu1 }
 0x738   : > { %v23915_v50 = vadd.f32 %v23914_v48, %v23913_v47 }
 0x739   : > { %v23916_v52 = vpop.f32.mrf.mxu0  ;;  %v23936_v51 = vpop.f32.mrf.mxu1 }
 0x73a   : > { %v19559_v53 = vadd.f32 %v23915_v50, %v19519_v45  ;;  %v23937_v54 = vadd.f32 %v23936_v51, %v23935_v49 }
 0x73b   : > { %v23917_v55 = vpop.f32.mrf.mxu0  ;;  %v23938_v56 = vpop.f32.mrf.mxu1 }
 0x73c   : > { %v19599_v57 = vadd.f32 %v23937_v54, %v19559_v53 }
 0x73d   : > { %v23939_v58 = vpop.f32.mrf.mxu1 }
 0x755   : > { %v23957_v60 = vpop.f32.mrf.mxu0 }
 0x757   : > { %v23958_v61 = vpop.f32.mrf.mxu0  ;;  %v23979_v59 = vpop.f32.mrf.mxu1 }
 0x758   : > { %v23959_v12 = vadd.f32 %v23958_v61, %v23957_v60 }
 0x759   : > { %v23960_v62 = vpop.f32.mrf.mxu0  ;;  %v23980_v63 = vpop.f32.mrf.mxu1 }
 0x75a   : > { %v19639_v11 = vadd.f32 %v23959_v12, %v19599_v57  ;;  %v23981_v13 = vadd.f32 %v23980_v63, %v23979_v59 }
 0x75b   : > { %v23961_v0 = vpop.f32.mrf.mxu0  ;;  %v23982_v1 = vpop.f32.mrf.mxu1 }
 0x75c   : > { %v19679_v15 = vadd.f32 %v23981_v13, %v19639_v11 }
 0x75d   : > { %v23983_v2 = vpop.f32.mrf.mxu1 }
 0x775   : > { %v24001_v3 = vpop.f32.mrf.mxu0 }
 0x777   : > { %v24002_v4 = vpop.f32.mrf.mxu0  ;;  %v24023_v5 = vpop.f32.mrf.mxu1 }
 0x778   : > { %v24003_v14 = vadd.f32 %v24002_v4, %v24001_v3 }
 0x779   : > { %v24004_v6 = vpop.f32.mrf.mxu0  ;;  %v24024_v7 = vpop.f32.mrf.mxu1 }
 0x77a   : > { %v19719_v16 = vadd.f32 %v24003_v14, %v19679_v15  ;;  %v24025_v17 = vadd.f32 %v24024_v7, %v24023_v5 }
 0x77b   : > { %v24005_v8 = vpop.f32.mrf.mxu0  ;;  %v24026_v9 = vpop.f32.mrf.mxu1 }
 0x77c   : > { %v19759_v21 = vadd.f32 %v24025_v17, %v19719_v16 }
 0x77d   : > { %v24027_v10 = vpop.f32.mrf.mxu1 }
 0x795   : > { %v24045_v18 = vpop.f32.mrf.mxu0 }
 0x797   : > { %v24046_v19 = vpop.f32.mrf.mxu0 }
 0x798   : > { %v24047_v20 = vadd.f32 %v24046_v19, %v24045_v18 }
 0x799   : > { %v24048_v23 = vpop.f32.mrf.mxu0 }
 0x79a   : > { %v19799_v24 = vadd.f32 %v24047_v20, %v19759_v21  ;;  %19810 = sbr.rel (%p21689_p5) target bundleno = 2178 (0x882), region = 48 }
 0x79b   : > { %v24049_v25 = vpop.f32.mrf.mxu0 }
 0x79c   : > { %v19804_v27 = vadd.f32 %v19799_v24, %v235_v22 }
 0x79e   : > { %19806 = vst.msk [vmem:[#allocation2] sm:$0x3] %vm19805_vm3, %v19804_v27 }
 0x79f   : > { %v19827_v26 = vld [vmem:[%s28156_s3 + $0x38] sm:$0xff]  ;;  %v25880_v42 = vmov 0.0   ;;  %v19826_v28 = vld [vmem:[%s28156_s3 + $0x30] sm:$0xff]  ;;  %vm25881_vm4 = vmmov 0   ;;  %v19825_v29 = vld [vmem:[%s28156_s3 + $0x28] sm:$0xff]  ;;  %vm19835_vm5 = vcmask 523264  }
 0x7a0   : > { %24060 = vmatprep.subr.mxu0 %v25880_v42  ;;  %24076 = vmatprep.mubr.msk.f32.mxu0 %vm25881_vm4, %v25880_v42  ;;  %v19824_v30 = vld [vmem:[%s28156_s3 + $0x20] sm:$0xff]  ;;  %v19823_v31 = vld [vmem:[%s28156_s3 + $0x18] sm:$0xff]  ;;  %v19822_v32 = vld [vmem:[%s28156_s3 + $0x10] sm:$0xff]  ;;  %vm19910_vm6 = vcmask 9216  }
 0x7a1   : > { %24061 = vmatpush3.msra.mxu0 %v19827_v26  ;;  %v21690_v35 = vld [vmem:[%s28155_s2] ss:$0 sm:$0xff]  ;;  %v19821_v36 = vld [vmem:[%s28156_s3 + $0x8] sm:$0xff] }
 0x7a2   : > { %24062 = vmatprep.subr.mxu0 %v25880_v42  ;;  %v19820_v34 = vld [vmem:[%s28156_s3] sm:$0xff] }
 0x7a3   : > { %24063 = vmatpush3.msra.mxu0 %v19826_v28  ;;  %v21691_v38 = vld [vmem:[%s28157_s4] ss:$0 sm:$0xff] }
 0x7a4   : > { %24064 = vmatprep.subr.mxu0 %v25880_v42 }
 0x7a5   : > { %24065 = vmatpush3.msra.mxu0 %v19825_v29  ;;  %v19811_v33 = vld [vmem:[#allocation2] sm:$0x3] }
 0x7a6   : > { %24066 = vmatprep.subr.mxu0 %v25880_v42  ;;  %v19819_v37 = vadd.f32 %v21690_v35, %v19811_v33 }
 0x7a7   : > { %24067 = vmatpush3.msra.mxu0 %v19824_v30 }
 0x7a8   : > { %24068 = vmatprep.subr.mxu0 %v25880_v42 }
 0x7a9   : > { %24069 = vmatpush3.msra.mxu0 %v19823_v31 }
 0x7aa   : > { %24070 = vmatprep.subr.mxu0 %v25880_v42 }
 0x7ab   : > { %24071 = vmatpush3.msra.mxu0 %v19822_v32 }
 0x7ac   : > { %24072 = vmatprep.subr.mxu0 %v25880_v42 }
 0x7ad   : > { %24073 = vmatpush3.msra.mxu0 %v19821_v36 }
 0x7ae   : > { %24074 = vmatprep.subr.mxu0 %v25880_v42 }
 0x7af   : > { %24075 = vmatpush3.msra.mxu0 %v19820_v34 }
 0x7b0   : > { %24077 = vmatmul.mubr.msk.f32.vlgmr.msra.gmra.mxu0 %vm19835_vm5, %v19819_v37 }
 0x870   : > { %v19905_v39 = vpop.f32.mrf.mxu0 }
 0x871   : > { %v19906_v40 = vadd.f32 %v21691_v38, %v19905_v39 }
 0x872   : > { %v24078_v41 = vpop.f32.mrf.mxu0 }
 0x873   : > { %25840 = vtanh.f32 %v19906_v40 }
 0x880   : > { %v25841_v43 = vpop.eup %25840 }
 0x881   : > { %19911 = vst.msk [vmem:[#allocation3] sm:$0x3] %vm19910_vm6, %v25841_v43 }
 0x882 PF: > { %p24086_p6 = scmp.eq.s32.totalorder %s25919_s19, 1  ;;  %s25882_s26 = smov [#allocation3]  }
 0x883   : > { %s19919_s27 = sshll.u32 %s25882_s26, 4  ;;  %s19920_s27 = int_to_ptr.vmem [resolvable:$true] %s19919_s27 }
 0x884   : > { %s25842_s28 = scalar_lea.vmem %s19920_s27, 32  ;;  %p25849_p10 = scmp.lt.s32.totalorder %s19920_s27, %s19920_s27 }
 0x885   : > { %p25843_p7 = scmp.ne.s32.totalorder %s19920_s27, %s25842_s28  ;;  %p25850_p11 = scmp.lt.s32.totalorder %s25842_s28, %s25842_s28 }
 0x887   : > { %p25844_p8 = pnand %p25843_p7, %p24086_p6  ;;  %p25851_p12 = por %p25850_p11, %p25849_p10 }
 0x889   : > { %p25845_p9 = pneg %p25844_p8 }
 0x88b   : > { %p25852_p13 = pnand %p25851_p12, %p25845_p9 }
 0x88d   : > { %25855 = shalt.err (!%p25852_p13)
}
 0x88e   : > { %24083 = dma.vmem_to_hbm [thread:$0]  (%p24086_p6), %s19920_s27, 32, %s28158_s5, [#allocation4]  }
 0x88f   : > { %25871 = dma.done.wait (%p24086_p6), [#allocation4], 32  }
 0x890   : > { %25873 = vsyncadd (%p24086_p6), [#allocation4], 4294967264 }
 0x891 PF: > { %s16_s18 = sadd.s32 1, %s25876_s18  }
 0x892   : > { %p13_p0 = scmp.ge.s32.totalorder %s16_s18, 4  }
 0x894   :  { %15 = sbr.rel (!%p13_p0) target bundleno = 1 (0x1), region = 78 }
 0x899   :  { %19932 = vsyncpa [#allocation4], 1 }
 0x89a   :  { %19934 = vsyncpa [#allocation4 + $0x1], 1 }

</bundles_post_ra>
